<compile_context>
chip_gen: v7x
topology: tpu7x:2x2x1
jax: 0.10.0
libtpu: 0.0.40
codegen_flags: <defaults>
</compile_context>

<pallas_src>
import numpy as np
import jax
import jax.numpy as jnp
from jax import lax
from jax.experimental import pallas as pl
from jax.experimental.pallas import tpu as pltpu

_F32 = jnp.float32

# Edge tile (lane axis of the scatter compare / sublane axis of the per-edge
# tensors).  1024 keeps per-step DMA bursts large while the in-kernel
# intermediates ([TE, F*D] f32) stay a few MiB, comfortably under the 32 MiB
# scoped budget even on v7x's 64 MiB VMEM.
_TE = 1024
# Node padding multiple == readout node tile (multiple of 128 -> lane aligned
# membership matrix blocks).
_TNR = 128
_VMEM_LIMIT = 32 * 1024 * 1024


def _round_up(x, m):
    return (x + m - 1) // m * m


def _fixed_spec(shape):
    """Full-array block (weights / biases), same block for every grid step."""
    zeros = (0,) * len(shape)
    return pl.BlockSpec(tuple(shape), lambda *_: zeros)


# ----------------------------------------------------------------------------
# Kernel 1: one PerNodeFourierMP layer, fully fused:
#   per-edge Fourier message  +  mean aggregation (weighted one-hot scatter)
#   +  update MLP  +  eval-mode BatchNorm1d  +  ReLU.
# Grid: (edge tiles,) marked "arbitrary"; node axis lives entirely in VMEM as
# an [N_pad, F] f32 accumulator (fine for molecule-sized graphs).
# ----------------------------------------------------------------------------
def _gnn_layer_kernel(hi_ref, hj_ref, dst_ref, w_ref, x_ref,
                      wf_ref, bf_ref, rep_ref, fold_ref, wo_ref, bo_ref,
                      w1x_ref, w1a_ref, b1_ref, w2_ref, b2_ref,
                      bns_ref, bnb_ref,
                      out_ref, acc_ref):
    k = pl.program_id(0)
    n_pad = acc_ref.shape[0]
    te = hi_ref.shape[0]

    @pl.when(k == 0)
    def _init():
        acc_ref[...] = jnp.zeros_like(acc_ref)

    # ---- per-edge Fourier message for this edge tile (computed exactly once) --
    hi = hi_ref[...]                                   # [te, D]  dst (target) feats
    hj = hj_ref[...]                                   # [te, D]  src (source) feats
    # freq_generator applied per edge (E/N extra flops on a tiny GEMM; saves a
    # kernel launch + an [E_pad, F*D] HBM array vs node-level generation).
    freqs = jnp.dot(hi, wf_ref[...], preferred_element_type=_F32) + bf_ref[...]   # [te, F*D]
    # lane-aligned replicate (hj -> [te, F*D]) and fold ([te, F*D] -> [te, F])
    # via small constant 0/1 matmuls: no in-kernel reshape of sub-128 tiles.
    hj_rep = jnp.dot(hj, rep_ref[...], preferred_element_type=_F32)               # [te, F*D]
    proj = jnp.dot(freqs * hj_rep, fold_ref[...], preferred_element_type=_F32)    # [te, F]

    # 2 EUP transcendentals + double-angle identities (keep f32!).
    s1 = jnp.sin(proj)
    c1 = jnp.cos(proj)
    s2 = 2.0 * s1 * c1
    c2 = 1.0 - 2.0 * s1 * s1
    s4 = 2.0 * s2 * c2
    c4 = 1.0 - 2.0 * s2 * s2

    # one fused out_proj matmul: [te, 6F] @ [6F, F] (W_out in torch layout).
    emb = jnp.concatenate([s1, c1, s2, c2, s4, c4], axis=-1)                      # [te, 6F]
    msg = jnp.dot(emb, wo_ref[...], preferred_element_type=_F32) + bo_ref[...]    # [te, F]

    # mean aggregation: scatter[n, e] = 1/deg(n) if dst(e) == n (0 for padded
    # edges), built in-kernel from the streamed dst indices (no dense [N,E]).
    node_ids = lax.broadcasted_iota(jnp.int32, (n_pad, te), 0)                    # [n_pad, te]
    scatter = (node_ids == dst_ref[...]).astype(_F32) * w_ref[...]                # [n_pad, te]
    acc_ref[...] += jnp.dot(scatter, msg, preferred_element_type=_F32)            # [n_pad, F]

    @pl.when(k == pl.num_programs(0) - 1)
    def _finalize():
        # update MLP with split W1 (avoids concat([x, aggr])), then BN + ReLU.
        hid = jnp.maximum(
            jnp.dot(x_ref[...], w1x_ref[...], preferred_element_type=_F32)
            + jnp.dot(acc_ref[...], w1a_ref[...], preferred_element_type=_F32)
            + b1_ref[...], 0.0)
        upd = jnp.dot(hid, w2_ref[...], preferred_element_type=_F32) + b2_ref[...]
        # TODO(synk): lane-dense repack of the [N_pad, F=16] output (8 node rows
        # per 128-lane slab) if masked stores show up on the critical path.
        out_ref[...] = jnp.maximum(upd * bns_ref[...] + bnb_ref[...],
                                   0.0).astype(out_ref.dtype)


def gnn_layer(x, hi_e, hj_e, dst2d, w2d, p, bn_scale, bn_shift, *, te):
    n_pad, din = x.shape
    e_pad = hi_e.shape[0]
    f_dim = p['W_out'].shape[1]

    # constant 0/1 matrices implementing the flattened einsum('bfd,bd->bf')
    rep = jnp.tile(jnp.eye(din, dtype=_F32), (1, f_dim))          # [D, F*D]
    fold = jnp.repeat(jnp.eye(f_dim, dtype=_F32), din, axis=0)    # [F*D, F]

    w1x = p['W1'][:din]                                           # x part of update MLP
    w1a = p['W1'][din:]                                           # aggr part

    inputs = (hi_e, hj_e, dst2d, w2d, x,
              p['W_freq'], p['b_freq'], rep, fold, p['W_out'], p['b_out'],
              w1x, w1a, p['b1'], p['W2'], p['b2'], bn_scale, bn_shift)

    in_specs = [
        pl.BlockSpec((te, din), lambda k: (k, 0)),     # dst-gathered feats (edge stream)
        pl.BlockSpec((te, din), lambda k: (k, 0)),     # src-gathered feats (edge stream)
        pl.BlockSpec((1, te), lambda k: (0, k)),       # dst indices (int32, edge stream)
        pl.BlockSpec((1, te), lambda k: (0, k)),       # 1/deg(dst) weights (0 for pad edges)
        _fixed_spec(x.shape),                          # node features for the update MLP
    ] + [_fixed_spec(a.shape) for a in inputs[5:]]     # weights / biases / BN

    return pl.pallas_call(
        _gnn_layer_kernel,
        out_shape=jax.ShapeDtypeStruct((n_pad, f_dim), _F32),
        grid=(e_pad // te,),
        in_specs=in_specs,
        out_specs=pl.BlockSpec((n_pad, f_dim), lambda k: (0, 0)),
        scratch_shapes=[pltpu.VMEM((n_pad, f_dim), jnp.float32)],
        compiler_params=pltpu.CompilerParams(
            dimension_semantics=("arbitrary",),
            vmem_limit_bytes=_VMEM_LIMIT),
    )(*inputs)


# ----------------------------------------------------------------------------
# Kernel 2: AttentionalAggregation readout + classifier MLP.
# Grid over node tiles ("arbitrary") with [G, F] / [G, 1] VMEM accumulators, so
# h and M never have to fit VMEM whole.  Fused gate/feat weights are ordered
# [W_nn | w_gate] so the F-wide feat slice is lane-aligned.
# ----------------------------------------------------------------------------
def _readout_classifier_kernel(h_ref, M_ref, wgf_ref, bgf_ref,
                               wc1_ref, bc1_ref, wc2_ref, bc2_ref,
                               out_ref, num_ref, den_ref):
    i = pl.program_id(0)
    f_dim = wgf_ref.shape[0]

    @pl.when(i == 0)
    def _init():
        num_ref[...] = jnp.zeros_like(num_ref)
        den_ref[...] = jnp.zeros_like(den_ref)

    h = h_ref[...]                                                              # [tnr, F]
    gf = jnp.dot(h, wgf_ref[...], preferred_element_type=_F32) + bgf_ref[...]   # [tnr, F+1]
    feat = jnp.maximum(gf[:, :f_dim], 0.0)                                      # [tnr, F]
    # gate in (0,1) after sigmoid, so exp() needs no max-shift.
    eg = jnp.exp(jax.nn.sigmoid(gf[:, f_dim:f_dim + 1]))                        # [tnr, 1]
    M = M_ref[...]                                                              # [G, tnr]
    num_ref[...] += jnp.dot(M, eg * feat, preferred_element_type=_F32)          # [G, F]
    den_ref[...] += jnp.dot(M, eg, preferred_element_type=_F32)                 # [G, 1]

    @pl.when(i == pl.num_programs(0) - 1)
    def _finalize():
        pooled = num_ref[...] / den_ref[...]                                    # per-graph softmax pool
        hid = jnp.maximum(
            jnp.dot(pooled, wc1_ref[...], preferred_element_type=_F32) + bc1_ref[...], 0.0)
        out_ref[...] = (jnp.dot(hid, wc2_ref[...], preferred_element_type=_F32)
                        + bc2_ref[...]).astype(out_ref.dtype)


def readout_classifier(h, M, p_ro, p_cls, *, tnr):
    g, n_pad = M.shape
    f_dim = h.shape[1]
    c = p_cls['W2'].shape[1]
    wgf = jnp.concatenate([p_ro['W_nn'], p_ro['w_gate']], axis=1)   # [F, F+1]
    bgf = jnp.concatenate([p_ro['b_nn'], p_ro['b_gate']], axis=1)   # [1, F+1]
    inputs = (h, M, wgf, bgf, p_cls['W1'], p_cls['b1'], p_cls['W2'], p_cls['b2'])
    in_specs = [
        pl.BlockSpec((tnr, f_dim), lambda i: (i, 0)),
        pl.BlockSpec((g, tnr), lambda i: (0, i)),
    ] + [_fixed_spec(a.shape) for a in inputs[2:]]
    return pl.pallas_call(
        _readout_classifier_kernel,
        out_shape=jax.ShapeDtypeStruct((g, c), _F32),
        grid=(n_pad // tnr,),
        in_specs=in_specs,
        out_specs=pl.BlockSpec((g, c), lambda i: (0, 0)),
        scratch_shapes=[pltpu.VMEM((g, f_dim), jnp.float32),
                        pltpu.VMEM((g, 1), jnp.float32)],
        compiler_params=pltpu.CompilerParams(
            dimension_semantics=("arbitrary",),
            vmem_limit_bytes=_VMEM_LIMIT),
    )(*inputs)


# ----------------------------------------------------------------------------
# Full forward pass (glue: self-loops, padding, index/weight streams, gathers).
# ----------------------------------------------------------------------------
def molecule_gnn_fourier(x, edge_index, batch, params, *, te=_TE, tnr=_TNR):
    n, din = x.shape
    g = params['num_graphs']

    # add_self_loops
    loop = jnp.arange(n, dtype=edge_index.dtype)
    src = jnp.concatenate([edge_index[0], loop])
    dst = jnp.concatenate([edge_index[1], loop])
    e = src.shape[0]

    te = min(te, _round_up(e, 128))       # don't over-pad tiny graphs
    n_pad = _round_up(n, tnr)
    e_pad = _round_up(e, te)

    x_pad = jnp.zeros((n_pad, din), _F32).at[:n].set(x.astype(_F32))

    # per-edge streams: dst indices + mean-scatter weights 1/deg(dst); padded
    # edges get weight 0 (they still run the message pipeline but contribute 0).
    deg = jnp.zeros((n,), _F32).at[dst].add(1.0)           # >= 1 thanks to self loops
    w_edge = (1.0 / jnp.maximum(deg, 1.0))[dst]            # [E]
    dst_pad = jnp.zeros((e_pad,), jnp.int32).at[:e].set(dst.astype(jnp.int32))
    src_pad = jnp.zeros((e_pad,), jnp.int32).at[:e].set(src.astype(jnp.int32))
    w_pad = jnp.zeros((e_pad,), _F32).at[:e].set(w_edge)
    dst2d = dst_pad[None, :]                               # [1, E_pad] int32
    w2d = w_pad[None, :]                                   # [1, E_pad] f32

    def run_layer(h, p, bn):
        # TODO(synk): for very large graphs, gather hi/hj inside the kernel via
        # scalar-prefetched indices instead of materializing [E_pad, D] in HBM.
        hi_e = jnp.take(h, dst_pad, axis=0)                # [E_pad, D] target feats
        hj_e = jnp.take(h, src_pad, axis=0)                # [E_pad, D] source feats
        return gnn_layer(h, hi_e, hj_e, dst2d, w2d, p, *bn, te=te)

    h1 = run_layer(x_pad, params['conv1'], params['bn1'])
    h2 = run_layer(h1, params['conv2'], params['bn2'])

    # graph membership matrix; padded nodes belong to no graph (zero columns).
    batch_pad = jnp.concatenate([batch, jnp.full((n_pad - n,), g, batch.dtype)])
    M = (batch_pad[None, :] == jnp.arange(g)[:, None]).astype(_F32)   # [G, N_pad]
    return readout_classifier(h2, M, params['readout'], params['classifier'], tnr=tnr)


# ----------------------------------------------------------------------------
# Deterministic parameter init (PyTorch nn.Linear-style uniform).
# ----------------------------------------------------------------------------
def linear_init(key, fan_in, fan_out):
    kw, kb = jax.random.split(key)
    bound = 1.0 / np.sqrt(fan_in)
    W = jax.random.uniform(kw, (fan_in, fan_out), jnp.float32, -bound, bound)
    b = jax.random.uniform(kb, (1, fan_out), jnp.float32, -bound, bound)
    return W, b


def make_layer_params(key, in_dim, hidden_dim, out_dim):
    k = jax.random.split(key, 4)
    W_freq, b_freq = linear_init(k[0], in_dim, out_dim * in_dim)
    # NOTE: phase_generator exists in the torch __init__ but is unused in forward.
    W_out, b_out = linear_init(k[1], 6 * out_dim, out_dim)
    W1, b1 = linear_init(k[2], in_dim + out_dim, hidden_dim)
    W2, b2 = linear_init(k[3], hidden_dim, out_dim)
    return dict(W_freq=W_freq, b_freq=b_freq, W_out=W_out, b_out=b_out,
                W1=W1, b1=b1, W2=W2, b2=b2)


def make_bn_params(key, dim, eps=1e-5):
    k = jax.random.split(key, 4)
    gamma = jax.random.uniform(k[0], (1, dim), jnp.float32, 0.5, 1.5)
    beta = 0.1 * jax.random.normal(k[1], (1, dim), jnp.float32)
    rmean = 0.1 * jax.random.normal(k[2], (1, dim), jnp.float32)
    rvar = jax.random.uniform(k[3], (1, dim), jnp.float32, 0.5, 1.5)
    scale = gamma / jnp.sqrt(rvar + eps)
    shift = beta - rmean * scale
    return scale, shift


# ----------------------------------------------------------------------------
# Pure-JAX reference (mirrors the PyTorch forward) for validation.
# ----------------------------------------------------------------------------
def _fourier_ref(h_src, h_i, p, F_dim):
    B, D = h_src.shape
    freqs = (h_i @ p['W_freq'] + p['b_freq']).reshape(B, F_dim, D)
    proj = jnp.einsum('bfd,bd->bf', freqs, h_src)
    emb = jnp.concatenate([jnp.sin(proj), jnp.cos(proj),
                           jnp.sin(2 * proj), jnp.cos(2 * proj),
                           jnp.sin(4 * proj), jnp.cos(4 * proj)], axis=-1)
    return emb @ p['W_out'] + p['b_out']


def _layer_ref(x, src, dst, S, p, bn_scale, bn_shift):
    msg = _fourier_ref(x[src], x[dst], p, p['W_out'].shape[1])
    aggr = S @ msg
    cat = jnp.concatenate([x, aggr], axis=-1)
    upd = jnp.maximum(cat @ p['W1'] + p['b1'], 0.0) @ p['W2'] + p['b2']
    return jnp.maximum(upd * bn_scale + bn_shift, 0.0)


def _model_ref(x, edge_index, batch, params):
    N = x.shape[0]
    loop = jnp.arange(N, dtype=edge_index.dtype)
    src = jnp.concatenate([edge_index[0], loop])
    dst = jnp.concatenate([edge_index[1], loop])
    onehot = (dst[None, :] == jnp.arange(N)[:, None]).astype(x.dtype)
    S = onehot / jnp.maximum(onehot.sum(axis=1, keepdims=True), 1.0)
    h = _layer_ref(x, src, dst, S, params['conv1'], *params['bn1'])
    h = _layer_ref(h, src, dst, S, params['conv2'], *params['bn2'])
    G = params['num_graphs']
    M = (batch[None, :] == jnp.arange(G)[:, None]).astype(x.dtype)
    ro, cls = params['readout'], params['classifier']
    gate = jax.nn.sigmoid(h @ ro['w_gate'] + ro['b_gate'])
    feat = jnp.maximum(h @ ro['W_nn'] + ro['b_nn'], 0.0)
    eg = jnp.exp(gate)
    w = eg / (M.T @ (M @ eg))
    pooled = M @ (w * feat)
    return jnp.maximum(pooled @ cls['W1'] + cls['b1'], 0.0) @ cls['W2'] + cls['b2']


if __name__ == "__main__":
    in_dim, hidden_dim, out_dim, num_classes = 8, 32, 16, 4
    nodes_per_graph, num_graphs = 12, 4
    n_nodes = nodes_per_graph * num_graphs

    key = jax.random.PRNGKey(0)
    keys = jax.random.split(key, 8)

    kr = jax.random.split(keys[4], 2)
    kc = jax.random.split(keys[5], 2)
    wg, bg = linear_init(kr[0], out_dim, 1)
    wn, bn_b = linear_init(kr[1], out_dim, out_dim)
    wc1, bc1 = linear_init(kc[0], out_dim, hidden_dim)
    wc2, bc2 = linear_init(kc[1], hidden_dim, num_classes)

    params = {
        'conv1': make_layer_params(keys[0], in_dim, hidden_dim, out_dim),
        'bn1': make_bn_params(keys[1], out_dim),
        'conv2': make_layer_params(keys[2], out_dim, hidden_dim, out_dim),
        'bn2': make_bn_params(keys[3], out_dim),
        'readout': dict(w_gate=wg, b_gate=bg, W_nn=wn, b_nn=bn_b),
        'classifier': dict(W1=wc1, b1=bc1, W2=wc2, b2=bc2),
        'num_graphs': num_graphs,
    }

    # input data: four small molecules, each a 12-node ring (edges in both directions)
    x = jax.random.normal(keys[6], (n_nodes, in_dim), jnp.float32)
    edges = []
    for gi in range(num_graphs):
        off = gi * nodes_per_graph
        for i in range(nodes_per_graph):
            u, v = off + i, off + (i + 1) % nodes_per_graph
            edges.append((u, v))
            edges.append((v, u))
    edge_index = jnp.asarray(np.array(edges, dtype=np.int32).T)   # [2, E0], row0=src, row1=dst
    batch = jnp.repeat(jnp.arange(num_graphs, dtype=jnp.int32), nodes_per_graph)

    logits = molecule_gnn_fourier(x, edge_index, batch, params)
    logits = jax.block_until_ready(logits)

    with jax.default_matmul_precision("highest"):
        ref = _model_ref(x, edge_index, batch, params)
    err = float(jnp.max(jnp.abs(logits - ref)))
    assert logits.shape == (num_graphs, num_classes)
    assert err < 1e-3, f"mismatch vs pure-JAX reference: {err}"
    print("KERNEL_OK")
</pallas_src>

<mosaic_0001>
module attributes {stable_mosaic.version = 11 : i64} {
  func.func @_gnn_layer_kernel(%arg0: i32, %arg1: memref<256x8xf32, #tpu.memory_space<vmem>>, %arg2: memref<256x8xf32, #tpu.memory_space<vmem>>, %arg3: memref<1x256xi32, #tpu.memory_space<vmem>>, %arg4: memref<1x256xf32, #tpu.memory_space<vmem>>, %arg5: memref<128x8xf32, #tpu.memory_space<vmem>>, %arg6: memref<8x128xf32, #tpu.memory_space<vmem>>, %arg7: memref<1x128xf32, #tpu.memory_space<vmem>>, %arg8: memref<8x128xf32, #tpu.memory_space<vmem>>, %arg9: memref<128x16xf32, #tpu.memory_space<vmem>>, %arg10: memref<96x16xf32, #tpu.memory_space<vmem>>, %arg11: memref<1x16xf32, #tpu.memory_space<vmem>>, %arg12: memref<8x32xf32, #tpu.memory_space<vmem>>, %arg13: memref<16x32xf32, #tpu.memory_space<vmem>>, %arg14: memref<1x32xf32, #tpu.memory_space<vmem>>, %arg15: memref<32x16xf32, #tpu.memory_space<vmem>>, %arg16: memref<1x16xf32, #tpu.memory_space<vmem>>, %arg17: memref<1x16xf32, #tpu.memory_space<vmem>>, %arg18: memref<1x16xf32, #tpu.memory_space<vmem>>, %arg19: memref<128x16xf32, #tpu.memory_space<vmem>>, %arg20: memref<128x16xf32, #tpu.memory_space<vmem>>) attributes {dimension_semantics = [#tpu.dimension_semantics<arbitrary>], iteration_bounds = array<i64: 1>, scalar_prefetch = 0 : i64, scratch_operands = 1 : i64, tpu.core_type = #tpu.core_type<tc>, window_params = [{transform_indices = @transform_0, window_bounds = array<i64: 256, 8>}, {transform_indices = @transform_1, window_bounds = array<i64: 256, 8>}, {transform_indices = @transform_2, window_bounds = array<i64: 1, 256>}, {transform_indices = @transform_3, window_bounds = array<i64: 1, 256>}, {pipeline_mode = #tpu.pipeline_mode<synchronous>, transform_indices = @transform_4, window_bounds = array<i64: 128, 8>}, {pipeline_mode = #tpu.pipeline_mode<synchronous>, transform_indices = @transform_5, window_bounds = array<i64: 8, 128>}, {pipeline_mode = #tpu.pipeline_mode<synchronous>, transform_indices = @transform_6, window_bounds = array<i64: 1, 128>}, {pipeline_mode = #tpu.pipeline_mode<synchronous>, transform_indices = @transform_7, window_bounds = array<i64: 8, 128>}, {pipeline_mode = #tpu.pipeline_mode<synchronous>, transform_indices = @transform_8, window_bounds = array<i64: 128, 16>}, {pipeline_mode = #tpu.pipeline_mode<synchronous>, transform_indices = @transform_9, window_bounds = array<i64: 96, 16>}, {pipeline_mode = #tpu.pipeline_mode<synchronous>, transform_indices = @transform_10, window_bounds = array<i64: 1, 16>}, {pipeline_mode = #tpu.pipeline_mode<synchronous>, transform_indices = @transform_11, window_bounds = array<i64: 8, 32>}, {pipeline_mode = #tpu.pipeline_mode<synchronous>, transform_indices = @transform_12, window_bounds = array<i64: 16, 32>}, {pipeline_mode = #tpu.pipeline_mode<synchronous>, transform_indices = @transform_13, window_bounds = array<i64: 1, 32>}, {pipeline_mode = #tpu.pipeline_mode<synchronous>, transform_indices = @transform_14, window_bounds = array<i64: 32, 16>}, {pipeline_mode = #tpu.pipeline_mode<synchronous>, transform_indices = @transform_15, window_bounds = array<i64: 1, 16>}, {pipeline_mode = #tpu.pipeline_mode<synchronous>, transform_indices = @transform_16, window_bounds = array<i64: 1, 16>}, {pipeline_mode = #tpu.pipeline_mode<synchronous>, transform_indices = @transform_17, window_bounds = array<i64: 1, 16>}, {pipeline_mode = #tpu.pipeline_mode<synchronous>, transform_indices = @transform_18, window_bounds = array<i64: 128, 16>}]} {
    %c0_i32 = arith.constant 0 : i32
    %0 = arith.cmpi eq, %arg0, %c0_i32 : i32
    %1 = arith.extui %0 : i1 to i32
    %c0_i32_0 = arith.constant 0 : i32
    %2 = arith.cmpi ne, %1, %c0_i32_0 : i32
    scf.if %2 {
      %cst_36 = arith.constant 0.000000e+00 : f32
      %55 = vector.broadcast %cst_36 : f32 to vector<128x16xf32>
      %c0_37 = arith.constant 0 : index
      %c0_38 = arith.constant 0 : index
      %56 = vector.load %arg20[%c0_37, %c0_38] : memref<128x16xf32, #tpu.memory_space<vmem>>, vector<128x16xf32>
      tpu.vector_store %arg20[%c0_37, %c0_38], %55 {strides = array<i32>} : memref<128x16xf32, #tpu.memory_space<vmem>>, vector<128x16xf32>,
    } else {
    }
    %c0 = arith.constant 0 : index
    %c0_1 = arith.constant 0 : index
    %3 = vector.load %arg1[%c0, %c0_1] : memref<256x8xf32, #tpu.memory_space<vmem>>, vector<256x8xf32>
    %c0_2 = arith.constant 0 : index
    %c0_3 = arith.constant 0 : index
    %4 = vector.load %arg2[%c0_2, %c0_3] : memref<256x8xf32, #tpu.memory_space<vmem>>, vector<256x8xf32>
    %c0_4 = arith.constant 0 : index
    %c0_5 = arith.constant 0 : index
    %5 = vector.load %arg6[%c0_4, %c0_5] : memref<8x128xf32, #tpu.memory_space<vmem>>, vector<8x128xf32>
    %cst = arith.constant dense<0.000000e+00> : vector<256x128xf32>
    %6 = tpu.matmul %3, %5, %cst {dimension_numbers = #tpu.dot_dimension_numbers<[1], [0], [0], [1], [0, 0, 1, 1], [], []>} : vector<256x8xf32>, vector<8x128xf32>, vector<256x128xf32> -> vector<256x128xf32>
    %c0_6 = arith.constant 0 : index
    %c0_7 = arith.constant 0 : index
    %7 = vector.load %arg7[%c0_6, %c0_7] : memref<1x128xf32, #tpu.memory_space<vmem>>, vector<1x128xf32>
    %8 = vector.broadcast %7 : vector<1x128xf32> to vector<256x128xf32>
    %9 = arith.addf %6, %8 : vector<256x128xf32>
    %c0_8 = arith.constant 0 : index
    %c0_9 = arith.constant 0 : index
    %10 = vector.load %arg8[%c0_8, %c0_9] : memref<8x128xf32, #tpu.memory_space<vmem>>, vector<8x128xf32>
    %cst_10 = arith.constant dense<0.000000e+00> : vector<256x128xf32>
    %11 = tpu.matmul %4, %10, %cst_10 {dimension_numbers = #tpu.dot_dimension_numbers<[1], [0], [0], [1], [0, 0, 1, 1], [], []>} : vector<256x8xf32>, vector<8x128xf32>, vector<256x128xf32> -> vector<256x128xf32>
    %12 = arith.mulf %9, %11 : vector<256x128xf32>
    %c0_11 = arith.constant 0 : index
    %c0_12 = arith.constant 0 : index
    %13 = vector.load %arg9[%c0_11, %c0_12] : memref<128x16xf32, #tpu.memory_space<vmem>>, vector<128x16xf32>
    %cst_13 = arith.constant dense<0.000000e+00> : vector<256x16xf32>
    %14 = tpu.matmul %12, %13, %cst_13 {dimension_numbers = #tpu.dot_dimension_numbers<[1], [0], [0], [1], [0, 0, 1, 1], [], []>} : vector<256x128xf32>, vector<128x16xf32>, vector<256x16xf32> -> vector<256x16xf32>
    %15 = math.sin %14 : vector<256x16xf32>
    %16 = math.cos %14 : vector<256x16xf32>
    %cst_14 = arith.constant 2.000000e+00 : f32
    %17 = vector.broadcast %cst_14 : f32 to vector<256x16xf32>
    %18 = arith.mulf %17, %15 : vector<256x16xf32>
    %19 = arith.mulf %18, %16 : vector<256x16xf32>
    %cst_15 = arith.constant 2.000000e+00 : f32
    %20 = vector.broadcast %cst_15 : f32 to vector<256x16xf32>
    %21 = arith.mulf %20, %15 : vector<256x16xf32>
    %22 = arith.mulf %21, %15 : vector<256x16xf32>
    %cst_16 = arith.constant 1.000000e+00 : f32
    %23 = vector.broadcast %cst_16 : f32 to vector<256x16xf32>
    %24 = arith.subf %23, %22 : vector<256x16xf32>
    %cst_17 = arith.constant 2.000000e+00 : f32
    %25 = vector.broadcast %cst_17 : f32 to vector<256x16xf32>
    %26 = arith.mulf %25, %19 : vector<256x16xf32>
    %27 = arith.mulf %26, %24 : vector<256x16xf32>
    %cst_18 = arith.constant 2.000000e+00 : f32
    %28 = vector.broadcast %cst_18 : f32 to vector<256x16xf32>
    %29 = arith.mulf %28, %19 : vector<256x16xf32>
    %30 = arith.mulf %29, %19 : vector<256x16xf32>
    %cst_19 = arith.constant 1.000000e+00 : f32
    %31 = vector.broadcast %cst_19 : f32 to vector<256x16xf32>
    %32 = arith.subf %31, %30 : vector<256x16xf32>
    %33 = tpu.concatenate %15, %16, %19, %24, %27, %32 in 1 : vector<256x16xf32>, vector<256x16xf32>, vector<256x16xf32>, vector<256x16xf32>, vector<256x16xf32>, vector<256x16xf32> -> vector<256x96xf32>
    %c0_20 = arith.constant 0 : index
    %c0_21 = arith.constant 0 : index
    %34 = vector.load %arg10[%c0_20, %c0_21] : memref<96x16xf32, #tpu.memory_space<vmem>>, vector<96x16xf32>
    %cst_22 = arith.constant dense<0.000000e+00> : vector<256x16xf32>
    %35 = tpu.matmul %33, %34, %cst_22 {dimension_numbers = #tpu.dot_dimension_numbers<[1], [0], [0], [1], [0, 0, 1, 1], [], []>} : vector<256x96xf32>, vector<96x16xf32>, vector<256x16xf32> -> vector<256x16xf32>
    %c0_23 = arith.constant 0 : index
    %c0_24 = arith.constant 0 : index
    %36 = vector.load %arg11[%c0_23, %c0_24] : memref<1x16xf32, #tpu.memory_space<vmem>>, vector<1x16xf32>
    %37 = vector.broadcast %36 : vector<1x16xf32> to vector<256x16xf32>
    %38 = arith.addf %35, %37 : vector<256x16xf32>
    %39 = tpu.iota {dimensions = array<i32: 0>} : vector<128x256xi32>
    %c0_25 = arith.constant 0 : index
    %c0_26 = arith.constant 0 : index
    %40 = vector.load %arg3[%c0_25, %c0_26] : memref<1x256xi32, #tpu.memory_space<vmem>>, vector<1x256xi32>
    %41 = vector.broadcast %40 : vector<1x256xi32> to vector<128x256xi32>
    %42 = arith.cmpi eq, %39, %41 : vector<128x256xi32>
    %43 = arith.extui %42 : vector<128x256xi1> to vector<128x256xi32>
    %44 = arith.sitofp %43 : vector<128x256xi32> to vector<128x256xf32>
    %c0_27 = arith.constant 0 : index
    %c0_28 = arith.constant 0 : index
    %45 = vector.load %arg4[%c0_27, %c0_28] : memref<1x256xf32, #tpu.memory_space<vmem>>, vector<1x256xf32>
    %46 = vector.broadcast %45 : vector<1x256xf32> to vector<128x256xf32>
    %47 = arith.mulf %44, %46 : vector<128x256xf32>
    %c0_29 = arith.constant 0 : index
    %c0_30 = arith.constant 0 : index
    %48 = vector.load %arg20[%c0_29, %c0_30] : memref<128x16xf32, #tpu.memory_space<vmem>>, vector<128x16xf32>
    %cst_31 = arith.constant dense<0.000000e+00> : vector<128x16xf32>
    %49 = tpu.matmul %47, %38, %cst_31 {dimension_numbers = #tpu.dot_dimension_numbers<[1], [0], [0], [1], [0, 0, 1, 1], [], []>} : vector<128x256xf32>, vector<256x16xf32>, vector<128x16xf32> -> vector<128x16xf32>
    %50 = arith.addf %48, %49 : vector<128x16xf32>
    %c0_32 = arith.constant 0 : index
    %c0_33 = arith.constant 0 : index
    %51 = vector.load %arg20[%c0_32, %c0_33] : memref<128x16xf32, #tpu.memory_space<vmem>>, vector<128x16xf32>
    tpu.vector_store %arg20[%c0_32, %c0_33], %50 {strides = array<i32>} : memref<128x16xf32, #tpu.memory_space<vmem>>, vector<128x16xf32>,
    %c0_i32_34 = arith.constant 0 : i32
    %52 = arith.cmpi eq, %arg0, %c0_i32_34 : i32
    %53 = arith.extui %52 : i1 to i32
    %c0_i32_35 = arith.constant 0 : i32
    %54 = arith.cmpi ne, %53, %c0_i32_35 : i32
    scf.if %54 {
      %c0_36 = arith.constant 0 : index
      %c0_37 = arith.constant 0 : index
      %55 = vector.load %arg5[%c0_36, %c0_37] : memref<128x8xf32, #tpu.memory_space<vmem>>, vector<128x8xf32>
      %c0_38 = arith.constant 0 : index
      %c0_39 = arith.constant 0 : index
      %56 = vector.load %arg12[%c0_38, %c0_39] : memref<8x32xf32, #tpu.memory_space<vmem>>, vector<8x32xf32>
      %cst_40 = arith.constant dense<0.000000e+00> : vector<128x32xf32>
      %57 = tpu.matmul %55, %56, %cst_40 {dimension_numbers = #tpu.dot_dimension_numbers<[1], [0], [0], [1], [0, 0, 1, 1], [], []>} : vector<128x8xf32>, vector<8x32xf32>, vector<128x32xf32> -> vector<128x32xf32>
      %c0_41 = arith.constant 0 : index
      %c0_42 = arith.constant 0 : index
      %58 = vector.load %arg20[%c0_41, %c0_42] : memref<128x16xf32, #tpu.memory_space<vmem>>, vector<128x16xf32>
      %c0_43 = arith.constant 0 : index
      %c0_44 = arith.constant 0 : index
      %59 = vector.load %arg13[%c0_43, %c0_44] : memref<16x32xf32, #tpu.memory_space<vmem>>, vector<16x32xf32>
      %cst_45 = arith.constant dense<0.000000e+00> : vector<128x32xf32>
      %60 = tpu.matmul %58, %59, %cst_45 {dimension_numbers = #tpu.dot_dimension_numbers<[1], [0], [0], [1], [0, 0, 1, 1], [], []>} : vector<128x16xf32>, vector<16x32xf32>, vector<128x32xf32> -> vector<128x32xf32>
      %61 = arith.addf %57, %60 : vector<128x32xf32>
      %c0_46 = arith.constant 0 : index
      %c0_47 = arith.constant 0 : index
      %62 = vector.load %arg14[%c0_46, %c0_47] : memref<1x32xf32, #tpu.memory_space<vmem>>, vector<1x32xf32>
      %63 = vector.broadcast %62 : vector<1x32xf32> to vector<128x32xf32>
      %64 = arith.addf %61, %63 : vector<128x32xf32>
      %cst_48 = arith.constant 0.000000e+00 : f32
      %65 = vector.broadcast %cst_48 : f32 to vector<128x32xf32>
      %66 = arith.maximumf %64, %65 : vector<128x32xf32>
      %c0_49 = arith.constant 0 : index
      %c0_50 = arith.constant 0 : index
      %67 = vector.load %arg15[%c0_49, %c0_50] : memref<32x16xf32, #tpu.memory_space<vmem>>, vector<32x16xf32>
      %cst_51 = arith.constant dense<0.000000e+00> : vector<128x16xf32>
      %68 = tpu.matmul %66, %67, %cst_51 {dimension_numbers = #tpu.dot_dimension_numbers<[1], [0], [0], [1], [0, 0, 1, 1], [], []>} : vector<128x32xf32>, vector<32x16xf32>, vector<128x16xf32> -> vector<128x16xf32>
      %c0_52 = arith.constant 0 : index
      %c0_53 = arith.constant 0 : index
      %69 = vector.load %arg16[%c0_52, %c0_53] : memref<1x16xf32, #tpu.memory_space<vmem>>, vector<1x16xf32>
      %70 = vector.broadcast %69 : vector<1x16xf32> to vector<128x16xf32>
      %71 = arith.addf %68, %70 : vector<128x16xf32>
      %c0_54 = arith.constant 0 : index
      %c0_55 = arith.constant 0 : index
      %72 = vector.load %arg17[%c0_54, %c0_55] : memref<1x16xf32, #tpu.memory_space<vmem>>, vector<1x16xf32>
      %73 = vector.broadcast %72 : vector<1x16xf32> to vector<128x16xf32>
      %74 = arith.mulf %71, %73 : vector<128x16xf32>
      %c0_56 = arith.constant 0 : index
      %c0_57 = arith.constant 0 : index
      %75 = vector.load %arg18[%c0_56, %c0_57] : memref<1x16xf32, #tpu.memory_space<vmem>>, vector<1x16xf32>
      %76 = vector.broadcast %75 : vector<1x16xf32> to vector<128x16xf32>
      %77 = arith.addf %74, %76 : vector<128x16xf32>
      %cst_58 = arith.constant 0.000000e+00 : f32
      %78 = vector.broadcast %cst_58 : f32 to vector<128x16xf32>
      %79 = arith.maximumf %77, %78 : vector<128x16xf32>
      %c0_59 = arith.constant 0 : index
      %c0_60 = arith.constant 0 : index
      %80 = vector.load %arg19[%c0_59, %c0_60] : memref<128x16xf32, #tpu.memory_space<vmem>>, vector<128x16xf32>
      tpu.vector_store %arg19[%c0_59, %c0_60], %79 {strides = array<i32>} : memref<128x16xf32, #tpu.memory_space<vmem>>, vector<128x16xf32>,
    } else {
    }
    return
  }
  func.func @transform_0(%arg0: i32) -> (i32, i32) {
    %c0_i32 = arith.constant 0 : i32
    %c0_i32_0 = arith.constant 0 : i32
    return %arg0, %c0_i32 : i32, i32
  }
  func.func @transform_1(%arg0: i32) -> (i32, i32) {
    %c0_i32 = arith.constant 0 : i32
    %c0_i32_0 = arith.constant 0 : i32
    return %arg0, %c0_i32 : i32, i32
  }
  func.func @transform_2(%arg0: i32) -> (i32, i32) {
    %c0_i32 = arith.constant 0 : i32
    %c0_i32_0 = arith.constant 0 : i32
    return %c0_i32, %arg0 : i32, i32
  }
  func.func @transform_3(%arg0: i32) -> (i32, i32) {
    %c0_i32 = arith.constant 0 : i32
    %c0_i32_0 = arith.constant 0 : i32
    return %c0_i32, %arg0 : i32, i32
  }
  func.func @transform_4(%arg0: i32) -> (i32, i32) {
    %c0_i32 = arith.constant 0 : i32
    %c0_i32_0 = arith.constant 0 : i32
    %c0_i32_1 = arith.constant 0 : i32
    return %c0_i32, %c0_i32_0 : i32, i32
  }
  func.func @transform_5(%arg0: i32) -> (i32, i32) {
    %c0_i32 = arith.constant 0 : i32
    %c0_i32_0 = arith.constant 0 : i32
    %c0_i32_1 = arith.constant 0 : i32
    return %c0_i32, %c0_i32_0 : i32, i32
  }
  func.func @transform_6(%arg0: i32) -> (i32, i32) {
    %c0_i32 = arith.constant 0 : i32
    %c0_i32_0 = arith.constant 0 : i32
    %c0_i32_1 = arith.constant 0 : i32
    return %c0_i32, %c0_i32_0 : i32, i32
  }
  func.func @transform_7(%arg0: i32) -> (i32, i32) {
    %c0_i32 = arith.constant 0 : i32
    %c0_i32_0 = arith.constant 0 : i32
    %c0_i32_1 = arith.constant 0 : i32
    return %c0_i32, %c0_i32_0 : i32, i32
  }
  func.func @transform_8(%arg0: i32) -> (i32, i32) {
    %c0_i32 = arith.constant 0 : i32
    %c0_i32_0 = arith.constant 0 : i32
    %c0_i32_1 = arith.constant 0 : i32
    return %c0_i32, %c0_i32_0 : i32, i32
  }
  func.func @transform_9(%arg0: i32) -> (i32, i32) {
    %c0_i32 = arith.constant 0 : i32
    %c0_i32_0 = arith.constant 0 : i32
    %c0_i32_1 = arith.constant 0 : i32
    return %c0_i32, %c0_i32_0 : i32, i32
  }
  func.func @transform_10(%arg0: i32) -> (i32, i32) {
    %c0_i32 = arith.constant 0 : i32
    %c0_i32_0 = arith.constant 0 : i32
    %c0_i32_1 = arith.constant 0 : i32
    return %c0_i32, %c0_i32_0 : i32, i32
  }
  func.func @transform_11(%arg0: i32) -> (i32, i32) {
    %c0_i32 = arith.constant 0 : i32
    %c0_i32_0 = arith.constant 0 : i32
    %c0_i32_1 = arith.constant 0 : i32
    return %c0_i32, %c0_i32_0 : i32, i32
  }
  func.func @transform_12(%arg0: i32) -> (i32, i32) {
    %c0_i32 = arith.constant 0 : i32
    %c0_i32_0 = arith.constant 0 : i32
    %c0_i32_1 = arith.constant 0 : i32
    return %c0_i32, %c0_i32_0 : i32, i32
  }
  func.func @transform_13(%arg0: i32) -> (i32, i32) {
    %c0_i32 = arith.constant 0 : i32
    %c0_i32_0 = arith.constant 0 : i32
    %c0_i32_1 = arith.constant 0 : i32
    return %c0_i32, %c0_i32_0 : i32, i32
  }
  func.func @transform_14(%arg0: i32) -> (i32, i32) {
    %c0_i32 = arith.constant 0 : i32
    %c0_i32_0 = arith.constant 0 : i32
    %c0_i32_1 = arith.constant 0 : i32
    return %c0_i32, %c0_i32_0 : i32, i32
  }
  func.func @transform_15(%arg0: i32) -> (i32, i32) {
    %c0_i32 = arith.constant 0 : i32
    %c0_i32_0 = arith.constant 0 : i32
    %c0_i32_1 = arith.constant 0 : i32
    return %c0_i32, %c0_i32_0 : i32, i32
  }
  func.func @transform_16(%arg0: i32) -> (i32, i32) {
    %c0_i32 = arith.constant 0 : i32
    %c0_i32_0 = arith.constant 0 : i32
    %c0_i32_1 = arith.constant 0 : i32
    return %c0_i32, %c0_i32_0 : i32, i32
  }
  func.func @transform_17(%arg0: i32) -> (i32, i32) {
    %c0_i32 = arith.constant 0 : i32
    %c0_i32_0 = arith.constant 0 : i32
    %c0_i32_1 = arith.constant 0 : i32
    return %c0_i32, %c0_i32_0 : i32, i32
  }
  func.func @transform_18(%arg0: i32) -> (i32, i32) {
    %c0_i32 = arith.constant 0 : i32
    %c0_i32_0 = arith.constant 0 : i32
    %c0_i32_1 = arith.constant 0 : i32
    return %c0_i32, %c0_i32_0 : i32, i32
  }
}

</mosaic_0001>

<bundles_post_ra>
// kernel: tpu_custom_call.1
= control target key start
LH: loop header
LB: loop body
LE: loop exit
PB: predicated region body
PF: predicated region fallthrough
CT: control target
= control target key end

     0   :  { %vm18791_vm0 = vcmask 64512   ;;  %s11666_s23 = smov 48   ;;  %s11668_s25 = smov 80   ;;  %s18701_s5 = inlined_call_operand.vmem [shape: f32[8,128], index: 5, kind: input, shape index: {}]   ;;  %s18702_s0 = inlined_call_operand.vmem [shape: f32[256,8], index: 0, kind: input, shape index: {}]   ;;  %s18703_s7 = inlined_call_operand.vmem [shape: f32[8,128], index: 7, kind: input, shape index: {}]   ;;  %s18704_s1 = inlined_call_operand.vmem [shape: f32[256,8], index: 1, kind: input, shape index: {}]   ;;  %s18705_s8 = inlined_call_operand.vmem [shape: f32[128,16], index: 8, kind: input, shape index: {}]   ;;  %s18706_s6 = inlined_call_operand.vmem [shape: f32[1,128], index: 6, kind: input, shape index: {}]   ;;  %s18707_s9 = inlined_call_operand.vmem [shape: f32[96,16], index: 9, kind: input, shape index: {}]   ;;  %s18708_s10 = inlined_call_operand.vmem [shape: f32[1,16], index: 10, kind: input, shape index: {}]   ;;  %s18709_s2 = inlined_call_operand.vmem [shape: s32[1,256], index: 2, kind: input, shape index: {}]   ;;  %s18710_s3 = inlined_call_operand.vmem [shape: f32[1,256], index: 3, kind: input, shape index: {}]   ;;  %s18711_s12 = inlined_call_operand.vmem [shape: f32[16,32], index: 12, kind: input, shape index: {}]   ;;  %s18712_s11 = inlined_call_operand.vmem [shape: f32[8,32], index: 11, kind: input, shape index: {}]   ;;  %s18713_s14 = inlined_call_operand.vmem [shape: f32[32,16], index: 14, kind: input, shape index: {}]   ;;  %s18714_s4 = inlined_call_operand.vmem [shape: f32[128,8], index: 4, kind: input, shape index: {}]   ;;  %s18715_s13 = inlined_call_operand.vmem [shape: f32[1,32], index: 13, kind: input, shape index: {}]   ;;  %s18716_s15 = inlined_call_operand.vmem [shape: f32[1,16], index: 15, kind: input, shape index: {}]   ;;  %s18717_s16 = inlined_call_operand.vmem [shape: f32[1,16], index: 16, kind: input, shape index: {}]   ;;  %s18718_s17 = inlined_call_operand.vmem [shape: f32[1,16], index: 17, kind: input, shape index: {}]   ;;  %s18719_s18 = inlined_call_operand.vmem [shape: f32[128,16], index: 18, kind: output, shape index: {}]  }
   0x1   :  { %19019 = sst [smem:[#allocation135_spill]] %s18701_s5  ;;  %v112_v17 = vld [vmem:[%s18704_s1] sm:$0xff]  ;;  %v113_v19 = vld [vmem:[%s18704_s1 + $0x8] sm:$0xff]  ;;  %v114_v21 = vld [vmem:[%s18704_s1 + $0x10] sm:$0xff] }
   0x2   :  { %19020 = sst [smem:[#allocation136_spill]] %s18702_s0  ;;  %s19022_s29 = sld [smem:[#allocation135_spill]]  ;;  %v115_v23 = vld [vmem:[%s18704_s1 + $0x18] sm:$0xff]  ;;  %v116_v25 = vld [vmem:[%s18704_s1 + $0x20] sm:$0xff]  ;;  %v829_v27 = vld [vmem:[%s18705_s8 + $0x8] sm:$0xff] }
   0x3   :  { %19021 = sst [smem:[#allocation137_spill]] %s18703_s7  ;;  %s19023_s19 = sld [smem:[#allocation136_spill]]  ;;  %v828_v26 = vld [vmem:[%s18705_s8] sm:$0xff]  ;;  %v830_v28 = vld [vmem:[%s18705_s8 + $0x10] sm:$0xff]  ;;  %v831_v31 = vld [vmem:[%s18705_s8 + $0x18] sm:$0xff] }
   0x4   :  { %s19024_s24 = sld [smem:[#allocation137_spill]]  ;;  %v11272_v30 = vpack.c.bf16 %v829_v27, %v828_v26  ;;  %v117_v32 = vld [vmem:[%s18704_s1 + $0x28] sm:$0xff]  ;;  %v118_v34 = vld [vmem:[%s18704_s1 + $0x30] sm:$0xff]  ;;  %v11276_v35 = vpack.c.bf16 %v831_v31, %v830_v28  ;;  %v832_v36 = vld [vmem:[%s18705_s8 + $0x20] sm:$0xff]  ;;  %s11665_s7 = smov 32  }
   0x5   :  { %v833_v37 = vld [vmem:[%s18705_s8 + $0x28] sm:$0xff]  ;;  %v119_v39 = vld [vmem:[%s18704_s1 + $0x38] sm:$0xff]  ;;  %v120_v41 = vld [vmem:[%s18704_s1 + $0x40] sm:$0xff] }
   0x6   :  { %v11280_v42 = vpack.c.bf16 %v833_v37, %v832_v36  ;;  %v834_v43 = vld [vmem:[%s18705_s8 + $0x30] sm:$0xff]  ;;  %v835_v44 = vld [vmem:[%s18705_s8 + $0x38] sm:$0xff]  ;;  %v121_v46 = vld [vmem:[%s18704_s1 + $0x48] sm:$0xff] }
   0x7   :  { %v122_v48 = vld [vmem:[%s18704_s1 + $0x50] sm:$0xff]  ;;  %v11284_v49 = vpack.c.bf16 %v835_v44, %v834_v43  ;;  %v123_v51 = vld [vmem:[%s18704_s1 + $0x58] sm:$0xff]  ;;  %v124_v53 = vld [vmem:[%s18704_s1 + $0x60] sm:$0xff] }
   0x8   :  { %v144_v0 = vld [vmem:[%s19022_s29] sm:$0xff]  ;;  %v125_v55 = vld [vmem:[%s18704_s1 + $0x68] sm:$0xff]  ;;  %v126_v57 = vld [vmem:[%s18704_s1 + $0x70] sm:$0xff] }
   0x9   :  { %v104_v1 = vld [vmem:[%s19023_s19 + $0xc0] sm:$0xff]  ;;  %v105_v2 = vld [vmem:[%s19023_s19 + $0xc8] sm:$0xff]  ;;  %11372 = vmatprep.subr.mxu1 %v144_v0  ;;  %v106_v3 = vld [vmem:[%s19023_s19 + $0xd0] sm:$0xff]  ;;  %10934 = vmatprep.subr.mxu0 %v144_v0 }
   0xa   :  { %10972 = vmatprep.mubr.msk.f32.mxu1 %vm18791_vm0, %v104_v1  ;;  %v474_v4 = vld [vmem:[%s19024_s24] sm:$0xff]  ;;  %11373 = vmatpush3.msra.mxu1 %v144_v0  ;;  %v81_v6 = vld [vmem:[%s19023_s19 + $0x8] sm:$0xff]  ;;  %v107_v7 = vld [vmem:[%s19023_s19 + $0xd8] sm:$0xff]  ;;  %s11667_s24 = smov 64  }
   0xb   :  { %10973 = vmatmul.mubr.msk.f32.vlgmr.msra.gmra.mrb[0].mxu1 %vm18791_vm0, %v105_v2  ;;  %10984 = vmatprep.subr.mxu1 %v474_v4  ;;  %v80_v5 = vld [vmem:[%s19023_s19] sm:$0xff]  ;;  %v82_v8 = vld [vmem:[%s19023_s19 + $0x10] sm:$0xff]  ;;  %v83_v10 = vld [vmem:[%s19023_s19 + $0x18] sm:$0xff] }
   0xc   :  { %10975 = vmatprep.mubr.msk.f32.mxu1 %vm18791_vm0, %v106_v3  ;;  %10985 = vmatpush3.msra.mxu1 %v474_v4  ;;  %v108_v9 = vld [vmem:[%s19023_s19 + $0xe0] sm:$0xff]  ;;  %v109_v11 = vld [vmem:[%s19023_s19 + $0xe8] sm:$0xff]  ;;  %v110_v13 = vld [vmem:[%s19023_s19 + $0xf0] sm:$0xff] }
   0xd   :  { %10935 = vmatpush3.msra.mxu0 %v144_v0  ;;  %10936 = vmatprep.mubr.msk.f32.mxu0 %vm18791_vm0, %v80_v5  ;;  %v84_v12 = vld [vmem:[%s19023_s19 + $0x20] sm:$0xff]  ;;  %v85_v14 = vld [vmem:[%s19023_s19 + $0x28] sm:$0xff]  ;;  %v111_v15 = vld [vmem:[%s19023_s19 + $0xf8] sm:$0xff] }
   0xe   :  { %10937 = vmatmul.mubr.msk.f32.vlgmr.msra.gmra.mrb[0].mxu0 %vm18791_vm0, %v81_v6  ;;  %v86_v16 = vld [vmem:[%s19023_s19 + $0x30] sm:$0xff]  ;;  %v87_v18 = vld [vmem:[%s19023_s19 + $0x38] sm:$0xff]  ;;  %v88_v20 = vld [vmem:[%s19023_s19 + $0x40] sm:$0xff]  ;;  %11273 = vmatprep.subr.bf16.mxu0 %v11272_v30 }
   0xf   :  { %10976 = vmatmul.mubr.msk.f32.gmra.mrb[2].mxu1 %vm18791_vm0, %v107_v7  ;;  %10939 = vmatprep.mubr.msk.f32.mxu0 %vm18791_vm0, %v82_v8  ;;  %v89_v22 = vld [vmem:[%s19023_s19 + $0x48] sm:$0xff]  ;;  %v90_v24 = vld [vmem:[%s19023_s19 + $0x50] sm:$0xff]  ;;  %v91_v29 = vld [vmem:[%s19023_s19 + $0x58] sm:$0xff] }
  0x10   :  { %10978 = vmatprep.mubr.msk.f32.mxu1 %vm18791_vm0, %v108_v9  ;;  %v92_v33 = vld [vmem:[%s19023_s19 + $0x60] sm:$0xff]  ;;  %v93_v38 = vld [vmem:[%s19023_s19 + $0x68] sm:$0xff]  ;;  %v94_v40 = vld [vmem:[%s19023_s19 + $0x70] sm:$0xff]  ;;  %11275 = vmatpush3.bf16.msra.mxu0 %v11272_v30 }
  0x11   :  { %11277 = vmatprep.subr.bf16.mxu0 %v11276_v35  ;;  %v95_v45 = vld [vmem:[%s19023_s19 + $0x78] sm:$0xff]  ;;  %v96_v47 = vld [vmem:[%s19023_s19 + $0x80] sm:$0xff]  ;;  %v97_v50 = vld [vmem:[%s19023_s19 + $0x88] sm:$0xff] }
  0x12   :  { %10940 = vmatmul.mubr.msk.f32.gmra.mrb[2].mxu0 %vm18791_vm0, %v83_v10  ;;  %v98_v52 = vld [vmem:[%s19023_s19 + $0x90] sm:$0xff]  ;;  %v99_v54 = vld [vmem:[%s19023_s19 + $0x98] sm:$0xff]  ;;  %v100_v56 = vld [vmem:[%s19023_s19 + $0xa0] sm:$0xff] }
  0x13   :  { %10979 = vmatmul.mubr.msk.f32.gmra.mrb[4].mxu1 %vm18791_vm0, %v109_v11  ;;  %10942 = vmatprep.mubr.msk.f32.mxu0 %vm18791_vm0, %v84_v12  ;;  %v101_v58 = vld [vmem:[%s19023_s19 + $0xa8] sm:$0xff]  ;;  %v127_v59 = vld [vmem:[%s18704_s1 + $0x78] sm:$0xff]  ;;  %v102_v60 = vld [vmem:[%s19023_s19 + $0xb0] sm:$0xff] }
  0x14   :  { %10981 = vmatprep.mubr.msk.f32.mxu1 %vm18791_vm0, %v110_v13  ;;  %11279 = vmatpush3.bf16.msra.mxu0 %v11276_v35  ;;  %v128_v61 = vld [vmem:[%s18704_s1 + $0x80] sm:$0xff]  ;;  %v103_v62 = vld [vmem:[%s19023_s19 + $0xb8] sm:$0xff]  ;;  %v129_v63 = vld [vmem:[%s18704_s1 + $0x88] sm:$0xff] }
  0x15   :  { %11281 = vmatprep.subr.bf16.mxu0 %v11280_v42  ;;  %v130_v0 = vld [vmem:[%s18704_s1 + $0x90] sm:$0xff]  ;;  %v131_v1 = vld [vmem:[%s18704_s1 + $0x98] sm:$0xff]  ;;  %v132_v2 = vld [vmem:[%s18704_s1 + $0xa0] sm:$0xff] }
  0x16   :  { %10943 = vmatmul.mubr.msk.f32.gmra.mrb[4].mxu0 %vm18791_vm0, %v85_v14  ;;  %v133_v3 = vld [vmem:[%s18704_s1 + $0xa8] sm:$0xff]  ;;  %v134_v4 = vld [vmem:[%s18704_s1 + $0xb0] sm:$0xff]  ;;  %v135_v5 = vld [vmem:[%s18704_s1 + $0xb8] sm:$0xff] }
  0x17   :  { %10982 = vmatmul.mubr.msk.f32.gmra.mrb[6].mxu1 %vm18791_vm0, %v111_v15  ;;  %10945 = vmatprep.mubr.msk.f32.mxu0 %vm18791_vm0, %v86_v16  ;;  %v136_v6 = vld [vmem:[%s18704_s1 + $0xc0] sm:$0xff]  ;;  %v137_v7 = vld [vmem:[%s18704_s1 + $0xc8] sm:$0xff]  ;;  %v138_v8 = vld [vmem:[%s18704_s1 + $0xd0] sm:$0xff] }
  0x18   :  { %10986 = vmatprep.mubr.msk.f32.mxu1 %vm18791_vm0, %v112_v17  ;;  %11283 = vmatpush3.bf16.msra.mxu0 %v11280_v42  ;;  %v139_v9 = vld [vmem:[%s18704_s1 + $0xd8] sm:$0xff]  ;;  %v140_v10 = vld [vmem:[%s18704_s1 + $0xe0] sm:$0xff]  ;;  %v141_v11 = vld [vmem:[%s18704_s1 + $0xe8] sm:$0xff] }
  0x19   :  { %11285 = vmatprep.subr.bf16.mxu0 %v11284_v49  ;;  %v142_v12 = vld [vmem:[%s18704_s1 + $0xf0] sm:$0xff]  ;;  %v143_v13 = vld [vmem:[%s18704_s1 + $0xf8] sm:$0xff]  ;;  %v836_v14 = vld [vmem:[%s18705_s8 + $0x40] sm:$0xff] }
  0x1a   :  { %10946 = vmatmul.mubr.msk.f32.gmra.mrb[6].mxu0 %vm18791_vm0, %v87_v18  ;;  %v837_v15 = vld [vmem:[%s18705_s8 + $0x48] sm:$0xff]  ;;  %v838_v17 = vld [vmem:[%s18705_s8 + $0x50] sm:$0xff]  ;;  %v839_v18 = vld [vmem:[%s18705_s8 + $0x58] sm:$0xff] }
  0x1b   :  { %10987 = vmatmul.mubr.msk.f32.vlgmr.msra.gmra.mrb[8].mxu1 %vm18791_vm0, %v113_v19  ;;  %10948 = vmatprep.mubr.msk.f32.mxu0 %vm18791_vm0, %v88_v20  ;;  %v11288_v16 = vpack.c.bf16 %v837_v15, %v836_v14  ;;  %v11292_v19 = vpack.c.bf16 %v839_v18, %v838_v17  ;;  %v840_v20 = vld [vmem:[%s18705_s8 + $0x60] sm:$0xff] }
  0x1c   :  { %10989 = vmatprep.mubr.msk.f32.mxu1 %vm18791_vm0, %v114_v21  ;;  %11287 = vmatpush3.bf16.msra.mxu0 %v11284_v49  ;;  %v841_v21 = vld [vmem:[%s18705_s8 + $0x68] sm:$0xff]  ;;  %v12090_v37 = vld [vmem:[%s18706_s6] ss:$0 sm:$0xff]  ;;  %s11664_s6 = smov 16  }
  0x1d   :  { %11289 = vmatprep.subr.bf16.mxu0 %v11288_v16 }
  0x1e   :  { %10949 = vmatmul.mubr.msk.f32.gmra.mrb[8].mxu0 %vm18791_vm0, %v89_v22  ;;  %v11296_v22 = vpack.c.bf16 %v841_v21, %v840_v20 }
  0x1f   :  { %10990 = vmatmul.mubr.msk.f32.gmra.mrb[10].mxu1 %vm18791_vm0, %v115_v23  ;;  %10951 = vmatprep.mubr.msk.f32.mxu0 %vm18791_vm0, %v90_v24  ;;  %v842_v23 = vld [vmem:[%s18705_s8 + $0x70] sm:$0xff]  ;;  %v843_v24 = vld [vmem:[%s18705_s8 + $0x78] sm:$0xff] }
  0x20   :  { %10992 = vmatprep.mubr.msk.f32.mxu1 %vm18791_vm0, %v116_v25  ;;  %11291 = vmatpush3.bf16.msra.mxu0 %v11288_v16  ;;  %v11300_v25 = vpack.c.bf16 %v843_v24, %v842_v23 }
  0x21   :  { %11293 = vmatprep.subr.bf16.mxu0 %v11292_v19 }
  0x22   :  { %10952 = vmatmul.mubr.msk.f32.gmra.mrb[10].mxu0 %vm18791_vm0, %v91_v29 }
  0x23   :  { %10993 = vmatmul.mubr.msk.f32.gmra.mrb[12].mxu1 %vm18791_vm0, %v117_v32  ;;  %10954 = vmatprep.mubr.msk.f32.mxu0 %vm18791_vm0, %v92_v33 }
  0x24   :  { %10995 = vmatprep.mubr.msk.f32.mxu1 %vm18791_vm0, %v118_v34  ;;  %11295 = vmatpush3.bf16.msra.mxu0 %v11292_v19 }
  0x25   :  { %11297 = vmatprep.subr.bf16.mxu0 %v11296_v22 }
  0x26   :  { %10955 = vmatmul.mubr.msk.f32.gmra.mrb[12].mxu0 %vm18791_vm0, %v93_v38 }
  0x27   :  { %10996 = vmatmul.mubr.msk.f32.gmra.mrb[14].mxu1 %vm18791_vm0, %v119_v39  ;;  %10957 = vmatprep.mubr.msk.f32.mxu0 %vm18791_vm0, %v94_v40 }
  0x28   :  { %10998 = vmatprep.mubr.msk.f32.mxu1 %vm18791_vm0, %v120_v41  ;;  %11299 = vmatpush3.bf16.msra.mxu0 %v11296_v22 }
  0x29   :  { %11301 = vmatprep.subr.bf16.mxu0 %v11300_v25 }
  0x2a   :  { %10958 = vmatmul.mubr.msk.f32.gmra.mrb[14].mxu0 %vm18791_vm0, %v95_v45 }
  0x2b   :  { %10999 = vmatmul.mubr.msk.f32.gmra.mrb[16].mxu1 %vm18791_vm0, %v121_v46  ;;  %10960 = vmatprep.mubr.msk.f32.mxu0 %vm18791_vm0, %v96_v47 }
  0x2c   :  { %11001 = vmatprep.mubr.msk.f32.mxu1 %vm18791_vm0, %v122_v48  ;;  %11303 = vmatpush3.bf16.msra.mxu0 %v11300_v25 }
  0x2e   :  { %10961 = vmatmul.mubr.msk.f32.gmra.mrb[16].mxu0 %vm18791_vm0, %v97_v50 }
  0x2f   :  { %11002 = vmatmul.mubr.msk.f32.gmra.mrb[18].mxu1 %vm18791_vm0, %v123_v51  ;;  %10963 = vmatprep.mubr.msk.f32.mxu0 %vm18791_vm0, %v98_v52 }
  0x30   :  { %11004 = vmatprep.mubr.msk.f32.mxu1 %vm18791_vm0, %v124_v53 }
  0x32   :  { %10964 = vmatmul.mubr.msk.f32.gmra.mrb[18].mxu0 %vm18791_vm0, %v99_v54 }
  0x33   :  { %11005 = vmatmul.mubr.msk.f32.gmra.mrb[20].mxu1 %vm18791_vm0, %v125_v55  ;;  %10966 = vmatprep.mubr.msk.f32.mxu0 %vm18791_vm0, %v100_v56 }
  0x34   :  { %11007 = vmatprep.mubr.msk.f32.mxu1 %vm18791_vm0, %v126_v57 }
  0x36   :  { %10967 = vmatmul.mubr.msk.f32.gmra.mrb[20].mxu0 %vm18791_vm0, %v101_v58 }
  0x37   :  { %11008 = vmatmul.mubr.msk.f32.gmra.mrb[22].mxu1 %vm18791_vm0, %v127_v59  ;;  %10969 = vmatprep.mubr.msk.f32.mxu0 %vm18791_vm0, %v102_v60 }
  0x38   :  { %11010 = vmatprep.mubr.msk.f32.mxu1 %vm18791_vm0, %v128_v61 }
  0x3a   :  { %10970 = vmatmul.mubr.msk.f32.gmra.mrb[22].mxu0 %vm18791_vm0, %v103_v62 }
  0x3b   :  { %11011 = vmatmul.mubr.msk.f32.gmra.mrb[24].mxu1 %vm18791_vm0, %v129_v63 }
  0x3c   :  { %11013 = vmatprep.mubr.msk.f32.mxu1 %vm18791_vm0, %v130_v0 }
  0x3f   :  { %11014 = vmatmul.mubr.msk.f32.gmra.mrb[26].mxu1 %vm18791_vm0, %v131_v1 }
  0x40   :  { %11016 = vmatprep.mubr.msk.f32.mxu1 %vm18791_vm0, %v132_v2 }
  0x43   :  { %11017 = vmatmul.mubr.msk.f32.gmra.mrb[28].mxu1 %vm18791_vm0, %v133_v3 }
  0x44   :  { %11019 = vmatprep.mubr.msk.f32.mxu1 %vm18791_vm0, %v134_v4 }
  0x47   :  { %11020 = vmatmul.mubr.msk.f32.gmra.mrb[30].mxu1 %vm18791_vm0, %v135_v5 }
  0x48   :  { %11022 = vmatprep.mubr.msk.f32.mxu1 %vm18791_vm0, %v136_v6 }
  0x4b   :  { %11023 = vmatmul.mubr.msk.f32.gmra.mrb[32].mxu1 %vm18791_vm0, %v137_v7 }
  0x4c   :  { %11025 = vmatprep.mubr.msk.f32.mxu1 %vm18791_vm0, %v138_v8 }
  0x4f   :  { %11026 = vmatmul.mubr.msk.f32.gmra.mrb[34].mxu1 %vm18791_vm0, %v139_v9 }
  0x50   :  { %11028 = vmatprep.mubr.msk.f32.mxu1 %vm18791_vm0, %v140_v10 }
  0x53   :  { %11029 = vmatmul.mubr.msk.f32.gmra.mrb[36].mxu1 %vm18791_vm0, %v141_v11 }
  0x54   :  { %11031 = vmatprep.mubr.msk.f32.mxu1 %vm18791_vm0, %v142_v12 }
  0x57   :  { %11032 = vmatmul.mubr.msk.f32.gmra.mrb[38].mxu1 %vm18791_vm0, %v143_v13 }
  0xde   :  { %v12075_v26 = vpop.f32.mrb[0].mxu1 }
  0xdf   :  { %v12077_v27 = vpop.f32.mrb[1].mxu1 }
  0xe1   :  { %v10938_v28 = vpop.f32.mrb[0].mxu0 }
  0xe2   :  { %v12079_v29 = vpop.f32.mrb[2].mxu1  ;;  %v315_v30 = vpop.f32.mrb[1].mxu0  ;;  %v321_v40 = vadd.f32 %v10938_v28, %v12090_v37 }
  0xe3   :  { %v12081_v31 = vpop.f32.mrb[3].mxu1  ;;  %v316_v42 = vadd.f32 %v12090_v37, %v315_v30 }
  0xe5   :  { %v10941_v32 = vpop.f32.mrb[2].mxu0 }
  0xe6   :  { %v12083_v33 = vpop.f32.mrb[4].mxu1  ;;  %v325_v34 = vpop.f32.mrb[3].mxu0  ;;  %v331_v48 = vadd.f32 %v10941_v32, %v12090_v37 }
  0xe7   :  { %v12085_v35 = vpop.f32.mrb[5].mxu1  ;;  %v326_v50 = vadd.f32 %v12090_v37, %v325_v34 }
  0xe9   :  { %v10944_v36 = vpop.f32.mrb[4].mxu0 }
  0xea   :  { %v12092_v38 = vpop.f32.mrb[6].mxu1  ;;  %v335_v39 = vpop.f32.mrb[5].mxu0  ;;  %v341_v56 = vadd.f32 %v10944_v36, %v12090_v37 }
  0xeb   :  { %v12095_v41 = vpop.f32.mrb[7].mxu1  ;;  %v336_v58 = vadd.f32 %v12090_v37, %v335_v39 }
  0xed   :  { %v10947_v43 = vpop.f32.mrb[6].mxu0 }
  0xee   :  { %v10988_v44 = vpop.f32.mrb[8].mxu1  ;;  %v345_v45 = vpop.f32.mrb[7].mxu0  ;;  %v351_v0 = vadd.f32 %v10947_v43, %v12090_v37 }
  0xef   :  { %v797_v46 = vmul.f32 %v10988_v44, %v321_v40  ;;  %v637_v47 = vpop.f32.mrb[9].mxu1  ;;  %v346_v2 = vadd.f32 %v12090_v37, %v345_v45 }
  0xf0   :  { %v796_v49 = vmul.f32 %v637_v47, %v316_v42 }
  0xf1   :  { %v10950_v51 = vpop.f32.mrb[8].mxu0 }
  0xf2   :  { %v10991_v52 = vpop.f32.mrb[10].mxu1  ;;  %11066 = vmatprep.mubr.f32.mxu0 %v796_v49  ;;  %v355_v53 = vpop.f32.mrb[9].mxu0  ;;  %v361_v8 = vadd.f32 %v10950_v51, %v12090_v37 }
  0xf3   :  { %v799_v54 = vmul.f32 %v10991_v52, %v331_v48  ;;  %v647_v55 = vpop.f32.mrb[11].mxu1  ;;  %11067 = vmatmul.mubr.f32.vlgmr.msra.gmra.mrb[24].mxu0 %v797_v46  ;;  %v356_v10 = vadd.f32 %v12090_v37, %v355_v53 }
  0xf4   :  { %v798_v57 = vmul.f32 %v647_v55, %v326_v50 }
  0xf5   :  { %v10953_v59 = vpop.f32.mrb[10].mxu0 }
  0xf6   :  { %v10994_v60 = vpop.f32.mrb[12].mxu1  ;;  %11069 = vmatprep.mubr.f32.mxu0 %v798_v57  ;;  %v365_v61 = vpop.f32.mrb[11].mxu0  ;;  %v371_v16 = vadd.f32 %v10953_v59, %v12090_v37 }
  0xf7   :  { %v801_v62 = vmul.f32 %v10994_v60, %v341_v56  ;;  %v657_v63 = vpop.f32.mrb[13].mxu1  ;;  %11070 = vmatmul.mubr.f32.gmra.mrb[26].mxu0 %v799_v54  ;;  %v366_v18 = vadd.f32 %v12090_v37, %v365_v61 }
  0xf8   :  { %v800_v1 = vmul.f32 %v657_v63, %v336_v58 }
  0xf9   :  { %v10956_v3 = vpop.f32.mrb[12].mxu0 }
  0xfa   :  { %v10997_v4 = vpop.f32.mrb[14].mxu1  ;;  %11072 = vmatprep.mubr.f32.mxu0 %v800_v1  ;;  %v375_v5 = vpop.f32.mrb[13].mxu0  ;;  %v381_v24 = vadd.f32 %v10956_v3, %v12090_v37 }
  0xfb   :  { %v803_v6 = vmul.f32 %v10997_v4, %v351_v0  ;;  %v667_v7 = vpop.f32.mrb[15].mxu1  ;;  %11073 = vmatmul.mubr.f32.gmra.mrb[28].mxu0 %v801_v62  ;;  %v376_v28 = vadd.f32 %v12090_v37, %v375_v5 }
  0xfc   :  { %v802_v9 = vmul.f32 %v667_v7, %v346_v2 }
  0xfd   :  { %v10959_v11 = vpop.f32.mrb[14].mxu0 }
  0xfe   :  { %v11000_v12 = vpop.f32.mrb[16].mxu1  ;;  %11075 = vmatprep.mubr.f32.mxu0 %v802_v9  ;;  %v385_v13 = vpop.f32.mrb[15].mxu0  ;;  %v391_v40 = vadd.f32 %v10959_v11, %v12090_v37 }
  0xff   :  { %v805_v14 = vmul.f32 %v11000_v12, %v361_v8  ;;  %v677_v15 = vpop.f32.mrb[17].mxu1  ;;  %11076 = vmatmul.mubr.f32.gmra.mrb[30].mxu0 %v803_v6  ;;  %v386_v43 = vadd.f32 %v12090_v37, %v385_v13  ;;  %v441_v12 = vadd.f32 %v12075_v26, %v12090_v37  ;;  %v436_v13 = vadd.f32 %v12090_v37, %v12077_v27 }
 0x100   :  { %v804_v17 = vmul.f32 %v677_v15, %v356_v10  ;;  %v461_v27 = vadd.f32 %v12083_v33, %v12090_v37 }
 0x101   :  { %v10962_v19 = vpop.f32.mrb[16].mxu0 }
 0x102   :  { %v11003_v20 = vpop.f32.mrb[18].mxu1  ;;  %11078 = vmatprep.mubr.f32.mxu0 %v804_v17  ;;  %v395_v21 = vpop.f32.mrb[17].mxu0  ;;  %v401_v49 = vadd.f32 %v10962_v19, %v12090_v37  ;;  %v446_v19 = vadd.f32 %v12090_v37, %v12081_v31  ;;  %v471_v31 = vadd.f32 %v12092_v38, %v12090_v37 }
 0x103   :  { %v807_v22 = vmul.f32 %v11003_v20, %v371_v16  ;;  %v687_v23 = vpop.f32.mrb[19].mxu1  ;;  %11079 = vmatmul.mubr.f32.gmra.mrb[32].mxu0 %v805_v14  ;;  %v396_v51 = vadd.f32 %v12090_v37, %v395_v21 }
 0x104   :  { %v806_v25 = vmul.f32 %v687_v23, %v366_v18  ;;  %v451_v18 = vadd.f32 %v12079_v29, %v12090_v37  ;;  %v456_v23 = vadd.f32 %v12090_v37, %v12085_v35 }
 0x105   :  { %v10965_v30 = vpop.f32.mrb[18].mxu0 }
 0x106   :  { %v11006_v32 = vpop.f32.mrb[20].mxu1  ;;  %11081 = vmatprep.mubr.f32.mxu0 %v806_v25  ;;  %v405_v34 = vpop.f32.mrb[19].mxu0  ;;  %v411_v57 = vadd.f32 %v10965_v30, %v12090_v37  ;;  %v466_v30 = vadd.f32 %v12090_v37, %v12095_v41 }
 0x107   :  { %v809_v36 = vmul.f32 %v11006_v32, %v381_v24  ;;  %v697_v39 = vpop.f32.mrb[21].mxu1  ;;  %11082 = vmatmul.mubr.f32.gmra.mrb[34].mxu0 %v807_v22  ;;  %v406_v59 = vadd.f32 %v12090_v37, %v405_v34 }
 0x108   :  { %v808_v42 = vmul.f32 %v697_v39, %v376_v28 }
 0x109   :  { %v10968_v44 = vpop.f32.mrb[20].mxu0 }
 0x10a   :  { %v11009_v45 = vpop.f32.mrb[22].mxu1  ;;  %11084 = vmatprep.mubr.f32.mxu0 %v808_v42  ;;  %v415_v46 = vpop.f32.mrb[21].mxu0  ;;  %v421_v63 = vadd.f32 %v10968_v44, %v12090_v37 }
 0x10b   :  { %v811_v47 = vmul.f32 %v11009_v45, %v391_v40  ;;  %v707_v48 = vpop.f32.mrb[23].mxu1  ;;  %11085 = vmatmul.mubr.f32.gmra.mrb[36].mxu0 %v809_v36  ;;  %v416_v1 = vadd.f32 %v12090_v37, %v415_v46 }
 0x10c   :  { %v810_v50 = vmul.f32 %v707_v48, %v386_v43 }
 0x10d   :  { %v10971_v52 = vpop.f32.mrb[22].mxu0 }
 0x10e   :  { %v11012_v53 = vpop.f32.mrb[24].mxu1  ;;  %11087 = vmatprep.mubr.f32.mxu0 %v810_v50  ;;  %v425_v54 = vpop.f32.mrb[23].mxu0  ;;  %v431_v5 = vadd.f32 %v10971_v52, %v12090_v37 }
 0x10f   :  { %v813_v55 = vmul.f32 %v11012_v53, %v401_v49  ;;  %v717_v56 = vpop.f32.mrb[25].mxu1  ;;  %11088 = vmatmul.mubr.f32.gmra.mrb[38].mxu0 %v811_v47  ;;  %v426_v7 = vadd.f32 %v12090_v37, %v425_v54 }
 0x110   :  { %v812_v58 = vmul.f32 %v717_v56, %v396_v51 }
 0x112   :  { %v11015_v60 = vpop.f32.mrb[26].mxu1  ;;  %11090 = vmatprep.mubr.f32.mxu0 %v812_v58 }
 0x113   :  { %v815_v61 = vmul.f32 %v11015_v60, %v411_v57  ;;  %v727_v62 = vpop.f32.mrb[27].mxu1  ;;  %11091 = vmatmul.mubr.f32.gmra.mrb[40].mxu0 %v813_v55  ;;  %v18727_v57 = vmov 920167782  }
 0x114   :  { %v814_v0 = vmul.f32 %v727_v62, %v406_v59 }
 0x116   :  { %v11018_v2 = vpop.f32.mrb[28].mxu1  ;;  %11093 = vmatprep.mubr.f32.mxu0 %v814_v0 }
 0x117   :  { %v817_v3 = vmul.f32 %v11018_v2, %v421_v63  ;;  %v737_v4 = vpop.f32.mrb[29].mxu1  ;;  %11094 = vmatmul.mubr.f32.gmra.mrb[42].mxu0 %v815_v61  ;;  %v18732_v63 = vmov 2102212464  }
 0x118   :  { %v816_v6 = vmul.f32 %v737_v4, %v416_v1  ;;  %v18723_v1 = vmov 1326507024  }
 0x11a   :  { %v11021_v8 = vpop.f32.mrb[30].mxu1  ;;  %11096 = vmatprep.mubr.f32.mxu0 %v816_v6 }
 0x11b   :  { %v819_v9 = vmul.f32 %v11021_v8, %v431_v5  ;;  %v747_v10 = vpop.f32.mrb[31].mxu1  ;;  %11097 = vmatmul.mubr.f32.gmra.mrb[44].mxu0 %v817_v3  ;;  %v18725_v3 = vmov 2475754826   ;;  %v18729_v5 = vmov 2131351028  }
 0x11c   :  { %v818_v11 = vmul.f32 %v747_v10, %v426_v7 }
 0x11e   :  { %v11024_v14 = vpop.f32.mrb[32].mxu1  ;;  %11099 = vmatprep.mubr.f32.mxu0 %v818_v11 }
 0x11f   :  { %v821_v15 = vmul.f32 %v11024_v14, %v441_v12  ;;  %v757_v16 = vpop.f32.mrb[33].mxu1  ;;  %11100 = vmatmul.mubr.f32.gmra.mrb[46].mxu0 %v819_v9  ;;  %v18736_v12 = vmov 683565275  }
 0x120   :  { %v820_v17 = vmul.f32 %v757_v16, %v436_v13 }
 0x122   :  { %v11027_v20 = vpop.f32.mrb[34].mxu1  ;;  %11102 = vmatprep.mubr.f32.mxu0 %v820_v17 }
 0x123   :  { %v823_v21 = vmul.f32 %v11027_v20, %v451_v18  ;;  %v767_v22 = vpop.f32.mrb[35].mxu1  ;;  %11103 = vmatmul.mubr.f32.gmra.mrb[48].mxu0 %v821_v15 }
 0x124   :  { %v822_v26 = vmul.f32 %v767_v22, %v446_v19 }
 0x126   :  { %v11030_v24 = vpop.f32.mrb[36].mxu1  ;;  %11105 = vmatprep.mubr.f32.mxu0 %v822_v26 }
 0x127   :  { %v825_v25 = vmul.f32 %v11030_v24, %v461_v27  ;;  %v777_v28 = vpop.f32.mrb[37].mxu1  ;;  %11106 = vmatmul.mubr.f32.gmra.mrb[50].mxu0 %v823_v21 }
 0x128   :  { %v824_v29 = vmul.f32 %v777_v28, %v456_v23 }
 0x12a   :  { %v11033_v32 = vpop.f32.mrb[38].mxu1  ;;  %11108 = vmatprep.mubr.f32.mxu0 %v824_v29 }
 0x12b   :  { %v827_v34 = vmul.f32 %v11033_v32, %v471_v31  ;;  %v787_v36 = vpop.f32.mrb[39].mxu1  ;;  %11109 = vmatmul.mubr.f32.gmra.mrb[52].mxu0 %v825_v25 }
 0x12c   :  { %v826_v33 = vmul.f32 %v787_v36, %v466_v30 }
 0x12e   :  { %11111 = vmatprep.mubr.f32.mxu0 %v826_v33 }
 0x12f   :  { %11112 = vmatmul.mubr.f32.gmra.mrb[54].mxu0 %v827_v34 }
 0x1c6   :  { %v12136_v35 = vpop.f32.mrb[24].mxu0 }
 0x1c7   :  { %19025 = vst [vmem:[#allocation3_spill] sm:$0xff] %v12136_v35  ;;  %v12138_v39 = vpop.f32.mrb[25].mxu0  ;;  %v1176_v45 = vand.u32 2139095040, %v12136_v35  ;;  %v1173_v61 = vand.u32 2147483647, %v12136_v35 }
 0x1c8   :  { %19026 = vst [vmem:[#allocation4_spill] sm:$0xff] %v12138_v39  ;;  %v1072_v48 = vand.u32 2139095040, %v12138_v39  ;;  %v18731_v24 = vand.u32 2147483647, %v12138_v39 }
 0x1c9   :  { %v1177_v46 = vshrl.u32 %v1176_v45, 23  ;;  %v1180_v16 = vand.u32 8388607, %v1173_v61 }
 0x1ca   :  { %v12140_v40 = vpop.f32.mrb[26].mxu0  ;;  %v1073_v50 = vshrl.u32 %v1072_v48, 23 }
 0x1cb   :  { %19027 = vst [vmem:[#allocation5_spill] sm:$0xff] %v12140_v40  ;;  %v12142_v42 = vpop.f32.mrb[27].mxu0  ;;  %v10272_v47 = vadd.s32 4294967169, %v1177_v46  ;;  %v1384_v60 = vand.u32 2139095040, %v12140_v40  ;;  %v1181_v25 = vor.u32 8388608, %v1180_v16 }
 0x1cc   :  { %19028 = vst [vmem:[#allocation6_spill] sm:$0xff] %v12142_v42  ;;  %v10268_v53 = vadd.s32 4294967169, %v1073_v50 }
 0x1cd   :  { %v1183_v49 = vadd.s32 1, %v10272_v47  ;;  %v1385_v11 = vshrl.u32 %v1384_v60, 23 }
 0x1ce   :  { %v12144_v38 = vpop.f32.mrb[28].mxu0  ;;  %v1079_v55 = vadd.s32 1, %v10268_v53 }
 0x1cf   :  { %19029 = vst [vmem:[#allocation7_spill] sm:$0xff] %v12144_v38  ;;  %v12146_v43 = vpop.f32.mrb[29].mxu0  ;;  %vm1184_vm1 = vcmp.gt.s32.totalorder %v1183_v49, 0  ;;  %v10280_v26 = vadd.s32 4294967169, %v1385_v11 }
 0x1d0   :  { %19030 = vst [vmem:[#allocation8_spill] sm:$0xff] %v12146_v43  ;;  %v1185_v52 = vsel %vm1184_vm1, %v1183_v49, 0  ;;  %vm1080_vm2 = vcmp.gt.s32.totalorder %v1079_v55, 0 }
 0x1d1   :  { %v1187_v54 = vand.u32 31, %v1185_v52  ;;  %v1081_v59 = vsel %vm1080_vm2, %v1079_v55, 0  ;;  %v12164_v62 = vshrl.u32 %v1185_v52, 5  ;;  %v1391_v34 = vadd.s32 1, %v10280_v26 }
 0x1d2   :  { %v12148_v37 = vpop.f32.mrb[30].mxu0  ;;  %v1083_v8 = vand.u32 31, %v1081_v59  ;;  %v12200_v30 = vshrl.u32 %v1081_v59, 5  ;;  %v1221_v52 = vshll.u32 %v1181_v25, 8 }
 0x1d3   :  { %19031 = vst [vmem:[#allocation9_spill] sm:$0xff] %v12148_v37  ;;  %v12150_v41 = vpop.f32.mrb[31].mxu0  ;;  %v12158_v56 = vsub.s32 32, %v1187_v54  ;;  %v1199_v0 = vshll.u32 %v18732_v63, %v1187_v54  ;;  %v1202_v10 = vshll.u32 %v18727_v57, %v1187_v54  ;;  %v1190_v13 = vshll.u32 %v18736_v12, %v1187_v54 }
 0x1d4   :  { %19032 = vst [vmem:[#allocation10_spill] sm:$0xff] %v12150_v41  ;;  %v1193_v14 = vshll.u32 %v18725_v3, %v1187_v54  ;;  %v1196_v15 = vshll.u32 %v18729_v5, %v1187_v54  ;;  %vm1208_vm3 = vcmp.lt.s32.totalorder %v12164_v62, 4  ;;  %v12182_v21 = vsub.s32 32, %v1083_v8 }
 0x1d5   :  { %v1200_v58 = vshrl.u32 %v18727_v57, %v12158_v56  ;;  %v1203_v2 = vshrl.u32 %v18723_v1, %v12158_v56  ;;  %v1191_v4 = vshrl.u32 %v18725_v3, %v12158_v56  ;;  %v1194_v6 = vshrl.u32 %v18729_v5, %v12158_v56 }
 0x1d6   :  { %v12152_v44 = vpop.f32.mrb[32].mxu0  ;;  %v1197_v7 = vshrl.u32 %v18732_v63, %v12158_v56  ;;  %vm1205_vm4 = vcmp.lt.s32.totalorder %v12164_v62, 1  ;;  %vm1207_vm5 = vcmp.lt.s32.totalorder %v12164_v62, 3  ;;  %v1096_v31 = vshrl.u32 %v18727_v57, %v12182_v21 }
 0x1d7   :  { %19033 = vst [vmem:[#allocation11_spill] sm:$0xff] %v12152_v44  ;;  %v12156_v51 = vpop.f32.mrb[33].mxu0  ;;  %v1201_v9 = vor.u32 %v1200_v58, %v1199_v0  ;;  %v1204_v17 = vor.u32 %v1203_v2, %v1202_v10  ;;  %v1192_v18 = vor.u32 %v1191_v4, %v1190_v13  ;;  %v1195_v19 = vor.u32 %v1194_v6, %v1193_v14 }
 0x1d8   :  { %19034 = vst [vmem:[#allocation12_spill] sm:$0xff] %v12156_v51  ;;  %v1198_v20 = vor.u32 %v1197_v7, %v1196_v15  ;;  %vm1206_vm6 = vcmp.lt.s32.totalorder %v12164_v62, 2  ;;  %v1099_v32 = vshrl.u32 %v18723_v1, %v12182_v21  ;;  %v1087_v45 = vshrl.u32 %v18725_v3, %v12182_v21 }
 0x1d9   :  { %v1214_v22 = vsel %vm1208_vm3, %v1201_v9, 920167782  ;;  %v1218_v23 = vsel %vm1208_vm3, %v1204_v17, 1326507024  ;;  %v1213_v28 = vsel %vm1205_vm4, %v1192_v18, %v1195_v19  ;;  %v1095_v46 = vshll.u32 %v18732_v63, %v1083_v8 }
 0x1da   :  { %v12186_v27 = vpop.f32.mrb[34].mxu0  ;;  %v1215_v29 = vsel %vm1207_vm5, %v1198_v20, %v1214_v22  ;;  %v1217_v36 = vsel %vm1205_vm4, %v1195_v19, %v1198_v20  ;;  %v1219_v33 = vsel %vm1207_vm5, %v1201_v9, %v1218_v23  ;;  %v1090_v48 = vshrl.u32 %v18729_v5, %v12182_v21 }
 0x1db   :  { %19035 = vst [vmem:[#allocation13_spill] sm:$0xff] %v12186_v27  ;;  %v1216_v47 = vsel %vm1206_vm6, %v1213_v28, %v1215_v29  ;;  %v1093_v49 = vshrl.u32 %v18732_v63, %v12182_v21  ;;  %v1098_v50 = vshll.u32 %v18727_v57, %v1083_v8  ;;  %v1086_v53 = vshll.u32 %v18736_v12, %v1083_v8 }
 0x1dc   :  { %v1097_v54 = vor.u32 %v1096_v31, %v1095_v46  ;;  %v1220_v55 = vsel %vm1206_vm6, %v1217_v36, %v1219_v33  ;;  %v1089_v58 = vshll.u32 %v18725_v3, %v1083_v8  ;;  %v1092_v59 = vshll.u32 %v18729_v5, %v1083_v8  ;;  %v12272_v46 = vpop.f32.mrb[35].mxu0 }
 0x1dd   :  { %v1100_v60 = vor.u32 %v1099_v32, %v1098_v50  ;;  %v12223_v0 = vmul.u32.u64.low %v1221_v52, %v1216_v47  ;;  %v12224_v2 = vmul.u32.u64.high %v1221_v52, %v1216_v47, %v12223_v0  ;;  %v1076_v4 = vand.u32 8388607, %v18731_v24  ;;  %19036 = vst [vmem:[#allocation14_spill] sm:$0xff] %v12272_v46 }
 0x1de   :  { %vm1392_vm7 = vcmp.gt.s32.totalorder %v1391_v34, 0  ;;  %v1088_v6 = vor.u32 %v1087_v45, %v1086_v53  ;;  %v1091_v7 = vor.u32 %v1090_v48, %v1089_v58  ;;  %v1094_v9 = vor.u32 %v1093_v49, %v1092_v59 }
 0x1df   :  { %vm1104_vm8 = vcmp.lt.s32.totalorder %v12200_v30, 4  ;;  %v12230_v10 = vmul.u32.u64.low %v1221_v52, %v1220_v55  ;;  %v12231_v11 = vmul.u32.u64.high %v1221_v52, %v1220_v55, %v12230_v10  ;;  %v1393_v14 = vsel %vm1392_vm7, %v1391_v34, 0 }
 0x1e0   :  { %v1110_v8 = vsel %vm1104_vm8, %v1097_v54, 920167782  ;;  %v1114_v13 = vsel %vm1104_vm8, %v1100_v60, 1326507024  ;;  %vm1101_vm9 = vcmp.lt.s32.totalorder %v12200_v30, 1  ;;  %vm1103_vm10 = vcmp.lt.s32.totalorder %v12200_v30, 3 }
 0x1e1   :  { %v1210_v15 = vsel %vm1208_vm3, %v1198_v20, 2102212464  ;;  %v1077_v16 = vor.u32 8388608, %v1076_v4  ;;  %v1109_v17 = vsel %vm1101_vm9, %v1088_v6, %v1091_v7  ;;  %v1111_v22 = vsel %vm1103_vm10, %v1094_v9, %v1110_v8 }
 0x1e2   :  { %v1189_v26 = vshrl.u32 %v18736_v12, %v12158_v56  ;;  %v1113_v23 = vsel %vm1101_vm9, %v1091_v7, %v1094_v9  ;;  %v1115_v25 = vsel %vm1103_vm10, %v1097_v54, %v1114_v13  ;;  %v1395_v28 = vand.u32 31, %v1393_v14 }
 0x1e3   :  { %vm1102_vm11 = vcmp.lt.s32.totalorder %v12200_v30, 2  ;;  %v1211_v29 = vsel %vm1207_vm5, %v1195_v19, %v1210_v15  ;;  %v1231_v56 = vadd.s32 1, %v12224_v2  ;;  %v1117_v34 = vshll.u32 %v1077_v16, 8 }
 0x1e4   :  { %v1209_v20 = vsel %vm1205_vm4, %v1189_v26, %v1192_v18  ;;  %v1112_v31 = vsel %vm1102_vm11, %v1109_v17, %v1111_v22  ;;  %v1116_v32 = vsel %vm1102_vm11, %v1113_v23, %v1115_v25  ;;  %vm1230_vm12 = vc.u32 %v12231_v11, %v12223_v0 }
 0x1e5   :  { %v12263_v36 = vsub.s32 32, %v1395_v28  ;;  %v1280_v33 = vand.u32 2139095040, %v12142_v42  ;;  %v1212_v18 = vsel %vm1206_vm6, %v1209_v20, %v1211_v29  ;;  %v1232_v49 = vsel %vm1230_vm12, %v1231_v56, %v12224_v2 }
 0x1e6   :  { %v12268_v19 = vmul.u32.u64.low %v1117_v34, %v1112_v31  ;;  %v12269_v45 = vmul.u32.u64.high %v1117_v34, %v1112_v31, %v12268_v19  ;;  %v12274_v47 = vmul.u32.u64.low %v1117_v34, %v1116_v32  ;;  %v12275_v48 = vmul.u32.u64.high %v1117_v34, %v1116_v32, %v12274_v47 }
 0x1e7   :  { %v1085_v50 = vshrl.u32 %v18736_v12, %v12182_v21  ;;  %v1106_v53 = vsel %vm1104_vm8, %v1094_v9, 2102212464  ;;  %v18722_v62 = vand.u32 2147483647, %v12140_v40  ;;  %v1228_v54 = vmul.u32 %v1221_v52, %v1212_v18 }
 0x1e8   :  { %v1407_v55 = vshll.u32 %v18732_v63, %v1395_v28  ;;  %v1408_v58 = vshrl.u32 %v18727_v57, %v12263_v36  ;;  %v1281_v59 = vshrl.u32 %v1280_v33, 23  ;;  %v12288_v4 = vshrl.u32 %v1393_v14, 5 }
 0x1e9   :  { %v1105_v60 = vsel %vm1101_vm9, %v1085_v50, %v1088_v6  ;;  %v1410_v2 = vshll.u32 %v18727_v57, %v1395_v28  ;;  %v1411_v21 = vshrl.u32 %v18723_v1, %v12263_v36  ;;  %v1233_v9 = vadd.s32 %v1232_v49, %v1228_v54 }
 0x1ea   :  { %v1107_v52 = vsel %vm1103_vm10, %v1091_v7, %v1106_v53  ;;  %v1398_v10 = vshll.u32 %v18736_v12, %v1395_v28  ;;  %v1401_v8 = vshll.u32 %v18725_v3, %v1395_v28  ;;  %v1399_v13 = vshrl.u32 %v18725_v3, %v12263_v36 }
 0x1eb   :  { %v1402_v6 = vshrl.u32 %v18729_v5, %v12263_v36  ;;  %v1404_v14 = vshll.u32 %v18729_v5, %v1395_v28  ;;  %v1405_v15 = vshrl.u32 %v18732_v63, %v12263_v36  ;;  %v1409_v16 = vor.u32 %v1408_v58, %v1407_v55 }
 0x1ec   :  { %v1127_v17 = vadd.s32 1, %v12269_v45  ;;  %v1412_v22 = vor.u32 %v1411_v21, %v1410_v2  ;;  %vm1416_vm13 = vcmp.lt.s32.totalorder %v12288_v4, 4  ;;  %v10276_v7 = vadd.s32 4294967169, %v1281_v59 }
 0x1ed   :  { %v1108_v26 = vsel %vm1102_vm11, %v1105_v60, %v1107_v52  ;;  %vm1126_vm14 = vc.u32 %v12275_v48, %v12268_v19  ;;  %v1388_v23 = vand.u32 8388607, %v18722_v62  ;;  %v1234_v25 = vadd.s32 536870912, %v1233_v9 }
 0x1ee   :  { %v1400_v28 = vor.u32 %v1399_v13, %v1398_v10  ;;  %v1403_v20 = vor.u32 %v1402_v6, %v1401_v8  ;;  %v1406_v29 = vor.u32 %v1405_v15, %v1404_v14  ;;  %vm1413_vm15 = vcmp.lt.s32.totalorder %v12288_v4, 1 }
 0x1ef   :  { %v1422_v31 = vsel %vm1416_vm13, %v1409_v16, 920167782  ;;  %v1128_v56 = vsel %vm1126_vm14, %v1127_v17, %v12269_v45  ;;  %v1426_v30 = vsel %vm1416_vm13, %v1412_v22, 1326507024  ;;  %v1287_v32 = vadd.s32 1, %v10276_v7 }
 0x1f0   :  { %v1124_v33 = vmul.u32 %v1117_v34, %v1108_v26  ;;  %vm1415_vm1 = vcmp.lt.s32.totalorder %v12288_v4, 3  ;;  %v12319_v18 = vshrl.u32 %v1234_v25, 30  ;;  %v1389_v47 = vor.u32 8388608, %v1388_v23 }
 0x1f1   :  { %v1421_v49 = vsel %vm1413_vm15, %v1400_v28, %v1403_v20  ;;  %v1423_v50 = vsel %vm1415_vm1, %v1406_v29, %v1422_v31  ;;  %v1425_v45 = vsel %vm1413_vm15, %v1403_v20, %v1406_v29  ;;  %v1427_v54 = vsel %vm1415_vm1, %v1409_v16, %v1426_v30  ;;  %v12348_v16 = vpop.f32.mrb[36].mxu0 }
 0x1f2   :  { %19037 = vst [vmem:[#allocation15_spill] sm:$0xff] %v12319_v18  ;;  %v1129_v53 = vadd.s32 %v1128_v56, %v1124_v33  ;;  %vm1414_vm2 = vcmp.lt.s32.totalorder %v12288_v4, 2  ;;  %vm1288_vm3 = vcmp.gt.s32.totalorder %v1287_v32, 0  ;;  %v1236_v55 = vshll.u32 %v12319_v18, 30  ;;  %19038 = vst [vmem:[#allocation16_spill] sm:$0xff] %v12348_v16 }
 0x1f3   :  { %v1424_v34 = vsel %vm1414_vm2, %v1421_v49, %v1423_v50  ;;  %v1428_v58 = vsel %vm1414_vm2, %v1425_v45, %v1427_v54  ;;  %v1429_v59 = vshll.u32 %v1389_v47, 8  ;;  %v1289_v2 = vsel %vm1288_vm3, %v1287_v32, 0 }
 0x1f4   :  { %v1130_v60 = vadd.s32 536870912, %v1129_v53  ;;  %v12342_v13 = vsub.s32 %v1233_v9, %v1236_v55  ;;  %v1291_v6 = vand.u32 31, %v1289_v2  ;;  %v1397_v15 = vshrl.u32 %v18736_v12, %v12263_v36 }
 0x1f5   :  { %v12335_v21 = vmul.u32.u64.low %v1429_v59, %v1424_v34  ;;  %v12336_v52 = vmul.u32.u64.high %v1429_v59, %v1424_v34, %v12335_v21  ;;  %v12339_v10 = vmul.u32.u64.low %v1429_v59, %v1428_v58  ;;  %v12340_v8 = vmul.u32.u64.high %v1429_v59, %v1428_v58, %v12339_v10 }
 0x1f6   :  { %v12344_v14 = vshrl.u32 %v1130_v60, 30  ;;  %v1418_v17 = vsel %vm1416_vm13, %v1406_v29, 2102212464  ;;  %v1239_v22 = vsub.s32 0, %v12342_v13  ;;  %v12353_v7 = vsub.s32 32, %v1291_v6 }
 0x1f7   :  { %v1417_v9 = vsel %vm1413_vm15, %v1397_v15, %v1400_v28  ;;  %v1419_v23 = vsel %vm1415_vm1, %v1403_v20, %v1418_v17  ;;  %v1592_v25 = vand.u32 2139095040, %v12144_v38  ;;  %v1439_v36 = vadd.s32 1, %v12336_v52 }
 0x1f8   :  { %v1132_v26 = vshll.u32 %v12344_v14, 30  ;;  %vm1438_vm4 = vc.u32 %v12340_v8, %v12335_v21  ;;  %v18721_v29 = vand.u32 2147483647, %v12142_v42  ;;  %v10273_v31 = vmin.u32 %v1239_v22, %v12342_v13 }
 0x1f9   :  { %v1420_v56 = vsel %vm1414_vm2, %v1417_v9, %v1419_v23  ;;  %v1303_v30 = vshll.u32 %v18732_v63, %v1291_v6  ;;  %v1304_v28 = vshrl.u32 %v18727_v57, %v12353_v7  ;;  %v1306_v32 = vshll.u32 %v18727_v57, %v1291_v6 }
 0x1fa   :  { %v12371_v20 = vsub.s32 %v1129_v53, %v1132_v26  ;;  %v1307_v33 = vshrl.u32 %v18723_v1, %v12353_v7  ;;  %v1593_v47 = vshrl.u32 %v1592_v25, 23  ;;  %v1440_v49 = vsel %vm1438_vm4, %v1439_v36, %v12336_v52 }
 0x1fb   :  { %v12377_v50 = vshrl.u32 %v1289_v2, 5  ;;  %v1294_v4 = vshll.u32 %v18736_v12, %v1291_v6  ;;  %v1297_v45 = vshll.u32 %v18725_v3, %v1291_v6  ;;  %v1295_v54 = vshrl.u32 %v18725_v3, %v12353_v7 }
 0x1fc   :  { %v1298_v53 = vshrl.u32 %v18729_v5, %v12353_v7  ;;  %v1300_v34 = vshll.u32 %v18729_v5, %v1291_v6  ;;  %v1301_v55 = vshrl.u32 %v18732_v63, %v12353_v7  ;;  %v1241_v58 = vclz %v10273_v31 }
 0x1fd   :  { %v1436_v60 = vmul.u32 %v1429_v59, %v1420_v56  ;;  %v1305_v52 = vor.u32 %v1304_v28, %v1303_v30  ;;  %v1135_v2 = vsub.s32 0, %v12371_v20  ;;  %v1308_v10 = vor.u32 %v1307_v33, %v1306_v32 }
 0x1fe   :  { %v10288_v15 = vadd.s32 4294967169, %v1593_v47  ;;  %v1284_v22 = vand.u32 8388607, %v18721_v29  ;;  %v1296_v26 = vor.u32 %v1295_v54, %v1294_v4  ;;  %v1299_v9 = vor.u32 %v1298_v53, %v1297_v45  ;;  %v12410_v45 = vpop.f32.mrb[37].mxu0 }
 0x1ff   :  { %v1441_v17 = vadd.s32 %v1440_v49, %v1436_v60  ;;  %v1302_v23 = vor.u32 %v1301_v55, %v1300_v34  ;;  %vm1312_vm5 = vcmp.lt.s32.totalorder %v12377_v50, 4  ;;  %v10274_v6 = vadd.s32 4294967294, %v1241_v58  ;;  %19039 = vst [vmem:[#allocation17_spill] sm:$0xff] %v12410_v45 }
 0x200   :  { %v1318_v25 = vsel %vm1312_vm5, %v1305_v52, 920167782  ;;  %v10269_v59 = vmin.u32 %v1135_v2, %v12371_v20  ;;  %v1322_v36 = vsel %vm1312_vm5, %v1308_v10, 1326507024  ;;  %v1599_v31 = vadd.s32 1, %v10288_v15 }
 0x201   :  { %vm1309_vm6 = vcmp.lt.s32.totalorder %v12377_v50, 1  ;;  %vm1311_vm7 = vcmp.lt.s32.totalorder %v12377_v50, 3  ;;  %v1442_v56 = vadd.s32 536870912, %v1441_v17  ;;  %v1285_v30 = vor.u32 8388608, %v1284_v22 }
 0x202   :  { %v1317_v28 = vsel %vm1309_vm6, %v1296_v26, %v1299_v9  ;;  %v1319_v32 = vsel %vm1311_vm7, %v1302_v23, %v1318_v25  ;;  %vm10275_vm8 = vcmp.lt.s32.totalorder %v10274_v6, 0  ;;  %v1321_v33 = vsel %vm1309_vm6, %v1299_v9, %v1302_v23 }
 0x203   :  { %v1323_v47 = vsel %vm1311_vm7, %v1305_v52, %v1322_v36  ;;  %v1137_v49 = vclz %v10269_v59  ;;  %vm1310_vm9 = vcmp.lt.s32.totalorder %v12377_v50, 2  ;;  %vm1600_vm10 = vcmp.gt.s32.totalorder %v1599_v31, 0 }
 0x204   :  { %v1320_v4 = vsel %vm1310_vm9, %v1317_v28, %v1319_v32  ;;  %v1244_v54 = vsel %vm10275_vm8, 0, %v10274_v6  ;;  %v12412_v53 = vshrl.u32 %v1442_v56, 30  ;;  %v1324_v34 = vsel %vm1310_vm9, %v1321_v33, %v1323_v47 }
 0x205   :  { %v1325_v55 = vshll.u32 %v1285_v30, 8  ;;  %v1601_v58 = vsel %vm1600_vm10, %v1599_v31, 0  ;;  %v10270_v60 = vadd.s32 4294967294, %v1137_v49  ;;  %v1249_v10 = vsub.s32 4294967266, %v1244_v54 }
 0x206   :  { %v1293_v15 = vshrl.u32 %v18736_v12, %v12353_v7  ;;  %v1444_v6 = vshll.u32 %v12412_v53, 30  ;;  %v1314_v59 = vsel %vm1312_vm5, %v1302_v23, 2102212464  ;;  %v1603_v36 = vand.u32 31, %v1601_v58 }
 0x207   :  { %v12416_v2 = vmul.u32.u64.low %v1325_v55, %v1320_v4  ;;  %v12417_v52 = vmul.u32.u64.high %v1325_v55, %v1320_v4, %v12416_v2  ;;  %v12422_v22 = vmul.u32.u64.low %v1325_v55, %v1324_v34  ;;  %v12423_v25 = vmul.u32.u64.high %v1325_v55, %v1324_v34, %v12422_v22 }
 0x208   :  { %vm10271_vm11 = vcmp.lt.s32.totalorder %v10270_v60, 0  ;;  %v1245_v31 = vsub.s32 32, %v1244_v54  ;;  %v1250_v56 = vadd.s32 127, %v1249_v10  ;;  %v1313_v30 = vsel %vm1309_vm6, %v1293_v15, %v1296_v26 }
 0x209   :  { %v1315_v28 = vsel %vm1311_vm7, %v1299_v9, %v1314_v59  ;;  %v12432_v32 = vsub.s32 %v1441_v17, %v1444_v6  ;;  %v12434_v7 = vsub.s32 32, %v1603_v36  ;;  %v1229_v33 = vadd.s32 %v12223_v0, %v12231_v11 }
 0x20a   :  { %v12438_v47 = vsel %vm10271_vm11, 0, %v10270_v60  ;;  %v1316_v23 = vsel %vm1310_vm9, %v1313_v30, %v1315_v28  ;;  %v1335_v49 = vadd.s32 1, %v12417_v52  ;;  %v1251_v34 = vshll.u32 %v1250_v56, 23 }
 0x20b   :  { %v1247_v4 = vshrl.u32 %v1229_v33, %v1245_v31  ;;  %vm1334_vm12 = vc.u32 %v12423_v25, %v12416_v2  ;;  %v18735_v17 = vand.u32 2147483647, %v12144_v38  ;;  %v1145_v26 = vsub.s32 4294967266, %v12438_v47 }
 0x20c   :  { %v1447_v9 = vsub.s32 0, %v12432_v32  ;;  %v1615_v0 = vshll.u32 %v18732_v63, %v1603_v36  ;;  %v1616_v11 = vshrl.u32 %v18727_v57, %v12434_v7  ;;  %v1332_v50 = vmul.u32 %v1325_v55, %v1316_v23 }
 0x20d   :  { %v12451_v60 = vshrl.u32 %v1601_v58, 5  ;;  %v1618_v10 = vshll.u32 %v18727_v57, %v1603_v36  ;;  %v1619_v15 = vshrl.u32 %v18723_v1, %v12434_v7  ;;  %v1336_v22 = vsel %vm1334_vm12, %v1335_v49, %v12417_v52 }
 0x20e   :  { %v1606_v6 = vshll.u32 %v18736_v12, %v1603_v36  ;;  %v1609_v59 = vshll.u32 %v18725_v3, %v1603_v36  ;;  %v1488_v31 = vand.u32 2139095040, %v12146_v43  ;;  %v1607_v56 = vshrl.u32 %v18725_v3, %v12434_v7 }
 0x20f   :  { %v1610_v55 = vshrl.u32 %v18729_v5, %v12434_v7  ;;  %v1612_v58 = vshll.u32 %v18729_v5, %v1603_v36  ;;  %v1613_v30 = vshrl.u32 %v18732_v63, %v12434_v7  ;;  %v1246_v28 = vshll.u32 %v12342_v13, %v1244_v54 }
 0x210   :  { %v10281_v52 = vmin.u32 %v1447_v9, %v12432_v32  ;;  %v1617_v33 = vor.u32 %v1616_v11, %v1615_v0  ;;  %v1337_v23 = vadd.s32 %v1336_v22, %v1332_v50  ;;  %v1596_v49 = vand.u32 8388607, %v18735_v17 }
 0x211   :  { %v1620_v29 = vor.u32 %v1619_v15, %v1618_v10  ;;  %vm1624_vm13 = vcmp.lt.s32.totalorder %v12451_v60, 4  ;;  %v1248_v62 = vor.u32 %v1247_v4, %v1246_v28  ;;  %v1146_v1 = vadd.s32 127, %v1145_v26 }
 0x212   :  { %v1489_v3 = vshrl.u32 %v1488_v31, 23  ;;  %v1252_v57 = vor.u32 4788187, %v1251_v34  ;;  %v1608_v36 = vor.u32 %v1607_v56, %v1606_v6  ;;  %v1611_v5 = vor.u32 %v1610_v55, %v1609_v59 }
 0x213   :  { %v1614_v24 = vor.u32 %v1613_v30, %v1612_v58  ;;  %v1141_v63 = vsub.s32 32, %v12438_v47  ;;  %vm1621_vm14 = vcmp.lt.s32.totalorder %v12451_v60, 1  ;;  %vm1623_vm15 = vcmp.lt.s32.totalorder %v12451_v60, 3 }
 0x214   :  { %v1630_v13 = vsel %vm1624_vm13, %v1617_v33, 920167782  ;;  %v1449_v54 = vclz %v10281_v52  ;;  %v1338_v9 = vadd.s32 536870912, %v1337_v23  ;;  %v1597_v0 = vor.u32 8388608, %v1596_v49  ;;  %v12511_v49 = vpop.f32.mrb[38].mxu0 }
 0x215   :  { %v1634_v4 = vsel %vm1624_vm13, %v1620_v29, 1326507024  ;;  %v1125_v34 = vadd.s32 %v12268_v19, %v12275_v48  ;;  %v1147_v26 = vshll.u32 %v1146_v1, 23  ;;  %v10284_v11 = vadd.s32 4294967169, %v1489_v3  ;;  %19040 = vst [vmem:[#allocation18_spill] sm:$0xff] %v12511_v49 }
 0x216   :  { %v1253_v50 = vand.u32 2147483647, %v1252_v57  ;;  %vm1622_vm1 = vcmp.lt.s32.totalorder %v12451_v60, 2  ;;  %v1629_v10 = vsel %vm1621_vm14, %v1608_v36, %v1611_v5  ;;  %v1631_v15 = vsel %vm1623_vm15, %v1614_v24, %v1630_v13 }
 0x217   :  { %v1143_v22 = vshrl.u32 %v1125_v34, %v1141_v63  ;;  %v1633_v6 = vsel %vm1621_vm14, %v1611_v5, %v1614_v24  ;;  %v1635_v29 = vsel %vm1623_vm15, %v1617_v33, %v1634_v4  ;;  %v1255_v59 = vcvt.s32.f32 %v1248_v62 }
 0x218   :  { %v10282_v19 = vadd.s32 4294967294, %v1449_v54  ;;  %v12490_v1 = vshrl.u32 %v1338_v9, 30  ;;  %v12492_v57 = vshll.u32 %v1597_v0, 8  ;;  %v1142_v3 = vshll.u32 %v12371_v20, %v12438_v47 }
 0x219   :  { %v1148_v48 = vor.u32 4788187, %v1147_v26  ;;  %v1632_v31 = vsel %vm1622_vm1, %v1629_v10, %v1631_v15  ;;  %v1495_v63 = vadd.s32 1, %v10284_v11  ;;  %v1256_v56 = vmul.f32 %v1255_v59, %v1253_v50 }
 0x21a   :  { %v1636_v55 = vsel %vm1622_vm1, %v1633_v6, %v1635_v29  ;;  %v1800_v58 = vand.u32 2139095040, %v12148_v37  ;;  %v1144_v62 = vor.u32 %v1143_v22, %v1142_v3  ;;  %vm10283_vm2 = vcmp.lt.s32.totalorder %v10282_v19, 0 }
 0x21b   :  { %v1340_v30 = vshll.u32 %v12490_v1, 30  ;;  %v12503_v28 = vmul.u32.u64.low %v12492_v57, %v1632_v31  ;;  %v12504_v52 = vmul.u32.u64.high %v12492_v57, %v1632_v31, %v12503_v28  ;;  %v1149_v20 = vand.u32 2147483647, %v1148_v48 }
 0x21c   :  { %v12508_v47 = vmul.u32.u64.low %v12492_v57, %v1636_v55  ;;  %v12509_v33 = vmul.u32.u64.high %v12492_v57, %v1636_v55, %v12508_v47  ;;  %vm1496_vm3 = vcmp.gt.s32.totalorder %v1495_v63, 0  ;;  %v1257_v13 = vxor.u32 2147483648, %v1256_v56 }
 0x21d   :  { %v1801_v54 = vshrl.u32 %v1800_v58, 23  ;;  %v1151_v9 = vcvt.s32.f32 %v1144_v62  ;;  %v12513_v0 = vsel %vm10283_vm2, 0, %v10282_v19  ;;  %v1605_v4 = vshrl.u32 %v18736_v12, %v12434_v7 }
 0x21e   :  { %v12517_v34 = vsub.s32 %v1337_v23, %v1340_v30  ;;  %v1626_v26 = vsel %vm1624_vm13, %v1614_v24, 2102212464  ;;  %v1497_v11 = vsel %vm1496_vm3, %v1495_v63, 0  ;;  %vm18792_vm4 = vcmp.lt.s32.totalorder %v12136_v35, 0 }
 0x21f   :  { %v1152_v50 = vmul.f32 %v1151_v9, %v1149_v20  ;;  %v1258_v10 = vsel %vm18792_vm4, %v1257_v13, %v1256_v56  ;;  %v1457_v15 = vsub.s32 4294967266, %v12513_v0  ;;  %v10296_v22 = vadd.s32 4294967169, %v1801_v54 }
 0x220   :  { %v1625_v6 = vsel %vm1621_vm14, %v1605_v4, %v1608_v36  ;;  %v1627_v7 = vsel %vm1623_vm15, %v1611_v5, %v1626_v26  ;;  %v1499_v23 = vand.u32 31, %v1497_v11  ;;  %vm12531_vm5 = vcmp.le.f32.partialorder %v1173_v61, 0.7853982  ;;  %v12544_v61 = vpop.f32.mrb[39].mxu0 }
 0x221   :  { %v19041_v24 = vmov 0  ;;  %v1155_v29 = vsub.s32 4, %v12344_v14  ;;  %v1343_v59 = vsub.s32 0, %v12517_v34  ;;  %v1647_v19 = vadd.s32 1, %v12504_v52  ;;  %19044 = vst [vmem:[#allocation20_spill] sm:$0xff] %v12544_v61  ;;  %v12678_v49 = vpop.f32.mrb[40].mxu0 }
 0x222   :  { %v19042_v24 = vsel %vm12531_vm5, 4294967295, %v19041_v24  ;;  %v1261_v36 = vsel %vm12531_vm5, %v12136_v35, %v1258_v10  ;;  %v1153_v3 = vxor.u32 2147483648, %v1152_v50  ;;  %v1453_v5 = vsub.s32 32, %v12513_v0  ;;  %19058 = vst [vmem:[#allocation25_spill] sm:$0xff] %v12678_v49 }
 0x223   :  { %19043 = vst [vmem:[#allocation19_spill] sm:$0xff] %v19042_v24  ;;  %vm1646_vm6 = vc.u32 %v12509_v33, %v12503_v28  ;;  %v1458_v48 = vadd.s32 127, %v1457_v15  ;;  %v1628_v31 = vsel %vm1622_vm1, %v1625_v6, %v1627_v7  ;;  %v1807_v63 = vadd.s32 1, %v10296_v22 }
 0x224   :  { %v1696_v56 = vand.u32 2139095040, %v12150_v41  ;;  %v19045_v55 = vand.u32 2147483647, %v12138_v39  ;;  %v19046_v58 = vmov 0  ;;  %vm1071_vm8 = vcmp.lt.s32.totalorder %v12138_v39, 0 }
 0x225   :  { %v18734_v62 = vand.u32 2147483647, %v12146_v43  ;;  %v12557_v30 = vsub.s32 32, %v1499_v23  ;;  %v12560_v20 = vsel %vm1071_vm8, %v1155_v29, %v12344_v14  ;;  %v1437_v60 = vadd.s32 %v12335_v21, %v12340_v8 }
 0x226   :  { %vm12551_vm7 = vcmp.le.f32.partialorder %v19045_v55, 0.7853982  ;;  %19049 = vst [vmem:[#allocation22_spill] sm:$0xff] %v12560_v20  ;;  %v10277_v47 = vmin.u32 %v1343_v59, %v12517_v34  ;;  %v1648_v13 = vsel %vm1646_vm6, %v1647_v19, %v12504_v52  ;;  %11530 = vcosq.f32 %v1261_v36 }
 0x227   :  { %v19047_v58 = vsel %vm12551_vm7, 4294967295, %v19046_v58  ;;  %v1154_v54 = vsel %vm1071_vm8, %v1153_v3, %v1152_v50  ;;  %v1454_v9 = vshll.u32 %v12432_v32, %v12513_v0  ;;  %v1644_v4 = vmul.u32 %v12492_v57, %v1628_v31 }
 0x228   :  { %19048 = vst [vmem:[#allocation21_spill] sm:$0xff] %v19047_v58  ;;  %v1455_v26 = vshrl.u32 %v1437_v60, %v1453_v5  ;;  %v1459_v10 = vshll.u32 %v1458_v48, 23  ;;  %vm1808_vm9 = vcmp.gt.s32.totalorder %v1807_v63, 0  ;;  %v1697_v15 = vshrl.u32 %v1696_v56, 23 }
 0x229   :  { %v12569_v14 = vadd.s32 %v1648_v13, %v1644_v4  ;;  %v1492_v21 = vand.u32 8388607, %v18734_v62  ;;  %v19050_v8 = vmov 2102212464   ;;  %v19051_v52 = vmov 920167782  }
 0x22a   :  { %v1511_v22 = vshll.u32 %v19050_v8, %v1499_v23  ;;  %v1512_v6 = vshrl.u32 %v19051_v52, %v12557_v30  ;;  %v1345_v50 = vclz %v10277_v47  ;;  %v12576_v7 = vshrl.u32 %v1497_v11, 5 }
 0x22b   :  { %v1502_v32 = vshll.u32 %v18736_v12, %v1499_v23  ;;  %v19052_v57 = vmov 2475754826   ;;  %v19053_v59 = vmov 2131351028   ;;  %v1809_v5 = vsel %vm1808_vm9, %v1807_v63, 0 }
 0x22c   :  { %v1505_v0 = vshll.u32 %v19052_v57, %v1499_v23  ;;  %v1503_v29 = vshrl.u32 %v19052_v57, %v12557_v30  ;;  %v1506_v19 = vshrl.u32 %v19053_v59, %v12557_v30  ;;  %v1508_v3 = vshll.u32 %v19053_v59, %v1499_v23 }
 0x22d   :  { %v1509_v48 = vshrl.u32 %v19050_v8, %v12557_v30  ;;  %v1514_v31 = vshll.u32 %v19051_v52, %v1499_v23  ;;  %v19054_v11 = vmov 1326507024   ;;  %v10292_v55 = vadd.s32 4294967169, %v1697_v15 }
 0x22e   :  { %v1515_v56 = vshrl.u32 %v19054_v11, %v12557_v30  ;;  %11532 = vsinq.f32 %v1261_v36  ;;  %v12593_v60 = vsel %vm12551_vm7, %v12138_v39, %v1154_v54  ;;  %v1650_v47 = vadd.s32 536870912, %v12569_v14 }
 0x22f   :  { %v1513_v13 = vor.u32 %v1512_v6, %v1511_v22  ;;  %v12596_v4 = vor.u32 %v1455_v26, %v1454_v9  ;;  %v10278_v63 = vadd.s32 4294967294, %v1345_v50  ;;  %vm1520_vm10 = vcmp.lt.s32.totalorder %v12576_v7, 4 }
 0x230   :  { %v1811_v62 = vand.u32 31, %v1809_v5  ;;  %v12599_v23 = vor.u32 4788187, %v1459_v10  ;;  %v1493_v17 = vor.u32 8388608, %v1492_v21  ;;  %v12601_v12 = vor.u32 %v1503_v29, %v1502_v32  ;;  %v12608_v22 = vpop.eup %11530 }
 0x231   :  { %v18740_v36 = vand.u32 2147483647, %v12148_v37  ;;  %v12604_v15 = vor.u32 %v1506_v19, %v1505_v0  ;;  %v12606_v54 = vor.u32 %v1509_v48, %v1508_v3  ;;  %v1516_v39 = vor.u32 %v1515_v56, %v1514_v31  ;;  %19055 = vst [vmem:[#allocation23_spill] sm:$0xff] %v12608_v22  ;;  %v12694_v37 = vpop.f32.mrb[41].mxu0 }
 0x232   :  { %v1703_v58 = vadd.s32 1, %v10292_v55  ;;  %v12610_v9 = vshrl.u32 %v1650_v47, 30  ;;  %vm1517_vm11 = vcmp.lt.s32.totalorder %v12576_v7, 1  ;;  %vm1519_vm12 = vcmp.lt.s32.totalorder %v12576_v7, 3  ;;  %19061 = vst [vmem:[#allocation28_spill] sm:$0xff] %v12694_v37 }
 0x233   :  { %v1526_v26 = vsel %vm1520_vm10, %v1513_v13, 920167782  ;;  %11534 = vcosq.f32 %v12593_v60  ;;  %vm10279_vm13 = vcmp.lt.s32.totalorder %v10278_v63, 0  ;;  %v12618_v21 = vsub.s32 32, %v1811_v62 }
 0x234   :  { %v12624_v32 = vadd.s32 %v12416_v2, %v12423_v25  ;;  %vm1518_vm14 = vcmp.lt.s32.totalorder %v12576_v7, 2  ;;  %v1525_v0 = vsel %vm1517_vm11, %v12601_v12, %v12604_v15  ;;  %v1527_v29 = vsel %vm1519_vm12, %v12606_v54, %v1526_v26 }
 0x235   :  { %v1530_v19 = vsel %vm1520_vm10, %v1516_v39, 1326507024  ;;  %vm1704_vm15 = vcmp.gt.s32.totalorder %v1703_v58, 0  ;;  %v12636_v3 = vsel %vm10279_vm13, 0, %v10278_v63  ;;  %v1652_v2 = vshll.u32 %v12610_v9, 30 }
 0x236   :  { %v12639_v25 = vshll.u32 %v1493_v17, 8  ;;  %v1804_v48 = vand.u32 8388607, %v18740_v36  ;;  %v1529_v31 = vsel %vm1517_vm11, %v12604_v15, %v12606_v54  ;;  %v1823_v56 = vshll.u32 %v19050_v8, %v1811_v62 }
 0x237   :  { %v1824_v39 = vshrl.u32 %v19051_v52, %v12618_v21  ;;  %v2008_v55 = vand.u32 2139095040, %v12152_v44  ;;  %v1528_v17 = vsel %vm1518_vm14, %v1525_v0, %v1527_v29  ;;  %v1531_v63 = vsel %vm1519_vm12, %v1513_v13, %v1530_v19 }
 0x238   :  { %v12651_v47 = vpop.eup %11532  ;;  %v12657_v26 = vshrl.u32 %v1809_v5, 5  ;;  %v1705_v36 = vsel %vm1704_vm15, %v1703_v58, 0  ;;  %v19057_v10 = vmov 683565275   ;;  %v1815_v6 = vshrl.u32 %v19052_v57, %v12618_v21 }
 0x239   :  { %19056 = vst [vmem:[#allocation24_spill] sm:$0xff] %v12651_v47  ;;  %v1814_v50 = vshll.u32 %v19057_v10, %v1811_v62  ;;  %v1817_v20 = vshll.u32 %v19052_v57, %v1811_v62  ;;  %v1818_v22 = vshrl.u32 %v19053_v59, %v12618_v21  ;;  %v1820_v47 = vshll.u32 %v19053_v59, %v1811_v62 }
 0x23a   :  { %v1821_v0 = vshrl.u32 %v19050_v8, %v12618_v21  ;;  %v1826_v13 = vshll.u32 %v19051_v52, %v1811_v62  ;;  %v1827_v58 = vshrl.u32 %v19054_v11, %v12618_v21  ;;  %v1805_v5 = vor.u32 8388608, %v1804_v48 }
 0x23b   :  { %v1825_v29 = vor.u32 %v1824_v39, %v1823_v56  ;;  %v1707_v19 = vand.u32 31, %v1705_v36  ;;  %v2009_v24 = vshrl.u32 %v2008_v55, 23  ;;  %v1353_v35 = vsub.s32 4294967266, %v12636_v3 }
 0x23c   :  { %v12673_v18 = vsub.s32 %v12569_v14, %v1652_v2  ;;  %v1501_v61 = vshrl.u32 %v19057_v10, %v12557_v30  ;;  %vm1832_vm1 = vcmp.lt.s32.totalorder %v12657_v26, 4  ;;  %v1532_v48 = vsel %vm1518_vm14, %v1529_v31, %v1531_v63 }
 0x23d   :  { %v12680_v62 = vpop.eup %11534  ;;  %v12685_v56 = vmul.u32.u64.low %v12639_v25, %v1528_v17  ;;  %v12686_v39 = vmul.u32.u64.high %v12639_v25, %v1528_v17, %v12685_v56  ;;  %vm1829_vm2 = vcmp.lt.s32.totalorder %v12657_v26, 1  ;;  %v12690_v14 = vor.u32 %v1815_v6, %v1814_v50 }
 0x23e   :  { %19059 = vst [vmem:[#allocation26_spill] sm:$0xff] %v12680_v62  ;;  %v12692_v2 = vor.u32 %v1818_v22, %v1817_v20  ;;  %v1822_v30 = vor.u32 %v1821_v0, %v1820_v47  ;;  %v1828_v55 = vor.u32 %v1827_v58, %v1826_v13  ;;  %vm1831_vm3 = vcmp.lt.s32.totalorder %v12657_v26, 3 }
 0x23f   :  { %19060 = vst [vmem:[#allocation27_spill] sm:$0xff] %v12685_v56  ;;  %v1838_v31 = vsel %vm1832_vm1, %v1825_v29, 920167782  ;;  %v12699_v63 = vsub.s32 32, %v1707_v19  ;;  %v10304_v17 = vadd.s32 4294967169, %v2009_v24  ;;  %v12709_v50 = vadd.s32 127, %v1353_v35 }
 0x240   :  { %v1522_v62 = vsel %vm1520_vm10, %v12606_v54, 2102212464  ;;  %v12705_v6 = vmul.u32.u64.low %v12639_v25, %v1532_v48  ;;  %v12706_v20 = vmul.u32.u64.high %v12639_v25, %v1532_v48, %v12705_v6  ;;  %v1655_v47 = vsub.s32 0, %v12673_v18 }
 0x241   :  { %v1521_v0 = vsel %vm1517_vm11, %v1501_v61, %v12601_v12  ;;  %v12715_v13 = vshll.u32 %v1805_v5, 8  ;;  %vm1830_vm6 = vcmp.lt.s32.totalorder %v12657_v26, 2  ;;  %v1837_v24 = vsel %vm1829_vm2, %v12690_v14, %v12692_v2 }
 0x242   :  { %19062 = vst [vmem:[#allocation29_spill] sm:$0xff] %v12706_v20  ;;  %v1839_v54 = vsel %vm1831_vm3, %v1822_v30, %v1838_v31  ;;  %v1842_v35 = vsel %vm1832_vm1, %v1828_v55, 1326507024  ;;  %v1523_v58 = vsel %vm1519_vm12, %v12604_v15, %v1522_v62  ;;  %v1719_v12 = vshll.u32 %v19050_v8, %v1707_v19 }
 0x243   :  { %v1720_v61 = vshrl.u32 %v19051_v52, %v12699_v63  ;;  %v2015_v5 = vadd.s32 1, %v10304_v17  ;;  %v1841_v48 = vsel %vm1829_vm2, %v12692_v2, %v1822_v30  ;;  %v12735_v6 = vshrl.u32 %v1705_v36, 5 }
 0x244   :  { %v1722_v31 = vshll.u32 %v19051_v52, %v1707_v19  ;;  %v1723_v55 = vshrl.u32 %v19054_v11, %v12699_v63  ;;  %v1840_v15 = vsel %vm1830_vm6, %v1837_v24, %v1839_v54  ;;  %v1843_v62 = vsel %vm1831_vm3, %v1825_v29, %v1842_v35 }
 0x245   :  { %v1710_v22 = vshll.u32 %v19057_v10, %v1707_v19  ;;  %v1713_v17 = vshll.u32 %v19052_v57, %v1707_v19  ;;  %v1711_v37 = vshrl.u32 %v19052_v57, %v12699_v63  ;;  %v1714_v36 = vshrl.u32 %v19053_v59, %v12699_v63 }
 0x246   :  { %v1716_v49 = vshll.u32 %v19053_v59, %v1707_v19  ;;  %v1717_v45 = vshrl.u32 %v19050_v8, %v12699_v63  ;;  %v1524_v24 = vsel %vm1518_vm14, %v1521_v0, %v1523_v58  ;;  %v1543_v29 = vadd.s32 1, %v12686_v39 }
 0x247   :  { %v1721_v54 = vor.u32 %v1720_v61, %v1719_v12  ;;  %vm2016_vm8 = vcmp.gt.s32.totalorder %v2015_v5, 0  ;;  %vm1542_vm9 = vc.u32 %v12706_v20, %v12685_v56  ;;  %v19063_v35 = vand.u32 2147483647, %v12150_v41 }
 0x248   :  { %v1724_v16 = vor.u32 %v1723_v55, %v1722_v31  ;;  %vm1728_vm10 = vcmp.lt.s32.totalorder %v12735_v6, 4  ;;  %v1813_v19 = vshrl.u32 %v19057_v10, %v12618_v21  ;;  %v1844_v7 = vsel %vm1830_vm6, %v1841_v48, %v1843_v62 }
 0x249   :  { %v1700_v43 = vand.u32 8388607, %v19063_v35  ;;  %v12766_v0 = vmul.u32.u64.low %v12715_v13, %v1840_v15  ;;  %v12767_v58 = vmul.u32.u64.high %v12715_v13, %v1840_v15, %v12766_v0  ;;  %v1712_v12 = vor.u32 %v1711_v37, %v1710_v22 }
 0x24a   :  { %v1715_v61 = vor.u32 %v1714_v36, %v1713_v17  ;;  %v1718_v56 = vor.u32 %v1717_v45, %v1716_v49  ;;  %v2017_v20 = vsel %vm2016_vm8, %v2015_v5, 0  ;;  %v1544_v35 = vsel %vm1542_vm9, %v1543_v29, %v12686_v39 }
 0x24b   :  { %vm1725_vm11 = vcmp.lt.s32.totalorder %v12735_v6, 1  ;;  %vm1727_vm12 = vcmp.lt.s32.totalorder %v12735_v6, 3  ;;  %v1734_v21 = vsel %vm1728_vm10, %v1721_v54, 920167782  ;;  %v1701_v55 = vor.u32 8388608, %v1700_v43 }
 0x24c   :  { %v12776_v48 = vmul.u32.u64.low %v12715_v13, %v1844_v7  ;;  %v12777_v31 = vmul.u32.u64.high %v12715_v13, %v1844_v7, %v12776_v48  ;;  %v1738_v37 = vsel %vm1728_vm10, %v1724_v16, 1326507024  ;;  %v10289_v45 = vmin.u32 %v1655_v47, %v12673_v18 }
 0x24d   :  { %v1540_v49 = vmul.u32 %v12639_v25, %v1524_v24  ;;  %v1834_v39 = vsel %vm1832_vm1, %v1822_v30, 2102212464  ;;  %v2019_v22 = vand.u32 31, %v2017_v20  ;;  %vm1726_vm13 = vcmp.lt.s32.totalorder %v12735_v6, 2 }
 0x24e   :  { %v1733_v5 = vsel %vm1725_vm11, %v1712_v12, %v1715_v61  ;;  %v1735_v15 = vsel %vm1727_vm12, %v1718_v56, %v1734_v21  ;;  %v1904_v43 = vand.u32 2139095040, %v12156_v51  ;;  %v19064_v16 = vand.u32 2147483647, %v12599_v23 }
 0x24f   :  { %v19065_v47 = vcvt.s32.f32 %v12596_v4  ;;  %v12797_v25 = vadd.s32 %v1544_v35, %v1540_v49  ;;  %v1737_v30 = vsel %vm1725_vm11, %v1715_v61, %v1718_v56  ;;  %v1739_v17 = vsel %vm1727_vm12, %v1721_v54, %v1738_v37 }
 0x250   :  { %v1349_v36 = vsub.s32 32, %v12636_v3  ;;  %v1833_v24 = vsel %vm1829_vm2, %v1813_v19, %v12690_v14  ;;  %v1835_v4 = vsel %vm1831_vm3, %v12692_v2, %v1834_v39  ;;  %v12810_v23 = vshll.u32 %v1701_v55, 8 }
 0x251   :  { %v12795_v62 = vmul.f32 %v19065_v47, %v19064_v16  ;;  %v1350_v29 = vshll.u32 %v12517_v34, %v12636_v3  ;;  %v1355_v7 = vshll.u32 %v12709_v50, 23  ;;  %v1736_v54 = vsel %vm1726_vm13, %v1733_v5, %v1735_v15 }
 0x252   :  { %v12817_v35 = vsub.s32 32, %v2019_v22  ;;  %v1657_v21 = vclz %v10289_v45  ;;  %v1709_v14 = vshrl.u32 %v19057_v10, %v12699_v63  ;;  %v1740_v19 = vsel %vm1726_vm13, %v1737_v30, %v1739_v17  ;;  %v12837_v45 = vpop.f32.mrb[42].mxu0 }
 0x253   :  { %v1905_v2 = vshrl.u32 %v1904_v43, 23  ;;  %v1546_v48 = vadd.s32 536870912, %v12797_v25  ;;  %v1836_v34 = vsel %vm1830_vm6, %v1833_v24, %v1835_v4  ;;  %v1730_v3 = vsel %vm1728_vm10, %v1718_v56, 2102212464  ;;  %19066 = vst [vmem:[#allocation30_spill] sm:$0xff] %v12837_v45  ;;  %v12852_v47 = vpop.f32.mrb[43].mxu0 }
 0x254   :  { %v18763_v50 = vand.u32 2147483647, %v12152_v44  ;;  %vm1854_vm14 = vc.u32 %v12777_v31, %v12766_v0  ;;  %v1855_v55 = vadd.s32 1, %v12767_v58  ;;  %v2031_v56 = vshll.u32 %v19050_v8, %v2019_v22  ;;  %19067 = vst [vmem:[#allocation31_spill] sm:$0xff] %v12852_v47 }
 0x255   :  { %v12833_v63 = vmul.u32.u64.low %v12810_v23, %v1736_v54  ;;  %v12834_v37 = vmul.u32.u64.high %v12810_v23, %v1736_v54, %v12833_v63  ;;  %v12840_v26 = vmul.u32.u64.low %v12810_v23, %v1740_v19  ;;  %v12841_v49 = vmul.u32.u64.high %v12810_v23, %v1740_v19, %v12840_v26 }
 0x256   :  { %v2032_v39 = vshrl.u32 %v19051_v52, %v12817_v35  ;;  %v1729_v5 = vsel %vm1725_vm11, %v1709_v14, %v1712_v12  ;;  %v1731_v15 = vsel %vm1727_vm12, %v1715_v61, %v1730_v3  ;;  %v12850_v43 = vshrl.u32 %v2017_v20, 5 }
 0x257   :  { %v10300_v16 = vadd.s32 4294967169, %v1905_v2  ;;  %v2022_v30 = vshll.u32 %v19057_v10, %v2019_v22  ;;  %v2025_v17 = vshll.u32 %v19052_v57, %v2019_v22  ;;  %v2034_v24 = vshll.u32 %v19051_v52, %v2019_v22 }
 0x258   :  { %v2035_v4 = vshrl.u32 %v19054_v11, %v12817_v35  ;;  %v2023_v12 = vshrl.u32 %v19052_v57, %v12817_v35  ;;  %v2026_v61 = vshrl.u32 %v19053_v59, %v12817_v35  ;;  %v2028_v20 = vshll.u32 %v19053_v59, %v2019_v22 }
 0x259   :  { %v2029_v54 = vshrl.u32 %v19050_v8, %v12817_v35  ;;  %v1351_v14 = vshrl.u32 %v12624_v32, %v1349_v36  ;;  %v1356_v19 = vor.u32 4788187, %v1355_v7  ;;  %v10290_v2 = vadd.s32 4294967294, %v1657_v21 }
 0x25a   :  { %v2033_v3 = vor.u32 %v2032_v39, %v2031_v56  ;;  %v12867_v26 = vshrl.u32 %v1546_v48, 30  ;;  %v2012_v47 = vand.u32 8388607, %v18763_v50  ;;  %vm2040_vm15 = vcmp.lt.s32.totalorder %v12850_v43, 4 }
 0x25b   :  { %v1911_v45 = vadd.s32 1, %v10300_v16  ;;  %vm1383_vm1 = vcmp.lt.s32.totalorder %v12140_v40, 0  ;;  %v1852_v22 = vmul.u32 %v12715_v13, %v1836_v34  ;;  %v1856_v32 = vsel %vm1854_vm14, %v1855_v55, %v12767_v58 }
 0x25c   :  { %v1732_v36 = vsel %vm1726_vm13, %v1729_v5, %v1731_v15  ;;  %v2036_v7 = vor.u32 %v2035_v4, %v2034_v24  ;;  %v1751_v21 = vadd.s32 1, %v12834_v37  ;;  %v2024_v48 = vor.u32 %v2023_v12, %v2022_v30 }
 0x25d   :  { %v2027_v56 = vor.u32 %v2026_v61, %v2025_v17  ;;  %v2030_v39 = vor.u32 %v2029_v54, %v2028_v20  ;;  %vm1750_vm2 = vc.u32 %v12841_v49, %v12833_v63  ;;  %vm2037_vm3 = vcmp.lt.s32.totalorder %v12850_v43, 1 }
 0x25e   :  { %vm2039_vm6 = vcmp.lt.s32.totalorder %v12850_v43, 3  ;;  %v2046_v13 = vsel %vm2040_vm15, %v2033_v3, 920167782  ;;  %v1352_v58 = vor.u32 %v1351_v14, %v1350_v29  ;;  %vm10291_vm8 = vcmp.lt.s32.totalorder %v10290_v2, 0 }
 0x25f   :  { %v2013_v6 = vor.u32 8388608, %v2012_v47  ;;  %vm1912_vm9 = vcmp.gt.s32.totalorder %v1911_v45, 0  ;;  %v1548_v34 = vshll.u32 %v12867_v26, 30  ;;  %v12888_v55 = vadd.s32 %v1856_v32, %v1852_v22 }
 0x260   :  { %v1748_v5 = vmul.u32 %v12810_v23, %v1732_v36  ;;  %v2050_v15 = vsel %vm2040_vm15, %v2036_v7, 1326507024  ;;  %v19068_v16 = vand.u32 2147483647, %v12140_v40  ;;  %v19069_v30 = vmov 0 }
 0x261   :  { %vm1279_vm11 = vcmp.lt.s32.totalorder %v12142_v42, 0  ;;  %v1752_v29 = vsel %vm1750_vm2, %v1751_v21, %v12834_v37  ;;  %vm2038_vm12 = vcmp.lt.s32.totalorder %v12850_v43, 2  ;;  %v2045_v47 = vsel %vm2037_vm3, %v2024_v48, %v2027_v56 }
 0x262   :  { %vm12895_vm10 = vcmp.le.f32.partialorder %v19068_v16, 0.7853982  ;;  %v2047_v23 = vsel %vm2039_vm6, %v2030_v39, %v2046_v13  ;;  %v1465_v17 = vxor.u32 2147483648, %v12795_v62  ;;  %v1357_v24 = vand.u32 2147483647, %v1356_v19 }
 0x263   :  { %v19070_v30 = vsel %vm12895_vm10, 4294967295, %v19069_v30  ;;  %v1913_v4 = vsel %vm1912_vm9, %v1911_v45, 0  ;;  %v2216_v12 = vand.u32 2139095040, %v12186_v27  ;;  %v12909_v61 = vsel %vm10291_vm8, 0, %v10290_v2 }
 0x264   :  { %19071 = vst [vmem:[#allocation32_spill] sm:$0xff] %v19070_v30  ;;  %v2049_v37 = vsel %vm2037_vm3, %v2027_v56, %v2030_v39  ;;  %v2051_v20 = vsel %vm2039_vm6, %v2033_v3, %v2050_v15  ;;  %v12915_v54 = vshll.u32 %v2013_v6, 8  ;;  %v12918_v14 = vsub.s32 %v12797_v25, %v1548_v34 }
 0x265   :  { %v1858_v22 = vadd.s32 536870912, %v12888_v55  ;;  %v12921_v19 = vadd.s32 %v1752_v29, %v1748_v5  ;;  %v2048_v45 = vsel %vm2038_vm12, %v2045_v47, %v2047_v23  ;;  %11536 = vsinq.f32 %v12593_v60 }
 0x266   :  { %v19072_v2 = vsub.s32 4, %v12412_v53  ;;  %v1359_v32 = vcvt.s32.f32 %v1352_v58  ;;  %v1915_v36 = vand.u32 31, %v1913_v4  ;;  %v1466_v25 = vsel %vm1383_vm1, %v1465_v17, %v12795_v62 }
 0x267   :  { %v1363_v7 = vsub.s32 4, %v12490_v1  ;;  %v2052_v21 = vsel %vm2038_vm12, %v2049_v37, %v2051_v20  ;;  %v2217_v13 = vshrl.u32 %v2216_v12, 23  ;;  %v1665_v6 = vsub.s32 4294967266, %v12909_v61 }
 0x268   :  { %v12931_v3 = vsel %vm1383_vm1, %v19072_v2, %v12412_v53  ;;  %v12939_v60 = vmul.f32 %v1359_v32, %v1357_v24  ;;  %v12943_v34 = vmul.u32.u64.low %v12915_v54, %v2048_v45  ;;  %v12944_v53 = vmul.u32.u64.high %v12915_v54, %v2048_v45, %v12943_v34 }
 0x269   :  { %19073 = vst [vmem:[#allocation33_spill] sm:$0xff] %v12931_v3  ;;  %v1551_v58 = vsub.s32 0, %v12918_v14  ;;  %v12948_v5 = vshrl.u32 %v1858_v22, 30  ;;  %v1754_v62 = vadd.s32 536870912, %v12921_v19  ;;  %v2021_v15 = vshrl.u32 %v19057_v10, %v12817_v35 }
 0x26a   :  { %v2042_v16 = vsel %vm2040_vm15, %v2030_v39, 2102212464  ;;  %v12956_v29 = vmul.u32.u64.low %v12915_v54, %v2052_v21  ;;  %v12957_v47 = vmul.u32.u64.high %v12915_v54, %v2052_v21, %v12956_v29  ;;  %v12959_v23 = vsub.s32 32, %v1915_v36  ;;  %v12988_v21 = vpop.f32.mrb[44].mxu0 }
 0x26b   :  { %v12964_v17 = vsel %vm12895_vm10, %v12140_v40, %v1466_v25  ;;  %v12969_v24 = vsel %vm1279_vm11, %v1363_v7, %v12490_v1  ;;  %v1645_v35 = vadd.s32 %v12503_v28, %v12509_v33  ;;  %v10312_v39 = vadd.s32 4294967169, %v2217_v13  ;;  %19075 = vst [vmem:[#allocation35_spill] sm:$0xff] %v12988_v21  ;;  %v13002_v50 = vpop.f32.mrb[45].mxu0 }
 0x26c   :  { %19074 = vst [vmem:[#allocation34_spill] sm:$0xff] %v12969_v24  ;;  %v1361_v12 = vxor.u32 2147483648, %v12939_v60  ;;  %v1661_v37 = vsub.s32 32, %v12909_v61  ;;  %v1666_v20 = vadd.s32 127, %v1665_v6  ;;  %v10285_v45 = vmin.u32 %v1551_v58, %v12918_v14  ;;  %19077 = vst [vmem:[#allocation37_spill] sm:$0xff] %v13002_v50 }
 0x26d   :  { %v2041_v2 = vsel %vm2037_vm3, %v2021_v15, %v2024_v48  ;;  %v2043_v1 = vsel %vm2039_vm6, %v2027_v56, %v2042_v16  ;;  %v1860_v28 = vshll.u32 %v12948_v5, 30  ;;  %v12983_v33 = vshrl.u32 %v1754_v62, 30 }
 0x26e   :  { %v1927_v25 = vshll.u32 %v19050_v8, %v1915_v36  ;;  %v1928_v7 = vshrl.u32 %v19051_v52, %v12959_v23  ;;  %v12990_v13 = vshrl.u32 %v1913_v4, 5  ;;  %v1930_v48 = vshll.u32 %v19051_v52, %v1915_v36 }
 0x26f   :  { %v1931_v56 = vshrl.u32 %v19054_v11, %v12959_v23  ;;  %v2223_v6 = vadd.s32 1, %v10312_v39  ;;  %v12995_v58 = vpop.eup %11536  ;;  %v2044_v62 = vsel %vm2038_vm12, %v2041_v2, %v2043_v1  ;;  %v2063_v15 = vadd.s32 1, %v12944_v53 }
 0x270   :  { %19076 = vst [vmem:[#allocation36_spill] sm:$0xff] %v12995_v58  ;;  %v1918_v16 = vshll.u32 %v19057_v10, %v1915_v36  ;;  %v1921_v29 = vshll.u32 %v19052_v57, %v1915_v36  ;;  %v1919_v4 = vshrl.u32 %v19052_v57, %v12959_v23  ;;  %v1922_v22 = vshrl.u32 %v19053_v59, %v12959_v23 }
 0x271   :  { %v1924_v39 = vshll.u32 %v19053_v59, %v1915_v36  ;;  %v1925_v43 = vshrl.u32 %v19050_v8, %v12959_v23  ;;  %v1553_v2 = vclz %v10285_v45  ;;  %v13012_v1 = vsub.s32 %v12888_v55, %v1860_v28 }
 0x272   :  { %vm2062_vm13 = vc.u32 %v12957_v47, %v12943_v34  ;;  %v1929_v32 = vor.u32 %v1928_v7, %v1927_v25  ;;  %v19078_v40 = vand.u32 2147483647, %v12142_v42  ;;  %v19079_v24 = vmov 0 }
 0x273   :  { %vm1591_vm15 = vcmp.lt.s32.totalorder %v12144_v38, 0  ;;  %v19082_v36 = vand.u32 2147483647, %v12156_v51  ;;  %v1932_v3 = vor.u32 %v1931_v56, %v1930_v48  ;;  %vm1936_vm1 = vcmp.lt.s32.totalorder %v12990_v13, 4 }
 0x274   :  { %vm13018_vm14 = vcmp.le.f32.partialorder %v19078_v40, 0.7853982  ;;  %vm2224_vm2 = vcmp.gt.s32.totalorder %v2223_v6, 0  ;;  %v1663_v55 = vshrl.u32 %v1645_v35, %v1661_v37  ;;  %v1667_v45 = vshll.u32 %v1666_v20, 23 }
 0x275   :  { %v19080_v24 = vsel %vm13018_vm14, 4294967295, %v19079_v24  ;;  %v1908_v30 = vand.u32 8388607, %v19082_v36  ;;  %v1756_v28 = vshll.u32 %v12983_v33, 30  ;;  %v2060_v25 = vmul.u32 %v12915_v54, %v2044_v62 }
 0x276   :  { %19081 = vst [vmem:[#allocation38_spill] sm:$0xff] %v19080_v24  ;;  %v2064_v40 = vsel %vm2062_vm13, %v2063_v15, %v12944_v53  ;;  %v1920_v7 = vor.u32 %v1919_v4, %v1918_v16  ;;  %v1923_v58 = vor.u32 %v1922_v22, %v1921_v29  ;;  %v1926_v50 = vor.u32 %v1925_v43, %v1924_v39 }
 0x277   :  { %vm1933_vm3 = vcmp.lt.s32.totalorder %v12990_v13, 1  ;;  %vm1935_vm6 = vcmp.lt.s32.totalorder %v12990_v13, 3  ;;  %v1942_v48 = vsel %vm1936_vm1, %v1929_v32, 920167782  ;;  %v2225_v56 = vsel %vm2224_vm2, %v2223_v6, 0 }
 0x278   :  { %v10286_v36 = vadd.s32 4294967294, %v1553_v2  ;;  %v1863_v35 = vsub.s32 0, %v13012_v1  ;;  %v1909_v37 = vor.u32 8388608, %v1908_v30  ;;  %v1946_v54 = vsel %vm1936_vm1, %v1932_v3, 1326507024 }
 0x279   :  { %v1362_v53 = vsel %vm1279_vm11, %v1361_v12, %v12939_v60  ;;  %v1662_v20 = vshll.u32 %v12673_v18, %v12909_v61  ;;  %v13042_v22 = vsub.s32 %v12921_v19, %v1756_v28  ;;  %v13044_v62 = vadd.s32 %v2064_v40, %v2060_v25 }
 0x27a   :  { %vm1934_vm8 = vcmp.lt.s32.totalorder %v12990_v13, 2  ;;  %v1941_v30 = vsel %vm1933_vm3, %v1920_v7, %v1923_v58  ;;  %v1943_v3 = vsel %vm1935_vm6, %v1926_v50, %v1942_v48  ;;  %v2227_v6 = vand.u32 31, %v2225_v56 }
 0x27b   :  { %v1664_v15 = vor.u32 %v1663_v55, %v1662_v20  ;;  %v1668_v16 = vor.u32 4788187, %v1667_v45  ;;  %v1945_v60 = vsel %vm1933_vm3, %v1923_v58, %v1926_v50  ;;  %v1947_v18 = vsel %vm1935_vm6, %v1929_v32, %v1946_v54 }
 0x27c   :  { %11538 = vcosq.f32 %v12964_v17  ;;  %vm10287_vm9 = vcmp.lt.s32.totalorder %v10286_v36, 0  ;;  %v10297_v61 = vmin.u32 %v1863_v35, %v13012_v1  ;;  %v13057_v19 = vshll.u32 %v1909_v37, 8 }
 0x27d   :  { %11540 = vsinq.f32 %v12964_v17  ;;  %v13063_v12 = vsel %vm13018_vm14, %v12142_v42, %v1362_v53  ;;  %v19083_v29 = vsub.s32 4, %v12610_v9  ;;  %v1944_v4 = vsel %vm1934_vm8, %v1941_v30, %v1943_v3 }
 0x27e   :  { %v1759_v39 = vsub.s32 0, %v13042_v22  ;;  %v2066_v43 = vadd.s32 536870912, %v13044_v62  ;;  %v1948_v17 = vsel %vm1934_vm8, %v1945_v60, %v1947_v18  ;;  %v13078_v2 = vsub.s32 32, %v2227_v6 }
 0x27f   :  { %v13070_v32 = vsel %vm1591_vm15, %v19083_v29, %v12610_v9  ;;  %v1669_v55 = vand.u32 2147483647, %v1668_v16  ;;  %v1671_v45 = vcvt.s32.f32 %v1664_v15  ;;  %v13080_v28 = vsel %vm10287_vm9, 0, %v10286_v36 }
 0x280   :  { %19084 = vst [vmem:[#allocation39_spill] sm:$0xff] %v13070_v32  ;;  %v1917_v9 = vshrl.u32 %v19057_v10, %v12959_v23  ;;  %v1865_v25 = vclz %v10297_v61  ;;  %v13085_v40 = vmul.u32.u64.low %v13057_v19, %v1944_v4  ;;  %v13086_v48 = vmul.u32.u64.high %v13057_v19, %v1944_v4, %v13085_v40 }
 0x281   :  { %v2112_v35 = vand.u32 2139095040, %v12272_v46  ;;  %v1938_v37 = vsel %vm1936_vm1, %v1926_v50, 2102212464  ;;  %v13093_v54 = vmul.u32.u64.low %v13057_v19, %v1948_v17  ;;  %v13094_v53 = vmul.u32.u64.high %v13057_v19, %v1948_v17, %v13093_v54 }
 0x282   :  { %v10293_v20 = vmin.u32 %v1759_v39, %v13042_v22  ;;  %v13098_v23 = vshrl.u32 %v2066_v43, 30  ;;  %v2239_v30 = vshll.u32 %v19050_v8, %v2227_v6  ;;  %v2240_v3 = vshrl.u32 %v19051_v52, %v13078_v2 }
 0x283   :  { %v1937_v15 = vsel %vm1933_vm3, %v1917_v9, %v1920_v7  ;;  %v13105_v16 = vshrl.u32 %v2225_v56, 5  ;;  %v2242_v50 = vshll.u32 %v19051_v52, %v2227_v6  ;;  %v2243_v60 = vshrl.u32 %v19054_v11, %v13078_v2 }
 0x284   :  { %v1939_v18 = vsel %vm1935_vm6, %v1923_v58, %v1938_v37  ;;  %v2230_v61 = vshll.u32 %v19057_v10, %v2227_v6  ;;  %v2233_v29 = vshll.u32 %v19052_v57, %v2227_v6  ;;  %v2113_v4 = vshrl.u32 %v2112_v35, 23 }
 0x285   :  { %v2231_v39 = vshrl.u32 %v19052_v57, %v13078_v2  ;;  %v2234_v7 = vshrl.u32 %v19053_v59, %v13078_v2  ;;  %v2236_v56 = vshll.u32 %v19053_v59, %v2227_v6  ;;  %v2237_v43 = vshrl.u32 %v19050_v8, %v13078_v2 }
 0x286   :  { %v13121_v17 = vpop.eup %11538  ;;  %v1672_v9 = vmul.f32 %v1671_v45, %v1669_v55  ;;  %v1561_v58 = vsub.s32 4294967266, %v13080_v28  ;;  %v2068_v37 = vshll.u32 %v13098_v23, 30  ;;  %v2241_v54 = vor.u32 %v2240_v3, %v2239_v30 }
 0x287   :  { %19085 = vst [vmem:[#allocation40_spill] sm:$0xff] %v13121_v17  ;;  %v13125_v35 = vpop.eup %11540  ;;  %v1761_v36 = vclz %v10293_v20  ;;  %v19087_v32 = vand.u32 2147483647, %v12186_v27  ;;  %v2244_v24 = vor.u32 %v2243_v60, %v2242_v50  ;;  %vm2248_vm11 = vcmp.lt.s32.totalorder %v13105_v16, 4  ;;  %v13139_v17 = vpop.f32.mrb[46].mxu0 }
 0x288   :  { %19086 = vst [vmem:[#allocation41_spill] sm:$0xff] %v13125_v35  ;;  %v10298_v6 = vadd.s32 4294967294, %v1865_v25  ;;  %v1940_v21 = vsel %vm1934_vm8, %v1937_v15, %v1939_v18  ;;  %v1959_v55 = vadd.s32 1, %v13086_v48  ;;  %v10308_v45 = vadd.s32 4294967169, %v2113_v4  ;;  %19088 = vst [vmem:[#allocation42_spill] sm:$0xff] %v13139_v17  ;;  %v13148_v25 = vpop.f32.mrb[47].mxu0 }
 0x289   :  { %v2220_v42 = vand.u32 8388607, %v19087_v32  ;;  %vm1958_vm12 = vc.u32 %v13094_v53, %v13085_v40  ;;  %v13135_v30 = vor.u32 %v2231_v39, %v2230_v61  ;;  %v13137_v3 = vor.u32 %v2234_v7, %v2233_v29  ;;  %19089 = vst [vmem:[#allocation43_spill] sm:$0xff] %v13148_v25 }
 0x28a   :  { %v2238_v20 = vor.u32 %v2237_v43, %v2236_v56  ;;  %v13142_v32 = vsub.s32 %v13044_v62, %v2068_v37  ;;  %vm2245_vm13 = vcmp.lt.s32.totalorder %v13105_v16, 1  ;;  %vm2247_vm1 = vcmp.lt.s32.totalorder %v13105_v16, 3  ;;  %v19094_v56 = vld [vmem:[#allocation29_spill] sm:$0xff]  ;;  %v19095_v43 = vld [vmem:[#allocation27_spill] sm:$0xff] }
 0x28b   :  { %v2254_v13 = vsel %vm2248_vm11, %v2241_v54, 920167782  ;;  %v10294_v15 = vadd.s32 4294967294, %v1761_v36  ;;  %v1956_v50 = vmul.u32 %v13057_v19, %v1940_v21  ;;  %v2221_v60 = vor.u32 8388608, %v2220_v42 }
 0x28c   :  { %v2258_v18 = vsel %vm2248_vm11, %v2244_v24, 1326507024  ;;  %v1673_v61 = vxor.u32 2147483648, %v1672_v9  ;;  %v1557_v62 = vsub.s32 32, %v13080_v28  ;;  %v1960_v29 = vsel %vm1958_vm12, %v1959_v55, %v13086_v48 }
 0x28d   :  { %v2119_v4 = vadd.s32 1, %v10308_v45  ;;  %v1562_v39 = vadd.s32 127, %v1561_v58  ;;  %vm2246_vm2 = vcmp.lt.s32.totalorder %v13105_v16, 2  ;;  %v2253_v42 = vsel %vm2245_vm13, %v13135_v30, %v13137_v3 }
 0x28e   :  { %v2255_v24 = vsel %vm2247_vm1, %v2238_v20, %v2254_v13  ;;  %v19090_v21 = vand.u32 2147483647, %v12144_v38  ;;  %v19091_v19 = vmov 0  ;;  %vm10299_vm6 = vcmp.lt.s32.totalorder %v10298_v6, 0 }
 0x28f   :  { %v2071_v48 = vsub.s32 0, %v13142_v32  ;;  %v2257_v36 = vsel %vm2245_vm13, %v13137_v3, %v2238_v20  ;;  %v2259_v7 = vsel %vm2247_vm1, %v2241_v54, %v2258_v18  ;;  %v1541_v58 = vadd.s32 %v19095_v43, %v19094_v56  ;;  %v19096_v18 = vld [vmem:[#allocation16_spill] sm:$0xff] }
 0x290   :  { %vm13167_vm3 = vcmp.le.f32.partialorder %v19090_v21, 0.7853982  ;;  %vm10295_vm8 = vcmp.lt.s32.totalorder %v10294_v15, 0  ;;  %v13179_v37 = vadd.s32 %v1960_v29, %v1956_v50  ;;  %v13181_v55 = vshll.u32 %v2221_v60, 8 }
 0x291   :  { %v19092_v19 = vsel %vm13167_vm3, 4294967295, %v19091_v19  ;;  %11542 = vcosq.f32 %v13063_v12  ;;  %v1674_v45 = vsel %vm1591_vm15, %v1673_v61, %v1672_v9  ;;  %v2256_v13 = vsel %vm2246_vm2, %v2253_v42, %v2255_v24 }
 0x292   :  { %19093 = vst [vmem:[#allocation44_spill] sm:$0xff] %v19092_v19  ;;  %vm2120_vm9 = vcmp.gt.s32.totalorder %v2119_v4, 0  ;;  %v1559_v21 = vshrl.u32 %v1541_v58, %v1557_v62  ;;  %v13188_v35 = vsel %vm10299_vm6, 0, %v10298_v6  ;;  %v2260_v54 = vsel %vm2246_vm2, %v2257_v36, %v2259_v7 }
 0x293   :  { %v2424_v50 = vand.u32 2139095040, %v19096_v18  ;;  %v1558_v60 = vshll.u32 %v12918_v14, %v13080_v28  ;;  %v1563_v29 = vshll.u32 %v1562_v39, 23  ;;  %v13195_v56 = vsel %vm10295_vm8, 0, %v10294_v15 }
 0x294   :  { %v10305_v9 = vmin.u32 %v2071_v48, %v13142_v32  ;;  %v1962_v61 = vadd.s32 536870912, %v13179_v37  ;;  %v13200_v42 = vmul.u32.u64.low %v13181_v55, %v2256_v13  ;;  %v13201_v62 = vmul.u32.u64.high %v13181_v55, %v2256_v13, %v13200_v42 }
 0x295   :  { %v2121_v6 = vsel %vm2120_vm9, %v2119_v4, 0  ;;  %v1873_v24 = vsub.s32 4294967266, %v13188_v35  ;;  %v2229_v36 = vshrl.u32 %v19057_v10, %v13078_v2  ;;  %v1560_v15 = vor.u32 %v1559_v21, %v1558_v60 }
 0x296   :  { %19097 = vst [vmem:[#allocation29_spill] sm:$0xff] %v13200_v42  ;;  %v13208_v14 = vmul.u32.u64.low %v13181_v55, %v2260_v54  ;;  %v13209_v28 = vmul.u32.u64.high %v13181_v55, %v2260_v54, %v13208_v14  ;;  %v1769_v39 = vsub.s32 4294967266, %v13195_v56  ;;  %v2250_v48 = vsel %vm2248_vm11, %v2238_v20, 2102212464 }
 0x297   :  { %v2425_v7 = vshrl.u32 %v2424_v50, 23  ;;  %11544 = vsinq.f32 %v13063_v12  ;;  %v1564_v43 = vor.u32 4788187, %v1563_v29  ;;  %v2073_v4 = vclz %v10305_v9 }
 0x298   :  { %v2123_v58 = vand.u32 31, %v2121_v6  ;;  %v13218_v2 = vsel %vm13167_vm3, %v12144_v38, %v1674_v45  ;;  %v1853_v21 = vadd.s32 %v12766_v0, %v12777_v31  ;;  %v13223_v54 = vshrl.u32 %v1962_v61, 30 }
 0x299   :  { %v1869_v20 = vsub.s32 32, %v13188_v35  ;;  %v1874_v50 = vadd.s32 127, %v1873_v24  ;;  %v2249_v12 = vsel %vm2245_vm13, %v2229_v36, %v13135_v30  ;;  %v2251_v60 = vsel %vm2247_vm1, %v13137_v3, %v2250_v48 }
 0x29a   :  { %v1567_v45 = vcvt.s32.f32 %v1560_v15  ;;  %v1765_v29 = vsub.s32 32, %v13195_v56  ;;  %v1770_v9 = vadd.s32 127, %v1769_v39  ;;  %v10320_v14 = vadd.s32 4294967169, %v2425_v7 }
 0x29b   :  { %v13233_v13 = vpop.eup %11542  ;;  %v1565_v0 = vand.u32 2147483647, %v1564_v43  ;;  %v1749_v31 = vadd.s32 %v12833_v63, %v12841_v49  ;;  %v10306_v61 = vadd.s32 4294967294, %v2073_v4  ;;  %v13237_v24 = vsub.s32 32, %v2123_v58 }
 0x29c   :  { %19098 = vst [vmem:[#allocation27_spill] sm:$0xff] %v13233_v13  ;;  %v1870_v30 = vshll.u32 %v13012_v1, %v13188_v35  ;;  %v1964_v36 = vshll.u32 %v13223_v54, 30  ;;  %v2252_v3 = vsel %vm2246_vm2, %v2249_v12, %v2251_v60  ;;  %v2271_v15 = vadd.s32 1, %v13201_v62 }
 0x29d   :  { %v1871_v39 = vshrl.u32 %v1853_v21, %v1869_v20  ;;  %v1875_v48 = vshll.u32 %v1874_v50, 23  ;;  %vm2270_vm15 = vc.u32 %v13209_v28, %v13200_v42  ;;  %v1766_v49 = vshll.u32 %v13042_v22, %v13195_v56  ;;  %v19099_v21 = vld [vmem:[#allocation8_spill] sm:$0xff] }
 0x29e   :  { %v1767_v7 = vshrl.u32 %v1749_v31, %v1765_v29  ;;  %v1771_v43 = vshll.u32 %v1770_v9, 23  ;;  %v2431_v1 = vadd.s32 1, %v10320_v14  ;;  %vm10307_vm11 = vcmp.lt.s32.totalorder %v10306_v61, 0 }
 0x29f   :  { %v2268_v35 = vmul.u32 %v13181_v55, %v2252_v3  ;;  %v2135_v16 = vshll.u32 %v19050_v8, %v2123_v58  ;;  %v2136_v4 = vshrl.u32 %v19051_v52, %v13237_v24  ;;  %vm1487_vm12 = vcmp.lt.s32.totalorder %v19099_v21, 0 }
 0x2a0   :  { %v13256_v20 = vsub.s32 %v13179_v37, %v1964_v36  ;;  %v2272_v50 = vsel %vm2270_vm15, %v2271_v15, %v13201_v62  ;;  %v13259_v12 = vshrl.u32 %v2121_v6, 5  ;;  %v2126_v22 = vshll.u32 %v19057_v10, %v2123_v58  ;;  %v13277_v15 = vpop.f32.mrb[48].mxu0 }
 0x2a1   :  { %v13262_v56 = vpop.eup %11544  ;;  %v2129_v55 = vshll.u32 %v19052_v57, %v2123_v58  ;;  %v2132_v60 = vshll.u32 %v19053_v59, %v2123_v58  ;;  %v2138_v29 = vshll.u32 %v19051_v52, %v2123_v58  ;;  %v2139_v9 = vshrl.u32 %v19054_v11, %v13237_v24  ;;  %19101 = vst [vmem:[#allocation46_spill] sm:$0xff] %v13277_v15 }
 0x2a2   :  { %19100 = vst [vmem:[#allocation45_spill] sm:$0xff] %v13262_v56  ;;  %v2127_v37 = vshrl.u32 %v19052_v57, %v13237_v24  ;;  %v2130_v62 = vshrl.u32 %v19053_v59, %v13237_v24  ;;  %v2133_v6 = vshrl.u32 %v19050_v8, %v13237_v24  ;;  %vm2432_vm13 = vcmp.gt.s32.totalorder %v2431_v1, 0 }
 0x2a3   :  { %v1568_v14 = vmul.f32 %v1567_v45, %v1565_v0  ;;  %v1872_v31 = vor.u32 %v1871_v39, %v1870_v30  ;;  %v13275_v36 = vadd.s32 %v2272_v50, %v2268_v35  ;;  %v2137_v3 = vor.u32 %v2136_v4, %v2135_v16 }
 0x2a4   :  { %v1876_v58 = vor.u32 4788187, %v1875_v48  ;;  %v1768_v63 = vor.u32 %v1767_v7, %v1766_v49  ;;  %v19102_v38 = vand.u32 2147483647, %v12272_v46  ;;  %vm2144_vm1 = vcmp.lt.s32.totalorder %v13259_v12, 4 }
 0x2a5   :  { %v1772_v13 = vor.u32 4788187, %v1771_v43  ;;  %v13283_v56 = vsel %vm10307_vm11, 0, %v10306_v61  ;;  %v2140_v25 = vor.u32 %v2139_v9, %v2138_v29  ;;  %v2433_v17 = vsel %vm2432_vm13, %v2431_v1, 0 }
 0x2a6   :  { %v2116_v19 = vand.u32 8388607, %v19102_v38  ;;  %v1967_v45 = vsub.s32 0, %v13256_v20  ;;  %v13286_v0 = vor.u32 %v2127_v37, %v2126_v22  ;;  %v13288_v30 = vor.u32 %v2130_v62, %v2129_v55 }
 0x2a7   :  { %v2134_v39 = vor.u32 %v2133_v6, %v2132_v60  ;;  %v2274_v48 = vadd.s32 536870912, %v13275_v36  ;;  %vm2141_vm2 = vcmp.lt.s32.totalorder %v13259_v12, 1  ;;  %vm2143_vm6 = vcmp.lt.s32.totalorder %v13259_v12, 3 }
 0x2a8   :  { %v2150_v38 = vsel %vm2144_vm1, %v2137_v3, 920167782  ;;  %11546 = vcosq.f32 %v13218_v2  ;;  %v1569_v61 = vxor.u32 2147483648, %v1568_v14  ;;  %v2117_v49 = vor.u32 8388608, %v2116_v19 }
 0x2a9   :  { %v2435_v7 = vand.u32 31, %v2433_v17  ;;  %v19103_v43 = vsub.s32 4, %v12867_v26  ;;  %v1877_v35 = vand.u32 2147483647, %v1876_v58  ;;  %v1773_v16 = vand.u32 2147483647, %v1772_v13 }
 0x2aa   :  { %v2154_v4 = vsel %vm2144_vm1, %v2140_v25, 1326507024  ;;  %v2081_v50 = vsub.s32 4294967266, %v13283_v56  ;;  %vm2142_vm8 = vcmp.lt.s32.totalorder %v13259_v12, 2  ;;  %v2149_v19 = vsel %vm2141_vm2, %v13286_v0, %v13288_v30 }
 0x2ab   :  { %v13301_v1 = vsel %vm1487_vm12, %v19103_v43, %v12867_v26  ;;  %v2151_v22 = vsel %vm2143_vm6, %v2134_v39, %v2150_v38  ;;  %v1879_v55 = vcvt.s32.f32 %v1872_v31  ;;  %v1775_v26 = vcvt.s32.f32 %v1768_v63 }
 0x2ac   :  { %19104 = vst [vmem:[#allocation47_spill] sm:$0xff] %v13301_v1  ;;  %v10301_v60 = vmin.u32 %v1967_v45, %v13256_v20  ;;  %v13314_v13 = vshrl.u32 %v2274_v48, 30  ;;  %v2153_v25 = vsel %vm2141_vm2, %v13288_v30, %v2134_v39  ;;  %v2155_v29 = vsel %vm2143_vm6, %v2137_v3, %v2154_v4 }
 0x2ad   :  { %v13321_v9 = vshll.u32 %v2117_v49, 8  ;;  %v13323_v37 = vsub.s32 32, %v2435_v7  ;;  %v13327_v62 = vsel %vm1487_vm12, %v1569_v61, %v1568_v14  ;;  %v13329_v63 = vmul.f32 %v1879_v55, %v1877_v35  ;;  %v19106_v61 = vld [vmem:[#allocation17_spill] sm:$0xff] }
 0x2ae   :  { %19105 = vst [vmem:[#allocation48_spill] sm:$0xff] %v13314_v13  ;;  %v2061_v6 = vadd.s32 %v12943_v34, %v12957_v47  ;;  %v2152_v31 = vsel %vm2142_vm8, %v2149_v19, %v2151_v22  ;;  %v13335_v58 = vmul.f32 %v1775_v26, %v1773_v16  ;;  %v2077_v3 = vsub.s32 32, %v13283_v56 }
 0x2af   :  { %v2082_v45 = vadd.s32 127, %v2081_v50  ;;  %v1969_v38 = vclz %v10301_v60  ;;  %v2276_v49 = vshll.u32 %v13314_v13, 30  ;;  %v2156_v14 = vsel %vm2142_vm8, %v2153_v25, %v2155_v29 }
 0x2b0   :  { %v2320_v43 = vand.u32 2139095040, %v19106_v61  ;;  %v13344_v34 = vmul.u32.u64.low %v13321_v9, %v2152_v31  ;;  %v13345_v47 = vmul.u32.u64.high %v13321_v9, %v2152_v31, %v13344_v34  ;;  %v2447_v35 = vshll.u32 %v19050_v8, %v2435_v7 }
 0x2b1   :  { %v2448_v16 = vshrl.u32 %v19051_v52, %v13323_v37  ;;  %v2125_v4 = vshrl.u32 %v19057_v10, %v13237_v24  ;;  %v13353_v50 = vshrl.u32 %v2433_v17, 5  ;;  %v2450_v19 = vshll.u32 %v19051_v52, %v2435_v7 }
 0x2b2   :  { %v2451_v22 = vshrl.u32 %v19054_v11, %v13323_v37  ;;  %v13358_v55 = vpop.eup %11546  ;;  %v13361_v26 = vmul.u32.u64.low %v13321_v9, %v2156_v14  ;;  %v13362_v60 = vmul.u32.u64.high %v13321_v9, %v2156_v14, %v13361_v26  ;;  %v2438_v25 = vshll.u32 %v19057_v10, %v2435_v7 }
 0x2b3   :  { %19107 = vst [vmem:[#allocation49_spill] sm:$0xff] %v13358_v55  ;;  %v2441_v29 = vshll.u32 %v19052_v57, %v2435_v7  ;;  %v2439_v24 = vshrl.u32 %v19052_v57, %v13323_v37  ;;  %v2442_v17 = vshrl.u32 %v19053_v59, %v13323_v37  ;;  %v2444_v31 = vshll.u32 %v19053_v59, %v2435_v7 }
 0x2b4   :  { %v2445_v48 = vshrl.u32 %v19050_v8, %v13323_v37  ;;  %v10302_v1 = vadd.s32 4294967294, %v1969_v38  ;;  %v13374_v55 = vsub.s32 %v13275_v36, %v2276_v49  ;;  %v2146_v14 = vsel %vm2144_vm1, %v2134_v39, 2102212464 }
 0x2b5   :  { %v2449_v26 = vor.u32 %v2448_v16, %v2447_v35  ;;  %v19108_v15 = vand.u32 2147483647, %v19099_v21  ;;  %v19109_v13 = vmov 0  ;;  %v19112_v46 = vand.u32 2147483647, %v19096_v18 }
 0x2b6   :  { %v2452_v27 = vor.u32 %v2451_v22, %v2450_v19  ;;  %vm2456_vm15 = vcmp.lt.s32.totalorder %v13353_v50, 4  ;;  %v2321_v38 = vshrl.u32 %v2320_v43, 23  ;;  %v2078_v36 = vshll.u32 %v13142_v32, %v13283_v56 }
 0x2b7   :  { %vm13380_vm9 = vcmp.le.f32.partialorder %v19108_v15, 0.7853982  ;;  %v2428_v7 = vand.u32 8388607, %v19112_v46  ;;  %v2079_v49 = vshrl.u32 %v2061_v6, %v2077_v3  ;;  %v2083_v42 = vshll.u32 %v2082_v45, 23  ;;  %v19113_v6 = vld [vmem:[#allocation9_spill] sm:$0xff] }
 0x2b8   :  { %v19110_v13 = vsel %vm13380_vm9, 4294967295, %v19109_v13  ;;  %v2145_v39 = vsel %vm2141_vm2, %v2125_v4, %v13286_v0  ;;  %v2147_v15 = vsel %vm2143_vm6, %v13288_v30, %v2146_v14  ;;  %v13395_v35 = vor.u32 %v2439_v24, %v2438_v25 }
 0x2b9   :  { %19111 = vst [vmem:[#allocation50_spill] sm:$0xff] %v19110_v13  ;;  %v13397_v46 = vor.u32 %v2442_v17, %v2441_v29  ;;  %v2446_v16 = vor.u32 %v2445_v48, %v2444_v31  ;;  %v2279_v43 = vsub.s32 0, %v13374_v55  ;;  %vm2453_vm11 = vcmp.lt.s32.totalorder %v13353_v50, 1 }
 0x2ba   :  { %vm2455_vm12 = vcmp.lt.s32.totalorder %v13353_v50, 3  ;;  %v2462_v32 = vsel %vm2456_vm15, %v2449_v26, 920167782  ;;  %vm10303_vm13 = vcmp.lt.s32.totalorder %v10302_v1, 0  ;;  %v2429_v56 = vor.u32 8388608, %v2428_v7 }
 0x2bb   :  { %v2466_v0 = vsel %vm2456_vm15, %v2452_v27, 1326507024  ;;  %v10316_v30 = vadd.s32 4294967169, %v2321_v38  ;;  %vm1799_vm1 = vcmp.lt.s32.totalorder %v19113_v6, 0  ;;  %v2080_v3 = vor.u32 %v2079_v49, %v2078_v36 }
 0x2bc   :  { %v2084_v45 = vor.u32 4788187, %v2083_v42  ;;  %v2148_v48 = vsel %vm2142_vm8, %v2145_v39, %v2147_v15  ;;  %v2167_v4 = vadd.s32 1, %v13345_v47  ;;  %vm2166_vm2 = vc.u32 %v13362_v60, %v13344_v34 }
 0x2bd   :  { %vm2454_vm6 = vcmp.lt.s32.totalorder %v13353_v50, 2  ;;  %v2461_v27 = vsel %vm2453_vm11, %v13395_v35, %v13397_v46  ;;  %v2463_v19 = vsel %vm2455_vm12, %v2446_v16, %v2462_v32  ;;  %vm1695_vm0 = vcmp.lt.s32.totalorder %v12150_v41, 0 }
 0x2be   :  { %v13420_v42 = vsel %vm10303_vm13, 0, %v10302_v1  ;;  %v10313_v12 = vmin.u32 %v2279_v43, %v13374_v55  ;;  %v2465_v22 = vsel %vm2453_vm11, %v13397_v46, %v2446_v16  ;;  %v2467_v25 = vsel %vm2455_vm12, %v2449_v26, %v2466_v0 }
 0x2bf   :  { %11548 = vsinq.f32 %v13218_v2  ;;  %v2164_v29 = vmul.u32 %v13321_v9, %v2148_v48  ;;  %v13430_v24 = vshll.u32 %v2429_v56, 8  ;;  %v2327_v17 = vadd.s32 1, %v10316_v30 }
 0x2c0   :  { %v1573_v1 = vsel %vm13380_vm9, %v19099_v21, %v13327_v62  ;;  %v19114_v31 = vand.u32 2147483647, %v19113_v6  ;;  %v19115_v14 = vmov 0  ;;  %v1883_v26 = vsub.s32 4, %v12948_v5 }
 0x2c1   :  { %v2168_v2 = vsel %vm2166_vm2, %v2167_v4, %v13345_v47  ;;  %v2464_v9 = vsel %vm2454_vm6, %v2461_v27, %v2463_v19  ;;  %v1881_v7 = vxor.u32 2147483648, %v13329_v63  ;;  %v19118_v62 = vand.u32 2147483647, %v12150_v41 }
 0x2c2   :  { %vm13438_vm8 = vcmp.le.f32.partialorder %v19114_v31, 0.7853982  ;;  %v19119_v38 = vmov 0  ;;  %v1777_v36 = vxor.u32 2147483648, %v13335_v58  ;;  %v1977_v49 = vsub.s32 4294967266, %v13420_v42 }
 0x2c3   :  { %v19116_v14 = vsel %vm13438_vm8, 4294967295, %v19115_v14  ;;  %vm13452_vm13 = vcmp.le.f32.partialorder %v19118_v62, 0.7853982  ;;  %v2468_v39 = vsel %vm2454_vm6, %v2465_v22, %v2467_v25  ;;  %v2085_v15 = vand.u32 2147483647, %v2084_v45 }
 0x2c4   :  { %19117 = vst [vmem:[#allocation51_spill] sm:$0xff] %v19116_v14  ;;  %v19120_v38 = vsel %vm13452_vm13, 4294967295, %v19119_v38  ;;  %v2087_v47 = vcvt.s32.f32 %v2080_v3  ;;  %v1957_v43 = vadd.s32 %v13085_v40, %v13094_v53  ;;  %v2281_v32 = vclz %v10313_v12 }
 0x2c5   :  { %19121 = vst [vmem:[#allocation52_spill] sm:$0xff] %v19120_v38  ;;  %v13462_v56 = vadd.s32 %v2168_v2, %v2164_v29  ;;  %v13465_v0 = vmul.u32.u64.low %v13430_v24, %v2464_v9  ;;  %v13466_v30 = vmul.u32.u64.high %v13430_v24, %v2464_v9, %v13465_v0  ;;  %vm2328_vm2 = vcmp.gt.s32.totalorder %v2327_v17, 0  ;;  %v19123_v29 = vld [vmem:[#allocation18_spill] sm:$0xff] }
 0x2c6   :  { %v1973_v48 = vsub.s32 32, %v13420_v42  ;;  %v2437_v4 = vshrl.u32 %v19057_v10, %v13323_v37  ;;  %v13473_v45 = vmul.u32.u64.low %v13430_v24, %v2468_v39  ;;  %v13474_v3 = vmul.u32.u64.high %v13430_v24, %v2468_v39, %v13473_v45 }
 0x2c7   :  { %v13479_v40 = vsel %vm1799_vm1, %v1883_v26, %v12948_v5  ;;  %vm2007_vm4 = vcmp.lt.s32.totalorder %v12152_v44, 0  ;;  %v1978_v53 = vadd.s32 127, %v1977_v49  ;;  %v2458_v27 = vsel %vm2456_vm15, %v2446_v16, 2102212464 }
 0x2c8   :  { %19122 = vst [vmem:[#allocation53_spill] sm:$0xff] %v13479_v40  ;;  %11550 = vcosq.f32 %v1573_v1  ;;  %v1882_v37 = vsel %vm1799_vm1, %v1881_v7, %v13329_v63  ;;  %v10314_v19 = vadd.s32 4294967294, %v2281_v32  ;;  %v2329_v12 = vsel %vm2328_vm2, %v2327_v17, 0 }
 0x2c9   :  { %v1778_v22 = vsel %vm1695_vm0, %v1777_v36, %v13335_v58  ;;  %v2088_v25 = vmul.f32 %v2087_v47, %v2085_v15  ;;  %v2170_v5 = vadd.s32 536870912, %v13462_v56  ;;  %v2632_v31 = vand.u32 2139095040, %v19123_v29  ;;  %v13500_v17 = vpop.eup %11548 }
 0x2ca   :  { %v1974_v26 = vshll.u32 %v13256_v20, %v13420_v42  ;;  %v1975_v16 = vshrl.u32 %v1957_v43, %v1973_v48  ;;  %v2457_v2 = vsel %vm2453_vm11, %v2437_v4, %v13395_v35  ;;  %v2459_v63 = vsel %vm2455_vm12, %v13397_v46, %v2458_v27  ;;  %19124 = vst [vmem:[#allocation54_spill] sm:$0xff] %v13500_v17 }
 0x2cb   :  { %v1885_v58 = vsel %vm13438_vm8, %v19113_v6, %v1882_v37  ;;  %v1779_v9 = vsub.s32 4, %v12983_v33  ;;  %v1979_v7 = vshll.u32 %v1978_v53, 23  ;;  %v2331_v62 = vand.u32 31, %v2329_v12 }
 0x2cc   :  { %11552 = vsinq.f32 %v1573_v1  ;;  %v1781_v20 = vsel %vm13452_vm13, %v12150_v41, %v1778_v22  ;;  %v2091_v35 = vsub.s32 4, %v13098_v23  ;;  %vm10315_vm15 = vcmp.lt.s32.totalorder %v10314_v19, 0 }
 0x2cd   :  { %v13510_v42 = vshrl.u32 %v2170_v5, 30  ;;  %v2460_v46 = vsel %vm2454_vm6, %v2457_v2, %v2459_v63  ;;  %v2479_v36 = vadd.s32 1, %v13466_v30  ;;  %v2633_v49 = vshrl.u32 %v2632_v31, 23 }
 0x2ce   :  { %11554 = vcosq.f32 %v1885_v58  ;;  %v19125_v39 = vand.u32 2147483647, %v12152_v44  ;;  %v19126_v1 = vmov 0  ;;  %v2089_v15 = vxor.u32 2147483648, %v2088_v25 }
 0x2cf   :  { %v1976_v47 = vor.u32 %v1975_v16, %v1974_v26  ;;  %vm2478_vm12 = vc.u32 %v13474_v3, %v13465_v0  ;;  %11556 = vsinq.f32 %v1885_v58  ;;  %v13526_v50 = vsel %vm1695_vm0, %v1779_v9, %v12983_v33 }
 0x2d0   :  { %vm13517_vm11 = vcmp.le.f32.partialorder %v19125_v39, 0.7853982  ;;  %19129 = vst [vmem:[#allocation56_spill] sm:$0xff] %v13526_v50  ;;  %v1980_v43 = vor.u32 4788187, %v1979_v7  ;;  %v13528_v32 = vsub.s32 32, %v2331_v62  ;;  %11558 = vcosq.f32 %v1781_v20 }
 0x2d1   :  { %v19127_v1 = vsel %vm13517_vm11, 4294967295, %v19126_v1  ;;  %v13533_v48 = vsel %vm2007_vm4, %v2091_v35, %v13098_v23  ;;  %v13536_v4 = vsel %vm10315_vm15, 0, %v10314_v19  ;;  %v2476_v45 = vmul.u32 %v13430_v24, %v2460_v46 }
 0x2d2   :  { %19128 = vst [vmem:[#allocation55_spill] sm:$0xff] %v19127_v1  ;;  %19130 = vst [vmem:[#allocation57_spill] sm:$0xff] %v13533_v48  ;;  %11560 = vsinq.f32 %v1781_v20  ;;  %v2172_v53 = vshll.u32 %v13510_v42, 30  ;;  %v2480_v33 = vsel %vm2478_vm12, %v2479_v36, %v13466_v30  ;;  %v10328_v27 = vadd.s32 4294967169, %v2633_v49  ;;  %v13541_v37 = vpop.eup %11550 }
 0x2d3   :  { %19131 = vst [vmem:[#allocation58_spill] sm:$0xff] %v13541_v37  ;;  %v2090_v22 = vsel %vm2007_vm4, %v2089_v15, %v2088_v25  ;;  %v1983_v5 = vcvt.s32.f32 %v1976_v47  ;;  %v1987_v23 = vsub.s32 4, %v13223_v54  ;;  %v1981_v19 = vand.u32 2147483647, %v1980_v43  ;;  %v19133_v15 = vld [vmem:[#allocation29_spill] sm:$0xff] }
 0x2d4   :  { %v2289_v26 = vsub.s32 4294967266, %v13536_v4  ;;  %v2343_v24 = vshll.u32 %v19050_v8, %v2331_v62  ;;  %v2344_v16 = vshrl.u32 %v19051_v52, %v13528_v32  ;;  %v13551_v30 = vadd.s32 %v2480_v33, %v2476_v45 }
 0x2d5   :  { %v13553_v2 = vshrl.u32 %v2329_v12, 5  ;;  %v2346_v63 = vshll.u32 %v19051_v52, %v2331_v62  ;;  %v2347_v25 = vshrl.u32 %v19054_v11, %v13528_v32  ;;  %vm1903_vm0 = vcmp.lt.s32.totalorder %v12156_v51, 0 }
 0x2d6   :  { %v13560_v58 = vsub.s32 %v13462_v56, %v2172_v53  ;;  %v2334_v9 = vshll.u32 %v19057_v10, %v2331_v62  ;;  %v2337_v7 = vshll.u32 %v19052_v57, %v2331_v62  ;;  %v2639_v20 = vadd.s32 1, %v10328_v27  ;;  %v13564_v35 = vpop.eup %11552 }
 0x2d7   :  { %19132 = vst [vmem:[#allocation59_spill] sm:$0xff] %v13564_v35  ;;  %v2335_v12 = vshrl.u32 %v19052_v57, %v13528_v32  ;;  %v2338_v46 = vshrl.u32 %v19053_v59, %v13528_v32  ;;  %v2340_v36 = vshll.u32 %v19053_v59, %v2331_v62  ;;  %v2341_v49 = vshrl.u32 %v19050_v8, %v13528_v32  ;;  %v19135_v62 = vld [vmem:[#allocation20_spill] sm:$0xff] }
 0x2d8   :  { %v2093_v56 = vsel %vm13517_vm11, %v12152_v44, %v2090_v22  ;;  %v1984_v39 = vmul.f32 %v1983_v5, %v1981_v19  ;;  %v2269_v47 = vadd.s32 %v19133_v15, %v13209_v28  ;;  %v2345_v43 = vor.u32 %v2344_v16, %v2343_v24  ;;  %v13578_v45 = vpop.eup %11554 }
 0x2d9   :  { %19134 = vst [vmem:[#allocation29_spill] sm:$0xff] %v13578_v45  ;;  %v2482_v53 = vadd.s32 536870912, %v13551_v30  ;;  %v2348_v33 = vor.u32 %v2347_v25, %v2346_v63  ;;  %vm2352_vm4 = vcmp.lt.s32.totalorder %v13553_v2, 4  ;;  %v2528_v27 = vand.u32 2139095040, %v19135_v62  ;;  %v13583_v31 = vpop.eup %11556 }
 0x2da   :  { %19136 = vst [vmem:[#allocation60_spill] sm:$0xff] %v13583_v31  ;;  %v2285_v41 = vsub.s32 32, %v13536_v4  ;;  %v2290_v1 = vadd.s32 127, %v2289_v26  ;;  %v19137_v22 = vand.u32 2147483647, %v19106_v61  ;;  %vm2640_vm1 = vcmp.gt.s32.totalorder %v2639_v20, 0  ;;  %v13588_v28 = vpop.eup %11558 }
 0x2db   :  { %19138 = vst [vmem:[#allocation61_spill] sm:$0xff] %v13588_v28  ;;  %v2175_v19 = vsub.s32 0, %v13560_v58  ;;  %v2336_v24 = vor.u32 %v2335_v12, %v2334_v9  ;;  %v2339_v16 = vor.u32 %v2338_v46, %v2337_v7  ;;  %v2342_v63 = vor.u32 %v2341_v49, %v2340_v36 }
 0x2dc   :  { %v2324_v5 = vand.u32 8388607, %v19137_v22  ;;  %v13591_v25 = vpop.eup %11560  ;;  %v1985_v15 = vxor.u32 2147483648, %v1984_v39  ;;  %vm2349_vm6 = vcmp.lt.s32.totalorder %v13553_v2, 1  ;;  %vm2351_vm2 = vcmp.lt.s32.totalorder %v13553_v2, 3 }
 0x2dd   :  { %19139 = vst [vmem:[#allocation62_spill] sm:$0xff] %v13591_v25  ;;  %v2358_v26 = vsel %vm2352_vm4, %v2345_v43, 920167782  ;;  %v13597_v44 = vshrl.u32 %v2482_v53, 30  ;;  %v2362_v22 = vsel %vm2352_vm4, %v2348_v33, 1326507024  ;;  %v2286_v9 = vshll.u32 %v13374_v55, %v13536_v4 }
 0x2de   :  { %v2641_v48 = vsel %vm2640_vm1, %v2639_v20, 0  ;;  %v2529_v6 = vshrl.u32 %v2528_v27, 23  ;;  %v2287_v7 = vshrl.u32 %v2269_v47, %v2285_v41  ;;  %v2291_v12 = vshll.u32 %v2290_v1, 23  ;;  %v19140_v41 = vld [vmem:[#allocation25_spill] sm:$0xff] }
 0x2df   :  { %v2325_v46 = vor.u32 8388608, %v2324_v5  ;;  %v10309_v36 = vmin.u32 %v2175_v19, %v13560_v58  ;;  %vm2350_vm15 = vcmp.lt.s32.totalorder %v13553_v2, 2  ;;  %v2357_v49 = vsel %vm2349_vm6, %v2336_v24, %v2339_v16 }
 0x2e0   :  { %v2359_v53 = vsel %vm2351_vm2, %v2342_v63, %v2358_v26  ;;  %v2361_v20 = vsel %vm2349_vm6, %v2339_v16, %v2342_v63  ;;  %v2363_v33 = vsel %vm2351_vm2, %v2345_v43, %v2362_v22  ;;  %v2643_v55 = vand.u32 31, %v2641_v48 }
 0x2e1   :  { %v2840_v1 = vand.u32 2139095040, %v19140_v41  ;;  %11562 = vcosq.f32 %v2093_v56  ;;  %v13617_v4 = vsel %vm1903_vm0, %v1987_v23, %v13223_v54  ;;  %v2484_v47 = vshll.u32 %v13597_v44, 30 }
 0x2e2   :  { %19141 = vst [vmem:[#allocation63_spill] sm:$0xff] %v13617_v4  ;;  %v10324_v27 = vadd.s32 4294967169, %v2529_v6  ;;  %11564 = vsinq.f32 %v2093_v56  ;;  %v2288_v5 = vor.u32 %v2287_v7, %v2286_v9  ;;  %v13620_v19 = vshll.u32 %v2325_v46, 8 }
 0x2e3   :  { %v18801_v26 = vand.u32 2147483647, %v19123_v29  ;;  %v2292_v28 = vor.u32 4788187, %v2291_v12  ;;  %v2177_v43 = vclz %v10309_v36  ;;  %v2360_v22 = vsel %vm2350_vm15, %v2357_v49, %v2359_v53 }
 0x2e4   :  { %v2364_v25 = vsel %vm2350_vm15, %v2361_v20, %v2363_v33  ;;  %v13629_v54 = vsel %vm1903_vm0, %v1985_v15, %v1984_v39  ;;  %v2333_v6 = vshrl.u32 %v19057_v10, %v13528_v32  ;;  %v13633_v23 = vsub.s32 32, %v2643_v55 }
 0x2e5   :  { %v2841_v56 = vshrl.u32 %v2840_v1, 23  ;;  %v13637_v9 = vadd.s32 %v13344_v34, %v13362_v60  ;;  %v13640_v7 = vsub.s32 %v13551_v30, %v2484_v47  ;;  %v2354_v12 = vsel %vm2352_vm4, %v2342_v63, 2102212464 }
 0x2e6   :  { %v2535_v46 = vadd.s32 1, %v10324_v27  ;;  %v13645_v39 = vmul.u32.u64.low %v13620_v19, %v2364_v25  ;;  %v13646_v15 = vmul.u32.u64.high %v13620_v19, %v2364_v25, %v13645_v39  ;;  %v2293_v49 = vand.u32 2147483647, %v2292_v28 }
 0x2e7   :  { %v13649_v32 = vmul.u32.u64.low %v13620_v19, %v2360_v22  ;;  %v13650_v36 = vmul.u32.u64.high %v13620_v19, %v2360_v22, %v13649_v32  ;;  %v2295_v53 = vcvt.s32.f32 %v2288_v5  ;;  %v10310_v34 = vadd.s32 4294967294, %v2177_v43 }
 0x2e8   :  { %v2636_v60 = vand.u32 8388607, %v18801_v26  ;;  %v2353_v30 = vsel %vm2349_vm6, %v2333_v6, %v2336_v24  ;;  %v2655_v63 = vshll.u32 %v19050_v8, %v2643_v55  ;;  %v2656_v25 = vshrl.u32 %v19051_v52, %v13633_v23 }
 0x2e9   :  { %v10336_v20 = vadd.s32 4294967169, %v2841_v56  ;;  %v2487_v33 = vsub.s32 0, %v13640_v7  ;;  %v2355_v1 = vsel %vm2351_vm2, %v2339_v16, %v2354_v12  ;;  %v13663_v28 = vshrl.u32 %v2641_v48, 5 }
 0x2ea   :  { %vm2536_vm12 = vcmp.gt.s32.totalorder %v2535_v46, 0  ;;  %v2646_v47 = vshll.u32 %v19057_v10, %v2643_v55  ;;  %v2649_v27 = vshll.u32 %v19052_v57, %v2643_v55  ;;  %v2658_v24 = vshll.u32 %v19051_v52, %v2643_v55 }
 0x2eb   :  { %v2659_v5 = vshrl.u32 %v19054_v11, %v13633_v23  ;;  %v13670_v43 = vpop.eup %11562  ;;  %v2647_v22 = vshrl.u32 %v19052_v57, %v13633_v23  ;;  %v2650_v16 = vshrl.u32 %v19053_v59, %v13633_v23  ;;  %v2652_v48 = vshll.u32 %v19053_v59, %v2643_v55 }
 0x2ec   :  { %19142 = vst [vmem:[#allocation64_spill] sm:$0xff] %v13670_v43  ;;  %v2653_v6 = vshrl.u32 %v19050_v8, %v13633_v23  ;;  %v13679_v56 = vpop.eup %11564  ;;  %vm10311_vm0 = vcmp.lt.s32.totalorder %v10310_v34, 0  ;;  %v2657_v12 = vor.u32 %v2656_v25, %v2655_v63  ;;  %v2537_v39 = vsel %vm2536_vm12, %v2535_v46, 0 }
 0x2ed   :  { %19143 = vst [vmem:[#allocation65_spill] sm:$0xff] %v13679_v56  ;;  %v2847_v26 = vadd.s32 1, %v10336_v20  ;;  %v13682_v4 = vmin.u32 %v2487_v33, %v13640_v7  ;;  %v2356_v43 = vsel %vm2350_vm15, %v2353_v30, %v2355_v1  ;;  %vm2664_vm4 = vcmp.lt.s32.totalorder %v13663_v28, 4 }
 0x2ee   :  { %v18805_v38 = vand.u32 2147483647, %v19135_v62  ;;  %vm2374_vm1 = vc.u32 %v13646_v15, %v13649_v32  ;;  %v2375_v55 = vadd.s32 1, %v13650_v36  ;;  %v2637_v56 = vor.u32 8388608, %v2636_v60 }
 0x2ef   :  { %v2660_v50 = vor.u32 %v2659_v5, %v2658_v24  ;;  %v2648_v63 = vor.u32 %v2647_v22, %v2646_v47  ;;  %v2651_v46 = vor.u32 %v2650_v16, %v2649_v27  ;;  %v2654_v25 = vor.u32 %v2653_v6, %v2652_v48 }
 0x2f0   :  { %v2539_v20 = vand.u32 31, %v2537_v39  ;;  %vm2661_vm6 = vcmp.lt.s32.totalorder %v13663_v28, 1  ;;  %vm2663_vm2 = vcmp.lt.s32.totalorder %v13663_v28, 3  ;;  %v2670_v2 = vsel %vm2664_vm4, %v2657_v12, 920167782 }
 0x2f1   :  { %vm2848_vm15 = vcmp.gt.s32.totalorder %v2847_v26, 0  ;;  %v13695_v30 = vmul.f32 %v2295_v53, %v2293_v49  ;;  %v13698_v33 = vsel %vm10311_vm0, 0, %v10310_v34  ;;  %v2372_v60 = vmul.u32 %v13620_v19, %v2356_v43 }
 0x2f2   :  { %v13703_v1 = vand.u32 8388607, %v18805_v38  ;;  %v2376_v27 = vsel %vm2374_vm1, %v2375_v55, %v13650_v36  ;;  %vm2662_vm12 = vcmp.lt.s32.totalorder %v13663_v28, 2  ;;  %v2674_v49 = vsel %vm2664_vm4, %v2660_v50, 1326507024 }
 0x2f3   :  { %v2669_v53 = vsel %vm2661_vm6, %v2648_v63, %v2651_v46  ;;  %v2671_v19 = vsel %vm2663_vm2, %v2654_v25, %v2670_v2  ;;  %v13717_v34 = vsub.s32 32, %v2539_v20  ;;  %v2849_v24 = vsel %vm2848_vm15, %v2847_v26, 0 }
 0x2f4   :  { %v13721_v22 = vshll.u32 %v2637_v56, 8  ;;  %v13724_v16 = vadd.s32 %v2376_v27, %v2372_v60  ;;  %v2673_v50 = vsel %vm2661_vm6, %v2651_v46, %v2654_v25  ;;  %v2675_v48 = vsel %vm2663_vm2, %v2657_v12, %v2674_v49  ;;  %v19144_v12 = vld [vmem:[#allocation28_spill] sm:$0xff] }
 0x2f5   :  { %v2533_v6 = vor.u32 8388608, %v13703_v1  ;;  %v2645_v26 = vshrl.u32 %v19057_v10, %v13633_v23  ;;  %v2672_v55 = vsel %vm2662_vm12, %v2669_v53, %v2671_v19  ;;  %v2551_v56 = vshll.u32 %v19050_v8, %v2539_v20 }
 0x2f6   :  { %v2851_v2 = vand.u32 31, %v2849_v24  ;;  %v2552_v60 = vshrl.u32 %v19051_v52, %v13717_v34  ;;  %v2554_v27 = vshll.u32 %v19051_v52, %v2539_v20  ;;  %v2555_v38 = vshrl.u32 %v19054_v11, %v13717_v34 }
 0x2f7   :  { %v2736_v49 = vand.u32 2139095040, %v19144_v12  ;;  %v2676_v1 = vsel %vm2662_vm12, %v2673_v50, %v2675_v48  ;;  %v13744_v23 = vshrl.u32 %v2537_v39, 5  ;;  %v2542_v53 = vshll.u32 %v19057_v10, %v2539_v20 }
 0x2f8   :  { %v2545_v19 = vshll.u32 %v19052_v57, %v2539_v20  ;;  %v2543_v47 = vshrl.u32 %v19052_v57, %v13717_v34  ;;  %v2546_v43 = vshrl.u32 %v19053_v59, %v13717_v34  ;;  %v2548_v5 = vshll.u32 %v19053_v59, %v2539_v20 }
 0x2f9   :  { %v2549_v36 = vshrl.u32 %v19050_v8, %v13717_v34  ;;  %v2666_v50 = vsel %vm2664_vm4, %v2654_v25, 2102212464  ;;  %v13758_v39 = vmul.u32.u64.low %v13721_v22, %v2672_v55  ;;  %v13759_v48 = vmul.u32.u64.high %v13721_v22, %v2672_v55, %v13758_v39 }
 0x2fa   :  { %v13762_v45 = vsub.s32 32, %v2851_v2  ;;  %v2378_v31 = vadd.s32 536870912, %v13724_v16  ;;  %v2553_v21 = vor.u32 %v2552_v60, %v2551_v56  ;;  %v2556_v14 = vor.u32 %v2555_v38, %v2554_v27 }
 0x2fb   :  { %v2737_v40 = vshrl.u32 %v2736_v49, 23  ;;  %v2665_v20 = vsel %vm2661_vm6, %v2645_v26, %v2648_v63  ;;  %v13768_v37 = vmul.u32.u64.low %v13721_v22, %v2676_v1  ;;  %v13769_v35 = vmul.u32.u64.high %v13721_v22, %v2676_v1, %v13768_v37 }
 0x2fc   :  { %vm18817_vm0 = vcmp.lt.s32.totalorder %v13744_v23, 4  ;;  %v2667_v25 = vsel %vm2663_vm2, %v2651_v46, %v2666_v50  ;;  %v13774_v55 = vor.u32 %v2543_v47, %v2542_v53  ;;  %v13776_v13 = vor.u32 %v2546_v43, %v2545_v19 }
 0x2fd   :  { %v13778_v17 = vor.u32 %v2549_v36, %v2548_v5  ;;  %vm18821_vm4 = vcmp.lt.s32.totalorder %v13744_v23, 1  ;;  %vm18820_vm1 = vcmp.lt.s32.totalorder %v13744_v23, 3  ;;  %v2863_v38 = vshll.u32 %v19050_v8, %v2851_v2 }
 0x2fe   :  { %v2864_v37 = vshrl.u32 %v19051_v52, %v13762_v45  ;;  %v2566_v63 = vsel %vm18817_vm0, %v2553_v21, 920167782  ;;  %v2570_v46 = vsel %vm18817_vm0, %v2556_v14, 1326507024  ;;  %v13789_v47 = vshrl.u32 %v2849_v24, 5 }
 0x2ff   :  { %v10332_v43 = vadd.s32 4294967169, %v2737_v40  ;;  %v2854_v5 = vshll.u32 %v19057_v10, %v2851_v2  ;;  %v2855_v36 = vshrl.u32 %v19052_v57, %v13762_v45  ;;  %v2857_v26 = vshll.u32 %v19052_v57, %v2851_v2 }
 0x300   :  { %v2860_v56 = vshll.u32 %v19053_v59, %v2851_v2  ;;  %v2858_v60 = vshrl.u32 %v19053_v59, %v13762_v45  ;;  %v2861_v27 = vshrl.u32 %v19050_v8, %v13762_v45  ;;  %v2866_v14 = vshll.u32 %v19051_v52, %v2851_v2 }
 0x301   :  { %v2867_v40 = vshrl.u32 %v19054_v11, %v13762_v45  ;;  %v13803_v24 = vshrl.u32 %v2378_v31, 30  ;;  %v2668_v49 = vsel %vm2662_vm12, %v2665_v20, %v2667_v25  ;;  %v13807_v1 = vshll.u32 %v2533_v6, 8  ;;  %v13817_v31 = vpop.f32.mrb[49].mxu0 }
 0x302   :  { %v2865_v53 = vor.u32 %v2864_v37, %v2863_v38  ;;  %vm2558_vm6 = vcmp.lt.s32.totalorder %v13744_v23, 2  ;;  %v2565_v19 = vsel %vm18821_vm4, %v13774_v55, %v13776_v13  ;;  %v19146_v2 = vand.u32 2147483647, %v19140_v41  ;;  %19147 = vst [vmem:[#allocation67_spill] sm:$0xff] %v13817_v31 }
 0x303   :  { %19145 = vst [vmem:[#allocation66_spill] sm:$0xff] %v13803_v24  ;;  %vm18822_vm2 = vcmp.lt.s32.totalorder %v13789_v47, 4  ;;  %v19148_v28 = vand.u32 2147483647, %v12156_v51  ;;  %v19149_v6 = vmov 0  ;;  %v2567_v20 = vsel %vm18820_vm1, %v13778_v17, %v2566_v63 }
 0x304   :  { %v2844_v50 = vand.u32 8388607, %v19146_v2  ;;  %v2569_v25 = vsel %vm18821_vm4, %v13776_v13, %v13778_v17  ;;  %v2571_v38 = vsel %vm18820_vm1, %v2553_v21, %v2570_v46  ;;  %v2743_v37 = vadd.s32 1, %v10332_v43 }
 0x305   :  { %vm13821_vm15 = vcmp.le.f32.partialorder %v19148_v28, 0.7853982  ;;  %v13834_v2 = vor.u32 %v2855_v36, %v2854_v5  ;;  %v13836_v31 = vor.u32 %v2858_v60, %v2857_v26  ;;  %v2862_v28 = vor.u32 %v2861_v27, %v2860_v56 }
 0x306   :  { %v19150_v6 = vsel %vm13821_vm15, 4294967295, %v19149_v6  ;;  %v2868_v41 = vor.u32 %v2867_v40, %v2866_v14  ;;  %v2687_v62 = vadd.s32 1, %v13759_v48  ;;  %vm2869_vm12 = vcmp.lt.s32.totalorder %v13789_v47, 1 }
 0x307   :  { %19151 = vst [vmem:[#allocation68_spill] sm:$0xff] %v19150_v6  ;;  %vm2871_vm0 = vcmp.lt.s32.totalorder %v13789_v47, 3  ;;  %v2878_v63 = vsel %vm18822_vm2, %v2865_v53, 920167782  ;;  %v19152_v29 = vsub.s32 4294967266, %v13698_v33  ;;  %vm2686_vm1 = vc.u32 %v13769_v35, %v13758_v39 }
 0x308   :  { %v2568_v21 = vsel %vm2558_vm6, %v2565_v19, %v2567_v20  ;;  %v2845_v46 = vor.u32 8388608, %v2844_v50  ;;  %v2380_v43 = vshll.u32 %v13803_v24, 30  ;;  %v2684_v5 = vmul.u32 %v13721_v22, %v2668_v49 }
 0x309   :  { %v2186_v61 = vadd.s32 127, %v19152_v29  ;;  %v2572_v36 = vsel %vm2558_vm6, %v2569_v25, %v2571_v38  ;;  %vm2744_vm4 = vcmp.gt.s32.totalorder %v2743_v37, 0  ;;  %vm18824_vm2 = vcmp.lt.s32.totalorder %v13789_v47, 2 }
 0x30a   :  { %v2877_v29 = vsel %vm2869_vm12, %v13834_v2, %v13836_v31  ;;  %v2879_v26 = vsel %vm2871_vm0, %v2862_v28, %v2878_v63  ;;  %vm19153_vm11 = vcmp.lt.s32.totalorder %v13789_v47, 4  ;;  %v19154_v60 = vclz %v13682_v4 }
 0x30b   :  { %v2882_v56 = vsel %vm19153_vm11, %v2868_v41, 1326507024  ;;  %v2688_v27 = vsel %vm2686_vm1, %v2687_v62, %v13759_v48  ;;  %v13866_v14 = vmul.u32.u64.low %v13807_v1, %v2568_v21  ;;  %v13867_v40 = vmul.u32.u64.high %v13807_v1, %v2568_v21, %v13866_v14 }
 0x30c   :  { %v10322_v22 = vadd.s32 4294967294, %v19154_v60  ;;  %v13871_v49 = vmul.u32.u64.low %v13807_v1, %v2572_v36  ;;  %v13872_v19 = vmul.u32.u64.high %v13807_v1, %v2572_v36, %v13871_v49  ;;  %v13874_v50 = vshll.u32 %v2845_v46, 8 }
 0x30d   :  { %v2745_v20 = vsel %vm2744_vm4, %v2743_v37, 0  ;;  %v2541_v41 = vshrl.u32 %v19057_v10, %v13717_v34  ;;  %v2880_v4 = vsel %vm18824_vm2, %v2877_v29, %v2879_v26  ;;  %v2881_v62 = vsel %vm2869_vm12, %v13836_v31, %v2862_v28 }
 0x30e   :  { %v2883_v48 = vsel %vm2871_vm0, %v2865_v53, %v2882_v56  ;;  %v13889_v25 = vsel %vm13821_vm15, %v12156_v51, %v13629_v54  ;;  %v13892_v38 = vsub.s32 %v13724_v16, %v2380_v43  ;;  %v13894_v34 = vadd.s32 %v2688_v27, %v2684_v5  ;;  %v19160_v27 = vld [vmem:[#allocation30_spill] sm:$0xff] }
 0x30f   :  { %vm19155_vm11 = vcmp.lt.s32.totalorder %v13744_v23, 4  ;;  %v2182_v53 = vshll.u32 %v13560_v58, %v13698_v33  ;;  %vm10323_vm4 = vcmp.lt.s32.totalorder %v10322_v22, 0  ;;  %v2747_v21 = vand.u32 31, %v2745_v20 }
 0x310   :  { %v2562_v37 = vsel %vm19155_vm11, %v13778_v17, 2102212464  ;;  %v19156_v46 = vsub.s32 32, %v13698_v33  ;;  %v2884_v16 = vsel %vm18824_vm2, %v2881_v62, %v2883_v48  ;;  %v2187_v17 = vshll.u32 %v2186_v61, 23 }
 0x311   :  { %v13908_v43 = vmul.u32.u64.low %v13874_v50, %v2880_v4  ;;  %v13909_v5 = vmul.u32.u64.high %v13874_v50, %v2880_v4, %v13908_v43  ;;  %vm19157_vm1 = vcmp.lt.s32.totalorder %v13744_v23, 1  ;;  %vm19158_vm11 = vcmp.lt.s32.totalorder %v13744_v23, 3 }
 0x312   :  { %v2183_v54 = vshrl.u32 %v13637_v9, %v19156_v46  ;;  %v2561_v36 = vsel %vm19157_vm1, %v2541_v41, %v13774_v55  ;;  %v2563_v58 = vsel %vm19158_vm11, %v13776_v13, %v2562_v37  ;;  %v2853_v9 = vshrl.u32 %v19057_v10, %v13762_v45 }
 0x313   :  { %v13920_v33 = vsel %vm10323_vm4, 0, %v10322_v22  ;;  %v2383_v29 = vsub.s32 0, %v13892_v38  ;;  %v2690_v26 = vadd.s32 536870912, %v13894_v34  ;;  %vm19159_vm2 = vcmp.lt.s32.totalorder %v13789_v47, 4 }
 0x314   :  { %v2874_v61 = vsel %vm19159_vm2, %v2862_v28, 2102212464  ;;  %v13927_v56 = vmul.u32.u64.low %v13874_v50, %v2884_v16  ;;  %v13928_v60 = vmul.u32.u64.high %v13874_v50, %v2884_v16, %v13927_v56  ;;  %v13930_v55 = vsub.s32 32, %v2747_v21  ;;  %v19161_v28 = vld [vmem:[#allocation13_spill] sm:$0xff] }
 0x315   :  { %v3048_v13 = vand.u32 2139095040, %v19160_v27  ;;  %v13933_v49 = vor.u32 %v2183_v54, %v2182_v53  ;;  %v13937_v45 = vadd.s32 %v13465_v0, %v13474_v3  ;;  %v2564_v22 = vsel %vm2558_vm6, %v2561_v36, %v2563_v58 }
 0x316   :  { %v2583_v41 = vadd.s32 1, %v13867_v40  ;;  %vm18831_vm2 = vcmp.lt.s32.totalorder %v19161_v28, 0  ;;  %v13943_v4 = vor.u32 4788187, %v2187_v17  ;;  %vm2582_vm4 = vc.u32 %v13872_v19, %v13866_v14 }
 0x317   :  { %v2873_v62 = vsel %vm2869_vm12, %v2853_v9, %v13834_v2  ;;  %v2875_v0 = vsel %vm2871_vm0, %v13836_v31, %v2874_v61  ;;  %v2497_v3 = vsub.s32 4294967266, %v13920_v33  ;;  %v10317_v23 = vmin.u32 %v2383_v29, %v13892_v38 }
 0x318   :  { %v13955_v48 = vshrl.u32 %v2690_v26, 30  ;;  %v18830_v37 = vand.u32 2147483647, %v19144_v12  ;;  %v2580_v53 = vmul.u32 %v13807_v1, %v2564_v22  ;;  %v2759_v46 = vshll.u32 %v19050_v8, %v2747_v21 }
 0x319   :  { %v2760_v54 = vshrl.u32 %v19051_v52, %v13930_v55  ;;  %v3049_v2 = vshrl.u32 %v3048_v13, 23  ;;  %v2584_v16 = vsel %vm2582_vm4, %v2583_v41, %v13867_v40  ;;  %vm19162_vm0 = vcmp.lt.s32.totalorder %v13789_v47, 2 }
 0x31a   :  { %v2876_v31 = vsel %vm19162_vm0, %v2873_v62, %v2875_v0  ;;  %v2895_v17 = vadd.s32 1, %v13909_v5  ;;  %v13966_v36 = vshrl.u32 %v2745_v20, 5  ;;  %v2750_v58 = vshll.u32 %v19057_v10, %v2747_v21 }
 0x31b   :  { %v2753_v9 = vshll.u32 %v19052_v57, %v2747_v21  ;;  %v2762_v1 = vshll.u32 %v19051_v52, %v2747_v21  ;;  %v2763_v29 = vshrl.u32 %v19054_v11, %v13930_v55  ;;  %v2751_v26 = vshrl.u32 %v19052_v57, %v13930_v55 }
 0x31c   :  { %v2754_v47 = vshrl.u32 %v19053_v59, %v13930_v55  ;;  %v2756_v40 = vshll.u32 %v19053_v59, %v2747_v21  ;;  %v2757_v20 = vshrl.u32 %v19050_v8, %v13930_v55  ;;  %v2493_v61 = vsub.s32 32, %v13920_v33 }
 0x31d   :  { %vm2894_vm6 = vc.u32 %v13928_v60, %v13908_v43  ;;  %v2761_v56 = vor.u32 %v2760_v54, %v2759_v46  ;;  %v10344_v13 = vadd.s32 4294967169, %v3049_v2  ;;  %v19163_v22 = vand.u32 2147483647, %v19161_v28 }
 0x31e   :  { %v19164_v41 = vmov 0  ;;  %v2498_v62 = vadd.s32 127, %v2497_v3  ;;  %v2692_v0 = vshll.u32 %v13955_v48, 30  ;;  %v2740_v21 = vand.u32 8388607, %v18830_v37 }
 0x31f   :  { %vm13985_vm12 = vcmp.le.f32.partialorder %v19163_v22, 0.7853982  ;;  %vm2768_vm1 = vcmp.lt.s32.totalorder %v13966_v36, 4  ;;  %v2385_v63 = vclz %v10317_v23  ;;  %v13993_v51 = vadd.s32 %v2584_v16, %v2580_v53 }
 0x320   :  { %v19165_v41 = vsel %vm13985_vm12, 4294967295, %v19164_v41  ;;  %v2892_v46 = vmul.u32 %v13874_v50, %v2876_v31  ;;  %v2764_v54 = vor.u32 %v2763_v29, %v2762_v1  ;;  %v2896_v2 = vsel %vm2894_vm6, %v2895_v17, %v13909_v5 }
 0x321   :  { %19166 = vst [vmem:[#allocation69_spill] sm:$0xff] %v19165_v41  ;;  %v2752_v22 = vor.u32 %v2751_v26, %v2750_v58  ;;  %v2755_v6 = vor.u32 %v2754_v47, %v2753_v9  ;;  %v2758_v24 = vor.u32 %v2757_v20, %v2756_v40  ;;  %vm2765_vm11 = vcmp.lt.s32.totalorder %v13966_v36, 1  ;;  %v14025_v26 = vpop.f32.mrb[50].mxu0 }
 0x322   :  { %vm2767_vm4 = vcmp.lt.s32.totalorder %v13966_v36, 3  ;;  %v2774_v3 = vsel %vm2768_vm1, %v2761_v56, 920167782  ;;  %v3055_v37 = vadd.s32 1, %v10344_v13  ;;  %v19167_v23 = vxor.u32 2147483648, %v13695_v30  ;;  %19169 = vst [vmem:[#allocation70_spill] sm:$0xff] %v14025_v26 }
 0x323   :  { %v2191_v53 = vcvt.s32.f32 %v13933_v49  ;;  %v14008_v5 = vsub.s32 %v13894_v34, %v2692_v0  ;;  %v2741_v16 = vor.u32 8388608, %v2740_v21  ;;  %v2189_v31 = vand.u32 2147483647, %v13943_v4  ;;  %v19168_v49 = vld [vmem:[#allocation14_spill] sm:$0xff] }
 0x324   :  { %v2298_v50 = vsel %vm18831_vm2, %v19167_v23, %v13695_v30  ;;  %v10318_v17 = vadd.s32 4294967294, %v2385_v63  ;;  %v2586_v58 = vadd.s32 536870912, %v13993_v51  ;;  %v2778_v9 = vsel %vm2768_vm1, %v2764_v54, 1326507024 }
 0x325   :  { %v14014_v1 = vadd.s32 %v2896_v2, %v2892_v46  ;;  %vm2766_vm0 = vcmp.lt.s32.totalorder %v13966_v36, 2  ;;  %v2773_v30 = vsel %vm2765_vm11, %v2752_v22, %v2755_v6  ;;  %v2775_v34 = vsel %vm2767_vm4, %v2758_v24, %v2774_v3 }
 0x326   :  { %v2494_v63 = vshll.u32 %v13640_v7, %v13920_v33  ;;  %v2495_v4 = vshrl.u32 %v13937_v45, %v2493_v61  ;;  %v2499_v29 = vshll.u32 %v2498_v62, 23  ;;  %vm3056_vm2 = vcmp.gt.s32.totalorder %v3055_v37, 0  ;;  %v19170_v33 = vld [vmem:[#allocation48_spill] sm:$0xff] }
 0x327   :  { %v2695_v47 = vsub.s32 0, %v14008_v5  ;;  %v2777_v40 = vsel %vm2765_vm11, %v2755_v6, %v2758_v24  ;;  %v2779_v20 = vsel %vm2767_vm4, %v2761_v56, %v2778_v9  ;;  %v14032_v13 = vshll.u32 %v2741_v16, 8 }
 0x328   :  { %v2192_v0 = vmul.f32 %v2191_v53, %v2189_v31  ;;  %vm10319_vm6 = vcmp.lt.s32.totalorder %v10318_v17, 0  ;;  %v14034_v21 = vshrl.u32 %v2586_v58, 30  ;;  %v2776_v7 = vsel %vm2766_vm0, %v2773_v30, %v2775_v34 }
 0x329   :  { %11566 = vcosq.f32 %v13889_v25  ;;  %v2299_v45 = vsub.s32 4, %v19170_v33  ;;  %v2898_v61 = vadd.s32 536870912, %v14014_v1  ;;  %v3057_v62 = vsel %vm3056_vm2, %v3055_v37, 0 }
 0x32a   :  { %v14044_v56 = vsel %vm13985_vm12, %v19161_v28, %v2298_v50  ;;  %v2496_v46 = vor.u32 %v2495_v4, %v2494_v63  ;;  %v2500_v54 = vor.u32 4788187, %v2499_v29  ;;  %v2780_v2 = vsel %vm2766_vm0, %v2777_v40, %v2779_v20 }
 0x32b   :  { %v14048_v3 = vsel %vm10319_vm6, 0, %v10318_v17  ;;  %v10329_v23 = vmin.u32 %v2695_v47, %v14008_v5  ;;  %v14052_v53 = vmul.u32.u64.low %v14032_v13, %v2776_v7  ;;  %v14053_v16 = vmul.u32.u64.high %v14032_v13, %v2776_v7, %v14052_v53  ;;  %v19172_v47 = vld [vmem:[#allocation31_spill] sm:$0xff] }
 0x32c   :  { %v2193_v37 = vxor.u32 2147483648, %v2192_v0  ;;  %v2588_v31 = vshll.u32 %v14034_v21, 30  ;;  %v2749_v50 = vshrl.u32 %v19057_v10, %v13930_v55  ;;  %v3059_v58 = vand.u32 31, %v3057_v62 }
 0x32d   :  { %v14059_v9 = vshrl.u32 %v2898_v61, 30  ;;  %v2770_v17 = vsel %vm2768_vm1, %v2758_v24, 2102212464  ;;  %v14064_v30 = vmul.u32.u64.low %v14032_v13, %v2780_v2  ;;  %v14065_v34 = vmul.u32.u64.high %v14032_v13, %v2780_v2, %v14064_v30 }
 0x32e   :  { %v2501_v63 = vand.u32 2147483647, %v2500_v54  ;;  %v2503_v4 = vcvt.s32.f32 %v2496_v46  ;;  %v2393_v29 = vsub.s32 4294967266, %v14048_v3  ;;  %v2944_v40 = vand.u32 2139095040, %v19172_v47 }
 0x32f   :  { %19171 = vst [vmem:[#allocation48_spill] sm:$0xff] %v14059_v9  ;;  %11568 = vsinq.f32 %v13889_v25  ;;  %vm19173_vm2 = vcmp.lt.s32.totalorder %v19161_v28, 0  ;;  %v2697_v24 = vclz %v10329_v23  ;;  %v2769_v7 = vsel %vm2765_vm11, %v2749_v50, %v2752_v22 }
 0x330   :  { %v14073_v55 = vsel %vm19173_vm2, %v2299_v45, %v19170_v33  ;;  %11570 = vcosq.f32 %v14044_v56  ;;  %v2771_v61 = vsel %vm2767_vm4, %v2755_v6, %v2770_v17  ;;  %v14081_v46 = vsub.s32 32, %v3059_v58 }
 0x331   :  { %19174 = vst [vmem:[#allocation71_spill] sm:$0xff] %v14073_v55  ;;  %vm19175_vm1 = vcmp.lt.s32.totalorder %v19168_v49, 0  ;;  %v2373_v33 = vadd.s32 %v13649_v32, %v13646_v15  ;;  %v14090_v45 = vsub.s32 %v13993_v51, %v2588_v31  ;;  %v2900_v54 = vshll.u32 %v14059_v9, 30 }
 0x332   :  { %v14085_v25 = vsel %vm19175_vm1, %v2193_v37, %v2192_v0  ;;  %v14093_v2 = vmul.f32 %v2503_v4, %v2501_v63  ;;  %v2389_v22 = vsub.s32 32, %v14048_v3  ;;  %v2394_v23 = vadd.s32 127, %v2393_v29  ;;  %v14116_v29 = vpop.f32.mrb[51].mxu0 }
 0x333   :  { %v2945_v6 = vshrl.u32 %v2944_v40, 23  ;;  %v14096_v50 = vpop.eup %11566  ;;  %v10330_v17 = vadd.s32 4294967294, %v2697_v24  ;;  %v2772_v0 = vsel %vm2766_vm0, %v2769_v7, %v2771_v61  ;;  %v2791_v37 = vadd.s32 1, %v14053_v16  ;;  %19177 = vst [vmem:[#allocation73_spill] sm:$0xff] %v14116_v29 }
 0x334   :  { %19176 = vst [vmem:[#allocation72_spill] sm:$0xff] %v14096_v50  ;;  %v3071_v51 = vshll.u32 %v19050_v8, %v3059_v58  ;;  %v3072_v32 = vshrl.u32 %v19051_v52, %v14081_v46  ;;  %v3074_v31 = vshll.u32 %v19051_v52, %v3059_v58  ;;  %v3075_v30 = vshrl.u32 %v19054_v11, %v14081_v46 }
 0x335   :  { %v2591_v63 = vsub.s32 0, %v14090_v45  ;;  %v14110_v4 = vsub.s32 %v14014_v1, %v2900_v54  ;;  %vm2790_vm11 = vc.u32 %v14065_v34, %v14052_v53  ;;  %v14114_v36 = vshrl.u32 %v3057_v62, 5 }
 0x336   :  { %v19178_v40 = vand.u32 2147483647, %v19168_v49  ;;  %v19179_v24 = vmov 0  ;;  %v2788_v7 = vmul.u32 %v14032_v13, %v2772_v0  ;;  %v3062_v61 = vshll.u32 %v19057_v10, %v3059_v58 }
 0x337   :  { %v3065_v1 = vshll.u32 %v19052_v57, %v3059_v58  ;;  %v10340_v54 = vadd.s32 4294967169, %v2945_v6  ;;  %v3063_v20 = vshrl.u32 %v19052_v57, %v14081_v46  ;;  %v3066_v62 = vshrl.u32 %v19053_v59, %v14081_v46 }
 0x338   :  { %vm14120_vm4 = vcmp.le.f32.partialorder %v19178_v40, 0.7853982  ;;  %v3068_v15 = vshll.u32 %v19053_v59, %v3059_v58  ;;  %v3069_v40 = vshrl.u32 %v19050_v8, %v14081_v46  ;;  %v2390_v28 = vshll.u32 %v13892_v38, %v14048_v3 }
 0x339   :  { %v19180_v24 = vsel %vm14120_vm4, 4294967295, %v19179_v24  ;;  %v2792_v13 = vsel %vm2790_vm11, %v2791_v37, %v14053_v16  ;;  %v3073_v0 = vor.u32 %v3072_v32, %v3071_v51  ;;  %v3076_v41 = vor.u32 %v3075_v30, %v3074_v31  ;;  %v14137_v55 = vpop.eup %11568 }
 0x33a   :  { %19181 = vst [vmem:[#allocation74_spill] sm:$0xff] %v19180_v24  ;;  %19182 = vst [vmem:[#allocation75_spill] sm:$0xff] %v14137_v55  ;;  %v2391_v6 = vshrl.u32 %v2373_v33, %v2389_v22  ;;  %v2395_v50 = vshll.u32 %v2394_v23, 23  ;;  %v19183_v29 = vand.u32 2147483647, %v19160_v27  ;;  %vm18841_vm0 = vcmp.lt.s32.totalorder %v14114_v36, 4  ;;  %v14142_v58 = vpop.eup %11570 }
 0x33b   :  { %19184 = vst [vmem:[#allocation76_spill] sm:$0xff] %v14142_v58  ;;  %vm10331_vm6 = vcmp.lt.s32.totalorder %v10330_v17, 0  ;;  %v10325_v9 = vmin.u32 %v2591_v63, %v14090_v45  ;;  %v2903_v38 = vsub.s32 0, %v14110_v4  ;;  %v2951_v3 = vadd.s32 1, %v10340_v54 }
 0x33c   :  { %v3052_v26 = vand.u32 8388607, %v19183_v29  ;;  %v14146_v16 = vadd.s32 %v2792_v13, %v2788_v7  ;;  %v3064_v37 = vor.u32 %v3063_v20, %v3062_v61  ;;  %v3067_v51 = vor.u32 %v3066_v62, %v3065_v1 }
 0x33d   :  { %v3070_v32 = vor.u32 %v3069_v40, %v3068_v15  ;;  %v3086_v33 = vsel %vm18841_vm0, %v3073_v0, 920167782  ;;  %v3090_v22 = vsel %vm18841_vm0, %v3076_v41, 1326507024  ;;  %v2392_v23 = vor.u32 %v2391_v6, %v2390_v28  ;;  %v19185_v15 = vld [vmem:[#allocation35_spill] sm:$0xff] }
 0x33e   :  { %v2396_v31 = vor.u32 4788187, %v2395_v50  ;;  %v14154_v30 = vsel %vm10331_vm6, 0, %v10330_v17  ;;  %v3053_v63 = vor.u32 8388608, %v3052_v26  ;;  %v10337_v20 = vmin.u32 %v2903_v38, %v14110_v4 }
 0x33f   :  { %vm3078_vm12 = vcmp.lt.s32.totalorder %v14114_v36, 2  ;;  %vm2952_vm2 = vcmp.gt.s32.totalorder %v2951_v3, 0  ;;  %v3256_v29 = vand.u32 2139095040, %v19185_v15  ;;  %vm19186_vm1 = vcmp.lt.s32.totalorder %v14114_v36, 1 }
 0x340   :  { %v3085_v7 = vsel %vm19186_vm1, %v3064_v37, %v3067_v51  ;;  %vm19187_vm15 = vcmp.lt.s32.totalorder %v14114_v36, 3  ;;  %vm19188_vm0 = vmmov %vm19186_vm1  ;;  %11572 = vsinq.f32 %v14044_v56  ;;  %v19190_v50 = vsub.s32 4, %v13510_v42 }
 0x341   :  { %v3087_v41 = vsel %vm19187_vm15, %v3070_v32, %v3086_v33  ;;  %v3089_v28 = vsel %vm19188_vm0, %v3067_v51, %v3070_v32  ;;  %vm19189_vm6 = vmmov %vm19187_vm15  ;;  %vm19191_vm11 = vcmp.lt.s32.totalorder %v19168_v49, 0  ;;  %v2593_v61 = vclz %v10325_v9 }
 0x342   :  { %v3091_v26 = vsel %vm19189_vm6, %v3073_v0, %v3090_v22  ;;  %v14174_v17 = vsel %vm19191_vm11, %v19190_v50, %v13510_v42  ;;  %v2794_v1 = vadd.s32 536870912, %v14146_v16  ;;  %v2197_v54 = vsel %vm14120_vm4, %v19168_v49, %v14085_v25 }
 0x343   :  { %19192 = vst [vmem:[#allocation77_spill] sm:$0xff] %v14174_v17  ;;  %v2507_v62 = vsub.s32 4, %v13597_v44  ;;  %v14182_v40 = vshll.u32 %v3053_v63, 8  ;;  %v2953_v56 = vsel %vm2952_vm2, %v2951_v3, 0  ;;  %v2505_v13 = vxor.u32 2147483648, %v14093_v2 }
 0x344   :  { %v2705_v0 = vsub.s32 4294967266, %v14154_v30  ;;  %v3088_v42 = vsel %vm3078_vm12, %v3085_v7, %v3087_v41  ;;  %v3092_v9 = vsel %vm3078_vm12, %v3089_v28, %v3091_v26  ;;  %v2397_v6 = vand.u32 2147483647, %v2396_v31 }
 0x345   :  { %v2399_v38 = vcvt.s32.f32 %v2392_v23  ;;  %v2905_v33 = vclz %v10337_v20  ;;  %v3257_v22 = vshrl.u32 %v3256_v29, 23  ;;  %v10326_v25 = vadd.s32 4294967294, %v2593_v61 }
 0x346   :  { %v14190_v50 = vshrl.u32 %v2794_v1, 30  ;;  %v3061_v3 = vshrl.u32 %v19057_v10, %v14081_v46  ;;  %v2955_v63 = vand.u32 31, %v2953_v56  ;;  %v2685_v23 = vadd.s32 %v13758_v39, %v13769_v35 }
 0x347   :  { %v14195_v49 = vmul.u32.u64.low %v14182_v40, %v3092_v9  ;;  %v14196_v24 = vmul.u32.u64.high %v14182_v40, %v3092_v9, %v14195_v49  ;;  %v14199_v7 = vmul.u32.u64.low %v14182_v40, %v3088_v42  ;;  %v14200_v41 = vmul.u32.u64.high %v14182_v40, %v3088_v42, %v14199_v7 }
 0x348   :  { %v2701_v31 = vsub.s32 32, %v14154_v30  ;;  %v2706_v20 = vadd.s32 127, %v2705_v0  ;;  %vm19193_vm15 = vcmp.lt.s32.totalorder %v14114_v36, 4  ;;  %11574 = vcosq.f32 %v2197_v54 }
 0x349   :  { %v3082_v29 = vsel %vm19193_vm15, %v3070_v32, 2102212464  ;;  %vm19194_vm0 = vcmp.lt.s32.totalorder %v19096_v18, 0  ;;  %v10338_v49 = vadd.s32 4294967294, %v2905_v33  ;;  %v10352_v28 = vadd.s32 4294967169, %v3257_v22 }
 0x34a   :  { %v14211_v46 = vsel %vm19194_vm0, %v2507_v62, %v13597_v44  ;;  %11576 = vsinq.f32 %v2197_v54  ;;  %vm10327_vm2 = vcmp.lt.s32.totalorder %v10326_v25, 0  ;;  %v2796_v26 = vshll.u32 %v14190_v50, 30  ;;  %vm19196_vm1 = vmmov %vm19194_vm0  ;;  %v14227_v1 = vpop.eup %11572 }
 0x34b   :  { %19195 = vst [vmem:[#allocation78_spill] sm:$0xff] %v14211_v46  ;;  %v14214_v61 = vsub.s32 32, %v2955_v63  ;;  %v14219_v35 = vsel %vm19196_vm1, %v2505_v13, %v14093_v2  ;;  %v14221_v39 = vmul.f32 %v2399_v38, %v2397_v6  ;;  %vm19197_vm11 = vcmp.lt.s32.totalorder %v14114_v36, 1  ;;  %19198 = vst [vmem:[#allocation79_spill] sm:$0xff] %v14227_v1 }
 0x34c   :  { %v3081_v32 = vsel %vm19197_vm11, %v3061_v3, %v3064_v37  ;;  %v3083_v44 = vsel %vm19189_vm6, %v3067_v51, %v3082_v29  ;;  %v2702_v54 = vshll.u32 %v14008_v5, %v14154_v30  ;;  %v2703_v62 = vshrl.u32 %v2685_v23, %v2701_v31 }
 0x34d   :  { %v2707_v0 = vshll.u32 %v2706_v20, 23  ;;  %v2581_v42 = vadd.s32 %v13866_v14, %v13872_v19  ;;  %v14233_v2 = vsel %vm10327_vm2, 0, %v10326_v25  ;;  %vm10339_vm15 = vcmp.lt.s32.totalorder %v10338_v49, 0 }
 0x34e   :  { %v18844_v13 = vand.u32 2147483647, %v19172_v47  ;;  %v3263_v9 = vadd.s32 1, %v10352_v28  ;;  %v14237_v37 = vsub.s32 %v14146_v16, %v2796_v26  ;;  %v3084_v51 = vsel %vm3078_vm12, %v3081_v32, %v3083_v44  ;;  %v14268_v26 = vpop.f32.mrb[52].mxu0 }
 0x34f   :  { %v2967_v6 = vshll.u32 %v19050_v8, %v2955_v63  ;;  %v2968_v5 = vshrl.u32 %v19051_v52, %v14214_v61  ;;  %v19199_v30 = vand.u32 2147483647, %v19096_v18  ;;  %v19200_v14 = vmov 0  ;;  %19203 = vst [vmem:[#allocation81_spill] sm:$0xff] %v14268_v26 }
 0x350   :  { %vm3102_vm2 = vc.u32 %v14196_v24, %v14199_v7  ;;  %v3103_v19 = vadd.s32 1, %v14200_v41  ;;  %v14253_v16 = vshrl.u32 %v2953_v56, 5  ;;  %v2958_v36 = vshll.u32 %v19057_v10, %v2955_v63 }
 0x351   :  { %vm14246_vm0 = vcmp.le.f32.partialorder %v19199_v30, 0.7853982  ;;  %v2961_v38 = vshll.u32 %v19052_v57, %v2955_v63  ;;  %v2964_v33 = vshll.u32 %v19053_v59, %v2955_v63  ;;  %v2970_v22 = vshll.u32 %v19051_v52, %v2955_v63 }
 0x352   :  { %v19201_v14 = vsel %vm14246_vm0, 4294967295, %v19200_v14  ;;  %v2971_v25 = vshrl.u32 %v19054_v11, %v14214_v61  ;;  %v2959_v3 = vshrl.u32 %v19052_v57, %v14214_v61  ;;  %v2962_v23 = vshrl.u32 %v19053_v59, %v14214_v61  ;;  %v14270_v63 = vpop.eup %11574 }
 0x353   :  { %19202 = vst [vmem:[#allocation80_spill] sm:$0xff] %v19201_v14  ;;  %v2965_v56 = vshrl.u32 %v19050_v8, %v14214_v61  ;;  %vm3264_vm12 = vcmp.gt.s32.totalorder %v3263_v9, 0  ;;  %v2704_v31 = vor.u32 %v2703_v62, %v2702_v54  ;;  %v2708_v20 = vor.u32 4788187, %v2707_v0  ;;  %19204 = vst [vmem:[#allocation82_spill] sm:$0xff] %v14270_v63 }
 0x354   :  { %v3100_v29 = vmul.u32 %v14182_v40, %v3084_v51  ;;  %v2969_v28 = vor.u32 %v2968_v5, %v2967_v6  ;;  %v2597_v32 = vsub.s32 32, %v14233_v2  ;;  %v3104_v44 = vsel %vm3102_vm2, %v3103_v19, %v14200_v41  ;;  %v14280_v54 = vpop.eup %11576 }
 0x355   :  { %v2948_v30 = vand.u32 8388607, %v18844_v13  ;;  %vm2976_vm1 = vcmp.lt.s32.totalorder %v14253_v16, 4  ;;  %19205 = vst [vmem:[#allocation83_spill] sm:$0xff] %v14280_v54  ;;  %v2601_v40 = vsub.s32 4294967266, %v14233_v2  ;;  %v14284_v62 = vsel %vm10339_vm15, 0, %v10338_v49 }
 0x356   :  { %v2972_v0 = vor.u32 %v2971_v25, %v2970_v22  ;;  %v3265_v51 = vsel %vm3264_vm12, %v3263_v9, 0  ;;  %v2799_v6 = vsub.s32 0, %v14237_v37  ;;  %v14287_v5 = vor.u32 %v2959_v3, %v2958_v36 }
 0x357   :  { %v14289_v46 = vor.u32 %v2962_v23, %v2961_v38  ;;  %v2966_v41 = vor.u32 %v2965_v56, %v2964_v33  ;;  %v14291_v19 = vadd.s32 %v3104_v44, %v3100_v29  ;;  %vm2973_vm11 = vcmp.lt.s32.totalorder %v14253_v16, 1 }
 0x358   :  { %vm2975_vm6 = vcmp.lt.s32.totalorder %v14253_v16, 3  ;;  %v2982_v13 = vsel %vm2976_vm1, %v2969_v28, 920167782  ;;  %v2709_v49 = vand.u32 2147483647, %v2708_v20  ;;  %v2711_v63 = vcvt.s32.f32 %v2704_v31 }
 0x359   :  { %v2949_v22 = vor.u32 8388608, %v2948_v30  ;;  %v3267_v9 = vand.u32 31, %v3265_v51  ;;  %v2598_v36 = vshll.u32 %v14090_v45, %v14233_v2  ;;  %v2599_v25 = vshrl.u32 %v2581_v42, %v2597_v32 }
 0x35a   :  { %v2602_v38 = vadd.s32 127, %v2601_v40  ;;  %v2986_v33 = vsel %vm2976_vm1, %v2972_v0, 1326507024  ;;  %v2913_v3 = vsub.s32 4294967266, %v14284_v62  ;;  %vm18853_vm15 = vcmp.lt.s32.totalorder %v14253_v16, 2 }
 0x35b   :  { %v2981_v23 = vsel %vm2973_vm11, %v14287_v5, %v14289_v46  ;;  %v2983_v56 = vsel %vm2975_vm6, %v2966_v41, %v2982_v13  ;;  %v14313_v45 = vsel %vm14246_vm0, %v19096_v18, %v14219_v35  ;;  %v10333_v2 = vmin.u32 %v2799_v6, %v14237_v37 }
 0x35c   :  { %v3106_v31 = vadd.s32 536870912, %v14291_v19  ;;  %v2985_v20 = vsel %vm2973_vm11, %v14289_v46, %v2966_v41  ;;  %v2987_v29 = vsel %vm2975_vm6, %v2969_v28, %v2986_v33  ;;  %v14323_v13 = vshll.u32 %v2949_v22, 8 }
 0x35d   :  { %v14325_v32 = vsub.s32 32, %v3267_v9  ;;  %v14327_v44 = vmul.f32 %v2711_v63, %v2709_v49  ;;  %v14329_v35 = vor.u32 %v2599_v25, %v2598_v36  ;;  %v2893_v30 = vadd.s32 %v13908_v43, %v13928_v60 }
 0x35e   :  { %v2984_v40 = vsel %vm18853_vm15, %v2981_v23, %v2983_v56  ;;  %v2603_v0 = vshll.u32 %v2602_v38, 23  ;;  %v2909_v6 = vsub.s32 32, %v14284_v62  ;;  %v2914_v42 = vadd.s32 127, %v2913_v3  ;;  %v19206_v56 = vld [vmem:[#allocation17_spill] sm:$0xff] }
 0x35f   :  { %v2801_v22 = vclz %v10333_v2  ;;  %v14337_v33 = vshrl.u32 %v3106_v31, 30  ;;  %v2957_v63 = vshrl.u32 %v19057_v10, %v14214_v61  ;;  %v2988_v49 = vsel %vm18853_vm15, %v2985_v20, %v2987_v29 }
 0x360   :  { %v14344_v43 = vmul.u32.u64.low %v14323_v13, %v2984_v40  ;;  %v14345_v60 = vmul.u32.u64.high %v14323_v13, %v2984_v40, %v14344_v43  ;;  %v3279_v36 = vshll.u32 %v19050_v8, %v3267_v9  ;;  %v3280_v25 = vshrl.u32 %v19051_v52, %v14325_v32 }
 0x361   :  { %v2978_v38 = vsel %vm2976_vm1, %v2966_v41, 2102212464  ;;  %v14353_v3 = vshrl.u32 %v3265_v51, 5  ;;  %v3282_v61 = vshll.u32 %v19051_v52, %v3267_v9  ;;  %v3283_v23 = vshrl.u32 %v19054_v11, %v14325_v32 }
 0x362   :  { %v14360_v2 = vmul.u32.u64.low %v14323_v13, %v2988_v49  ;;  %v14361_v31 = vmul.u32.u64.high %v14323_v13, %v2988_v49, %v14360_v2  ;;  %v3270_v20 = vshll.u32 %v19057_v10, %v3267_v9  ;;  %v3273_v29 = vshll.u32 %v19052_v57, %v3267_v9 }
 0x363   :  { %v3271_v41 = vshrl.u32 %v19052_v57, %v14325_v32  ;;  %v3274_v51 = vshrl.u32 %v19053_v59, %v14325_v32  ;;  %v3276_v40 = vshll.u32 %v19053_v59, %v3267_v9  ;;  %v3277_v28 = vshrl.u32 %v19050_v8, %v14325_v32 }
 0x364   :  { %v2604_v18 = vor.u32 4788187, %v2603_v0  ;;  %v2607_v14 = vcvt.s32.f32 %v14329_v35  ;;  %v2910_v49 = vshll.u32 %v14110_v4, %v14284_v62  ;;  %v3281_v2 = vor.u32 %v3280_v25, %v3279_v36  ;;  %v14384_v0 = vpop.f32.mrb[53].mxu0  ;;  %v19213_v62 = vld [vmem:[#allocation18_spill] sm:$0xff] }
 0x365   :  { %v19207_v54 = vand.u32 2147483647, %v19206_v56  ;;  %v19208_v17 = vmov 0  ;;  %v2911_v58 = vshrl.u32 %v2893_v30, %v2909_v6  ;;  %v19211_v1 = vand.u32 2147483647, %v19185_v15  ;;  %19212 = vst [vmem:[#allocation85_spill] sm:$0xff] %v14384_v0 }
 0x366   :  { %v3284_v55 = vor.u32 %v3283_v23, %v3282_v61  ;;  %v2915_v35 = vshll.u32 %v2914_v42, 23  ;;  %v10334_v26 = vadd.s32 4294967294, %v2801_v22  ;;  %v2977_v4 = vsel %vm2973_vm11, %v2957_v63, %v14287_v5  ;;  %v19215_v42 = vld [vmem:[#allocation37_spill] sm:$0xff] }
 0x367   :  { %vm14377_vm12 = vcmp.le.f32.partialorder %v19207_v54, 0.7853982  ;;  %v3260_v9 = vand.u32 8388607, %v19211_v1  ;;  %v2979_v54 = vsel %vm2975_vm6, %v14289_v46, %v2978_v38  ;;  %v3108_v30 = vshll.u32 %v14337_v33, 30 }
 0x368   :  { %v19209_v17 = vsel %vm14377_vm12, 4294967295, %v19208_v17  ;;  %v14394_v1 = vor.u32 %v3271_v41, %v3270_v20  ;;  %v14396_v6 = vor.u32 %v3274_v51, %v3273_v29  ;;  %v3278_v36 = vor.u32 %v3277_v28, %v3276_v40 }
 0x369   :  { %19210 = vst [vmem:[#allocation84_spill] sm:$0xff] %v19209_v17  ;;  %vm3285_vm15 = vcmp.lt.s32.totalorder %v14353_v3, 1  ;;  %vm19214_vm0 = vcmp.lt.s32.totalorder %v14353_v3, 4  ;;  %v3152_v22 = vand.u32 2139095040, %v19215_v42  ;;  %vm19216_vm11 = vcmp.lt.s32.totalorder %v14253_v16, 2 }
 0x36a   :  { %v3294_v5 = vsel %vm19214_vm0, %v3281_v2, 920167782  ;;  %v2980_v46 = vsel %vm19216_vm11, %v2977_v4, %v2979_v54  ;;  %v2999_v63 = vadd.s32 1, %v14345_v60  ;;  %v3261_v25 = vor.u32 8388608, %v3260_v9  ;;  %vm19217_vm6 = vmmov %vm19214_vm0  ;;  %v19227_v54 = vld [vmem:[#allocation66_spill] sm:$0xff] }
 0x36b   :  { %v3298_v38 = vsel %vm19217_vm6, %v3284_v55, 1326507024  ;;  %v2605_v61 = vand.u32 2147483647, %v2604_v18  ;;  %v2912_v28 = vor.u32 %v2911_v58, %v2910_v49  ;;  %v2916_v23 = vor.u32 4788187, %v2915_v35 }
 0x36c   :  { %vm2998_vm2 = vc.u32 %v14361_v31, %v14344_v43  ;;  %vm10335_vm1 = vcmp.lt.s32.totalorder %v10334_v26, 0  ;;  %v3293_v16 = vsel %vm3285_vm15, %v14394_v1, %v14396_v6  ;;  %vm19218_vm11 = vcmp.lt.s32.totalorder %v14353_v3, 3  ;;  %v19223_v55 = vld [vmem:[#allocation20_spill] sm:$0xff] }
 0x36d   :  { %v3295_v20 = vsel %vm19218_vm11, %v3278_v36, %v3294_v5  ;;  %v19219_v29 = vand.u32 2147483647, %v19213_v62  ;;  %v19220_v18 = vmov 0  ;;  %vm18858_vm4 = vcmp.lt.s32.totalorder %v19223_v55, 0  ;;  %vm19224_vm0 = vmmov %vm19218_vm11 }
 0x36e   :  { %v2996_v58 = vmul.u32 %v14323_v13, %v2980_v46  ;;  %v3297_v41 = vsel %vm3285_vm15, %v14396_v6, %v3278_v36  ;;  %v3299_v51 = vsel %vm19224_vm0, %v3281_v2, %v3298_v38  ;;  %v3153_v40 = vshrl.u32 %v3152_v22, 23 }
 0x36f   :  { %vm14419_vm6 = vcmp.le.f32.partialorder %v19219_v29, 0.7853982  ;;  %v19225_v49 = vxor.u32 2147483648, %v14221_v39  ;;  %vm19226_vm11 = vcmp.lt.s32.totalorder %v19206_v56, 0  ;;  %v14436_v35 = vsub.s32 %v14291_v19, %v3108_v30 }
 0x370   :  { %v19221_v18 = vsel %vm14419_vm6, 4294967295, %v19220_v18  ;;  %v3000_v4 = vsel %vm2998_vm2, %v2999_v63, %v14345_v60  ;;  %v14439_v13 = vshll.u32 %v3261_v25, 8  ;;  %v2403_v5 = vsub.s32 4, %v19227_v54 }
 0x371   :  { %19222 = vst [vmem:[#allocation86_spill] sm:$0xff] %v19221_v18  ;;  %v2402_v9 = vsel %vm19226_vm11, %v19225_v49, %v14221_v39  ;;  %v2713_v46 = vxor.u32 2147483648, %v14327_v44  ;;  %v2804_v2 = vsel %vm10335_vm1, 0, %v10334_v26  ;;  %vm19228_vm0 = vcmp.lt.s32.totalorder %v14353_v3, 2 }
 0x372   :  { %v3296_v22 = vsel %vm19228_vm0, %v3293_v16, %v3295_v20  ;;  %v2608_v38 = vmul.f32 %v2607_v14, %v2605_v61  ;;  %v2917_v29 = vand.u32 2147483647, %v2916_v23  ;;  %v2919_v0 = vcvt.s32.f32 %v2912_v28  ;;  %vm19229_vm11 = vmmov %vm19228_vm0 }
 0x373   :  { %v3300_v39 = vsel %vm19229_vm11, %v3297_v41, %v3299_v51  ;;  %11578 = vcosq.f32 %v14313_v45  ;;  %v2405_v19 = vsel %vm14377_vm12, %v19206_v56, %v2402_v9  ;;  %v19230_v60 = vand.u32 2147483647, %v19223_v55 }
 0x374   :  { %v19231_v30 = vmov 0  ;;  %v14458_v26 = vadd.s32 %v3000_v4, %v2996_v58  ;;  %v10348_v14 = vadd.s32 4294967169, %v3153_v40  ;;  %v2809_v63 = vsub.s32 4294967266, %v2804_v2 }
 0x375   :  { %vm14454_vm2 = vcmp.le.f32.partialorder %v19230_v60, 0.7853982  ;;  %v3111_v25 = vsub.s32 0, %v14436_v35  ;;  %v14462_v61 = vmul.u32.u64.low %v14439_v13, %v3296_v22  ;;  %v14463_v28 = vmul.u32.u64.high %v14439_v13, %v3296_v22, %v14462_v61 }
 0x376   :  { %v19232_v30 = vsel %vm14454_vm2, 4294967295, %v19231_v30  ;;  %vm19234_vm1 = vcmp.lt.s32.totalorder %v19213_v62, 0  ;;  %v3269_v16 = vshrl.u32 %v19057_v10, %v14325_v32  ;;  %v2609_v41 = vxor.u32 2147483648, %v2608_v38  ;;  %v19237_v32 = vld [vmem:[#allocation25_spill] sm:$0xff] }
 0x377   :  { %19233 = vst [vmem:[#allocation66_spill] sm:$0xff] %v19232_v30  ;;  %v2714_v23 = vsel %vm19234_vm1, %v2713_v46, %v14327_v44  ;;  %v14472_v20 = vmul.u32.u64.low %v14439_v13, %v3300_v39  ;;  %v14473_v58 = vmul.u32.u64.high %v14439_v13, %v3300_v39, %v14472_v20  ;;  %v2920_v51 = vmul.f32 %v2919_v0, %v2917_v29  ;;  %v19236_v44 = vld [vmem:[#allocation42_spill] sm:$0xff] }
 0x378   :  { %v2789_v40 = vadd.s32 %v14052_v53, %v14065_v34  ;;  %vm19235_vm0 = vcmp.lt.s32.totalorder %v14353_v3, 4  ;;  %v2805_v9 = vsub.s32 32, %v2804_v2  ;;  %v3002_v4 = vadd.s32 536870912, %v14458_v26 }
 0x379   :  { %v3290_v49 = vsel %vm19235_vm0, %v3278_v36, 2102212464  ;;  %v3159_v22 = vadd.s32 1, %v10348_v14  ;;  %v3464_v46 = vand.u32 2139095040, %v19236_v44  ;;  %11580 = vsinq.f32 %v14313_v45 }
 0x37a   :  { %v2810_v39 = vadd.s32 127, %v2809_v63  ;;  %v10345_v60 = vmin.u32 %v3111_v25, %v14436_v35  ;;  %11582 = vcosq.f32 %v2405_v19  ;;  %v2715_v0 = vsub.s32 4, %v13955_v48 }
 0x37b   :  { %v3289_v53 = vsel %vm3285_vm15, %v3269_v16, %v14394_v1  ;;  %vm19238_vm1 = vcmp.lt.s32.totalorder %v14353_v3, 3  ;;  %v2717_v45 = vsel %vm14419_vm6, %v19213_v62, %v2714_v23  ;;  %v2610_v36 = vsel %vm18858_vm4, %v2609_v41, %v2608_v38  ;;  %vm19239_vm15 = vmmov %vm19229_vm11 }
 0x37c   :  { %v3291_v34 = vsel %vm19238_vm1, %v14396_v6, %v3290_v49  ;;  %v2921_v29 = vxor.u32 2147483648, %v2920_v51  ;;  %v2806_v14 = vshll.u32 %v14237_v37, %v2804_v2  ;;  %v2807_v63 = vshrl.u32 %v2789_v40, %v2805_v9 }
 0x37d   :  { %v14497_v25 = vshrl.u32 %v3002_v4, 30  ;;  %vm3160_vm0 = vcmp.gt.s32.totalorder %v3159_v22, 0  ;;  %v3465_v20 = vshrl.u32 %v3464_v46, 23  ;;  %v2811_v1 = vshll.u32 %v2810_v39, 23  ;;  %v14502_v18 = vpop.eup %11578 }
 0x37e   :  { %v3113_v16 = vclz %v10345_v60  ;;  %v3292_v6 = vsel %vm19239_vm15, %v3289_v53, %v3291_v34  ;;  %v3311_v49 = vadd.s32 1, %v14463_v28  ;;  %19240 = vst [vmem:[#allocation87_spill] sm:$0xff] %v14502_v18  ;;  %vm19241_vm1 = vcmp.lt.s32.totalorder %v19206_v56, 0 }
 0x37f   :  { %v14507_v38 = vsel %vm19241_vm1, %v2403_v5, %v19227_v54  ;;  %11584 = vsinq.f32 %v2405_v19  ;;  %v19243_v37 = vand.u32 2147483647, %v19237_v32  ;;  %v19244_v2 = vmov 0 }
 0x380   :  { %19242 = vst [vmem:[#allocation88_spill] sm:$0xff] %v14507_v38  ;;  %vm3310_vm11 = vc.u32 %v14473_v58, %v14462_v61  ;;  %vm19247_vm15 = vcmp.lt.s32.totalorder %v19213_v62, 0  ;;  %11586 = vcosq.f32 %v2717_v45  ;;  %v2613_v54 = vsel %vm14454_vm2, %v19223_v55, %v2610_v36 }
 0x381   :  { %vm14511_vm4 = vcmp.le.f32.partialorder %v19243_v37, 0.7853982  ;;  %v14520_v3 = vsel %vm19247_vm15, %v2715_v0, %v13955_v48  ;;  %v3161_v5 = vsel %vm3160_vm0, %v3159_v22, 0  ;;  %vm19249_vm1 = vcmp.lt.s32.totalorder %v19237_v32, 0 }
 0x382   :  { %v19245_v2 = vsel %vm14511_vm4, 4294967295, %v19244_v2  ;;  %19248 = vst [vmem:[#allocation90_spill] sm:$0xff] %v14520_v3  ;;  %v2922_v19 = vsel %vm19249_vm1, %v2921_v29, %v2920_v51  ;;  %v3004_v23 = vshll.u32 %v14497_v25, 30  ;;  %v3308_v41 = vmul.u32 %v14439_v13, %v3292_v6  ;;  %v19251_v51 = vld [vmem:[#allocation48_spill] sm:$0xff]  ;;  %v19272_v3 = vld [vmem:[#allocation46_spill] sm:$0xff] }
 0x383   :  { %19246 = vst [vmem:[#allocation89_spill] sm:$0xff] %v19245_v2  ;;  %v10360_v40 = vadd.s32 4294967169, %v3465_v20  ;;  %v2808_v9 = vor.u32 %v2807_v63, %v2806_v14  ;;  %v2812_v4 = vor.u32 4788187, %v2811_v1  ;;  %v10346_v46 = vadd.s32 4294967294, %v3113_v16  ;;  %v14532_v22 = vpop.eup %11580 }
 0x384   :  { %v3312_v48 = vsel %vm3310_vm11, %v3311_v49, %v14463_v28  ;;  %11588 = vsinq.f32 %v2717_v45  ;;  %v2611_v39 = vsub.s32 4, %v14034_v21  ;;  %v3163_v60 = vand.u32 31, %v3161_v5  ;;  %19250 = vst [vmem:[#allocation91_spill] sm:$0xff] %v14532_v22  ;;  %v14539_v34 = vpop.eup %11582 }
 0x385   :  { %11590 = vcosq.f32 %v2613_v54  ;;  %v2923_v0 = vsub.s32 4, %v19251_v51  ;;  %v2925_v13 = vsel %vm14511_vm4, %v19237_v32, %v2922_v19  ;;  %v2819_v53 = vsub.s32 4, %v14190_v50  ;;  %19252 = vst [vmem:[#allocation48_spill] sm:$0xff] %v14539_v34 }
 0x386   :  { %11592 = vsinq.f32 %v2613_v54  ;;  %v14542_v28 = vsub.s32 %v14458_v26, %v3004_v23  ;;  %v14544_v45 = vadd.s32 %v3312_v48, %v3308_v41  ;;  %v3471_v36 = vadd.s32 1, %v10360_v40  ;;  %v19262_v40 = vld [vmem:[#allocation43_spill] sm:$0xff] }
 0x387   :  { %v2813_v29 = vand.u32 2147483647, %v2812_v4  ;;  %v2815_v14 = vcvt.s32.f32 %v2808_v9  ;;  %vm10347_vm11 = vcmp.lt.s32.totalorder %v10346_v46, 0  ;;  %v3131_v63 = vsub.s32 4, %v14337_v33 }
 0x388   :  { %vm19253_vm0 = vcmp.lt.s32.totalorder %v19223_v55, 0  ;;  %11594 = vcosq.f32 %v2925_v13  ;;  %vm18870_vm1 = vcmp.lt.s32.totalorder %v19160_v27, 0  ;;  %v14553_v1 = vsub.s32 32, %v3163_v60 }
 0x389   :  { %v14550_v20 = vsel %vm19253_vm0, %v2611_v39, %v14034_v21  ;;  %vm19255_vm15 = vcmp.lt.s32.totalorder %v19237_v32, 0  ;;  %11596 = vsinq.f32 %v2925_v13  ;;  %vm19257_vm4 = vcmp.lt.s32.totalorder %v19144_v12, 0  ;;  %v14566_v21 = vpop.eup %11584 }
 0x38a   :  { %19254 = vst [vmem:[#allocation92_spill] sm:$0xff] %v14550_v20  ;;  %v14558_v26 = vsel %vm19255_vm15, %v2923_v0, %v19251_v51  ;;  %v14563_v16 = vsel %vm19257_vm4, %v2819_v53, %v14190_v50  ;;  %v18860_v6 = vand.u32 2147483647, %v19215_v42  ;;  %19259 = vst [vmem:[#allocation95_spill] sm:$0xff] %v14566_v21  ;;  %v14568_v49 = vsel %vm10347_vm11, 0, %v10346_v46  ;;  %v14572_v19 = vpop.eup %11586  ;;  %v14593_v0 = vpop.f32.mrb[54].mxu0 }
 0x38b   :  { %19256 = vst [vmem:[#allocation93_spill] sm:$0xff] %v14558_v26  ;;  %19258 = vst [vmem:[#allocation94_spill] sm:$0xff] %v14563_v16  ;;  %v3007_v37 = vsub.s32 0, %v14542_v28  ;;  %v3314_v54 = vadd.s32 536870912, %v14544_v45  ;;  %vm3472_vm0 = vcmp.gt.s32.totalorder %v3471_v36, 0  ;;  %v2816_v23 = vmul.f32 %v2815_v14, %v2813_v29 }
 0x38c   :  { %19260 = vst [vmem:[#allocation96_spill] sm:$0xff] %v14572_v19  ;;  %v3101_v41 = vadd.s32 %v14199_v7, %v14196_v24  ;;  %v14579_v50 = vsel %vm18870_vm1, %v3131_v63, %v14337_v33  ;;  %v3360_v9 = vand.u32 2139095040, %v19262_v40  ;;  %v3175_v4 = vshll.u32 %v19050_v8, %v3163_v60  ;;  %19263 = vst [vmem:[#allocation98_spill] sm:$0xff] %v14593_v0 }
 0x38d   :  { %19261 = vst [vmem:[#allocation97_spill] sm:$0xff] %v14579_v50  ;;  %v3176_v46 = vshrl.u32 %v19051_v52, %v14553_v1  ;;  %v3178_v48 = vshll.u32 %v19051_v52, %v3163_v60  ;;  %v3179_v39 = vshrl.u32 %v19054_v11, %v14553_v1  ;;  %v3121_v51 = vsub.s32 4294967266, %v14568_v49 }
 0x38e   :  { %v3156_v24 = vand.u32 8388607, %v18860_v6  ;;  %v14591_v7 = vshrl.u32 %v3161_v5, 5  ;;  %v3473_v33 = vsel %vm3472_vm0, %v3471_v36, 0  ;;  %v14595_v13 = vpop.eup %11588  ;;  %v10341_v53 = vmin.u32 %v3007_v37, %v14542_v28 }
 0x38f   :  { %19264 = vst [vmem:[#allocation99_spill] sm:$0xff] %v14595_v13  ;;  %v14598_v29 = vshrl.u32 %v3314_v54, 30  ;;  %v3166_v14 = vshll.u32 %v19057_v10, %v3163_v60  ;;  %v3167_v63 = vshrl.u32 %v19052_v57, %v14553_v1  ;;  %v14603_v50 = vpop.eup %11590  ;;  %v3169_v6 = vshll.u32 %v19052_v57, %v3163_v60 }
 0x390   :  { %19266 = vst [vmem:[#allocation101_spill] sm:$0xff] %v14603_v50  ;;  %v3170_v5 = vshrl.u32 %v19053_v59, %v14553_v1  ;;  %v3172_v36 = vshll.u32 %v19053_v59, %v3163_v60  ;;  %v3173_v32 = vshrl.u32 %v19050_v8, %v14553_v1  ;;  %v14611_v37 = vpop.eup %11592  ;;  %v3177_v54 = vor.u32 %v3176_v46, %v3175_v4 }
 0x391   :  { %19265 = vst [vmem:[#allocation100_spill] sm:$0xff] %v14598_v29  ;;  %19267 = vst [vmem:[#allocation102_spill] sm:$0xff] %v14611_v37  ;;  %v3180_v16 = vor.u32 %v3179_v39, %v3178_v48  ;;  %v3475_v55 = vand.u32 31, %v3473_v33  ;;  %v3361_v2 = vshrl.u32 %v3360_v9, 23  ;;  %v2817_v26 = vxor.u32 2147483648, %v2816_v23 }
 0x392   :  { %v3117_v62 = vsub.s32 32, %v14568_v49  ;;  %v14614_v50 = vadd.s32 127, %v3121_v51  ;;  %vm3184_vm4 = vcmp.lt.s32.totalorder %v14591_v7, 4  ;;  %v14617_v30 = vpop.eup %11594  ;;  %v3009_v20 = vclz %v10341_v53 }
 0x393   :  { %19268 = vst [vmem:[#allocation103_spill] sm:$0xff] %v14617_v30  ;;  %v3316_v60 = vshll.u32 %v14598_v29, 30  ;;  %v3157_v19 = vor.u32 8388608, %v3156_v24  ;;  %v14620_v13 = vor.u32 %v3167_v63, %v3166_v14  ;;  %v14622_v37 = vpop.eup %11596  ;;  %v3171_v4 = vor.u32 %v3170_v5, %v3169_v6 }
 0x394   :  { %19269 = vst [vmem:[#allocation104_spill] sm:$0xff] %v14622_v37  ;;  %v3174_v46 = vor.u32 %v3173_v32, %v3172_v36  ;;  %vm18880_vm15 = vcmp.lt.s32.totalorder %v14591_v7, 1  ;;  %vm18879_vm11 = vcmp.lt.s32.totalorder %v14591_v7, 3  ;;  %v3190_v9 = vsel %vm3184_vm4, %v3177_v54, 920167782 }
 0x395   :  { %v3194_v48 = vsel %vm3184_vm4, %v3180_v16, 1326507024  ;;  %v14630_v39 = vsub.s32 32, %v3475_v55  ;;  %v10356_v51 = vadd.s32 4294967169, %v3361_v2  ;;  %vm19270_vm0 = vcmp.lt.s32.totalorder %v19144_v12, 0  ;;  %v14652_v16 = vpop.f32.mrb[55].mxu0 }
 0x396   :  { %v14634_v24 = vsel %vm19270_vm0, %v2817_v26, %v2816_v23  ;;  %v3118_v32 = vshll.u32 %v14436_v35, %v14568_v49  ;;  %v3119_v6 = vshrl.u32 %v3101_v41, %v3117_v62  ;;  %v18871_v53 = vand.u32 2147483647, %v19236_v44  ;;  %19271 = vst [vmem:[#allocation105_spill] sm:$0xff] %v14652_v16 }
 0x397   :  { %v3123_v14 = vshll.u32 %v14614_v50, 23  ;;  %v10342_v63 = vadd.s32 4294967294, %v3009_v20  ;;  %vm18874_vm1 = vcmp.lt.s32.totalorder %v14591_v7, 2  ;;  %v14641_v5 = vshll.u32 %v3157_v19, 8 }
 0x398   :  { %v3189_v2 = vsel %vm18880_vm15, %v14620_v13, %v3171_v4  ;;  %v3191_v26 = vsel %vm18879_vm11, %v3174_v46, %v3190_v9  ;;  %v3193_v35 = vsel %vm18880_vm15, %v3171_v4, %v3174_v46  ;;  %v3195_v62 = vsel %vm18879_vm11, %v3177_v54, %v3194_v48 }
 0x399   :  { %v14655_v20 = vsub.s32 %v14544_v45, %v3316_v60  ;;  %v3487_v49 = vshll.u32 %v19050_v8, %v3475_v55  ;;  %v3488_v19 = vshrl.u32 %v19051_v52, %v14630_v39  ;;  %v3367_v23 = vadd.s32 1, %v10356_v51 }
 0x39a   :  { %v3468_v41 = vand.u32 8388607, %v18871_v53  ;;  %v14662_v50 = vshrl.u32 %v3473_v33, 5  ;;  %v3490_v36 = vshll.u32 %v19051_v52, %v3475_v55  ;;  %v3491_v54 = vshrl.u32 %v19054_v11, %v14630_v39 }
 0x39b   :  { %v3192_v45 = vsel %vm18874_vm1, %v3189_v2, %v3191_v26  ;;  %v3196_v60 = vsel %vm18874_vm1, %v3193_v35, %v3195_v62  ;;  %v3478_v9 = vshll.u32 %v19057_v10, %v3475_v55  ;;  %v3481_v48 = vshll.u32 %v19052_v57, %v3475_v55 }
 0x39c   :  { %v3479_v51 = vshrl.u32 %v19052_v57, %v14630_v39  ;;  %v3482_v33 = vshrl.u32 %v19053_v59, %v14630_v39  ;;  %v3484_v53 = vshll.u32 %v19053_v59, %v3475_v55  ;;  %v3485_v30 = vshrl.u32 %v19050_v8, %v14630_v39 }
 0x39d   :  { %v3319_v2 = vsub.s32 0, %v14655_v20  ;;  %v3165_v26 = vshrl.u32 %v19057_v10, %v14553_v1  ;;  %v3489_v35 = vor.u32 %v3488_v19, %v3487_v49  ;;  %vm3368_vm0 = vcmp.gt.s32.totalorder %v3367_v23, 0 }
 0x39e   :  { %v3186_v62 = vsel %vm3184_vm4, %v3174_v46, 2102212464  ;;  %v3492_v37 = vor.u32 %v3491_v54, %v3490_v36  ;;  %vm18882_vm1 = vcmp.lt.s32.totalorder %v14662_v50, 4  ;;  %v3672_v56 = vand.u32 2139095040, %v19272_v3 }
 0x39f   :  { %v14688_v55 = vmul.u32.u64.low %v14641_v5, %v3196_v60  ;;  %v14689_v34 = vmul.u32.u64.high %v14641_v5, %v3196_v60, %v14688_v55  ;;  %v14692_v21 = vmul.u32.u64.low %v14641_v5, %v3192_v45  ;;  %v14693_v17 = vmul.u32.u64.high %v14641_v5, %v3192_v45, %v14692_v21 }
 0x3a0   :  { %v14696_v1 = vor.u32 %v3479_v51, %v3478_v9  ;;  %v14698_v49 = vor.u32 %v3482_v33, %v3481_v48  ;;  %v3486_v19 = vor.u32 %v3485_v30, %v3484_v53  ;;  %v3369_v46 = vsel %vm3368_vm0, %v3367_v23, 0 }
 0x3a1   :  { %v14700_v36 = vor.u32 %v3119_v6, %v3118_v32  ;;  %vm3493_vm4 = vcmp.lt.s32.totalorder %v14662_v50, 1  ;;  %v3502_v54 = vsel %vm18882_vm1, %v3489_v35, 920167782  ;;  %vm10343_vm15 = vcmp.lt.s32.totalorder %v10342_v63, 0 }
 0x3a2   :  { %v3469_v60 = vor.u32 8388608, %v3468_v41  ;;  %v3506_v45 = vsel %vm18882_vm1, %v3492_v37, 1326507024  ;;  %v3673_v9 = vshrl.u32 %v3672_v56, 23  ;;  %v14708_v51 = vor.u32 4788187, %v3123_v14 }
 0x3a3   :  { %vm19273_vm0 = vcmp.lt.s32.totalorder %v14591_v7, 1  ;;  %vm19274_vm2 = vcmp.lt.s32.totalorder %v14591_v7, 3  ;;  %v3371_v6 = vand.u32 31, %v3369_v46  ;;  %v10353_v53 = vmin.u32 %v3319_v2, %v14655_v20 }
 0x3a4   :  { %v3185_v30 = vsel %vm19273_vm0, %v3165_v26, %v14620_v13  ;;  %v3187_v32 = vsel %vm19274_vm2, %v3171_v4, %v3186_v62  ;;  %vm3494_vm11 = vcmp.lt.s32.totalorder %v14662_v50, 2  ;;  %v3501_v37 = vsel %vm3493_vm4, %v14696_v1, %v14698_v49 }
 0x3a5   :  { %vm19275_vm1 = vcmp.lt.s32.totalorder %v14662_v50, 3  ;;  %v14723_v14 = vsel %vm10343_vm15, 0, %v10342_v63  ;;  %v3505_v13 = vsel %vm3493_vm4, %v14698_v49, %v3486_v19  ;;  %v18883_v23 = vand.u32 2147483647, %v19262_v40 }
 0x3a6   :  { %v3503_v56 = vsel %vm19275_vm1, %v3486_v19, %v3502_v54  ;;  %vm19276_vm2 = vmmov %vm19275_vm1  ;;  %v2997_v41 = vadd.s32 %v14344_v43, %v14361_v31  ;;  %vm19277_vm0 = vcmp.lt.s32.totalorder %v14591_v7, 2  ;;  %v14735_v33 = vshll.u32 %v3469_v60, 8 }
 0x3a7   :  { %v3507_v4 = vsel %vm19276_vm2, %v3489_v35, %v3506_v45  ;;  %v3188_v48 = vsel %vm19277_vm0, %v3185_v30, %v3187_v32  ;;  %v10368_v2 = vadd.s32 4294967169, %v3673_v9  ;;  %v3504_v62 = vsel %vm3494_vm11, %v3501_v37, %v3503_v56 }
 0x3a8   :  { %v14741_v55 = vsub.s32 32, %v3371_v6  ;;  %v3013_v35 = vsub.s32 32, %v14723_v14  ;;  %v3017_v54 = vsub.s32 4294967266, %v14723_v14  ;;  %v3321_v43 = vclz %v10353_v53 }
 0x3a9   :  { %v3508_v31 = vsel %vm3494_vm11, %v3505_v13, %v3507_v4  ;;  %v3204_v7 = vmul.u32 %v14641_v5, %v3188_v48  ;;  %vm3206_vm1 = vc.u32 %v14689_v34, %v14692_v21  ;;  %v3207_v60 = vadd.s32 1, %v14693_v17 }
 0x3aa   :  { %v3364_v45 = vand.u32 8388607, %v18883_v23  ;;  %v3477_v9 = vshrl.u32 %v19057_v10, %v14630_v39  ;;  %v14756_v30 = vmul.u32.u64.low %v14735_v33, %v3504_v62  ;;  %v14757_v32 = vmul.u32.u64.high %v14735_v33, %v3504_v62, %v14756_v30 }
 0x3ab   :  { %v3679_v53 = vadd.s32 1, %v10368_v2  ;;  %v14761_v37 = vmul.u32.u64.low %v14735_v33, %v3508_v31  ;;  %v14762_v5 = vmul.u32.u64.high %v14735_v33, %v3508_v31, %v14761_v37  ;;  %v3386_v56 = vshll.u32 %v19051_v52, %v3371_v6 }
 0x3ac   :  { %v3387_v13 = vshrl.u32 %v19054_v11, %v14741_v55  ;;  %vm19278_vm15 = vcmp.lt.s32.totalorder %v14662_v50, 4  ;;  %v14769_v48 = vshrl.u32 %v3369_v46, 5  ;;  %v3383_v39 = vshll.u32 %v19050_v8, %v3371_v6 }
 0x3ad   :  { %v3498_v4 = vsel %vm19278_vm15, %v3486_v19, 2102212464  ;;  %v3384_v62 = vshrl.u32 %v19051_v52, %v14741_v55  ;;  %v3208_v2 = vsel %vm3206_vm1, %v3207_v60, %v14693_v17  ;;  %v3374_v31 = vshll.u32 %v19057_v10, %v3371_v6 }
 0x3ae   :  { %v3375_v37 = vshrl.u32 %v19052_v57, %v14741_v55  ;;  %v3377_v23 = vshll.u32 %v19052_v57, %v3371_v6  ;;  %v19279_v26 = vand.u32 2147483647, %v19144_v12  ;;  %v19280_v19 = vmov 0 }
 0x3af   :  { %v3378_v46 = vshrl.u32 %v19053_v59, %v14741_v55  ;;  %v3380_v63 = vshll.u32 %v19053_v59, %v3371_v6  ;;  %v3381_v17 = vshrl.u32 %v19050_v8, %v14741_v55  ;;  %vm3680_vm0 = vcmp.gt.s32.totalorder %v3679_v53, 0  ;;  %v19284_v6 = vld [vmem:[#allocation67_spill] sm:$0xff] }
 0x3b0   :  { %vm14781_vm2 = vcmp.le.f32.partialorder %v19279_v26, 0.7853982  ;;  %v3014_v60 = vshll.u32 %v14542_v28, %v14723_v14  ;;  %v3497_v38 = vsel %vm3493_vm4, %v3477_v9, %v14696_v1  ;;  %vm19283_vm1 = vcmp.lt.s32.totalorder %v14662_v50, 3 }
 0x3b1   :  { %v19281_v19 = vsel %vm14781_vm2, 4294967295, %v19280_v19  ;;  %v3499_v26 = vsel %vm19283_vm1, %v14698_v49, %v3498_v4  ;;  %v3388_v18 = vor.u32 %v3387_v13, %v3386_v56  ;;  %v3018_v22 = vadd.s32 127, %v3017_v54 }
 0x3b2   :  { %19282 = vst [vmem:[#allocation106_spill] sm:$0xff] %v19281_v19  ;;  %v3385_v16 = vor.u32 %v3384_v62, %v3383_v39  ;;  %vm18893_vm15 = vcmp.lt.s32.totalorder %v14769_v48, 4  ;;  %v3568_v0 = vand.u32 2139095040, %v19284_v6  ;;  %v10354_v42 = vadd.s32 4294967294, %v3321_v43  ;;  %v19285_v43 = vld [vmem:[#allocation70_spill] sm:$0xff] }
 0x3b3   :  { %v14800_v29 = vadd.s32 %v3208_v2, %v3204_v7  ;;  %v3365_v40 = vor.u32 8388608, %v3364_v45  ;;  %v3681_v28 = vsel %vm3680_vm0, %v3679_v53, 0  ;;  %v3500_v14 = vsel %vm3494_vm11, %v3497_v38, %v3499_v26 }
 0x3b4   :  { %v14804_v1 = vor.u32 %v3375_v37, %v3374_v31  ;;  %v14806_v9 = vor.u32 %v3378_v46, %v3377_v23  ;;  %v3382_v49 = vor.u32 %v3381_v17, %v3380_v63  ;;  %vm3389_vm4 = vcmp.lt.s32.totalorder %v14769_v48, 1 }
 0x3b5   :  { %v3402_v54 = vsel %vm18893_vm15, %v3388_v18, 1326507024  ;;  %v3880_v7 = vand.u32 2139095040, %v19285_v43  ;;  %v3519_v45 = vadd.s32 1, %v14757_v32  ;;  %v3398_v50 = vsel %vm18893_vm15, %v3385_v16, 920167782 }
 0x3b6   :  { %v3683_v38 = vand.u32 31, %v3681_v28  ;;  %v3569_v53 = vshrl.u32 %v3568_v0, 23  ;;  %v3015_v56 = vshrl.u32 %v2997_v41, %v3013_v35  ;;  %v3019_v23 = vshll.u32 %v3018_v22, 23 }
 0x3b7   :  { %v3210_v63 = vadd.s32 536870912, %v14800_v29  ;;  %vm3518_vm11 = vc.u32 %v14762_v5, %v14756_v30  ;;  %vm10355_vm0 = vcmp.lt.s32.totalorder %v10354_v42, 0  ;;  %vm18897_vm1 = vcmp.lt.s32.totalorder %v14769_v48, 2 }
 0x3b8   :  { %v3401_v18 = vsel %vm3389_vm4, %v14806_v9, %v3382_v49  ;;  %vm19286_vm6 = vcmp.lt.s32.totalorder %v14769_v48, 3  ;;  %v3516_v4 = vmul.u32 %v14735_v33, %v3500_v14  ;;  %v3397_v22 = vsel %vm3389_vm4, %v14804_v1, %v14806_v9 }
 0x3b9   :  { %v3403_v13 = vsel %vm19286_vm6, %v3385_v16, %v3402_v54  ;;  %vm19287_vm15 = vmmov %vm19286_vm6  ;;  %v3881_v41 = vshrl.u32 %v3880_v7, 23  ;;  %v3520_v35 = vsel %vm3518_vm11, %v3519_v45, %v14757_v32  ;;  %v14833_v39 = vshll.u32 %v3365_v40, 8 }
 0x3ba   :  { %v3399_v0 = vsel %vm19287_vm15, %v3382_v49, %v3398_v50  ;;  %v14835_v62 = vsub.s32 32, %v3683_v38  ;;  %v10364_v2 = vadd.s32 4294967169, %v3569_v53  ;;  %v14841_v16 = vsel %vm14781_vm2, %v19144_v12, %v14634_v24 }
 0x3bb   :  { %v19288_v33 = vand.u32 2147483647, %v14708_v51  ;;  %v19289_v31 = vcvt.s32.f32 %v14700_v36  ;;  %v14849_v46 = vshrl.u32 %v3210_v63, 30  ;;  %v3404_v40 = vsel %vm18897_vm1, %v3401_v18, %v3403_v13 }
 0x3bc   :  { %v14853_v32 = vor.u32 %v3015_v56, %v3014_v60  ;;  %v14857_v17 = vadd.s32 %v14462_v61, %v14473_v58  ;;  %v3400_v24 = vsel %vm18897_vm1, %v3397_v22, %v3399_v0  ;;  %v18894_v51 = vand.u32 2147483647, %v19272_v3 }
 0x3bd   :  { %v14847_v37 = vmul.f32 %v19289_v31, %v19288_v33  ;;  %19290 = vst [vmem:[#allocation107_spill] sm:$0xff] %v14849_v46  ;;  %v14862_v26 = vor.u32 4788187, %v3019_v23  ;;  %v14865_v36 = vsel %vm10355_vm0, 0, %v10354_v42  ;;  %v14867_v14 = vadd.s32 %v3520_v35, %v3516_v4 }
 0x3be   :  { %v10376_v54 = vadd.s32 4294967169, %v3881_v41  ;;  %v14870_v60 = vmul.u32.u64.low %v14833_v39, %v3404_v40  ;;  %v14871_v7 = vmul.u32.u64.high %v14833_v39, %v3404_v40, %v14870_v60  ;;  %v3696_v61 = vshrl.u32 %v19051_v52, %v14835_v62 }
 0x3bf   :  { %v3575_v58 = vadd.s32 1, %v10364_v2  ;;  %v3212_v45 = vshll.u32 %v14849_v46, 30  ;;  %v14877_v50 = vmul.u32.u64.low %v14833_v39, %v3400_v24  ;;  %v14878_v53 = vmul.u32.u64.high %v14833_v39, %v3400_v24, %v14877_v50  ;;  %v19297_v46 = vld [vmem:[#allocation73_spill] sm:$0xff] }
 0x3c0   :  { %19291 = vst [vmem:[#allocation108_spill] sm:$0xff] %v14871_v7  ;;  %v3699_v42 = vshrl.u32 %v19054_v11, %v14835_v62  ;;  %v3676_v56 = vand.u32 8388607, %v18894_v51  ;;  %v14885_v23 = vshrl.u32 %v3681_v28, 5  ;;  %v3687_v63 = vshrl.u32 %v19052_v57, %v14835_v62 }
 0x3c1   :  { %19292 = vst [vmem:[#allocation109_spill] sm:$0xff] %v14877_v50  ;;  %v3695_v18 = vshll.u32 %v19050_v8, %v3683_v38  ;;  %v3690_v13 = vshrl.u32 %v19053_v59, %v14835_v62  ;;  %v3693_v4 = vshrl.u32 %v19050_v8, %v14835_v62  ;;  %v3698_v22 = vshll.u32 %v19051_v52, %v3683_v38 }
 0x3c2   :  { %v3887_v0 = vadd.s32 1, %v10376_v54  ;;  %v3522_v41 = vadd.s32 536870912, %v14867_v14  ;;  %v3686_v35 = vshll.u32 %v19057_v10, %v3683_v38  ;;  %vm3576_vm6 = vcmp.gt.s32.totalorder %v3575_v58, 0 }
 0x3c3   :  { %v3697_v28 = vor.u32 %v3696_v61, %v3695_v18  ;;  %v3373_v2 = vshrl.u32 %v19057_v10, %v14741_v55  ;;  %v3689_v33 = vshll.u32 %v19052_v57, %v3683_v38  ;;  %v3692_v31 = vshll.u32 %v19053_v59, %v3683_v38 }
 0x3c4   :  { %v3700_v40 = vor.u32 %v3699_v42, %v3698_v22  ;;  %v3329_v24 = vsub.s32 4294967266, %v14865_v36  ;;  %vm19293_vm15 = vcmp.lt.s32.totalorder %v14769_v48, 4  ;;  %v3688_v54 = vor.u32 %v3687_v63, %v3686_v35 }
 0x3c5   :  { %v3394_v60 = vsel %vm19293_vm15, %v3382_v49, 2102212464  ;;  %vm3704_vm11 = vcmp.lt.s32.totalorder %v14885_v23, 4  ;;  %v3691_v51 = vor.u32 %v3690_v13, %v3689_v33  ;;  %v3694_v12 = vor.u32 %v3693_v4, %v3692_v31 }
 0x3c6   :  { %v3577_v61 = vsel %vm3576_vm6, %v3575_v58, 0  ;;  %vm3888_vm0 = vcmp.gt.s32.totalorder %v3887_v0, 0  ;;  %v14907_v55 = vsub.s32 %v14800_v29, %v3212_v45  ;;  %v14909_v19 = vshrl.u32 %v3522_v41, 30 }
 0x3c7   :  { %v3710_v38 = vsel %vm3704_vm11, %v3697_v28, 920167782  ;;  %v3393_v49 = vsel %vm3389_vm4, %v3373_v2, %v14804_v1  ;;  %vm19295_vm15 = vcmp.lt.s32.totalorder %v14769_v48, 3  ;;  %v3677_v58 = vor.u32 8388608, %v3676_v56 }
 0x3c8   :  { %19294 = vst [vmem:[#allocation110_spill] sm:$0xff] %v14909_v19  ;;  %v3395_v42 = vsel %vm19295_vm15, %v14806_v9, %v3394_v60  ;;  %v3714_v63 = vsel %vm3704_vm11, %v3700_v40, 1326507024  ;;  %vm3701_vm6 = vcmp.lt.s32.totalorder %v14885_v23, 1  ;;  %vm3703_vm1 = vcmp.lt.s32.totalorder %v14885_v23, 3 }
 0x3c9   :  { %v3579_v29 = vand.u32 31, %v3577_v61  ;;  %v3889_v45 = vsel %vm3888_vm0, %v3887_v0, 0  ;;  %v14923_v13 = vadd.s32 127, %v3329_v24  ;;  %v3709_v4 = vsel %vm3701_vm6, %v3688_v54, %v3691_v51 }
 0x3ca   :  { %v3711_v1 = vsel %vm3703_vm1, %v3694_v12, %v3710_v38  ;;  %v18898_v9 = vand.u32 2147483647, %v19284_v6  ;;  %v3524_v56 = vshll.u32 %v14909_v19, 30  ;;  %v3415_v22 = vadd.s32 1, %v14878_v53 }
 0x3cb   :  { %v3713_v41 = vsel %vm3701_vm6, %v3691_v51, %v3694_v12  ;;  %v3715_v0 = vsel %vm3703_vm1, %v3697_v28, %v3714_v63  ;;  %vm19296_vm4 = vcmp.lt.s32.totalorder %v14769_v48, 2  ;;  %vm3414_vm0 = vc.u32 %v14871_v7, %v14877_v50 }
 0x3cc   :  { %v14938_v35 = vsel %vm19296_vm4, %v3393_v49, %v3395_v42  ;;  %vm18913_vm15 = vcmp.lt.s32.totalorder %v14885_v23, 2  ;;  %v3891_v2 = vand.u32 31, %v3889_v45  ;;  %v14946_v40 = vshll.u32 %v3677_v58, 8 }
 0x3cd   :  { %v3712_v31 = vsel %vm18913_vm15, %v3709_v4, %v3711_v1  ;;  %v14948_v24 = vsub.s32 32, %v3579_v29  ;;  %v3685_v48 = vshrl.u32 %v19057_v10, %v14835_v62  ;;  %v3716_v28 = vsel %vm18913_vm15, %v3713_v41, %v3715_v0 }
 0x3ce   :  { %v14956_v60 = vand.u32 8388607, %v18898_v9  ;;  %v18899_v38 = vand.u32 2147483647, %v19285_v43  ;;  %v14960_v49 = vsub.s32 %v14867_v14, %v3524_v56  ;;  %v14965_v58 = vsel %vm3414_vm0, %v3415_v22, %v14878_v53 }
 0x3cf   :  { %v3706_v62 = vsel %vm3704_vm11, %v3694_v12, 2102212464  ;;  %v14971_v63 = vsel %vm3701_vm6, %v3685_v48, %v3688_v54  ;;  %v14974_v4 = vmul.u32.u64.low %v14946_v40, %v3712_v31  ;;  %v14975_v1 = vmul.u32.u64.high %v14946_v40, %v3712_v31, %v14974_v4 }
 0x3d0   :  { %v14978_v14 = vsub.s32 32, %v3891_v2  ;;  %v14981_v56 = vmul.u32.u64.low %v14946_v40, %v3716_v28  ;;  %v14982_v41 = vmul.u32.u64.high %v14946_v40, %v3716_v28, %v14981_v56  ;;  %v3583_v53 = vshrl.u32 %v19052_v57, %v14948_v24 }
 0x3d1   :  { %v3592_v12 = vshrl.u32 %v19051_v52, %v14948_v24  ;;  %v14990_v54 = vsel %vm3703_vm1, %v3691_v51, %v3706_v62  ;;  %v3595_v0 = vshrl.u32 %v19054_v11, %v14948_v24  ;;  %v14997_v31 = vand.u32 8388607, %v18899_v38 }
 0x3d2   :  { %v14999_v48 = vshrl.u32 %v3577_v61, 5  ;;  %v3582_v28 = vshll.u32 %v19057_v10, %v3579_v29  ;;  %v3585_v56 = vshll.u32 %v19052_v57, %v3579_v29  ;;  %v3591_v9 = vshll.u32 %v19050_v8, %v3579_v29 }
 0x3d3   :  { %v3586_v51 = vshrl.u32 %v19053_v59, %v14948_v24  ;;  %v3589_v62 = vshrl.u32 %v19050_v8, %v14948_v24  ;;  %v3594_v18 = vshll.u32 %v19051_v52, %v3579_v29  ;;  %v3904_v38 = vshrl.u32 %v19051_v52, %v14978_v14 }
 0x3d4   :  { %v15011_v33 = vor.u32 %v3583_v53, %v3582_v28  ;;  %v3588_v61 = vshll.u32 %v19053_v59, %v3579_v29  ;;  %v3593_v22 = vor.u32 %v3592_v12, %v3591_v9  ;;  %v3907_v42 = vshrl.u32 %v19054_v11, %v14978_v14 }
 0x3d5   :  { %v3596_v43 = vor.u32 %v3595_v0, %v3594_v18  ;;  %v15016_v6 = vshrl.u32 %v3889_v45, 5  ;;  %v3903_v3 = vshll.u32 %v19050_v8, %v3891_v2  ;;  %v3776_v50 = vand.u32 2139095040, %v19297_v46 }
 0x3d6   :  { %v3895_v7 = vshrl.u32 %v19052_v57, %v14978_v14  ;;  %v3898_v53 = vshrl.u32 %v19053_v59, %v14978_v14  ;;  %v3901_v29 = vshrl.u32 %v19050_v8, %v14978_v14  ;;  %v3906_v9 = vshll.u32 %v19051_v52, %v3891_v2 }
 0x3d7   :  { %v15027_v12 = vor.u32 %v3586_v51, %v3585_v56  ;;  %v3590_v18 = vor.u32 %v3589_v62, %v3588_v61  ;;  %vm18912_vm1 = vcmp.lt.s32.totalorder %v14999_v48, 4  ;;  %v3905_v45 = vor.u32 %v3904_v38, %v3903_v3 }
 0x3d8   :  { %v3894_v0 = vshll.u32 %v19057_v10, %v3891_v2  ;;  %v3897_v28 = vshll.u32 %v19052_v57, %v3891_v2  ;;  %v3900_v19 = vshll.u32 %v19053_v59, %v3891_v2  ;;  %v3908_v44 = vor.u32 %v3907_v42, %v3906_v9 }
 0x3d9   :  { %v3727_v15 = vadd.s32 1, %v14975_v1  ;;  %v3606_v47 = vsel %vm18912_vm1, %v3593_v22, 920167782  ;;  %v3610_v56 = vsel %vm18912_vm1, %v3596_v43, 1326507024  ;;  %v3777_v51 = vshrl.u32 %v3776_v50, 23 }
 0x3da   :  { %v15038_v62 = vor.u32 %v3895_v7, %v3894_v0  ;;  %v15040_v61 = vor.u32 %v3898_v53, %v3897_v28  ;;  %v3902_v3 = vor.u32 %v3901_v29, %v3900_v19  ;;  %vm3912_vm11 = vcmp.lt.s32.totalorder %v15016_v6, 4 }
 0x3db   :  { %vm18915_vm4 = vcmp.lt.s32.totalorder %v14999_v48, 1  ;;  %vm18914_vm0 = vcmp.lt.s32.totalorder %v14999_v48, 3  ;;  %v3918_v2 = vsel %vm3912_vm11, %v3905_v45, 920167782  ;;  %v3922_v50 = vsel %vm3912_vm11, %v3908_v44, 1326507024 }
 0x3dc   :  { %v3605_v43 = vsel %vm18915_vm4, %v15011_v33, %v15027_v12  ;;  %v3607_v19 = vsel %vm18914_vm0, %v3590_v18, %v3606_v47  ;;  %v3609_v7 = vsel %vm18915_vm4, %v15027_v12, %v3590_v18  ;;  %v3611_v38 = vsel %vm18914_vm0, %v3593_v22, %v3610_v56 }
 0x3dd   :  { %vm3909_vm1 = vcmp.lt.s32.totalorder %v15016_v6, 1  ;;  %vm18916_vm6 = vcmp.lt.s32.totalorder %v15016_v6, 3  ;;  %v10372_v42 = vadd.s32 4294967169, %v3777_v51  ;;  %vm18918_vm15 = vcmp.lt.s32.totalorder %v14999_v48, 2 }
 0x3de   :  { %v3885_v53 = vor.u32 8388608, %v14997_v31  ;;  %v3917_v47 = vsel %vm3909_vm1, %v15038_v62, %v15040_v61  ;;  %v3919_v44 = vsel %vm18916_vm6, %v3902_v3, %v3918_v2  ;;  %v19298_v22 = vmul.u32 %v14833_v39, %v14938_v35 }
 0x3df   :  { %v3608_v9 = vsel %vm18918_vm15, %v3605_v43, %v3607_v19  ;;  %v3921_v31 = vsel %vm3909_vm1, %v15040_v61, %v3902_v3  ;;  %v3923_v0 = vsel %vm18916_vm6, %v3905_v45, %v3922_v50  ;;  %vm19299_vm0 = vcmp.lt.s32.totalorder %v14885_v23, 2 }
 0x3e0   :  { %v15076_v29 = vadd.s32 %v14965_v58, %v19298_v22  ;;  %v3708_v28 = vsel %vm19299_vm0, %v14971_v63, %v14990_v54  ;;  %v3612_v39 = vsel %vm18918_vm15, %v3609_v7, %v3611_v38  ;;  %v19300_v35 = vor.u32 8388608, %v14956_v60 }
 0x3e1   :  { %vm18917_vm4 = vcmp.lt.s32.totalorder %v15016_v6, 2  ;;  %v19301_v56 = vsub.s32 0, %v14907_v55  ;;  %vm19302_vm6 = vc.u32 %v14982_v41, %v14974_v4  ;;  %v3783_v63 = vadd.s32 1, %v10372_v42 }
 0x3e2   :  { %v15093_v58 = vshll.u32 %v19300_v35, 8  ;;  %v3728_v45 = vsel %vm19302_vm6, %v3727_v15, %v14975_v1  ;;  %v3920_v23 = vsel %vm18917_vm4, %v3917_v47, %v3919_v44  ;;  %v3924_v2 = vsel %vm18917_vm4, %v3921_v31, %v3923_v0 }
 0x3e3   :  { %v10349_v51 = vmin.u32 %v19301_v56, %v14907_v55  ;;  %v15112_v43 = vshll.u32 %v3885_v53, 8  ;;  %v3326_v19 = vshll.u32 %v14655_v20, %v14865_v36  ;;  %v3724_v7 = vmul.u32 %v14946_v40, %v3708_v28 }
 0x3e4   :  { %v15106_v54 = vmul.u32.u64.low %v15093_v58, %v3608_v9  ;;  %v15107_v60 = vmul.u32.u64.high %v15093_v58, %v3608_v9, %v15106_v54  ;;  %v15118_v15 = vmul.u32.u64.low %v15093_v58, %v3612_v39  ;;  %v15119_v1 = vmul.u32.u64.high %v15093_v58, %v3612_v39, %v15118_v15 }
 0x3e5   :  { %v3527_v50 = vsub.s32 0, %v14960_v49  ;;  %v3418_v38 = vadd.s32 536870912, %v15076_v29  ;;  %v15124_v42 = vmul.u32.u64.low %v15112_v43, %v3920_v23  ;;  %v15125_v47 = vmul.u32.u64.high %v15112_v43, %v3920_v23, %v15124_v42 }
 0x3e6   :  { %v15128_v53 = vadd.s32 %v3728_v45, %v3724_v7  ;;  %v15131_v44 = vmul.u32.u64.low %v15112_v43, %v3924_v2  ;;  %v15132_v20 = vmul.u32.u64.high %v15112_v43, %v3924_v2, %v15131_v44  ;;  %vm3784_vm6 = vcmp.gt.s32.totalorder %v3783_v63, 0 }
 0x3e7   :  { %v19303_v40 = vsub.s32 32, %v14865_v36  ;;  %v3331_v9 = vshll.u32 %v14923_v13, 23  ;;  %v3217_v31 = vclz %v10349_v51  ;;  %vm19304_vm0 = vcmp.lt.s32.totalorder %v14999_v48, 4 }
 0x3e8   :  { %v3602_v0 = vsel %vm19304_vm0, %v3590_v18, 2102212464  ;;  %v19305_v28 = vand.u32 2147483647, %v19160_v27  ;;  %v19306_v39 = vmov 0  ;;  %v3129_v35 = vxor.u32 2147483648, %v14847_v37 }
 0x3e9   :  { %v3327_v22 = vshrl.u32 %v14857_v17, %v19303_v40  ;;  %v3021_v56 = vand.u32 2147483647, %v14862_v26  ;;  %v3023_v36 = vcvt.s32.f32 %v14853_v32  ;;  %v3581_v17 = vshrl.u32 %v19057_v10, %v14948_v24 }
 0x3ea   :  { %vm15142_vm4 = vcmp.le.f32.partialorder %v19305_v28, 0.7853982  ;;  %v10361_v13 = vmin.u32 %v3527_v50, %v14960_v49  ;;  %v15152_v51 = vshrl.u32 %v3418_v38, 30  ;;  %v3914_v18 = vsel %vm3912_vm11, %v3902_v3, 2102212464 }
 0x3eb   :  { %v19307_v39 = vsel %vm15142_vm4, 4294967295, %v19306_v39  ;;  %v3785_v45 = vsel %vm3784_vm6, %v3783_v63, 0  ;;  %v3730_v23 = vadd.s32 536870912, %v15128_v53  ;;  %vm19309_vm0 = vcmp.lt.s32.totalorder %v14999_v48, 1 }
 0x3ec   :  { %19308 = vst [vmem:[#allocation111_spill] sm:$0xff] %v19307_v39  ;;  %v3601_v26 = vsel %vm19309_vm0, %v3581_v17, %v15011_v33  ;;  %vm19310_vm15 = vcmp.lt.s32.totalorder %v14999_v48, 3  ;;  %v3893_v24 = vshrl.u32 %v19057_v10, %v14978_v14  ;;  %v3328_v2 = vor.u32 %v3327_v22, %v3326_v19 }
 0x3ed   :  { %v3603_v32 = vsel %vm19310_vm15, %v15027_v12, %v3602_v0  ;;  %v3332_v7 = vor.u32 4788187, %v3331_v9  ;;  %v10350_v15 = vadd.s32 4294967294, %v3217_v31  ;;  %v3623_v3 = vadd.s32 1, %v15107_v60 }
 0x3ee   :  { %vm3622_vm11 = vc.u32 %v15119_v1, %v15106_v54  ;;  %v3913_v63 = vsel %vm3909_vm1, %v3893_v24, %v15038_v62  ;;  %vm19311_vm6 = vcmp.lt.s32.totalorder %v15016_v6, 3  ;;  %v3787_v12 = vand.u32 31, %v3785_v45 }
 0x3ef   :  { %v3915_v33 = vsel %vm19311_vm6, %v15040_v61, %v3914_v18  ;;  %v3529_v50 = vclz %v10361_v13  ;;  %v3420_v14 = vshll.u32 %v15152_v51, 30  ;;  %vm19312_vm15 = vcmp.lt.s32.totalorder %v14999_v48, 2 }
 0x3f0   :  { %v3604_v19 = vsel %vm19312_vm15, %v3601_v26, %v3603_v32  ;;  %v3935_v38 = vadd.s32 1, %v15125_v47  ;;  %11598 = vcosq.f32 %v14841_v16  ;;  %v15180_v44 = vmul.f32 %v3023_v36, %v3021_v56 }
 0x3f1   :  { %v15182_v40 = vshrl.u32 %v3730_v23, 30  ;;  %vm3934_vm1 = vc.u32 %v15132_v20, %v15124_v42  ;;  %v3333_v62 = vand.u32 2147483647, %v3332_v7  ;;  %v3335_v61 = vcvt.s32.f32 %v3328_v2 }
 0x3f2   :  { %v3624_v22 = vsel %vm3622_vm11, %v3623_v3, %v15107_v60  ;;  %vm19313_vm0 = vcmp.lt.s32.totalorder %v15016_v6, 2  ;;  %11600 = vsinq.f32 %v14841_v16  ;;  %vm19314_vm6 = vcmp.lt.s32.totalorder %v19160_v27, 0 }
 0x3f3   :  { %v3916_v9 = vsel %vm19313_vm0, %v3913_v63, %v3915_v33  ;;  %v3130_v48 = vsel %vm19314_vm6, %v3129_v35, %v14847_v37  ;;  %v3620_v31 = vmul.u32 %v15093_v58, %v3604_v19  ;;  %v15194_v0 = vsub.s32 32, %v3787_v12 }
 0x3f4   :  { %vm10351_vm15 = vcmp.lt.s32.totalorder %v10350_v15, 0  ;;  %v10362_v28 = vadd.s32 4294967294, %v3529_v50  ;;  %v15197_v56 = vsub.s32 %v15076_v29, %v3420_v14  ;;  %v3936_v60 = vsel %vm3934_vm1, %v3935_v38, %v15125_v47  ;;  %v19316_v50 = vld [vmem:[#allocation31_spill] sm:$0xff] }
 0x3f5   :  { %v3732_v36 = vshll.u32 %v15182_v40, 30  ;;  %v15202_v16 = vadd.s32 %v3624_v22, %v3620_v31  ;;  %v3932_v17 = vmul.u32 %v15112_v43, %v3916_v9  ;;  %v15208_v37 = vsel %vm15142_vm4, %v19160_v27, %v3130_v48 }
 0x3f6   :  { %v15211_v35 = vmul.f32 %v3335_v61, %v3333_v62  ;;  %v3205_v29 = vadd.s32 %v14692_v21, %v14689_v34  ;;  %v15215_v47 = vsel %vm10351_vm15, 0, %v10350_v15  ;;  %v3517_v13 = vadd.s32 %v14756_v30, %v14762_v5 }
 0x3f7   :  { %v15219_v18 = vadd.s32 %v3936_v60, %v3932_v17  ;;  %v3800_v43 = vshrl.u32 %v19051_v52, %v15194_v0  ;;  %vm10363_vm11 = vcmp.lt.s32.totalorder %v10362_v28, 0  ;;  %v3423_v23 = vsub.s32 0, %v15197_v56 }
 0x3f8   :  { %v18919_v26 = vand.u32 2147483647, %v19297_v46  ;;  %v3803_v32 = vshrl.u32 %v19054_v11, %v15194_v0  ;;  %v15228_v34 = vsub.s32 %v15128_v53, %v3732_v36  ;;  %v3626_v21 = vadd.s32 536870912, %v15202_v16 }
 0x3f9   :  { %v15231_v24 = vshrl.u32 %v3785_v45, 5  ;;  %v3799_v30 = vshll.u32 %v19050_v8, %v3787_v12  ;;  %v3791_v5 = vshrl.u32 %v19052_v57, %v15194_v0  ;;  %v3794_v2 = vshrl.u32 %v19053_v59, %v15194_v0 }
 0x3fa   :  { %v3797_v7 = vshrl.u32 %v19050_v8, %v15194_v0  ;;  %v3802_v15 = vshll.u32 %v19051_v52, %v3787_v12  ;;  %v15241_v3 = vpop.eup %11598  ;;  %v3225_v53 = vsub.s32 4294967266, %v15215_v47  ;;  %v15244_v63 = vsel %vm10363_vm11, 0, %v10362_v28 }
 0x3fb   :  { %19315 = vst [vmem:[#allocation112_spill] sm:$0xff] %v15241_v3  ;;  %v3938_v45 = vadd.s32 536870912, %v15219_v18  ;;  %v3801_v33 = vor.u32 %v3800_v43, %v3799_v30  ;;  %v3790_v14 = vshll.u32 %v19057_v10, %v3787_v12  ;;  %v3793_v19 = vshll.u32 %v19052_v57, %v3787_v12 }
 0x3fc   :  { %v3796_v38 = vshll.u32 %v19053_v59, %v3787_v12  ;;  %v3804_v62 = vor.u32 %v3803_v32, %v3802_v15  ;;  %v15251_v61 = vpop.eup %11600  ;;  %v10357_v22 = vmin.u32 %v3423_v23, %v15197_v56  ;;  %v3735_v9 = vsub.s32 0, %v15228_v34  ;;  %v19322_v15 = vld [vmem:[#allocation35_spill] sm:$0xff] }
 0x3fd   :  { %19317 = vst [vmem:[#allocation113_spill] sm:$0xff] %v15251_v61  ;;  %v15255_v48 = vshrl.u32 %v3626_v21, 30  ;;  %v3780_v31 = vand.u32 8388607, %v18919_v26  ;;  %v15259_v28 = vor.u32 %v3791_v5, %v3790_v14  ;;  %v15261_v60 = vor.u32 %v3794_v2, %v3793_v19 }
 0x3fe   :  { %v3798_v36 = vor.u32 %v3797_v7, %v3796_v38  ;;  %vm18923_vm0 = vcmp.lt.s32.totalorder %v15231_v24, 4  ;;  %v3221_v12 = vsub.s32 32, %v15215_v47  ;;  %v3222_v17 = vshll.u32 %v14907_v55, %v15215_v47 }
 0x3ff   :  { %v3537_v43 = vsub.s32 4294967266, %v15244_v63  ;;  %v3814_v23 = vsel %vm18923_vm0, %v3801_v33, 920167782  ;;  %v3226_v32 = vadd.s32 127, %v3225_v53  ;;  %v3533_v21 = vsub.s32 32, %v15244_v63 }
 0x400   :  { %v15271_v30 = vshrl.u32 %v3938_v45, 30  ;;  %v3818_v5 = vsel %vm18923_vm0, %v3804_v62, 1326507024  ;;  %v3425_v2 = vclz %v10357_v22  ;;  %v10369_v7 = vmin.u32 %v3735_v9, %v15228_v34 }
 0x401   :  { %vm18922_vm6 = vcmp.lt.s32.totalorder %v15231_v24, 1  ;;  %vm18920_vm15 = vcmp.lt.s32.totalorder %v15231_v24, 3  ;;  %v19318_v55 = vand.u32 2147483647, %v19316_v50  ;;  %v19319_v47 = vmov 0 }
 0x402   :  { %v3628_v53 = vshll.u32 %v15255_v48, 30  ;;  %v3781_v45 = vor.u32 8388608, %v3780_v31  ;;  %v3813_v14 = vsel %vm18922_vm6, %v15259_v28, %v15261_v60  ;;  %v3815_v19 = vsel %vm18920_vm15, %v3798_v36, %v3814_v23 }
 0x403   :  { %vm15280_vm11 = vcmp.le.f32.partialorder %v19318_v55, 0.7853982  ;;  %v3223_v38 = vshrl.u32 %v3205_v29, %v3221_v12  ;;  %v3538_v62 = vadd.s32 127, %v3537_v43  ;;  %v3817_v22 = vsel %vm18922_vm6, %v15261_v60, %v3798_v36 }
 0x404   :  { %v19320_v47 = vsel %vm15280_vm11, 4294967295, %v19319_v47  ;;  %v3819_v9 = vsel %vm18920_vm15, %v3801_v33, %v3818_v5  ;;  %v3227_v55 = vshll.u32 %v3226_v32, 23  ;;  %v3534_v31 = vshll.u32 %v14960_v49, %v15244_v63  ;;  %v19323_v32 = vld [vmem:[#allocation81_spill] sm:$0xff] }
 0x405   :  { %19321 = vst [vmem:[#allocation114_spill] sm:$0xff] %v19320_v47  ;;  %v3940_v26 = vshll.u32 %v15271_v30, 30  ;;  %vm18921_vm1 = vcmp.lt.s32.totalorder %v15231_v24, 2  ;;  %v3535_v6 = vshrl.u32 %v3517_v13, %v3533_v21  ;;  %v10358_v58 = vadd.s32 4294967294, %v3425_v2 }
 0x406   :  { %v3737_v23 = vclz %v10369_v7  ;;  %v3816_v29 = vsel %vm18921_vm1, %v3813_v14, %v3815_v19  ;;  %v15304_v12 = vsub.s32 %v15202_v16, %v3628_v53  ;;  %v3820_v33 = vsel %vm18921_vm1, %v3817_v22, %v3819_v9 }
 0x407   :  { %v15308_v43 = vshll.u32 %v3781_v45, 8  ;;  %v4088_v49 = vand.u32 2139095040, %v19323_v32  ;;  %11602 = vcosq.f32 %v15208_v37  ;;  %v19324_v13 = vxor.u32 2147483648, %v15180_v44 }
 0x408   :  { %vm19325_vm15 = vcmp.lt.s32.totalorder %v19316_v50, 0  ;;  %v3224_v21 = vor.u32 %v3223_v38, %v3222_v17  ;;  %v3539_v5 = vshll.u32 %v3538_v62, 23  ;;  %v3228_v2 = vor.u32 4788187, %v3227_v55 }
 0x409   :  { %v3026_v63 = vsel %vm19325_vm15, %v19324_v13, %v15180_v44  ;;  %v15318_v16 = vsub.s32 %v15219_v18, %v3940_v26  ;;  %v15321_v7 = vmul.u32.u64.low %v15308_v43, %v3816_v29  ;;  %v15322_v53 = vmul.u32.u64.high %v15308_v43, %v3816_v29, %v15321_v7 }
 0x40a   :  { %v19327_v45 = vand.u32 2147483647, %v19322_v15  ;;  %v19328_v14 = vmov 0  ;;  %v3337_v19 = vxor.u32 2147483648, %v15211_v35  ;;  %vm10359_vm15 = vcmp.lt.s32.totalorder %v10358_v58, 0 }
 0x40b   :  { %19326 = vst [vmem:[#allocation115_spill] sm:$0xff] %v15321_v7  ;;  %v15333_v44 = vmul.u32.u64.low %v15308_v43, %v3820_v33  ;;  %v15334_v17 = vmul.u32.u64.high %v15308_v43, %v3820_v33, %v15333_v44  ;;  %v3536_v18 = vor.u32 %v3535_v6, %v3534_v31  ;;  %v10370_v26 = vadd.s32 4294967294, %v3737_v23  ;;  %v19336_v33 = vld [vmem:[#allocation43_spill] sm:$0xff] }
 0x40c   :  { %vm15327_vm1 = vcmp.le.f32.partialorder %v19327_v45, 0.7853982  ;;  %v3631_v38 = vsub.s32 0, %v15304_v12  ;;  %v4089_v62 = vshrl.u32 %v4088_v49, 23  ;;  %11604 = vsinq.f32 %v15208_v37  ;;  %v19335_v45 = vld [vmem:[#allocation42_spill] sm:$0xff]  ;;  %v19339_v49 = vld [vmem:[#allocation100_spill] sm:$0xff] }
 0x40d   :  { %v19329_v14 = vsel %vm15327_vm1, 4294967295, %v19328_v14  ;;  %19331 = vst [vmem:[#allocation117_spill] sm:$0xff] %v15334_v17  ;;  %v19332_v22 = vsub.s32 4, %v14497_v25  ;;  %vm19333_vm6 = vcmp.lt.s32.totalorder %v19316_v50, 0  ;;  %v3231_v55 = vcvt.s32.f32 %v3224_v21 }
 0x40e   :  { %19330 = vst [vmem:[#allocation116_spill] sm:$0xff] %v19329_v14  ;;  %v3540_v29 = vor.u32 4788187, %v3539_v5  ;;  %v3229_v13 = vand.u32 2147483647, %v3228_v2  ;;  %v15347_v6 = vsel %vm10359_vm15, 0, %v10358_v58  ;;  %v3029_v23 = vsel %vm15280_vm11, %v19316_v50, %v3026_v63 }
 0x40f   :  { %v15343_v9 = vsel %vm19333_vm6, %v19332_v22, %v14497_v25  ;;  %v3943_v31 = vsub.s32 0, %v15318_v16  ;;  %vm19337_vm2 = vcmp.lt.s32.totalorder %v15231_v24, 4  ;;  %vm19338_vm6 = vcmp.lt.s32.totalorder %v19322_v15, 0  ;;  %v19340_v22 = vld [vmem:[#allocation37_spill] sm:$0xff] }
 0x410   :  { %19334 = vst [vmem:[#allocation118_spill] sm:$0xff] %v15343_v9  ;;  %v3810_v37 = vsel %vm19337_vm2, %v3798_v36, 2102212464  ;;  %v3338_v25 = vsel %vm19338_vm6, %v3337_v19, %v15211_v35  ;;  %v3339_v21 = vsub.s32 4, %v19339_v49  ;;  %v3789_v5 = vshrl.u32 %v19057_v10, %v15194_v0 }
 0x411   :  { %v3543_v58 = vcvt.s32.f32 %v3536_v18  ;;  %vm10371_vm15 = vcmp.lt.s32.totalorder %v10370_v26, 0  ;;  %v10365_v2 = vmin.u32 %v3631_v38, %v15304_v12  ;;  %v10384_v44 = vadd.s32 4294967169, %v4089_v62  ;;  %v19346_v38 = vld [vmem:[#allocation110_spill] sm:$0xff]  ;;  %v15379_v47 = vpop.eup %11602 }
 0x412   :  { %v3541_v36 = vand.u32 2147483647, %v3540_v29  ;;  %v3433_v27 = vsub.s32 4294967266, %v15347_v6  ;;  %vm19341_vm4 = vcmp.lt.s32.totalorder %v15231_v24, 1  ;;  %vm19342_vm6 = vcmp.lt.s32.totalorder %v15231_v24, 3  ;;  %19347 = vst [vmem:[#allocation100_spill] sm:$0xff] %v15379_v47 }
 0x413   :  { %v3809_v63 = vsel %vm19341_vm4, %v3789_v5, %v15259_v28  ;;  %v3811_v35 = vsel %vm19342_vm6, %v15261_v60, %v3810_v37  ;;  %v3232_v19 = vmul.f32 %v3231_v55, %v3229_v13  ;;  %v19343_v0 = vand.u32 2147483647, %v19335_v45  ;;  %v19351_v60 = vld [vmem:[#allocation108_spill] sm:$0xff]  ;;  %v19352_v55 = vld [vmem:[#allocation109_spill] sm:$0xff] }
 0x414   :  { %v3547_v62 = vsub.s32 4, %v19346_v38  ;;  %v10377_v29 = vmin.u32 %v3943_v31, %v15318_v16  ;;  %v3831_v50 = vadd.s32 1, %v15322_v53  ;;  %v19348_v28 = vand.u32 2147483647, %v19336_v33 }
 0x415   :  { %vm15372_vm0 = vcmp.le.f32.partialorder %v19343_v0, 0.7853982  ;;  %v3413_v13 = vadd.s32 %v19352_v55, %v19351_v60  ;;  %v3443_v37 = vsub.s32 4, %v15152_v51  ;;  %v3740_v0 = vsel %vm10371_vm15, 0, %v10370_v26 }
 0x416   :  { %vm15383_vm4 = vcmp.le.f32.partialorder %v19348_v28, 0.7853982  ;;  %vm3830_vm6 = vc.u32 %v15334_v17, %v15321_v7  ;;  %v19353_v31 = vand.u32 2147483647, %v19340_v22  ;;  %v19354_v9 = vmov 0  ;;  %v15411_v17 = vpop.eup %11604 }
 0x417   :  { %v3429_v28 = vsub.s32 32, %v15347_v6  ;;  %v3633_v47 = vclz %v10365_v2  ;;  %vm19357_vm11 = vcmp.lt.s32.totalorder %v15231_v24, 2  ;;  %v4095_v60 = vadd.s32 1, %v10384_v44 }
 0x418   :  { %vm15395_vm2 = vcmp.le.f32.partialorder %v19353_v31, 0.7853982  ;;  %v3812_v39 = vsel %vm19357_vm11, %v3809_v63, %v3811_v35  ;;  %11606 = vcosq.f32 %v3029_v23  ;;  %vm19358_vm15 = vcmp.lt.s32.totalorder %v19322_v15, 0  ;;  %v19362_v35 = vld [vmem:[#allocation107_spill] sm:$0xff] }
 0x419   :  { %v19355_v9 = vsel %vm15395_vm2, 4294967295, %v19354_v9  ;;  %v15405_v26 = vsel %vm19358_vm15, %v3339_v21, %v19339_v49  ;;  %v3544_v55 = vmul.f32 %v3543_v58, %v3541_v36  ;;  %v3434_v3 = vadd.s32 127, %v3433_v27 }
 0x41a   :  { %19356 = vst [vmem:[#allocation110_spill] sm:$0xff] %v19355_v9  ;;  %19359 = vst [vmem:[#allocation108_spill] sm:$0xff] %v15405_v26  ;;  %v3341_v31 = vsel %vm15327_vm1, %v19322_v15, %v3338_v25  ;;  %v3745_v61 = vsub.s32 4294967266, %v3740_v0  ;;  %v3945_v7 = vclz %v10377_v29  ;;  %v3832_v2 = vsel %vm3830_vm6, %v3831_v50, %v15322_v53  ;;  %v19472_v15 = vld [vmem:[#allocation8_spill] sm:$0xff]  ;;  %v19491_v26 = vld [vmem:[#allocation10_spill] sm:$0xff] }
 0x41b   :  { %v3233_v24 = vxor.u32 2147483648, %v3232_v19  ;;  %vm19360_vm11 = vcmp.lt.s32.totalorder %v19335_v45, 0  ;;  %vm19361_vm15 = vcmp.lt.s32.totalorder %v19336_v33, 0  ;;  %v3828_v27 = vmul.u32 %v15308_v43, %v3812_v39 }
 0x41c   :  { %v3548_v44 = vsel %vm19360_vm11, %v3547_v62, %v19346_v38  ;;  %v3444_v49 = vsel %vm19361_vm15, %v3443_v37, %v15152_v51  ;;  %v3430_v25 = vshll.u32 %v15197_v56, %v15347_v6  ;;  %v3431_v21 = vshrl.u32 %v3413_v13, %v3429_v28 }
 0x41d   :  { %v10366_v58 = vadd.s32 4294967294, %v3633_v47  ;;  %vm4096_vm1 = vcmp.gt.s32.totalorder %v4095_v60, 0  ;;  %v3545_v50 = vxor.u32 2147483648, %v3544_v55  ;;  %v3435_v53 = vshll.u32 %v3434_v3, 23 }
 0x41e   :  { %v3741_v36 = vsub.s32 32, %v3740_v0  ;;  %v15422_v63 = vadd.s32 %v3832_v2, %v3828_v27  ;;  %11608 = vsinq.f32 %v3029_v23  ;;  %v3235_v38 = vsub.s32 4, %v19362_v35 }
 0x41f   :  { %v3746_v62 = vadd.s32 127, %v3745_v61  ;;  %v10378_v29 = vadd.s32 4294967294, %v3945_v7  ;;  %11610 = vcosq.f32 %v3341_v31  ;;  %v15427_v39 = vsel %vm15372_vm0, 0, %v3548_v44 }
 0x420   :  { %19363 = vst [vmem:[#allocation109_spill] sm:$0xff] %v15427_v39  ;;  %v3725_v51 = vadd.s32 %v14974_v4, %v14982_v41  ;;  %v4097_v56 = vsel %vm4096_vm1, %v4095_v60, 0  ;;  %vm19364_vm6 = vcmp.lt.s32.totalorder %v19340_v22, 0  ;;  %v3432_v47 = vor.u32 %v3431_v21, %v3430_v25 }
 0x421   :  { %v3234_v3 = vsel %vm19364_vm6, %v3233_v24, %v3232_v19  ;;  %v15435_v43 = vsel %vm15383_vm4, 0, %v3444_v49  ;;  %vm10367_vm11 = vcmp.lt.s32.totalorder %v10366_v58, 0  ;;  %vm19366_vm15 = vcmp.lt.s32.totalorder %v19335_v45, 0  ;;  %vm19367_vm1 = vmmov %vm19364_vm6 }
 0x422   :  { %19365 = vst [vmem:[#allocation107_spill] sm:$0xff] %v15435_v43  ;;  %v3546_v61 = vsel %vm19366_vm15, %v3545_v50, %v3544_v55  ;;  %v3436_v7 = vor.u32 4788187, %v3435_v53  ;;  %v3743_v6 = vshrl.u32 %v3725_v51, %v3741_v36  ;;  %v3834_v23 = vadd.s32 536870912, %v15422_v63  ;;  %v15440_v41 = vpop.eup %11606  ;;  %v19370_v50 = vld [vmem:[#allocation46_spill] sm:$0xff] }
 0x423   :  { %11612 = vsinq.f32 %v3341_v31  ;;  %v3747_v13 = vshll.u32 %v3746_v62, 23  ;;  %vm10379_vm12 = vcmp.lt.s32.totalorder %v10378_v29, 0  ;;  %v4099_v4 = vand.u32 31, %v4097_v56 }
 0x424   :  { %v3237_v19 = vsel %vm15395_vm2, %v19340_v22, %v3234_v3  ;;  %v3554_v37 = vadd.s32 3, %v15427_v39  ;;  %v3742_v28 = vshll.u32 %v15228_v34, %v3740_v0  ;;  %v15447_v60 = vsel %vm10367_vm11, 0, %v10366_v58 }
 0x425   :  { %v15452_v55 = vsel %vm15372_vm0, %v19335_v45, %v3546_v61  ;;  %v3439_v31 = vcvt.s32.f32 %v3432_v47  ;;  %v3450_v2 = vadd.s32 3, %v15435_v43  ;;  %v3755_v24 = vsub.s32 4, %v15182_v40 }
 0x426   :  { %v3437_v44 = vand.u32 2147483647, %v3436_v7  ;;  %v15456_v49 = vor.u32 %v3743_v6, %v3742_v28  ;;  %v15458_v27 = vsel %vm10379_vm12, 0, %v10378_v29  ;;  %v15460_v25 = vshrl.u32 %v3834_v23, 30 }
 0x427   :  { %11614 = vcosq.f32 %v3237_v19  ;;  %v3748_v34 = vor.u32 4788187, %v3747_v13  ;;  %v3641_v0 = vsub.s32 4294967266, %v15447_v60  ;;  %v15463_v21 = vsub.s32 32, %v4099_v4 }
 0x428   :  { %v15468_v18 = vsel %vm19367_vm1, %v3235_v38, %v19362_v35  ;;  %11616 = vsinq.f32 %v3237_v19  ;;  %v15470_v58 = vand.u32 3, %v3554_v37  ;;  %vm18944_vm0 = vcmp.lt.s32.totalorder %v19370_v50, 0  ;;  %v15473_v53 = vpop.eup %11608  ;;  %v19373_v37 = vld [vmem:[#allocation85_spill] sm:$0xff] }
 0x429   :  { %19368 = vst [vmem:[#allocation119_spill] sm:$0xff] %v15468_v18  ;;  %11618 = vcosq.f32 %v15452_v55  ;;  %v15476_v36 = vand.u32 3, %v3450_v2  ;;  %v15481_v62 = vsel %vm18944_vm0, %v3755_v24, %v15182_v40  ;;  %v3953_v29 = vsub.s32 4294967266, %v15458_v27  ;;  %v15484_v35 = vpop.eup %11610 }
 0x42a   :  { %19369 = vst [vmem:[#allocation120_spill] sm:$0xff] %v15470_v58  ;;  %19372 = vst [vmem:[#allocation122_spill] sm:$0xff] %v15484_v35  ;;  %v15486_v38 = vmul.f32 %v3439_v31, %v3437_v44  ;;  %v3751_v51 = vcvt.s32.f32 %v15456_v49  ;;  %v3621_v3 = vadd.s32 %v15106_v54, %v15119_v1  ;;  %v3836_v47 = vshll.u32 %v15460_v25, 30  ;;  %v19488_v35 = vld [vmem:[#allocation57_spill] sm:$0xff] }
 0x42b   :  { %19371 = vst [vmem:[#allocation121_spill] sm:$0xff] %v15476_v36  ;;  %v3749_v61 = vand.u32 2147483647, %v3748_v34  ;;  %v3642_v7 = vadd.s32 127, %v3641_v0  ;;  %v4112_v40 = vshrl.u32 %v19051_v52, %v15463_v21  ;;  %v3637_v23 = vsub.s32 32, %v15447_v60 }
 0x42c   :  { %v3933_v13 = vadd.s32 %v15124_v42, %v15132_v20  ;;  %v4115_v19 = vshrl.u32 %v19054_v11, %v15463_v21  ;;  %v3984_v28 = vand.u32 2139095040, %v19373_v37  ;;  %v3954_v1 = vadd.s32 127, %v3953_v29 }
 0x42d   :  { %v15501_v54 = vpop.eup %11612  ;;  %v15503_v31 = vshrl.u32 %v4097_v56, 5  ;;  %v4103_v2 = vshrl.u32 %v19052_v57, %v15463_v21  ;;  %v4111_v24 = vshll.u32 %v19050_v8, %v4099_v4  ;;  %v15509_v44 = vsub.s32 %v15422_v63, %v3836_v47 }
 0x42e   :  { %19374 = vst [vmem:[#allocation123_spill] sm:$0xff] %v15501_v54  ;;  %v4106_v42 = vshrl.u32 %v19053_v59, %v15463_v21  ;;  %v4109_v20 = vshrl.u32 %v19050_v8, %v15463_v21  ;;  %v4114_v49 = vshll.u32 %v19051_v52, %v4099_v4  ;;  %v3643_v34 = vshll.u32 %v3642_v7, 23  ;;  %v19489_v54 = vld [vmem:[#allocation55_spill] sm:$0xff] }
 0x42f   :  { %v3949_v56 = vsub.s32 32, %v15458_v27  ;;  %v4102_v0 = vshll.u32 %v19057_v10, %v4099_v4  ;;  %v4113_v29 = vor.u32 %v4112_v40, %v4111_v24  ;;  %v3639_v6 = vshrl.u32 %v3621_v3, %v3637_v23 }
 0x430   :  { %v4105_v36 = vshll.u32 %v19052_v57, %v4099_v4  ;;  %v4108_v63 = vshll.u32 %v19053_v59, %v4099_v4  ;;  %v4116_v47 = vor.u32 %v4115_v19, %v4114_v49  ;;  %v19376_v45 = vand.u32 2147483647, %v19370_v50 }
 0x431   :  { %v15520_v58 = vpop.eup %11614  ;;  %v3638_v7 = vshll.u32 %v15304_v12, %v15447_v60  ;;  %v3955_v39 = vshll.u32 %v3954_v1, 23  ;;  %v19379_v40 = vand.u32 2147483647, %v19323_v32  ;;  %v15532_v23 = vor.u32 %v4103_v2, %v4102_v0  ;;  %v19382_v12 = vld [vmem:[#allocation67_spill] sm:$0xff] }
 0x432   :  { %19375 = vst [vmem:[#allocation124_spill] sm:$0xff] %v15520_v58  ;;  %vm15524_vm12 = vcmp.le.f32.partialorder %v19376_v45, 0.7853982  ;;  %v15534_v24 = vpop.eup %11616  ;;  %v3839_v4 = vsub.s32 0, %v15509_v44  ;;  %v15537_v19 = vor.u32 %v4106_v42, %v4105_v36  ;;  %v4110_v49 = vor.u32 %v4109_v20, %v4108_v63 }
 0x433   :  { %v4092_v3 = vand.u32 8388607, %v19379_v40  ;;  %19380 = vst [vmem:[#allocation125_spill] sm:$0xff] %v15534_v24  ;;  %vm18945_vm6 = vcmp.lt.s32.totalorder %v15503_v31, 4  ;;  %v15540_v45 = vpop.eup %11618  ;;  %v3441_v22 = vxor.u32 2147483648, %v15486_v38  ;;  %v3951_v1 = vshrl.u32 %v3933_v13, %v3949_v56 }
 0x434   :  { %19381 = vst [vmem:[#allocation126_spill] sm:$0xff] %v15540_v45  ;;  %v3644_v60 = vor.u32 4788187, %v3643_v34  ;;  %v4126_v2 = vsel %vm18945_vm6, %v4113_v29, 920167782  ;;  %v3752_v0 = vmul.f32 %v3751_v51, %v3749_v61  ;;  %v3640_v40 = vor.u32 %v3639_v6, %v3638_v7  ;;  %v19386_v7 = vld [vmem:[#allocation70_spill] sm:$0xff] }
 0x435   :  { %v4130_v36 = vsel %vm18945_vm6, %v4116_v47, 1326507024  ;;  %v3985_v42 = vshrl.u32 %v3984_v28, 23  ;;  %v3950_v20 = vshll.u32 %v15318_v16, %v15458_v27  ;;  %v3956_v63 = vor.u32 4788187, %v3955_v39 }
 0x436   :  { %vm18947_vm15 = vcmp.lt.s32.totalorder %v15503_v31, 1  ;;  %vm18946_vm1 = vcmp.lt.s32.totalorder %v15503_v31, 3  ;;  %v19383_v34 = vand.u32 2147483647, %v19382_v12  ;;  %v10373_v51 = vmin.u32 %v3839_v4, %v15509_v44 }
 0x437   :  { %v4093_v61 = vor.u32 8388608, %v4092_v3  ;;  %v4125_v6 = vsel %vm18947_vm15, %v15532_v23, %v15537_v19  ;;  %v4127_v16 = vsel %vm18946_vm1, %v4110_v49, %v4126_v2  ;;  %v3645_v39 = vand.u32 2147483647, %v3644_v60 }
 0x438   :  { %vm15554_vm0 = vcmp.le.f32.partialorder %v19383_v34, 0.7853982  ;;  %v3952_v27 = vor.u32 %v3951_v1, %v3950_v20  ;;  %v4129_v28 = vsel %vm18947_vm15, %v15537_v19, %v4110_v49  ;;  %v4131_v56 = vsel %vm18946_vm1, %v4113_v29, %v4130_v36 }
 0x439   :  { %11620 = vsinq.f32 %v15452_v55  ;;  %v3651_v47 = vsub.s32 4, %v15255_v48  ;;  %vm18950_vm6 = vcmp.lt.s32.totalorder %v19386_v7, 0  ;;  %vm18948_vm11 = vcmp.lt.s32.totalorder %v15503_v31, 2 }
 0x43a   :  { %v3647_v3 = vcvt.s32.f32 %v3640_v40  ;;  %v3957_v4 = vand.u32 2147483647, %v3956_v63  ;;  %v4128_v60 = vsel %vm18948_vm11, %v4125_v6, %v4127_v16  ;;  %v10380_v1 = vadd.s32 4294967169, %v3985_v42 }
 0x43b   :  { %v15579_v2 = vsel %vm15524_vm12, 0, %v15481_v62  ;;  %v3841_v29 = vclz %v10373_v51  ;;  %v4132_v55 = vsel %vm18948_vm11, %v4129_v28, %v4131_v56  ;;  %v15583_v36 = vshll.u32 %v4093_v61, 8 }
 0x43c   :  { %19387 = vst [vmem:[#allocation127_spill] sm:$0xff] %v15579_v2  ;;  %vm19388_vm1 = vcmp.lt.s32.totalorder %v19336_v33, 0  ;;  %v3753_v20 = vxor.u32 2147483648, %v3752_v0  ;;  %v3648_v63 = vmul.f32 %v3647_v3, %v3645_v39  ;;  %v3959_v34 = vcvt.s32.f32 %v3952_v27 }
 0x43d   :  { %v3442_v40 = vsel %vm19388_vm1, %v3441_v22, %v15486_v38  ;;  %vm19389_vm15 = vcmp.lt.s32.totalorder %v19382_v12, 0  ;;  %v3963_v62 = vsub.s32 4, %v15271_v30  ;;  %v3991_v22 = vadd.s32 1, %v10380_v1 }
 0x43e   :  { %v3652_v42 = vsel %vm19389_vm15, %v3651_v47, %v15255_v48  ;;  %v15593_v51 = vmul.u32.u64.low %v15583_v36, %v4128_v60  ;;  %v15594_v6 = vmul.u32.u64.high %v15583_v36, %v4128_v60, %v15593_v51  ;;  %v3960_v61 = vmul.f32 %v3959_v34, %v3957_v4  ;;  %v19411_v48 = vld [vmem:[#allocation15_spill] sm:$0xff] }
 0x43f   :  { %v15598_v16 = vmul.u32.u64.low %v15583_v36, %v4132_v55  ;;  %v15599_v28 = vmul.u32.u64.high %v15583_v36, %v4132_v55, %v15598_v16  ;;  %v3445_v38 = vsel %vm15383_vm4, %v19336_v33, %v3442_v40  ;;  %v19390_v39 = vand.u32 2147483647, %v19386_v7 }
 0x440   :  { %v10374_v27 = vadd.s32 4294967294, %v3841_v29  ;;  %v3859_v56 = vsub.s32 4, %v15460_v25  ;;  %vm19393_vm1 = vcmp.lt.s32.totalorder %v19370_v50, 0  ;;  %v3649_v3 = vxor.u32 2147483648, %v3648_v63 }
 0x441   :  { %vm15606_vm15 = vcmp.le.f32.partialorder %v19390_v39, 0.7853982  ;;  %v3754_v47 = vsel %vm19393_vm1, %v3753_v20, %v3752_v0  ;;  %v15615_v4 = vsel %vm15554_vm0, 0, %v3652_v42  ;;  %v19395_v5 = vand.u32 2147483647, %v19297_v46 }
 0x442   :  { %19394 = vst [vmem:[#allocation128_spill] sm:$0xff] %v15615_v4  ;;  %v3762_v1 = vadd.s32 3, %v15579_v2  ;;  %v3964_v29 = vsel %vm18950_vm6, %v3963_v62, %v15271_v30  ;;  %vm18971_vm11 = vcmp.lt.s32.totalorder %v19297_v46, 0  ;;  %vm19398_vm1 = vcmp.lt.s32.totalorder %v15503_v31, 4 }
 0x443   :  { %vm15619_vm4 = vcmp.le.f32.partialorder %v19395_v5, 0.7853982  ;;  %v4122_v0 = vsel %vm19398_vm1, %v4110_v49, 2102212464  ;;  %11622 = vcosq.f32 %v3445_v38  ;;  %v3961_v55 = vxor.u32 2147483648, %v3960_v61  ;;  %v15632_v20 = vpop.eup %11620 }
 0x444   :  { %v4101_v40 = vshrl.u32 %v19057_v10, %v15463_v21  ;;  %vm3992_vm2 = vcmp.gt.s32.totalorder %v3991_v22, 0  ;;  %19399 = vst [vmem:[#allocation129_spill] sm:$0xff] %v15632_v20  ;;  %v3757_v34 = vsel %vm15524_vm12, %v19370_v50, %v3754_v47  ;;  %v3658_v42 = vadd.s32 3, %v15615_v4 }
 0x445   :  { %vm10375_vm6 = vcmp.lt.s32.totalorder %v10374_v27, 0  ;;  %v3860_v30 = vsel %vm18971_vm11, %v3859_v56, %v15460_v25  ;;  %vm19400_vm1 = vcmp.lt.s32.totalorder %v19382_v12, 0  ;;  %v15645_v21 = vsel %vm15606_vm15, 0, %v3964_v29 }
 0x446   :  { %v3650_v49 = vsel %vm19400_vm1, %v3649_v3, %v3648_v63  ;;  %19401 = vst [vmem:[#allocation130_spill] sm:$0xff] %v15645_v21  ;;  %vm19402_vm13 = vcmp.lt.s32.totalorder %v15503_v31, 1  ;;  %vm19403_vm12 = vcmp.lt.s32.totalorder %v15503_v31, 3  ;;  %11624 = vsinq.f32 %v3445_v38 }
 0x447   :  { %v4121_v62 = vsel %vm19402_vm13, %v4101_v40, %v15532_v23  ;;  %v4123_v43 = vsel %vm19403_vm12, %v15537_v19, %v4122_v0  ;;  %v4143_v16 = vadd.s32 1, %v15594_v6  ;;  %v18952_v25 = vand.u32 2147483647, %v19373_v37  ;;  %v19409_v0 = vld [vmem:[#allocation98_spill] sm:$0xff] }
 0x448   :  { %v3993_v39 = vsel %vm3992_vm2, %v3991_v22, 0  ;;  %vm19404_vm1 = vcmp.lt.s32.totalorder %v19386_v7, 0  ;;  %v3844_v56 = vsel %vm10375_vm6, 0, %v10374_v27  ;;  %v15659_v47 = vsel %vm15619_vm4, 0, %v3860_v30 }
 0x449   :  { %v3962_v63 = vsel %vm19404_vm1, %v3961_v55, %v3960_v61  ;;  %19405 = vst [vmem:[#allocation131_spill] sm:$0xff] %v15659_v47  ;;  %vm4142_vm13 = vc.u32 %v15599_v28, %v15593_v51  ;;  %11626 = vcosq.f32 %v3757_v34  ;;  %v3653_v23 = vsel %vm15554_vm0, %v19382_v12, %v3650_v49  ;;  %v19413_v49 = vld [vmem:[#allocation117_spill] sm:$0xff]  ;;  %v19425_v12 = vld [vmem:[#allocation22_spill] sm:$0xff] }
 0x44a   :  { %v3970_v19 = vadd.s32 3, %v15645_v21  ;;  %vm19406_vm2 = vcmp.lt.s32.totalorder %v15503_v31, 2  ;;  %11628 = vsinq.f32 %v3757_v34  ;;  %v15669_v61 = vand.u32 3, %v3762_v1 }
 0x44b   :  { %v4124_v22 = vsel %vm19406_vm2, %v4121_v62, %v4123_v43  ;;  %v15671_v38 = vand.u32 3, %v3658_v42  ;;  %v15673_v27 = vand.u32 31, %v3993_v39  ;;  %v3965_v3 = vsel %vm15606_vm15, %v19386_v7, %v3962_v63 }
 0x44c   :  { %19407 = vst [vmem:[#allocation132_spill] sm:$0xff] %v15669_v61  ;;  %v3849_v5 = vsub.s32 4294967266, %v3844_v56  ;;  %v3866_v13 = vadd.s32 3, %v15659_v47  ;;  %v4144_v29 = vsel %vm4142_vm13, %v4143_v16, %v15594_v6  ;;  %11630 = vcosq.f32 %v3653_v23  ;;  %v19414_v6 = vld [vmem:[#allocation115_spill] sm:$0xff] }
 0x44d   :  { %19408 = vst [vmem:[#allocation133_spill] sm:$0xff] %v15671_v38  ;;  %v4140_v31 = vmul.u32 %v15583_v36, %v4124_v22  ;;  %v15683_v1 = vand.u32 8388607, %v18952_v25  ;;  %v4296_v55 = vand.u32 2139095040, %v19409_v0  ;;  %11632 = vsinq.f32 %v3653_v23  ;;  %v15689_v30 = vpop.eup %11622  ;;  %v19424_v38 = vld [vmem:[#allocation23_spill] sm:$0xff] }
 0x44e   :  { %v15686_v40 = vand.u32 3, %v3970_v19  ;;  %v3845_v34 = vsub.s32 32, %v3844_v56  ;;  %v1259_v42 = vsub.s32 4, %v19411_v48  ;;  %19412 = vst [vmem:[#allocation15_spill] sm:$0xff] %v15689_v30  ;;  %11634 = vcosq.f32 %v3965_v3 }
 0x44f   :  { %v3829_v62 = vadd.s32 %v19414_v6, %v19413_v49  ;;  %v15693_v43 = vadd.s32 %v4144_v29, %v4140_v31  ;;  %v15696_v36 = vsub.s32 32, %v15673_v27  ;;  %11636 = vsinq.f32 %v3965_v3 }
 0x450   :  { %19410 = vst [vmem:[#allocation134_spill] sm:$0xff] %v15686_v40  ;;  %v3850_v16 = vadd.s32 127, %v3849_v5  ;;  %v15698_v63 = vand.u32 3, %v3866_v13  ;;  %v15702_v22 = vshrl.u32 %v3993_v39, 5  ;;  %v15704_v25 = vshrl.u32 %v4296_v55, 23  ;;  %v19416_v40 = vld [vmem:[#allocation105_spill] sm:$0xff]  ;;  %v15707_v49 = vpop.eup %11624 }
 0x451   :  { %19417 = vst [vmem:[#allocation115_spill] sm:$0xff] %v15707_v49  ;;  %v3846_v29 = vshll.u32 %v15509_v44, %v3844_v56  ;;  %v3847_v31 = vshrl.u32 %v3829_v62, %v3845_v34  ;;  %v3998_v3 = vshll.u32 %v19057_v10, %v15673_v27  ;;  %v19418_v5 = vld [vmem:[#allocation3_spill] sm:$0xff]  ;;  %v4146_v6 = vadd.s32 536870912, %v15693_v43 }
 0x452   :  { %19415 = vst [vmem:[#allocation117_spill] sm:$0xff] %v15698_v63  ;;  %vm19419_vm0 = vcmp.lt.s32.totalorder %v19418_v5, 0  ;;  %v3999_v39 = vshrl.u32 %v19052_v57, %v15696_v36  ;;  %v4002_v55 = vshrl.u32 %v19053_v59, %v15696_v36  ;;  %v3851_v56 = vshll.u32 %v3850_v16, 23 }
 0x453   :  { %v1260_v13 = vsel %vm19419_vm0, %v1259_v42, %v19411_v48  ;;  %v15722_v44 = vpop.eup %11626  ;;  %v4005_v34 = vshrl.u32 %v19050_v8, %v15696_v36  ;;  %v4001_v42 = vshll.u32 %v19052_v57, %v15673_v27  ;;  %v4004_v63 = vshll.u32 %v19053_v59, %v15673_v27 }
 0x454   :  { %v1262_v23 = vsel %vm12531_vm5, 0, %v1260_v13  ;;  %19421 = vst [vmem:[#allocation3_spill] sm:$0xff] %v15722_v44  ;;  %v15726_v48 = vpop.eup %11628  ;;  %v4007_v7 = vshll.u32 %v19050_v8, %v15673_v27  ;;  %v19423_v13 = vld [vmem:[#allocation24_spill] sm:$0xff]  ;;  %v15737_v16 = vshrl.u32 %v19057_v10, %v15696_v36  ;;  %v1158_v50 = vsel %vm12551_vm7, 0, %v19425_v12 }
 0x455   :  { %v1266_v62 = vadd.s32 3, %v1262_v23  ;;  %v4593_v19 = vand.u32 3, %v1262_v23  ;;  %19422 = vst [vmem:[#allocation19_spill] sm:$0xff] %v15726_v48  ;;  %v1270_v47 = vxor.u32 2147483648, %v19423_v13  ;;  %v1273_v23 = vxor.u32 2147483648, %v19424_v38 }
 0x456   :  { %v15743_v4 = vpop.eup %11630  ;;  %v15745_v44 = vor.u32 %v3847_v31, %v3846_v29  ;;  %v15747_v48 = vshrl.u32 %v4146_v6, 30  ;;  %v15749_v2 = vor.u32 %v3999_v39, %v3998_v3  ;;  %v4008_v33 = vshrl.u32 %v19051_v52, %v15696_v36 }
 0x457   :  { %v1267_v21 = vand.u32 3, %v1266_v62  ;;  %19427 = vst [vmem:[#allocation24_spill] sm:$0xff] %v15743_v4  ;;  %v15753_v37 = vpop.eup %11632  ;;  %v3852_v62 = vor.u32 4788187, %v3851_v56  ;;  %v15755_v30 = vor.u32 %v4002_v55, %v4001_v42  ;;  %v15757_v49 = vor.u32 %v4005_v34, %v4004_v63 }
 0x458   :  { %19428 = vst [vmem:[#allocation23_spill] sm:$0xff] %v15753_v37  ;;  %vm4595_vm5 = vcmp.eq.s32.totalorder %v4593_v19, 0  ;;  %v15759_v12 = vpop.eup %11634  ;;  %vm4598_vm6 = vcmp.eq.s32.totalorder %v4593_v19, 2  ;;  %v1162_v29 = vadd.s32 3, %v1158_v50  ;;  %vm4594_vm12 = vcmp.lt.s32.totalorder %v4593_v19, 2 }
 0x459   :  { %19429 = vst [vmem:[#allocation22_spill] sm:$0xff] %v15759_v12  ;;  %vm1269_vm7 = vcmp.eq.s32.totalorder %v1267_v21, 0  ;;  %v4597_v61 = vsel %vm4595_vm5, %v19424_v38, %v1270_v47  ;;  %v15762_v31 = vpop.eup %11636  ;;  %vm1272_vm15 = vcmp.eq.s32.totalorder %v1267_v21, 2  ;;  %v4600_v3 = vsel %vm4598_vm6, %v1273_v23, %v19423_v13 }
 0x45a   :  { %19430 = vst [vmem:[#allocation21_spill] sm:$0xff] %v15762_v31  ;;  %v1271_v6 = vsel %vm1269_vm7, %v19424_v38, %v1270_v47  ;;  %vm1265_vm1 = vweird.f32 %v19418_v5  ;;  %vm1268_vm13 = vcmp.lt.s32.totalorder %v1267_v21, 2  ;;  %v4601_v63 = vsel %vm4594_vm12, %v4597_v61, %v4600_v3  ;;  %v19431_v38 = vld [vmem:[#allocation36_spill] sm:$0xff]  ;;  %v19432_v61 = vld [vmem:[#allocation26_spill] sm:$0xff] }
 0x45b   :  { %v1274_v39 = vsel %vm1272_vm15, %v1273_v23, %v19423_v13  ;;  %v4148_v55 = vshll.u32 %v15747_v48, 30  ;;  %v4602_v56 = vsel %vm1265_vm1, nan, %v4601_v63  ;;  %v4490_v42 = vand.u32 3, %v1158_v50 }
 0x45c   :  { %v1275_v34 = vsel %vm1268_vm13, %v1271_v6, %v1274_v39  ;;  %v4010_v12 = vshll.u32 %v19051_v52, %v15673_v27  ;;  %7983 = vrot.lane.b32.xlu0 %v4602_v56, %s11664_s6  ;;  %v1163_v47 = vand.u32 3, %v1162_v29  ;;  %v1166_v5 = vxor.u32 2147483648, %v19431_v38 }
 0x45d   :  { %v15772_v19 = vsel %vm1265_vm1, nan, %v1275_v34  ;;  %v3855_v21 = vcvt.s32.f32 %v15745_v44  ;;  %v4171_v13 = vsub.s32 4, %v15747_v48  ;;  %v1169_v50 = vxor.u32 2147483648, %v19432_v61  ;;  %v19435_v34 = vld [vmem:[#allocation33_spill] sm:$0xff] }
 0x45e   :  { %v15778_v23 = vmul.f32 2.0, %v15772_v19  ;;  %v3853_v3 = vand.u32 2147483647, %v3852_v62  ;;  %v15782_v27 = vor.u32 %v4008_v33, %v4007_v7  ;;  %v4011_v6 = vshrl.u32 %v19054_v11, %v15696_v36  ;;  %v19434_v7 = vld [vmem:[#allocation4_spill] sm:$0xff] }
 0x45f   :  { %vm4013_vm0 = vcmp.lt.s32.totalorder %v15702_v22, 1  ;;  %v15788_v29 = vsub.s32 %v15693_v43, %v4148_v55  ;;  %vm4492_vm7 = vcmp.eq.s32.totalorder %v4490_v42, 0  ;;  %vm4014_vm6 = vcmp.lt.s32.totalorder %v15702_v22, 2 }
 0x460   :  { %v15792_v44 = vmul.f32 %v15778_v23, %v4602_v56  ;;  %vm4016_vm15 = vcmp.lt.s32.totalorder %v15702_v22, 4  ;;  %vm1165_vm12 = vcmp.eq.s32.totalorder %v1163_v47, 0  ;;  %v4494_v33 = vsel %vm4492_vm7, %v19432_v61, %v1166_v5 }
 0x461   :  { %19433 = vst [vmem:[#allocation36_spill] sm:$0xff] %v15788_v29  ;;  %vm4495_vm1 = vcmp.eq.s32.totalorder %v4490_v42, 2  ;;  %vm1168_vm13 = vcmp.eq.s32.totalorder %v1163_v47, 2  ;;  %vm4491_vm11 = vcmp.lt.s32.totalorder %v4490_v42, 2  ;;  %v1167_v36 = vsel %vm1165_vm12, %v19432_v61, %v1166_v5 }
 0x462   :  { %8111 = vrot.lane.b32.xlu1 %v15792_v44, %s11665_s7  ;;  %v4497_v43 = vsel %vm4495_vm1, %v1169_v50, %v19431_v38  ;;  %vm1161_vm2 = vweird.f32 %v19434_v7  ;;  %vm1164_vm5 = vcmp.lt.s32.totalorder %v1163_v47, 2  ;;  %v1170_v63 = vsel %vm1168_vm13, %v1169_v50, %v19431_v38 }
 0x463   :  { %v4498_v62 = vsel %vm4491_vm11, %v4494_v33, %v4497_v43  ;;  %v4018_v39 = vsel %vm4016_vm15, %v15757_v49, 2102212464  ;;  %v1171_v56 = vsel %vm1164_vm5, %v1167_v36, %v1170_v63  ;;  %v1470_v42 = vsel %vm12895_vm10, 0, %v19435_v34  ;;  %v19438_v43 = vld [vmem:[#allocation41_spill] sm:$0xff] }
 0x464   :  { %v4499_v55 = vsel %vm1161_vm2, nan, %v4498_v62  ;;  %v15809_v4 = vmul.f32 %v3855_v21, %v3853_v3  ;;  %v4151_v5 = vsub.s32 0, %v15788_v29  ;;  %v15813_v47 = vsel %vm1161_vm2, nan, %v1171_v56  ;;  %v19440_v62 = vld [vmem:[#allocation40_spill] sm:$0xff] }
 0x465   :  { %7981 = vrot.lane.b32.xlu0 %v4499_v55, %s11664_s6  ;;  %v1474_v61 = vadd.s32 3, %v1470_v42  ;;  %v4012_v38 = vor.u32 %v4011_v6, %v4010_v12  ;;  %v4017_v50 = vsel %vm4013_vm0, %v15737_v16, %v15749_v2  ;;  %v4022_v31 = vsel %vm4016_vm15, %v15782_v27, 920167782 }
 0x466   :  { %v7693_v21 = vmul.f32 2.0, %v15813_v47  ;;  %vm19437_vm10 = vcmp.lt.s32.totalorder %v15702_v22, 3  ;;  %v1478_v36 = vxor.u32 2147483648, %v19438_v43  ;;  %v4799_v7 = vand.u32 3, %v1470_v42 }
 0x467   :  { %v4019_v3 = vsel %vm19437_vm10, %v15755_v30, %v4018_v39  ;;  %v1475_v33 = vand.u32 3, %v1474_v61  ;;  %vm19439_vm11 = vcmp.lt.s32.totalorder %v19323_v32, 0  ;;  %v4021_v16 = vsel %vm4013_vm0, %v15749_v2, %v15755_v30  ;;  %vm19441_vm2 = vmmov %vm19437_vm10 }
 0x468   :  { %v15830_v12 = vsel %vm19439_vm11, %v4171_v13, %v15747_v48  ;;  %v15836_v6 = vmul.f32 %v7693_v21, %v4499_v55  ;;  %v1481_v63 = vxor.u32 2147483648, %v19440_v62  ;;  %v3857_v39 = vxor.u32 2147483648, %v15809_v4  ;;  %vm19452_vm10 = vmmov %vm19441_vm2 }
 0x469   :  { %v10385_v56 = vmin.u32 %v4151_v5, %v15788_v29  ;;  %v4023_v34 = vsel %vm19441_vm2, %v15757_v49, %v4022_v31  ;;  %v4025_v48 = vsel %vm4013_vm0, %v15755_v30, %v15757_v49  ;;  %v15850_v2 = vsel %vm4014_vm6, %v4017_v50, %v4019_v3  ;;  %v19443_v30 = vld [vmem:[#allocation34_spill] sm:$0xff]  ;;  %v19445_v3 = vld [vmem:[#allocation5_spill] sm:$0xff] }
 0x46a   :  { %v4026_v13 = vsel %vm4016_vm15, %v4012_v38, 1326507024  ;;  %v19442_v55 = vor.u32 8388608, %v15683_v1  ;;  %8109 = vrot.lane.b32.xlu1 %v15836_v6, %s11665_s7  ;;  %vm4801_vm5 = vcmp.eq.s32.totalorder %v4799_v7, 0  ;;  %vm1477_vm7 = vcmp.eq.s32.totalorder %v1475_v33, 0 }
 0x46b   :  { %vm1480_vm12 = vcmp.eq.s32.totalorder %v1475_v33, 2  ;;  %v4803_v5 = vsel %vm4801_vm5, %v19440_v62, %v1478_v36  ;;  %v1366_v61 = vsel %vm13018_vm14, 0, %v19443_v30  ;;  %v15866_v50 = vsel %vm4014_vm6, %v4021_v16, %v4023_v34 }
 0x46c   :  { %v15856_v42 = vshll.u32 %v19442_v55, 8  ;;  %vm4804_vm0 = vcmp.eq.s32.totalorder %v4799_v7, 2  ;;  %v1479_v1 = vsel %vm1477_vm7, %v19440_v62, %v1478_v36  ;;  %v1482_v38 = vsel %vm1480_vm12, %v1481_v63, %v19438_v43 }
 0x46d   :  { %v15872_v31 = vmul.f32 %v15778_v23, %v15772_v19  ;;  %vm1473_vm15 = vweird.f32 %v19445_v3  ;;  %vm4800_vm1 = vcmp.lt.s32.totalorder %v4799_v7, 2  ;;  %v4806_v55 = vsel %vm4804_vm0, %v1481_v63, %v19438_v43  ;;  %v19450_v43 = vld [vmem:[#allocation45_spill] sm:$0xff]  ;;  %v19451_v63 = vld [vmem:[#allocation27_spill] sm:$0xff]  ;;  %v19454_v3 = vld [vmem:[#allocation6_spill] sm:$0xff] }
 0x46e   :  { %vm1476_vm13 = vcmp.lt.s32.totalorder %v1475_v33, 2  ;;  %v4807_v30 = vsel %vm4800_vm1, %v4803_v5, %v4806_v55  ;;  %v15877_v49 = vmul.f32 %v7693_v21, %v15813_v47  ;;  %v1370_v16 = vadd.s32 3, %v1366_v61 }
 0x46f   :  { %v19446_v34 = vand.u32 2147483647, %v19323_v32  ;;  %v19447_v36 = vmov 0  ;;  %v4153_v62 = vclz %v10385_v56  ;;  %v10392_v23 = vadd.s32 4294967169, %v15704_v25 }
 0x470   :  { %v4808_v7 = vsel %vm1473_vm15, nan, %v4807_v30  ;;  %v1483_v37 = vsel %vm1476_vm13, %v1479_v1, %v1482_v38  ;;  %v1371_v33 = vand.u32 3, %v1370_v16  ;;  %v1374_v21 = vxor.u32 2147483648, %v19450_v43 }
 0x471   :  { %vm15881_vm14 = vcmp.le.f32.partialorder %v19446_v34, 0.7853982  ;;  %7987 = vrot.lane.b32.xlu0 %v4808_v7, %s11664_s6  ;;  %v1377_v5 = vxor.u32 2147483648, %v19451_v63  ;;  %v4696_v55 = vand.u32 3, %v1366_v61  ;;  %v4027_v34 = vsel %vm19452_vm10, %v15782_v27, %v4026_v13 }
 0x472   :  { %v19448_v36 = vsel %vm15881_vm14, 4294967295, %v19447_v36  ;;  %v15896_v56 = vmul.u32.u64.low %v15856_v42, %v15866_v50  ;;  %v15897_v25 = vmul.u32.u64.high %v15856_v42, %v15866_v50, %v15896_v56  ;;  %v7790_v1 = vsub.f32 1.0, %v15872_v31 }
 0x473   :  { %19449 = vst [vmem:[#allocation26_spill] sm:$0xff] %v19448_v36  ;;  %v15903_v38 = vsel %vm1473_vm15, nan, %v1483_v37  ;;  %v18977_v30 = vsub.f32 1.0, %v15877_v49  ;;  %vm1373_vm11 = vcmp.eq.s32.totalorder %v1371_v33, 0  ;;  %v15907_v61 = vmul.f32 2.0, %v15792_v44 }
 0x474   :  { %vm1376_vm2 = vcmp.eq.s32.totalorder %v1371_v33, 2  ;;  %vm4697_vm5 = vcmp.lt.s32.totalorder %v4696_v55, 2  ;;  %vm4698_vm7 = vcmp.eq.s32.totalorder %v4696_v55, 0  ;;  %vm4701_vm12 = vcmp.eq.s32.totalorder %v4696_v55, 2  ;;  %v19455_v55 = vld [vmem:[#allocation39_spill] sm:$0xff] }
 0x475   :  { %8237 = vrot.lane.b32.xlu0 %v18977_v30, %s11666_s23  ;;  %v4700_v27 = vsel %vm4698_vm7, %v19451_v63, %v1374_v21  ;;  %v4703_v37 = vsel %vm4701_vm12, %v1377_v5, %v19450_v43  ;;  %v1375_v13 = vsel %vm1373_vm11, %v19451_v63, %v1374_v21  ;;  %v1378_v50 = vsel %vm1376_vm2, %v1377_v5, %v19450_v43  ;;  %v19459_v5 = vld [vmem:[#allocation49_spill] sm:$0xff] }
 0x476   :  { %vm19453_vm0 = vcmp.lt.s32.totalorder %v19297_v46, 0  ;;  %vm1369_vm15 = vweird.f32 %v19454_v3  ;;  %v4704_v16 = vsel %vm4697_vm5, %v4700_v27, %v4703_v37  ;;  %v1678_v45 = vsel %vm13167_vm3, 0, %v19455_v55 }
 0x477   :  { %v3858_v31 = vsel %vm19453_vm0, %v3857_v39, %v15809_v4  ;;  %v4028_v30 = vsel %vm4014_vm6, %v4025_v48, %v4027_v34  ;;  %vm1372_vm1 = vcmp.lt.s32.totalorder %v1371_v33, 2  ;;  %v4705_v21 = vsel %vm1369_vm15, nan, %v4704_v16  ;;  %v19458_v48 = vld [vmem:[#allocation54_spill] sm:$0xff] }
 0x478   :  { %v7854_v43 = vmul.f32 %v15907_v61, %v7790_v1  ;;  %v15930_v63 = vadd.s32 %v15593_v51, %v15599_v28  ;;  %v10386_v4 = vadd.s32 4294967294, %v4153_v62  ;;  %v15933_v39 = vmul.f32 2.0, %v15903_v38  ;;  %7985 = vrot.lane.b32.xlu1 %v4705_v21, %s11664_s6 }
 0x479   :  { %v1379_v32 = vsel %vm1372_vm1, %v1375_v13, %v1378_v50  ;;  %v15939_v22 = vsel %vm15881_vm14, 0, %v15830_v12  ;;  %v1686_v33 = vxor.u32 2147483648, %v19458_v48  ;;  %v1689_v51 = vxor.u32 2147483648, %v19459_v5 }
 0x47a   :  { %19457 = vst [vmem:[#allocation4_spill] sm:$0xff] %v15939_v22  ;;  %8367 = vrot.lane.b32.xlu0 %v7854_v43, %s11667_s24  ;;  %v5005_v28 = vand.u32 3, %v1678_v45  ;;  %v15947_v62 = vsel %vm15619_vm4, %v19297_v46, %v3858_v31  ;;  %v15950_v34 = vmul.u32.u64.low %v15856_v42, %v4028_v30  ;;  %v15951_v27 = vmul.u32.u64.high %v15856_v42, %v4028_v30, %v15950_v34  ;;  %v19466_v43 = vld [vmem:[#allocation59_spill] sm:$0xff] }
 0x47b   :  { %19460 = vst [vmem:[#allocation33_spill] sm:$0xff] %v15947_v62  ;;  %v19461_v37 = vand.u32 2147483647, %v19409_v0  ;;  %v15959_v50 = vadd.s32 1, %v10392_v23  ;;  %v15963_v16 = vsel %vm1369_vm15, nan, %v1379_v32  ;;  %v1682_v60 = vadd.s32 3, %v1678_v45 }
 0x47c   :  { %19462 = vst [vmem:[#allocation32_spill] sm:$0xff] %v15963_v16  ;;  %vm10387_vm3 = vcmp.lt.s32.totalorder %v10386_v4, 0  ;;  %v15966_v31 = vmul.f32 %v15933_v39, %v4808_v7  ;;  %8239 = vrot.lane.b32.xlu1 %v7790_v1, %s11666_s23  ;;  %vm5007_vm4 = vcmp.eq.s32.totalorder %v5005_v28, 0  ;;  %vm5010_vm6 = vcmp.eq.s32.totalorder %v5005_v28, 2  ;;  %v19463_v23 = vld [vmem:[#allocation47_spill] sm:$0xff] }
 0x47d   :  { %v15957_v13 = vand.u32 8388607, %v19461_v37  ;;  %vm5006_vm13 = vcmp.lt.s32.totalorder %v5005_v28, 2  ;;  %v5009_v30 = vsel %vm5007_vm4, %v19459_v5, %v1686_v33  ;;  %v5012_v55 = vsel %vm5010_vm6, %v1689_v51, %v19458_v48  ;;  %v19465_v45 = vld [vmem:[#allocation7_spill] sm:$0xff] }
 0x47e   :  { %v1574_v3 = vsel %vm13380_vm9, 0, %v19463_v23  ;;  %v7695_v32 = vmul.f32 2.0, %v15963_v16  ;;  %vm1681_vm10 = vweird.f32 %v19465_v45  ;;  %v5013_v34 = vsel %vm5006_vm13, %v5009_v30, %v5012_v55  ;;  %v19467_v55 = vld [vmem:[#allocation58_spill] sm:$0xff] }
 0x47f   :  { %v7821_v7 = vmul.f32 2.0, %v15836_v6  ;;  %v15977_v37 = vsel %vm10387_vm3, 0, %v10386_v4  ;;  %v1683_v28 = vand.u32 3, %v1682_v60  ;;  %v15982_v12 = vsel %vm1681_vm10, nan, %v5013_v34 }
 0x480   :  { %8115 = vrot.lane.b32.xlu1 %v15966_v31, %s11665_s7  ;;  %7991 = vrot.lane.b32.xlu0 %v15982_v12, %s11664_s6  ;;  %v1578_v23 = vadd.s32 3, %v1574_v3  ;;  %v1582_v30 = vxor.u32 2147483648, %v19466_v43  ;;  %v1585_v46 = vxor.u32 2147483648, %v19467_v55  ;;  %v4902_v4 = vand.u32 3, %v1574_v3 }
 0x481   :  { %v4039_v0 = vadd.s32 1, %v15897_v25  ;;  %v4301_v60 = vor.u32 8388608, %v15957_v13  ;;  %vm4304_vm9 = vcmp.gt.s32.totalorder %v15959_v50, 0  ;;  %v19468_v34 = vand.u32 2147483647, %v19416_v40 }
 0x482   :  { %v15998_v36 = vmul.f32 %v7695_v32, %v4705_v21  ;;  %v19469_v62 = vsub.f32 1.0, %v15877_v49  ;;  %v7886_v3 = vmul.f32 %v15907_v61, %v15792_v44  ;;  %vm1685_vm11 = vcmp.eq.s32.totalorder %v1683_v28, 0  ;;  %v19470_v61 = vld [vmem:[#allocation53_spill] sm:$0xff] }
 0x483   :  { %v15995_v1 = vand.u32 8388607, %v19468_v34  ;;  %vm1688_vm2 = vcmp.eq.s32.totalorder %v1683_v28, 2  ;;  %vm4904_vm5 = vcmp.eq.s32.totalorder %v4902_v4, 0  ;;  %vm4907_vm7 = vcmp.eq.s32.totalorder %v4902_v4, 2 }
 0x484   :  { %v7853_v20 = vmul.f32 %v7821_v7, %v19469_v62  ;;  %8113 = vrot.lane.b32.xlu1 %v15998_v36, %s11665_s7  ;;  %v1579_v13 = vand.u32 3, %v1578_v23  ;;  %vm4903_vm12 = vcmp.lt.s32.totalorder %v4902_v4, 2  ;;  %v4906_v21 = vsel %vm4904_vm5, %v19467_v55, %v1582_v30 }
 0x485   :  { %v4909_v34 = vsel %vm4907_vm7, %v1585_v46, %v19466_v43  ;;  %v1687_v49 = vsel %vm1685_vm11, %v19459_v5, %v1686_v33  ;;  %v1690_v62 = vsel %vm1688_vm2, %v1689_v51, %v19458_v48  ;;  %v1886_v58 = vsel %vm13438_vm8, 0, %v19470_v61  ;;  %v19473_v51 = vld [vmem:[#allocation60_spill] sm:$0xff] }
 0x486   :  { %8365 = vrot.lane.b32.xlu0 %v7853_v20, %s11667_s24  ;;  %v4910_v44 = vsel %vm4903_vm12, %v4906_v21, %v4909_v34  ;;  %v7918_v24 = vsub.f32 1.0, %v7886_v3  ;;  %vm1577_vm0 = vweird.f32 %v19472_v15  ;;  %v16016_v20 = vmul.f32 %v7695_v32, %v15963_v16 }
 0x487   :  { %v7760_v23 = vmul.f32 %v15933_v39, %v15903_v38  ;;  %vm4038_vm15 = vc.u32 %v15951_v27, %v15896_v56  ;;  %vm1684_vm1 = vcmp.lt.s32.totalorder %v1683_v28, 2  ;;  %v16026_v22 = vsel %vm1577_vm0, nan, %v4910_v44  ;;  %v19474_v28 = vld [vmem:[#allocation29_spill] sm:$0xff] }
 0x488   :  { %v1691_v48 = vsel %vm1684_vm1, %v1687_v49, %v1690_v62  ;;  %vm1581_vm8 = vcmp.eq.s32.totalorder %v1579_v13, 0  ;;  %vm1584_vm3 = vcmp.eq.s32.totalorder %v1579_v13, 2  ;;  %7989 = vrot.lane.b32.xlu1 %v16026_v22, %s11664_s6  ;;  %v5211_v39 = vand.u32 3, %v1886_v58 }
 0x489   :  { %v1583_v33 = vsel %vm1581_vm8, %v19467_v55, %v1582_v30  ;;  %v1586_v5 = vsel %vm1584_vm3, %v1585_v46, %v19466_v43  ;;  %v18988_v32 = vxor.u32 2147483648, %v19473_v51  ;;  %v18987_v3 = vxor.u32 2147483648, %v19474_v28  ;;  %v19477_v55 = vld [vmem:[#allocation56_spill] sm:$0xff] }
 0x48a   :  { %8495 = vrot.lane.b32.xlu0 %v7918_v24, %s11668_s25  ;;  %v7791_v21 = vsub.f32 1.0, %v16016_v20  ;;  %v7792_v34 = vsub.f32 1.0, %v7760_v23  ;;  %v7824_v49 = vmul.f32 2.0, %v15966_v31  ;;  %v7885_v24 = vmul.f32 %v7821_v7, %v15836_v6 }
 0x48b   :  { %v4305_v44 = vsel %vm4304_vm9, %v15959_v50, 0  ;;  %v16044_v46 = vsel %vm1681_vm10, nan, %v1691_v48  ;;  %vm1580_vm4 = vcmp.lt.s32.totalorder %v1579_v13, 2  ;;  %v4040_v43 = vsel %vm4038_vm15, %v4039_v0, %v15897_v25  ;;  %v19478_v0 = vld [vmem:[#allocation52_spill] sm:$0xff] }
 0x48c   :  { %19475 = vst [vmem:[#allocation41_spill] sm:$0xff] %v16044_v46  ;;  %v1587_v30 = vsel %vm1580_vm4, %v1583_v33, %v1586_v5  ;;  %8243 = vrot.lane.b32.xlu1 %v7792_v34, %s11666_s23  ;;  %vm5213_vm6 = vcmp.eq.s32.totalorder %v5211_v39, 0  ;;  %vm5216_vm13 = vcmp.eq.s32.totalorder %v5211_v39, 2  ;;  %v19476_v6 = vand.u32 2139095040, %v19416_v40 }
 0x48d   :  { %v5215_v45 = vsel %vm5213_vm6, %v19474_v28, %v18988_v32  ;;  %v5218_v7 = vsel %vm5216_vm13, %v18987_v3, %v19473_v51  ;;  %vm19479_vm10 = vnez %v19478_v0  ;;  %v16063_v13 = vshll.u32 %v4301_v60, 8 }
 0x48e   :  { %8241 = vrot.lane.b32.xlu0 %v7791_v21, %s11666_s23  ;;  %v4193_v50 = vshrl.u32 %v19476_v6, 23  ;;  %v1782_v25 = vsel %vm19479_vm10, 0, %v19477_v55  ;;  %v7698_v61 = vmul.f32 2.0, %v16044_v46  ;;  %v7856_v20 = vmul.f32 %v7824_v49, %v7792_v34 }
 0x48f   :  { %v7917_v23 = vsub.f32 1.0, %v7885_v24  ;;  %v19480_v48 = vmul.u32 %v15856_v42, %v15850_v2  ;;  %v16071_v5 = vand.u32 31, %v4305_v44  ;;  %v16075_v6 = vsel %vm1577_vm0, nan, %v1587_v30  ;;  %v19482_v42 = vld [vmem:[#allocation62_spill] sm:$0xff] }
 0x490   :  { %19481 = vst [vmem:[#allocation40_spill] sm:$0xff] %v16075_v6  ;;  %vm5212_vm9 = vcmp.lt.s32.totalorder %v5211_v39, 2  ;;  %v16077_v0 = vshrl.u32 %v4305_v44, 5  ;;  %v1890_v60 = vadd.s32 3, %v1886_v58  ;;  %v5108_v24 = vand.u32 3, %v1782_v25  ;;  %v19484_v44 = vld [vmem:[#allocation9_spill] sm:$0xff] }
 0x491   :  { %v16069_v33 = vadd.s32 %v4040_v43, %v19480_v48  ;;  %8493 = vrot.lane.b32.xlu1 %v7917_v23, %s11668_s25  ;;  %v5219_v34 = vsel %vm5212_vm9, %v5215_v45, %v5218_v7  ;;  %v16081_v55 = vadd.s32 4294967169, %v4193_v50  ;;  %v1790_v43 = vxor.u32 2147483648, %v19482_v42  ;;  %v19483_v48 = vld [vmem:[#allocation61_spill] sm:$0xff] }
 0x492   :  { %8371 = vrot.lane.b32.xlu0 %v7856_v20, %s11667_s24  ;;  %v1793_v15 = vxor.u32 2147483648, %v19483_v48  ;;  %v16087_v30 = vmul.f32 %v7698_v61, %v15982_v12  ;;  %v7697_v39 = vmul.f32 2.0, %v16075_v6  ;;  %vm1889_vm11 = vweird.f32 %v19484_v44  ;;  %v19496_v44 = vld [vmem:[#allocation68_spill] sm:$0xff] }
 0x493   :  { %v7823_v20 = vmul.f32 2.0, %v15998_v36  ;;  %v4042_v58 = vadd.s32 536870912, %v16069_v33  ;;  %v16094_v50 = vsub.s32 32, %v16071_v5  ;;  %v4310_v45 = vshll.u32 %v19057_v10, %v16071_v5 }
 0x494   :  { %v16100_v7 = vsel %vm1889_vm11, nan, %v5219_v34  ;;  %v1891_v12 = vand.u32 3, %v1890_v60  ;;  %v1786_v23 = vadd.s32 3, %v1782_v25  ;;  %vm5110_vm2 = vcmp.eq.s32.totalorder %v5108_v24, 0 }
 0x495   :  { %8119 = vrot.lane.b32.xlu1 %v16087_v30, %s11665_s7  ;;  %vm5113_vm5 = vcmp.eq.s32.totalorder %v5108_v24, 2  ;;  %v4313_v4 = vshll.u32 %v19052_v57, %v16071_v5  ;;  %v16110_v62 = vshll.u32 %v19053_v59, %v16071_v5  ;;  %v5112_v34 = vsel %vm5110_vm2, %v19483_v48, %v1790_v43 }
 0x496   :  { %7995 = vrot.lane.b32.xlu0 %v16100_v7, %s11664_s6  ;;  %v5115_v2 = vsel %vm5113_vm5, %v1793_v15, %v19482_v42  ;;  %v4319_v60 = vshll.u32 %v19050_v8, %v16071_v5  ;;  %v16117_v3 = vmul.f32 %v7697_v39, %v16026_v22  ;;  %v7855_v25 = vmul.f32 %v7823_v20, %v7791_v21 }
 0x497   :  { %v7888_v32 = vmul.f32 %v7824_v49, %v15966_v31  ;;  %v16120_v40 = vshrl.u32 %v4042_v58, 30  ;;  %v16124_v29 = vshrl.u32 %v19057_v10, %v16094_v50  ;;  %v4311_v9 = vshrl.u32 %v19052_v57, %v16094_v50 }
 0x498   :  { %vm5109_vm7 = vcmp.lt.s32.totalorder %v5108_v24, 2  ;;  %vm1893_vm12 = vcmp.eq.s32.totalorder %v1891_v12, 0  ;;  %vm1896_vm0 = vcmp.eq.s32.totalorder %v1891_v12, 2  ;;  %v1787_v22 = vand.u32 3, %v1786_v23 }
 0x499   :  { %19485 = vst [vmem:[#allocation34_spill] sm:$0xff] %v16120_v40  ;;  %8117 = vrot.lane.b32.xlu1 %v16117_v3, %s11665_s7  ;;  %v5116_v21 = vsel %vm5109_vm7, %v5112_v34, %v5115_v2  ;;  %v4314_v31 = vshrl.u32 %v19053_v59, %v16094_v50  ;;  %v19486_v49 = vxor.u32 2147483648, %v19473_v51  ;;  %v19487_v18 = vxor.u32 2147483648, %v19474_v28 }
 0x49a   :  { %8369 = vrot.lane.b32.xlu0 %v7855_v25, %s11667_s24  ;;  %vm19490_vm15 = vnez %v19489_v54  ;;  %v7920_v14 = vsub.f32 1.0, %v7888_v32  ;;  %vm1785_vm1 = vweird.f32 %v19491_v26  ;;  %v16144_v2 = vmul.f32 %v7697_v39, %v16075_v6  ;;  %v19493_v39 = vld [vmem:[#allocation64_spill] sm:$0xff] }
 0x49b   :  { %v1895_v58 = vsel %vm1893_vm12, %v19474_v28, %v19486_v49  ;;  %v1898_v24 = vsel %vm1896_vm0, %v19487_v18, %v19473_v51  ;;  %v2094_v16 = vsel %vm19490_vm15, 0, %v19488_v35  ;;  %v7762_v23 = vmul.f32 %v7698_v61, %v16044_v46  ;;  %v19492_v28 = vld [vmem:[#allocation65_spill] sm:$0xff] }
 0x49c   :  { %v4044_v34 = vshll.u32 %v16120_v40, 30  ;;  %v4317_v25 = vshrl.u32 %v19050_v8, %v16094_v50  ;;  %vm1892_vm8 = vcmp.lt.s32.totalorder %v1891_v12, 2  ;;  %v16152_v18 = vsel %vm1785_vm1, nan, %v5116_v21 }
 0x49d   :  { %v1899_v54 = vsel %vm1892_vm8, %v1895_v58, %v1898_v24  ;;  %vm1789_vm3 = vcmp.eq.s32.totalorder %v1787_v22, 0  ;;  %vm1792_vm4 = vcmp.eq.s32.totalorder %v1787_v22, 2  ;;  %7993 = vrot.lane.b32.xlu1 %v16152_v18, %s11664_s6  ;;  %v5417_v35 = vand.u32 3, %v2094_v16 }
 0x49e   :  { %8499 = vrot.lane.b32.xlu0 %v7920_v14, %s11668_s25  ;;  %v1791_v51 = vsel %vm1789_vm3, %v19483_v48, %v1790_v43  ;;  %v1794_v32 = vsel %vm1792_vm4, %v1793_v15, %v19482_v42  ;;  %v2102_v61 = vxor.u32 2147483648, %v19492_v28  ;;  %v18998_v12 = vxor.u32 2147483648, %v19493_v39  ;;  %v19495_v15 = vld [vmem:[#allocation63_spill] sm:$0xff] }
 0x49f   :  { %v7793_v21 = vsub.f32 1.0, %v16144_v2  ;;  %v7794_v49 = vsub.f32 1.0, %v7762_v23  ;;  %v7826_v58 = vmul.f32 2.0, %v16087_v30  ;;  %v7887_v14 = vmul.f32 %v7823_v20, %v15998_v36 }
 0x4a0   :  { %v4320_v24 = vshrl.u32 %v19051_v52, %v16094_v50  ;;  %v4322_v40 = vshll.u32 %v19051_v52, %v16071_v5  ;;  %v16170_v42 = vsel %vm1889_vm11, nan, %v1899_v54  ;;  %vm1788_vm6 = vcmp.lt.s32.totalorder %v1787_v22, 2 }
 0x4a1   :  { %v16172_v43 = vor.u32 %v4311_v9, %v4310_v45  ;;  %v1795_v48 = vsel %vm1788_vm6, %v1791_v51, %v1794_v32  ;;  %8247 = vrot.lane.b32.xlu1 %v7794_v49, %s11666_s23  ;;  %vm5419_vm13 = vcmp.eq.s32.totalorder %v5417_v35, 0  ;;  %vm5422_vm10 = vcmp.eq.s32.totalorder %v5417_v35, 2 }
 0x4a2   :  { %8245 = vrot.lane.b32.xlu0 %v7793_v21, %s11666_s23  ;;  %v16177_v36 = vsub.s32 %v16069_v33, %v4044_v34  ;;  %vm4325_vm9 = vcmp.lt.s32.totalorder %v16077_v0, 1  ;;  %v5421_v5 = vsel %vm5419_vm13, %v19493_v39, %v2102_v61  ;;  %v5424_v9 = vsel %vm5422_vm10, %v18998_v12, %v19492_v28 }
 0x4a3   :  { %vm19497_vm11 = vnez %v19496_v44  ;;  %v16189_v45 = vor.u32 %v4314_v31, %v4313_v4  ;;  %v7700_v22 = vmul.f32 2.0, %v16170_v42  ;;  %v7858_v33 = vmul.f32 %v7826_v58, %v7794_v49 }
 0x4a4   :  { %19494 = vst [vmem:[#allocation38_spill] sm:$0xff] %v16177_v36  ;;  %v1990_v20 = vsel %vm19497_vm11, 0, %v19495_v15  ;;  %v7919_v2 = vsub.f32 1.0, %v7887_v14  ;;  %v4321_v23 = vor.u32 %v4320_v24, %v4319_v60  ;;  %v4323_v34 = vshrl.u32 %v19054_v11, %v16094_v50  ;;  %v19499_v60 = vld [vmem:[#allocation75_spill] sm:$0xff]  ;;  %v19500_v14 = vld [vmem:[#allocation72_spill] sm:$0xff] }
 0x4a5   :  { %v16196_v54 = vsel %vm1785_vm1, nan, %v1795_v48  ;;  %vm5418_vm2 = vcmp.lt.s32.totalorder %v5417_v35, 2  ;;  %v4318_v51 = vor.u32 %v4317_v25, %v16110_v62  ;;  %v2098_v4 = vadd.s32 3, %v2094_v16  ;;  %v19501_v25 = vld [vmem:[#allocation11_spill] sm:$0xff] }
 0x4a6   :  { %19498 = vst [vmem:[#allocation5_spill] sm:$0xff] %v16196_v54  ;;  %8375 = vrot.lane.b32.xlu0 %v7858_v33, %s11667_s24  ;;  %8497 = vrot.lane.b32.xlu1 %v7919_v2, %s11668_s25  ;;  %v5425_v31 = vsel %vm5418_vm2, %v5421_v5, %v5424_v9  ;;  %v5314_v32 = vand.u32 3, %v1990_v20  ;;  %v4047_v49 = vsub.s32 0, %v16177_v36  ;;  %vm4328_vm5 = vcmp.lt.s32.totalorder %v16077_v0, 4 }
 0x4a7   :  { %v1998_v50 = vxor.u32 2147483648, %v19499_v60  ;;  %v2001_v26 = vxor.u32 2147483648, %v19500_v14  ;;  %vm4326_vm7 = vcmp.lt.s32.totalorder %v16077_v0, 2  ;;  %v16207_v35 = vmul.f32 %v7700_v22, %v16100_v7 }
 0x4a8   :  { %v7699_v62 = vmul.f32 2.0, %v16196_v54  ;;  %vm2097_vm12 = vweird.f32 %v19501_v25  ;;  %v7825_v16 = vmul.f32 2.0, %v16117_v3  ;;  %v4324_v24 = vor.u32 %v4323_v34, %v4322_v40 }
 0x4a9   :  { %vm4327_vm0 = vcmp.lt.s32.totalorder %v16077_v0, 3  ;;  %v4334_v48 = vsel %vm4328_vm5, %v4321_v23, 920167782  ;;  %v16217_v5 = vsel %vm2097_vm12, nan, %v5425_v31  ;;  %v2099_v7 = vand.u32 3, %v2098_v4 }
 0x4aa   :  { %8123 = vrot.lane.b32.xlu1 %v16207_v35, %s11665_s7  ;;  %7999 = vrot.lane.b32.xlu0 %v16217_v5, %s11664_s6  ;;  %v1994_v9 = vadd.s32 3, %v1990_v20  ;;  %vm5316_vm15 = vcmp.eq.s32.totalorder %v5314_v32, 0  ;;  %vm5319_vm1 = vcmp.eq.s32.totalorder %v5314_v32, 2  ;;  %v16224_v40 = vmin.u32 %v4047_v49, %v16177_v36  ;;  %v19506_v36 = vld [vmem:[#allocation12_spill] sm:$0xff] }
 0x4ab   :  { %v4330_v15 = vsel %vm4328_vm5, %v4318_v51, 2102212464  ;;  %v5318_v44 = vsel %vm5316_vm15, %v19500_v14, %v1998_v50  ;;  %v5321_v33 = vsel %vm5319_vm1, %v2001_v26, %v19499_v60  ;;  %v4333_v2 = vsel %vm4325_vm9, %v16172_v43, %v16189_v45 }
 0x4ac   :  { %v16235_v34 = vmul.f32 %v7699_v62, %v16152_v18  ;;  %v7857_v20 = vmul.f32 %v7825_v16, %v7793_v21  ;;  %v7890_v4 = vmul.f32 %v7826_v58, %v16087_v30  ;;  %v4335_v31 = vsel %vm4327_vm0, %v4318_v51, %v4334_v48  ;;  %v19504_v48 = vld [vmem:[#allocation69_spill] sm:$0xff] }
 0x4ad   :  { %v4337_v49 = vsel %vm4325_vm9, %v16189_v45, %v4318_v51  ;;  %v4338_v12 = vsel %vm4328_vm5, %v4324_v24, 1326507024  ;;  %vm5315_vm8 = vcmp.lt.s32.totalorder %v5314_v32, 2  ;;  %vm2101_vm3 = vcmp.eq.s32.totalorder %v2099_v7, 0  ;;  %v19503_v32 = vld [vmem:[#allocation71_spill] sm:$0xff] }
 0x4ae   :  { %vm2104_vm4 = vcmp.eq.s32.totalorder %v2099_v7, 2  ;;  %8121 = vrot.lane.b32.xlu1 %v16235_v34, %s11665_s7  ;;  %8373 = vrot.lane.b32.xlu0 %v7857_v20, %s11667_s24  ;;  %v1995_v18 = vand.u32 3, %v1994_v9  ;;  %v5322_v30 = vsel %vm5315_vm8, %v5318_v44, %v5321_v33  ;;  %v4049_v21 = vclz %v16224_v40 }
 0x4af   :  { %v2103_v58 = vsel %vm2101_vm3, %v19493_v39, %v2102_v61  ;;  %v19502_v51 = vxor.u32 2147483648, %v19493_v39  ;;  %vm19505_vm6 = vnez %v19504_v48  ;;  %v7922_v46 = vsub.f32 1.0, %v7890_v4 }
 0x4b0   :  { %v2302_v6 = vsel %vm19505_vm6, 0, %v19503_v32  ;;  %vm1993_vm13 = vweird.f32 %v19506_v36  ;;  %v16260_v9 = vmul.f32 %v7699_v62, %v16196_v54  ;;  %v7764_v40 = vmul.f32 %v7700_v22, %v16170_v42 }
 0x4b1   :  { %v2106_v24 = vsel %vm2104_vm4, %v19502_v51, %v19492_v28  ;;  %v16265_v44 = vsel %vm4326_vm7, %v4333_v2, %v4335_v31  ;;  %v4339_v61 = vsel %vm4327_vm0, %v4321_v23, %v4338_v12  ;;  %vm2100_vm10 = vcmp.lt.s32.totalorder %v2099_v7, 2  ;;  %v19507_v2 = vld [vmem:[#allocation79_spill] sm:$0xff]  ;;  %v19508_v23 = vld [vmem:[#allocation76_spill] sm:$0xff]  ;;  %v19511_v51 = vld [vmem:[#allocation74_spill] sm:$0xff] }
 0x4b2   :  { %v16271_v28 = vsel %vm1993_vm13, nan, %v5322_v30  ;;  %v2107_v39 = vsel %vm2100_vm10, %v2103_v58, %v2106_v24  ;;  %8503 = vrot.lane.b32.xlu0 %v7922_v46, %s11668_s25  ;;  %vm1997_vm11 = vcmp.eq.s32.totalorder %v1995_v18, 0  ;;  %vm2000_vm2 = vcmp.eq.s32.totalorder %v1995_v18, 2 }
 0x4b3   :  { %7997 = vrot.lane.b32.xlu1 %v16271_v28, %s11664_s6  ;;  %v5623_v22 = vand.u32 3, %v2302_v6  ;;  %v1999_v62 = vsel %vm1997_vm11, %v19500_v14, %v1998_v50  ;;  %v2002_v33 = vsel %vm2000_vm2, %v2001_v26, %v19499_v60  ;;  %v2310_v12 = vxor.u32 2147483648, %v19507_v2 }
 0x4b4   :  { %v2313_v7 = vxor.u32 2147483648, %v19508_v23  ;;  %v7795_v20 = vsub.f32 1.0, %v16260_v9  ;;  %v7796_v4 = vsub.f32 1.0, %v7764_v40  ;;  %v7828_v31 = vmul.f32 2.0, %v16207_v35 }
 0x4b5   :  { %v7889_v46 = vmul.f32 %v7825_v16, %v16117_v3  ;;  %v16285_v30 = vmul.u32.u64.low %v16063_v13, %v16265_v44  ;;  %v16286_v58 = vmul.u32.u64.high %v16063_v13, %v16265_v44, %v16285_v30  ;;  %v16291_v60 = vsel %vm2097_vm12, nan, %v2107_v39  ;;  %v19510_v16 = vld [vmem:[#allocation77_spill] sm:$0xff] }
 0x4b6   :  { %19509 = vst [vmem:[#allocation45_spill] sm:$0xff] %v16291_v60  ;;  %vm1996_vm5 = vcmp.lt.s32.totalorder %v1995_v18, 2  ;;  %8249 = vrot.lane.b32.xlu0 %v7795_v20, %s11666_s23  ;;  %v2306_v14 = vadd.s32 3, %v2302_v6  ;;  %vm5625_vm15 = vcmp.eq.s32.totalorder %v5623_v22, 0  ;;  %vm5628_vm1 = vcmp.eq.s32.totalorder %v5623_v22, 2 }
 0x4b7   :  { %v2003_v50 = vsel %vm1996_vm5, %v1999_v62, %v2002_v33  ;;  %8251 = vrot.lane.b32.xlu1 %v7796_v4, %s11666_s23  ;;  %v4329_v3 = vsel %vm4325_vm9, %v16124_v29, %v16172_v43  ;;  %v5627_v26 = vsel %vm5625_vm15, %v19508_v23, %v2310_v12  ;;  %v5630_v25 = vsel %vm5628_vm1, %v2313_v7, %v19507_v2 }
 0x4b8   :  { %vm19512_vm12 = vnez %v19511_v51  ;;  %v16306_v24 = vsel %vm4326_vm7, %v4337_v49, %v4339_v61  ;;  %v7702_v6 = vmul.f32 2.0, %v16291_v60  ;;  %v7860_v32 = vmul.f32 %v7828_v31, %v7796_v4 }
 0x4b9   :  { %v2198_v18 = vsel %vm19512_vm12, 0, %v19510_v16  ;;  %v7921_v48 = vsub.f32 1.0, %v7889_v46  ;;  %v4331_v29 = vsel %vm4327_vm0, %v16189_v45, %v4330_v15  ;;  %v4199_v43 = vadd.s32 1, %v16081_v55  ;;  %v19514_v45 = vld [vmem:[#allocation83_spill] sm:$0xff]  ;;  %v19515_v15 = vld [vmem:[#allocation82_spill] sm:$0xff] }
 0x4ba   :  { %v16315_v9 = vsel %vm1993_vm13, nan, %v2003_v50  ;;  %vm5624_vm9 = vcmp.lt.s32.totalorder %v5623_v22, 2  ;;  %v10382_v40 = vadd.s32 4294967294, %v4049_v21  ;;  %8379 = vrot.lane.b32.xlu0 %v7860_v32, %s11667_s24  ;;  %v2307_v49 = vand.u32 3, %v2306_v14  ;;  %v19516_v22 = vld [vmem:[#allocation13_spill] sm:$0xff] }
 0x4bb   :  { %19513 = vst [vmem:[#allocation27_spill] sm:$0xff] %v16315_v9  ;;  %8501 = vrot.lane.b32.xlu1 %v7921_v48, %s11668_s25  ;;  %v5631_v44 = vsel %vm5624_vm9, %v5627_v26, %v5630_v25  ;;  %v5520_v61 = vand.u32 3, %v2198_v18  ;;  %v16321_v39 = vmul.u32.u64.low %v16063_v13, %v16306_v24  ;;  %v16322_v62 = vmul.u32.u64.high %v16063_v13, %v16306_v24, %v16321_v39  ;;  %v19519_v24 = vld [vmem:[#allocation80_spill] sm:$0xff]  ;;  %v19521_v48 = vld [vmem:[#allocation14_spill] sm:$0xff] }
 0x4bc   :  { %v2206_v55 = vxor.u32 2147483648, %v19514_v45  ;;  %v2209_v36 = vxor.u32 2147483648, %v19515_v15  ;;  %v16327_v33 = vmul.f32 %v7702_v6, %v16217_v5  ;;  %v7701_v21 = vmul.f32 2.0, %v16315_v9 }
 0x4bd   :  { %vm2305_vm0 = vweird.f32 %v19516_v22  ;;  %v7827_v4 = vmul.f32 2.0, %v16235_v34  ;;  %v16334_v46 = vsel %vm4326_vm7, %v4329_v3, %v4331_v29  ;;  %v7892_v14 = vmul.f32 %v7828_v31, %v16207_v35  ;;  %v19523_v22 = vld [vmem:[#allocation91_spill] sm:$0xff] }
 0x4be   :  { %v16338_v50 = vsel %vm2305_vm0, nan, %v5631_v44  ;;  %v2202_v26 = vadd.s32 3, %v2198_v18  ;;  %vm2309_vm8 = vcmp.eq.s32.totalorder %v2307_v49, 0  ;;  %vm2312_vm3 = vcmp.eq.s32.totalorder %v2307_v49, 2  ;;  %v19518_v18 = vld [vmem:[#allocation78_spill] sm:$0xff] }
 0x4bf   :  { %8127 = vrot.lane.b32.xlu1 %v16327_v33, %s11665_s7  ;;  %8003 = vrot.lane.b32.xlu0 %v16338_v50, %s11664_s6  ;;  %vm5522_vm4 = vcmp.eq.s32.totalorder %v5520_v61, 0  ;;  %vm5525_vm6 = vcmp.eq.s32.totalorder %v5520_v61, 2  ;;  %v2311_v0 = vsel %vm2309_vm8, %v19508_v23, %v2310_v12  ;;  %v2314_v5 = vsel %vm2312_vm3, %v2313_v7, %v19507_v2 }
 0x4c0   :  { %v5524_v3 = vsel %vm5522_vm4, %v19515_v15, %v2206_v55  ;;  %v5527_v25 = vsel %vm5525_vm6, %v2209_v36, %v19514_v45  ;;  %vm10383_vm7 = vcmp.lt.s32.totalorder %v10382_v40, 0  ;;  %vm4200_vm13 = vcmp.gt.s32.totalorder %v4199_v43, 0 }
 0x4c1   :  { %v16350_v35 = vmul.f32 %v7701_v21, %v16271_v28  ;;  %v7859_v31 = vmul.f32 %v7827_v4, %v7795_v20  ;;  %v16354_v16 = vadd.s32 %v15896_v56, %v15951_v27  ;;  %vm2308_vm10 = vcmp.lt.s32.totalorder %v2307_v49, 2 }
 0x4c2   :  { %v2203_v51 = vand.u32 3, %v2202_v26  ;;  %vm5521_vm11 = vcmp.lt.s32.totalorder %v5520_v61, 2  ;;  %v19517_v12 = vor.u32 8388608, %v15995_v1  ;;  %v2315_v7 = vsel %vm2308_vm10, %v2311_v0, %v2314_v5  ;;  %v19524_v26 = vld [vmem:[#allocation87_spill] sm:$0xff] }
 0x4c3   :  { %8125 = vrot.lane.b32.xlu1 %v16350_v35, %s11665_s7  ;;  %8377 = vrot.lane.b32.xlu0 %v7859_v31, %s11667_s24  ;;  %v5528_v28 = vsel %vm5521_vm11, %v5524_v3, %v5527_v25  ;;  %v16365_v20 = vsel %vm10383_vm7, 0, %v10382_v40  ;;  %v4201_v56 = vsel %vm4200_vm13, %v4199_v43, 0  ;;  %v7924_v27 = vsub.f32 1.0, %v7892_v14 }
 0x4c4   :  { %v16360_v23 = vshll.u32 %v19517_v12, 8  ;;  %vm19520_vm2 = vnez %v19519_v24  ;;  %vm2201_vm5 = vweird.f32 %v19521_v48  ;;  %v16372_v1 = vmul.f32 %v7701_v21, %v16315_v9  ;;  %v19526_v12 = vld [vmem:[#allocation84_spill] sm:$0xff] }
 0x4c5   :  { %v2510_v32 = vsel %vm19520_vm2, 0, %v19518_v18  ;;  %v7766_v29 = vmul.f32 %v7702_v6, %v16291_v60  ;;  %v16377_v44 = vsel %vm2305_vm0, nan, %v2315_v7  ;;  %vm2205_vm15 = vcmp.eq.s32.totalorder %v2203_v51, 0 }
 0x4c6   :  { %v5829_v49 = vand.u32 3, %v2510_v32  ;;  %19522 = vst [vmem:[#allocation6_spill] sm:$0xff] %v16377_v44  ;;  %vm2208_vm1 = vcmp.eq.s32.totalorder %v2203_v51, 2  ;;  %v16381_v43 = vsel %vm2201_vm5, nan, %v5528_v28  ;;  %v2207_v40 = vsel %vm2205_vm15, %v19515_v15, %v2206_v55 }
 0x4c7   :  { %8507 = vrot.lane.b32.xlu0 %v7924_v27, %s11668_s25  ;;  %8001 = vrot.lane.b32.xlu1 %v16381_v43, %s11664_s6  ;;  %v2210_v6 = vsel %vm2208_vm1, %v2209_v36, %v19514_v45  ;;  %v16389_v61 = vmul.f32 2.0, %v16327_v33  ;;  %v7891_v39 = vmul.f32 %v7827_v4, %v16235_v34  ;;  %vm2204_vm12 = vcmp.lt.s32.totalorder %v2203_v51, 2  ;;  %v8754_v34 = vld [vmem:[%s18707_s9] sm:$0xff]  ;;  %v8755_v4 = vld [vmem:[%s18707_s9 + $0x8] sm:$0xff] }
 0x4c8   :  { %v2514_v21 = vadd.s32 3, %v2510_v32  ;;  %v2518_v14 = vxor.u32 2147483648, %v19523_v22  ;;  %v2521_v0 = vxor.u32 2147483648, %v19524_v26  ;;  %v19002_v5 = vsub.f32 1.0, %v16372_v1  ;;  %v19525_v51 = vld [vmem:[#allocation88_spill] sm:$0xff] }
 0x4c9   :  { %v7798_v3 = vsub.f32 1.0, %v7766_v29  ;;  %vm5831_vm9 = vcmp.eq.s32.totalorder %v5829_v49, 0  ;;  %vm5834_vm0 = vcmp.eq.s32.totalorder %v5829_v49, 2  ;;  %v4351_v55 = vadd.s32 1, %v16286_v58 }
 0x4ca   :  { %v16396_v15 = vshrl.u32 %v4201_v56, 5  ;;  %v16398_v45 = vand.u32 31, %v4201_v56  ;;  %v2211_v36 = vsel %vm2204_vm12, %v2207_v40, %v2210_v6  ;;  %vm4350_vm8 = vc.u32 %v16322_v62, %v16285_v30 }
 0x4cb   :  { %v16409_v25 = vmul.f32 2.0, %v16377_v44  ;;  %8253 = vrot.lane.b32.xlu0 %v19002_v5, %s11666_s23  ;;  %8255 = vrot.lane.b32.xlu1 %v7798_v3, %s11666_s23  ;;  %v7923_v31 = vsub.f32 1.0, %v7891_v39  ;;  %vm19527_vm3 = vnez %v19526_v12  ;;  %v2515_v28 = vand.u32 3, %v2514_v21  ;;  %v19531_v12 = vld [vmem:[#allocation48_spill] sm:$0xff] }
 0x4cc   :  { %v2406_v7 = vsel %vm19527_vm3, 0, %v19525_v51  ;;  %vm5830_vm4 = vcmp.lt.s32.totalorder %v5829_v49, 2  ;;  %v5833_v56 = vsel %vm5831_vm9, %v19524_v26, %v2518_v14  ;;  %v5836_v27 = vsel %vm5834_vm0, %v2521_v0, %v19523_v22  ;;  %v8758_v49 = vld [vmem:[%s18707_s9 + $0x20] sm:$0xff] }
 0x4cd   :  { %v16424_v18 = vsel %vm2201_vm5, nan, %v2211_v36  ;;  %v7862_v24 = vmul.f32 %v16389_v61, %v7798_v3  ;;  %v5726_v32 = vand.u32 3, %v2406_v7  ;;  %v11304_v29 = vpack.c.bf16 %v8755_v4, %v8754_v34  ;;  %v19529_v36 = vld [vmem:[#allocation16_spill] sm:$0xff]  ;;  %v8756_v4 = vld [vmem:[%s18707_s9 + $0x10] sm:$0xff] }
 0x4ce   :  { %19528 = vst [vmem:[#allocation39_spill] sm:$0xff] %v16424_v18  ;;  %v16428_v40 = vsub.s32 32, %v16398_v45  ;;  %v16432_v6 = vshll.u32 %v19057_v10, %v16398_v45  ;;  %v16436_v39 = vshll.u32 %v19052_v57, %v16398_v45  ;;  %v2410_v21 = vadd.s32 3, %v2406_v7 }
 0x4cf   :  { %v4352_v48 = vsel %vm4350_vm8, %v4351_v55, %v16286_v58  ;;  %v16444_v3 = vmul.f32 %v16409_v25, %v16338_v50  ;;  %8383 = vrot.lane.b32.xlu0 %v7862_v24, %s11667_s24  ;;  %8505 = vrot.lane.b32.xlu1 %v7923_v31, %s11668_s25  ;;  %vm2513_vm6 = vweird.f32 %v19529_v36  ;;  %v5837_v34 = vsel %vm5830_vm4, %v5833_v56, %v5836_v27  ;;  %v8757_v58 = vld [vmem:[%s18707_s9 + $0x18] sm:$0xff]  ;;  %v19530_v50 = vld [vmem:[#allocation95_spill] sm:$0xff]  ;;  %v8759_v31 = vld [vmem:[%s18707_s9 + $0x28] sm:$0xff] }
 0x4d0   :  { %v7703_v55 = vmul.f32 2.0, %v16424_v18  ;;  %vm2517_vm7 = vcmp.eq.s32.totalorder %v2515_v28, 0  ;;  %v2414_v51 = vxor.u32 2147483648, %v19530_v50  ;;  %v2417_v7 = vxor.u32 2147483648, %v19531_v12  ;;  %11305 = vmatprep.subr.bf16.mxu1 %v11304_v29 }
 0x4d1   :  { %vm2520_vm13 = vcmp.eq.s32.totalorder %v2515_v28, 2  ;;  %v16466_v56 = vmul.f32 2.0, %v16350_v35  ;;  %vm5728_vm10 = vcmp.eq.s32.totalorder %v5726_v32, 0  ;;  %vm5731_vm11 = vcmp.eq.s32.totalorder %v5726_v32, 2  ;;  %11307 = vmatpush3.bf16.msra.mxu1 %v11304_v29 }
 0x4d2   :  { %v16470_v27 = vshll.u32 %v19053_v59, %v16398_v45  ;;  %v16474_v24 = vsel %vm2513_vm6, nan, %v5837_v34  ;;  %v2411_v5 = vand.u32 3, %v2410_v21  ;;  %v11308_v2 = vpack.c.bf16 %v8757_v58, %v8756_v4  ;;  %v8760_v34 = vld [vmem:[%s18707_s9 + $0x30] sm:$0xff]  ;;  %v8761_v21 = vld [vmem:[%s18707_s9 + $0x38] sm:$0xff] }
 0x4d3   :  { %8131 = vrot.lane.b32.xlu1 %v16444_v3, %s11665_s7  ;;  %vm2516_vm2 = vcmp.lt.s32.totalorder %v2515_v28, 2  ;;  %8007 = vrot.lane.b32.xlu0 %v16474_v24, %s11664_s6  ;;  %v2519_v29 = vsel %vm2517_vm7, %v19524_v26, %v2518_v14  ;;  %v7894_v9 = vmul.f32 %v16389_v61, %v16327_v33  ;;  %v11312_v60 = vpack.c.bf16 %v8759_v31, %v8758_v49 }
 0x4d4   :  { %v2522_v4 = vsel %vm2520_vm13, %v2521_v0, %v19523_v22  ;;  %vm5727_vm5 = vcmp.lt.s32.totalorder %v5726_v32, 2  ;;  %v5730_v58 = vsel %vm5728_vm10, %v19531_v12, %v2414_v51  ;;  %v5733_v14 = vsel %vm5731_vm11, %v2417_v7, %v19530_v50  ;;  %11309 = vmatprep.subr.bf16.mxu1 %v11308_v2 }
 0x4d5   :  { %v19532_v33 = vmul.u32 %v16063_v13, %v16334_v46  ;;  %v16503_v26 = vshrl.u32 %v19057_v10, %v16428_v40  ;;  %v16506_v49 = vmul.f32 %v7703_v55, %v16381_v43  ;;  %v19533_v22 = vsub.f32 1.0, %v16372_v1  ;;  %11311 = vmatpush3.bf16.msra.mxu1 %v11308_v2  ;;  %v19534_v1 = vld [vmem:[#allocation17_spill] sm:$0xff]  ;;  %v8763_v43 = vld [vmem:[%s18707_s9 + $0x48] sm:$0xff] }
 0x4d6   :  { %v4207_v31 = vshrl.u32 %v19052_v57, %v16428_v40  ;;  %vm2413_vm15 = vcmp.eq.s32.totalorder %v2411_v5, 0  ;;  %vm2416_vm1 = vcmp.eq.s32.totalorder %v2411_v5, 2  ;;  %11313 = vmatprep.subr.bf16.mxu1 %v11312_v60  ;;  %v11316_v13 = vpack.c.bf16 %v8761_v21, %v8760_v34  ;;  %v8762_v57 = vld [vmem:[%s18707_s9 + $0x40] sm:$0xff]  ;;  %v19536_v34 = vld [vmem:[#allocation86_spill] sm:$0xff] }
 0x4d7   :  { %v16499_v61 = vadd.s32 %v4352_v48, %v19532_v33  ;;  %v7861_v0 = vmul.f32 %v16466_v56, %v19533_v22  ;;  %v4210_v46 = vshrl.u32 %v19053_v59, %v16428_v40  ;;  %v2523_v10 = vsel %vm2516_vm2, %v2519_v29, %v2522_v4  ;;  %8129 = vrot.lane.b32.xlu1 %v16506_v49, %s11665_s7  ;;  %v19535_v29 = vld [vmem:[#allocation90_spill] sm:$0xff] }
 0x4d8   :  { %vm2409_vm12 = vweird.f32 %v19534_v1  ;;  %v5734_v2 = vsel %vm5727_vm5, %v5730_v58, %v5733_v14  ;;  %v7926_v59 = vsub.f32 1.0, %v7894_v9  ;;  %v16528_v28 = vmul.f32 %v7703_v55, %v16424_v18  ;;  %v16547_v14 = vpop.permute.xlu0 %7983  ;;  %v19549_v18 = vld [vmem:[#allocation89_spill] sm:$0xff] }
 0x4d9   :  { %8381 = vrot.lane.b32.xlu0 %v7861_v0, %s11667_s24  ;;  %v7768_v48 = vmul.f32 %v16409_v25, %v16377_v44  ;;  %vm19537_vm9 = vnez %v19536_v34  ;;  %vm2412_vm0 = vcmp.lt.s32.totalorder %v2411_v5, 2  ;;  %v2415_v21 = vsel %vm2413_vm15, %v19531_v12, %v2414_v51  ;;  %11315 = vmatpush3.bf16.msra.mxu1 %v11312_v60  ;;  %v19548_v44 = vld [vmem:[#allocation93_spill] sm:$0xff] }
 0x4da   :  { %v2718_v32 = vsel %vm19537_vm9, 0, %v19535_v29  ;;  %v2418_v4 = vsel %vm2416_vm1, %v2417_v7, %v19530_v50  ;;  %v4213_v9 = vshrl.u32 %v19050_v8, %v16428_v40  ;;  %v4215_v55 = vshll.u32 %v19050_v8, %v16398_v45  ;;  %11317 = vmatprep.subr.bf16.mxu1 %v11316_v13  ;;  %v8764_v8 = vld [vmem:[%s18707_s9 + $0x50] sm:$0xff] }
 0x4db   :  { %v6035_v58 = vand.u32 3, %v2718_v32  ;;  %v16545_v25 = vsel %vm2409_vm12, nan, %v5734_v2  ;;  %v11320_v33 = vpack.c.bf16 %v8763_v43, %v8762_v57  ;;  %v4354_v51 = vadd.s32 536870912, %v16499_v61  ;;  %v19540_v57 = vld [vmem:[#allocation96_spill] sm:$0xff] }
 0x4dc   :  { %v16551_v50 = vor.u32 %v4207_v31, %v16432_v6  ;;  %v16554_v60 = vor.u32 %v4210_v46, %v16436_v39  ;;  %v16558_v12 = vsel %vm2513_vm6, nan, %v2523_v10  ;;  %8005 = vrot.lane.b32.xlu1 %v16545_v25, %s11664_s6  ;;  %v8765_v6 = vld [vmem:[%s18707_s9 + $0x58] sm:$0xff]  ;;  %v2419_v39 = vsel %vm2412_vm0, %v2415_v21, %v2418_v4  ;;  %v19539_v10 = vld [vmem:[#allocation99_spill] sm:$0xff]  ;;  %v16597_v34 = vpop.permute.xlu0 %7981  ;;  %v16603_v4 = vpop.permute.xlu1 %8111 }
 0x4dd   :  { %19538 = vst [vmem:[#allocation44_spill] sm:$0xff] %v16558_v12  ;;  %8511 = vrot.lane.b32.xlu0 %v7926_v59, %s11668_s25  ;;  %v7799_v7 = vsub.f32 1.0, %v16528_v28  ;;  %v7800_v36 = vsub.f32 1.0, %v7768_v48  ;;  %v7832_v22 = vmul.f32 2.0, %v16444_v3  ;;  %v7893_v0 = vmul.f32 %v16466_v56, %v16350_v35  ;;  %11319 = vmatpush3.bf16.msra.mxu1 %v11316_v13  ;;  %v19541_v56 = vld [vmem:[#allocation92_spill] sm:$0xff]  ;;  %v19542_v13 = vld [vmem:[#allocation66_spill] sm:$0xff] }
 0x4de   :  { %v2722_v31 = vadd.s32 3, %v2718_v32  ;;  %vm6037_vm8 = vcmp.eq.s32.totalorder %v6035_v58, 0  ;;  %vm6040_vm3 = vcmp.eq.s32.totalorder %v6035_v58, 2  ;;  %v4216_v46 = vshrl.u32 %v19051_v52, %v16428_v40  ;;  %11321 = vmatprep.subr.bf16.mxu1 %v11320_v33 }
 0x4df   :  { %v2726_v2 = vxor.u32 2147483648, %v19539_v10  ;;  %v2729_v5 = vxor.u32 2147483648, %v19540_v57  ;;  %v11324_v43 = vpack.c.bf16 %v8765_v6, %v8764_v8  ;;  %v16579_v59 = vor.u32 %v4213_v9, %v16470_v27 }
 0x4e0   :  { %v4218_v48 = vshll.u32 %v19051_v52, %v16398_v45  ;;  %v16584_v35 = vmul.f32 2.0, %v16558_v12  ;;  %8259 = vrot.lane.b32.xlu1 %v7800_v36, %s11666_s23  ;;  %vm19543_vm4 = vnez %v19542_v13  ;;  %v16595_v27 = vsel %vm2409_vm12, nan, %v2419_v39 }
 0x4e1   :  { %8257 = vrot.lane.b32.xlu0 %v7799_v7, %s11666_s23  ;;  %v2614_v29 = vsel %vm19543_vm4, 0, %v19541_v56  ;;  %19544 = vst [vmem:[#allocation54_spill] sm:$0xff] %v16595_v27  ;;  %vm6036_vm6 = vcmp.lt.s32.totalorder %v6035_v58, 2  ;;  %v6039_v52 = vsel %vm6037_vm8, %v19540_v57, %v2726_v2  ;;  %v6042_v45 = vsel %vm6040_vm3, %v2729_v5, %v19539_v10  ;;  %11323 = vmatpush3.bf16.msra.mxu1 %v11320_v33 }
 0x4e2   :  { %v7864_v32 = vmul.f32 %v7832_v22, %v7800_v36  ;;  %v7925_v21 = vsub.f32 1.0, %v7893_v0  ;;  %v2723_v9 = vand.u32 3, %v2722_v31  ;;  %v5932_v8 = vand.u32 3, %v2614_v29  ;;  %11325 = vmatprep.subr.bf16.mxu1 %v11324_v43 }
 0x4e3   :  { %v16605_v6 = vshrl.u32 %v4354_v51, 30  ;;  %v16607_v1 = vor.u32 %v4216_v46, %v4215_v55  ;;  %v4219_v39 = vshrl.u32 %v19054_v11, %v16428_v40  ;;  %v2618_v56 = vadd.s32 3, %v2614_v29  ;;  %v19545_v40 = vld [vmem:[#allocation18_spill] sm:$0xff]  ;;  %v16628_v58 = vpop.permute.xlu0 %7987  ;;  %v19547_v46 = vld [vmem:[#allocation101_spill] sm:$0xff] }
 0x4e4   :  { %vm4221_vm7 = vcmp.lt.s32.totalorder %v16396_v15, 1  ;;  %vm4223_vm13 = vcmp.lt.s32.totalorder %v16396_v15, 3  ;;  %vm4224_vm10 = vcmp.lt.s32.totalorder %v16396_v15, 4  ;;  %8509 = vrot.lane.b32.xlu1 %v7925_v21, %s11668_s25  ;;  %v6043_v33 = vsel %vm6036_vm6, %v6039_v52, %v6042_v45  ;;  %v16643_v45 = vpop.permute.xlu1 %8109 }
 0x4e5   :  { %8387 = vrot.lane.b32.xlu0 %v7864_v32, %s11667_s24  ;;  %v16619_v55 = vmul.f32 %v16584_v35, %v16474_v24  ;;  %v7705_v11 = vmul.f32 2.0, %v16595_v27  ;;  %vm2721_vm11 = vweird.f32 %v19545_v40  ;;  %v7831_v51 = vmul.f32 2.0, %v16506_v49  ;;  %11327 = vmatpush3.bf16.msra.mxu1 %v11324_v43  ;;  %v19546_v24 = vld [vmem:[#allocation102_spill] sm:$0xff] }
 0x4e6   :  { %vm2725_vm2 = vcmp.eq.s32.totalorder %v2723_v9, 0  ;;  %vm2728_vm5 = vcmp.eq.s32.totalorder %v2723_v9, 2  ;;  %vm5934_vm15 = vcmp.eq.s32.totalorder %v5932_v8, 0  ;;  %vm5937_vm1 = vcmp.eq.s32.totalorder %v5932_v8, 2 }
 0x4e7   :  { %v16626_v36 = vsel %vm2721_vm11, nan, %v6043_v33  ;;  %v2619_v0 = vand.u32 3, %v2618_v56  ;;  %v2622_v31 = vxor.u32 2147483648, %v19546_v24  ;;  %v2625_v13 = vxor.u32 2147483648, %v19547_v46 }
 0x4e8   :  { %v4220_v29 = vor.u32 %v4219_v39, %v4218_v48  ;;  %v4229_v52 = vsel %vm4221_vm7, %v16551_v50, %v16554_v60  ;;  %v4230_v43 = vsel %vm4224_vm10, %v16607_v1, 920167782  ;;  %8135 = vrot.lane.b32.xlu1 %v16619_v55, %s11665_s7  ;;  %v7896_v32 = vmul.f32 %v7832_v22, %v16444_v3  ;;  %v16662_v22 = vpop.permute.xlu0 %8237 }
 0x4e9   :  { %8011 = vrot.lane.b32.xlu0 %v16626_v36, %s11664_s6  ;;  %v16647_v48 = vmul.f32 %v7705_v11, %v16545_v25  ;;  %vm5933_vm12 = vcmp.lt.s32.totalorder %v5932_v8, 2  ;;  %v5936_v21 = vsel %vm5934_vm15, %v19547_v46, %v2622_v31  ;;  %v5939_v39 = vsel %vm5937_vm1, %v2625_v13, %v19546_v24 }
 0x4ea   :  { %vm2724_vm9 = vcmp.lt.s32.totalorder %v2723_v9, 2  ;;  %v2727_v56 = vsel %vm2725_vm2, %v19540_v57, %v2726_v2  ;;  %v2730_v33 = vsel %vm2728_vm5, %v2729_v5, %v19539_v10  ;;  %v7863_v3 = vmul.f32 %v7831_v51, %v7799_v7  ;;  %v19551_v7 = vld [vmem:[#allocation20_spill] sm:$0xff] }
 0x4eb   :  { %v4231_v25 = vsel %vm4223_vm13, %v16579_v59, %v4230_v43  ;;  %vm2621_vm0 = vcmp.eq.s32.totalorder %v2619_v0, 0  ;;  %vm2624_vm8 = vcmp.eq.s32.totalorder %v2619_v0, 2  ;;  %vm19550_vm3 = vnez %v19549_v18  ;;  %v16679_v18 = vpop.permute.xlu1 %7985 }
 0x4ec   :  { %v2926_v54 = vsel %vm19550_vm3, 0, %v19548_v44  ;;  %v4234_v2 = vsel %vm4224_vm10, %v4220_v29, 1326507024  ;;  %8133 = vrot.lane.b32.xlu1 %v16647_v48, %s11665_s7  ;;  %v7928_v28 = vsub.f32 1.0, %v7896_v32  ;;  %vm2617_vm4 = vweird.f32 %v19551_v7 }
 0x4ed   :  { %8385 = vrot.lane.b32.xlu0 %v7863_v3, %s11667_s24  ;;  %v5940_v10 = vsel %vm5933_vm12, %v5936_v21, %v5939_v39  ;;  %v2731_v57 = vsel %vm2724_vm9, %v2727_v56, %v2730_v33  ;;  %vm2620_vm6 = vcmp.lt.s32.totalorder %v2619_v0, 2  ;;  %v16675_v5 = vmul.f32 %v7705_v11, %v16595_v27  ;;  %v19553_v33 = vld [vmem:[#allocation104_spill] sm:$0xff] }
 0x4ee   :  { %v7770_v44 = vmul.f32 %v16584_v35, %v16558_v12  ;;  %v2623_v9 = vsel %vm2621_vm0, %v19547_v46, %v2622_v31  ;;  %v2626_v29 = vsel %vm2624_vm8, %v2625_v13, %v19546_v24  ;;  %v2930_v43 = vadd.s32 3, %v2926_v54 }
 0x4ef   :  { %v6241_v32 = vand.u32 3, %v2926_v54  ;;  %v4356_v3 = vshll.u32 %v16605_v6, 30  ;;  %vm4222_vm2 = vcmp.lt.s32.totalorder %v16396_v15, 2  ;;  %v4225_v8 = vsel %vm4221_vm7, %v16503_v26, %v16551_v50  ;;  %v16709_v26 = vpop.permute.xlu0 %8367  ;;  %v16714_v21 = vpop.permute.xlu1 %8239 }
 0x4f0   :  { %v16691_v35 = vsel %vm2617_vm4, nan, %v5940_v10  ;;  %v4232_v11 = vsel %vm4222_vm2, %v4229_v52, %v4231_v25  ;;  %v4233_v54 = vsel %vm4221_vm7, %v16554_v60, %v16579_v59  ;;  %v4235_v24 = vsel %vm4223_vm13, %v16607_v1, %v4234_v2  ;;  %v19554_v25 = vld [vmem:[#allocation103_spill] sm:$0xff] }
 0x4f1   :  { %v16704_v31 = vsel %vm2721_vm11, nan, %v2731_v57  ;;  %8515 = vrot.lane.b32.xlu0 %v7928_v28, %s11668_s25  ;;  %8009 = vrot.lane.b32.xlu1 %v16691_v35, %s11664_s6  ;;  %v2627_v50 = vsel %vm2620_vm6, %v2623_v9, %v2626_v29  ;;  %v19008_v46 = vsub.f32 1.0, %v16675_v5  ;;  %v7802_v13 = vsub.f32 1.0, %v7770_v44  ;;  %v19555_v44 = vld [vmem:[#allocation94_spill] sm:$0xff] }
 0x4f2   :  { %19552 = vst [vmem:[#allocation49_spill] sm:$0xff] %v16704_v31  ;;  %v7834_v52 = vmul.f32 2.0, %v16619_v55  ;;  %v7895_v1 = vmul.f32 %v7831_v51, %v16506_v49  ;;  %v2931_v40 = vand.u32 3, %v2930_v43  ;;  %vm6243_vm7 = vcmp.eq.s32.totalorder %v6241_v32, 0  ;;  %v19556_v9 = vld [vmem:[#allocation106_spill] sm:$0xff] }
 0x4f3   :  { %vm6246_vm11 = vcmp.eq.s32.totalorder %v6241_v32, 2  ;;  %v16718_v39 = vmul.u32.u64.low %v16360_v23, %v4232_v11  ;;  %v16719_v56 = vmul.u32.u64.high %v16360_v23, %v4232_v11, %v16718_v39  ;;  %v2934_v0 = vxor.u32 2147483648, %v19553_v33  ;;  %v16745_v43 = vpop.permute.xlu1 %8115  ;;  %v16747_v7 = vpop.permute.xlu0 %7991 }
 0x4f4   :  { %v2937_v2 = vxor.u32 2147483648, %v19554_v25  ;;  %v4226_v28 = vsel %vm4224_vm10, %v16579_v59, 2102212464  ;;  %v4236_v10 = vsel %vm4222_vm2, %v4233_v54, %v4235_v24  ;;  %v16730_v49 = vmul.f32 2.0, %v16704_v31 }
 0x4f5   :  { %v16734_v51 = vsel %vm2617_vm4, nan, %v2627_v50  ;;  %8261 = vrot.lane.b32.xlu0 %v19008_v46, %s11666_s23  ;;  %8263 = vrot.lane.b32.xlu1 %v7802_v13, %s11666_s23  ;;  %vm6242_vm5 = vcmp.lt.s32.totalorder %v6241_v32, 2  ;;  %v6245_v57 = vsel %vm6243_vm7, %v19554_v25, %v2934_v0  ;;  %vm19557_vm10 = vnez %v19556_v9 }
 0x4f6   :  { %v6248_v59 = vsel %vm6246_vm11, %v2937_v2, %v19553_v33  ;;  %v2822_v29 = vsel %vm19557_vm10, 0, %v19555_v44  ;;  %v7866_v11 = vmul.f32 %v7834_v52, %v7802_v13  ;;  %v7927_v54 = vsub.f32 1.0, %v7895_v1 }
 0x4f7   :  { %vm2933_vm15 = vcmp.eq.s32.totalorder %v2931_v40, 0  ;;  %v6138_v24 = vand.u32 3, %v2822_v29  ;;  %v16750_v50 = vsub.s32 %v16499_v61, %v4356_v3  ;;  %vm2936_vm1 = vcmp.eq.s32.totalorder %v2931_v40, 2  ;;  %v19558_v3 = vld [vmem:[#allocation25_spill] sm:$0xff] }
 0x4f8   :  { %v16753_v46 = vmul.u32.u64.low %v16360_v23, %v4236_v10  ;;  %v16754_v12 = vmul.u32.u64.high %v16360_v23, %v4236_v10, %v16753_v46  ;;  %v4227_v44 = vsel %vm4223_vm13, %v16554_v60, %v4226_v28  ;;  %v16761_v9 = vmul.f32 %v16730_v49, %v16626_v36  ;;  %v16772_v60 = vpop.permute.xlu1 %8113  ;;  %v8366_v36 = vpop.permute.xlu0 %8365 }
 0x4f9   :  { %v7707_v13 = vmul.f32 2.0, %v16734_v51  ;;  %8391 = vrot.lane.b32.xlu0 %v7866_v11, %s11667_s24  ;;  %8513 = vrot.lane.b32.xlu1 %v7927_v54, %s11668_s25  ;;  %v6249_v61 = vsel %vm6242_vm5, %v6245_v57, %v6248_v59  ;;  %vm2929_vm12 = vweird.f32 %v19558_v3  ;;  %vm2932_vm9 = vcmp.lt.s32.totalorder %v2931_v40, 2  ;;  %v19560_v59 = vld [vmem:[#allocation112_spill] sm:$0xff]  ;;  %v19564_v3 = vld [vmem:[#allocation111_spill] sm:$0xff] }
 0x4fa   :  { %v2935_v46 = vsel %vm2933_vm15, %v19554_v25, %v2934_v0  ;;  %v16770_v1 = vmul.f32 2.0, %v16647_v48  ;;  %v2938_v28 = vsel %vm2936_vm1, %v2937_v2, %v19553_v33  ;;  %v2826_v10 = vadd.s32 3, %v2822_v29  ;;  %v19559_v0 = vld [vmem:[#allocation113_spill] sm:$0xff] }
 0x4fb   :  { %vm6140_vm13 = vcmp.eq.s32.totalorder %v6138_v24, 0  ;;  %vm6143_vm0 = vcmp.eq.s32.totalorder %v6138_v24, 2  ;;  %v16777_v32 = vsel %vm4222_vm2, %v4225_v8, %v4227_v44  ;;  %v16781_v57 = vsel %vm2929_vm12, nan, %v6249_v61 }
 0x4fc   :  { %v2830_v25 = vxor.u32 2147483648, %v19559_v0  ;;  %v2833_v11 = vxor.u32 2147483648, %v19560_v59  ;;  %vm63_vm8 = vcmask 130048   ;;  %vm8622_vm3 = vcmask 261120   ;;  %v8496_v61 = vpop.permute.xlu0 %8495  ;;  %v16800_v54 = vpop.permute.xlu1 %7989 }
 0x4fd   :  { %8139 = vrot.lane.b32.xlu1 %v16761_v9, %s11665_s7  ;;  %8015 = vrot.lane.b32.xlu0 %v16781_v57, %s11664_s6  ;;  %v7898_v15 = vmul.f32 %v7834_v52, %v16619_v55  ;;  %v2939_v8 = vsel %vm2932_vm9, %v2935_v46, %v2938_v28  ;;  %vm6139_vm4 = vcmp.lt.s32.totalorder %v6138_v24, 2  ;;  %v16795_v29 = vadd.s32 1, %v16719_v56 }
 0x4fe   :  { %v6142_v33 = vsel %vm6140_vm13, %v19560_v59, %v2830_v25  ;;  %v6145_v2 = vsel %vm6143_vm0, %v2833_v11, %v19559_v0  ;;  %v16798_v44 = vmul.f32 %v7707_v13, %v16691_v35  ;;  %v19561_v27 = vsub.f32 1.0, %v16675_v5 }
 0x4ff   :  { %v2827_v52 = vand.u32 3, %v2826_v10  ;;  %vm4246_vm6 = vc.u32 %v16754_v12, %v16718_v39  ;;  %v8591_v40 = vsel %vm63_vm8, %v15772_v19, %v16547_v14  ;;  %vm8655_vm2 = vcmask 392192  }
 0x500   :  { %v7865_v55 = vmul.f32 %v16770_v1, %v19561_v27  ;;  %vm8688_vm7 = vcmask 523264   ;;  %v16811_v35 = vmul.f32 %v7707_v13, %v16734_v51  ;;  %v8624_v46 = vsel %vm8622_vm3, %v8591_v40, %v16603_v4  ;;  %v19563_v13 = vld [vmem:[#allocation97_spill] sm:$0xff]  ;;  %v16831_v10 = vpop.permute.xlu0 %8241  ;;  %v19566_v40 = vld [vmem:[#allocation28_spill] sm:$0xff] }
 0x501   :  { %v16817_v5 = vsel %vm2929_vm12, nan, %v2939_v8  ;;  %vm8721_vm11 = vcmask 654336   ;;  %8137 = vrot.lane.b32.xlu1 %v16798_v44, %s11665_s7  ;;  %v6146_v19 = vsel %vm6139_vm4, %v6142_v33, %v6145_v2  ;;  %v8590_v14 = vsel %vm63_vm8, %v15813_v47, %v16597_v34  ;;  %v16833_v8 = vpop.permute.xlu1 %8243 }
 0x502   :  { %19562 = vst [vmem:[#allocation47_spill] sm:$0xff] %v16817_v5  ;;  %8389 = vrot.lane.b32.xlu0 %v7865_v55, %s11667_s24  ;;  %v7930_v27 = vsub.f32 1.0, %v7898_v15  ;;  %v7772_v4 = vmul.f32 %v16730_v49, %v16704_v31  ;;  %vm19565_vm5 = vnez %v19564_v3  ;;  %vm2825_vm10 = vweird.f32 %v19566_v40 }
 0x503   :  { %v3134_v28 = vsel %vm19565_vm5, 0, %v19563_v13  ;;  %vm2829_vm15 = vcmp.eq.s32.totalorder %v2827_v52, 0  ;;  %vm2832_vm1 = vcmp.eq.s32.totalorder %v2827_v52, 2  ;;  %v16837_v33 = vmul.f32 2.0, %v16817_v5 }
 0x504   :  { %v6447_v24 = vand.u32 3, %v3134_v28  ;;  %v16841_v47 = vsel %vm2825_vm10, nan, %v6146_v19  ;;  %vm8773_vm12 = vcmask 785408   ;;  %v7803_v34 = vsub.f32 1.0, %v16811_v35 }
 0x505   :  { %v8623_v49 = vsel %vm8622_vm3, %v8590_v14, %v16643_v45  ;;  %v8657_v15 = vsel %vm8655_vm2, %v8624_v46, %v16714_v21  ;;  %vm2828_vm9 = vcmp.lt.s32.totalorder %v2827_v52, 2  ;;  %8013 = vrot.lane.b32.xlu1 %v16841_v47, %s11664_s6  ;;  %v3138_v2 = vadd.s32 3, %v3134_v28  ;;  %v16856_v14 = vpop.permute.xlu0 %8371  ;;  %v8494_v21 = vpop.permute.xlu1 %8493  ;;  %v19568_v52 = vld [vmem:[#allocation118_spill] sm:$0xff] }
 0x506   :  { %8519 = vrot.lane.b32.xlu0 %v7930_v27, %s11668_s25  ;;  %v8656_v55 = vsel %vm8655_vm2, %v8623_v49, %v16662_v22  ;;  %v2831_v19 = vsel %vm2829_vm15, %v19560_v59, %v2830_v25  ;;  %v2834_v13 = vsel %vm2832_vm1, %v2833_v11, %v19559_v0  ;;  %v7804_v3 = vsub.f32 1.0, %v7772_v4  ;;  %v19567_v59 = vld [vmem:[#allocation100_spill] sm:$0xff]  ;;  %v19569_v4 = vld [vmem:[#allocation114_spill] sm:$0xff] }
 0x507   :  { %v8689_v45 = vsel %vm8688_vm7, %v8656_v55, %v8366_v36  ;;  %v7897_v46 = vmul.f32 %v16770_v1, %v16647_v48  ;;  %vm6449_vm13 = vcmp.eq.s32.totalorder %v6447_v24, 0  ;;  %vm6452_vm0 = vcmp.eq.s32.totalorder %v6447_v24, 2 }
 0x508   :  { %v8690_v27 = vsel %vm8688_vm7, %v8657_v15, %v16709_v26  ;;  %v8722_v22 = vsel %vm8721_vm11, %v8689_v45, %v8494_v21  ;;  %v3142_v25 = vxor.u32 2147483648, %v15411_v17  ;;  %v3145_v0 = vxor.u32 2147483648, %v19567_v59 }
 0x509   :  { %v8723_v11 = vsel %vm8721_vm11, %v8690_v27, %v8496_v61  ;;  %v2835_v36 = vsel %vm2828_vm9, %v2831_v19, %v2834_v13  ;;  %11138 = vmatprep.mubr.msk.f32.mxu1 %vm8773_vm12, %v8722_v22  ;;  %v7836_v48 = vmul.f32 2.0, %v16761_v9  ;;  %v3139_v1 = vand.u32 3, %v3138_v2  ;;  %8267 = vrot.lane.b32.xlu1 %v7804_v3, %s11666_s23  ;;  %v16893_v13 = vpop.permute.xlu1 %8119  ;;  %v16895_v45 = vpop.permute.xlu0 %7995 }
 0x50a   :  { %8265 = vrot.lane.b32.xlu0 %v7803_v34, %s11666_s23  ;;  %11139 = vmatmul.mubr.msk.f32.vlgmr.msra.gmra.mrb[40].mxu1 %vm8773_vm12, %v8723_v11  ;;  %vm6448_vm4 = vcmp.lt.s32.totalorder %v6447_v24, 2  ;;  %v6451_v26 = vsel %vm6449_vm13, %v19567_v59, %v3142_v25  ;;  %v6454_v61 = vsel %vm6452_vm0, %v3145_v0, %v15411_v17  ;;  %vm19570_vm5 = vnez %v19569_v4 }
 0x50b   :  { %v3030_v28 = vsel %vm19570_vm5, 0, %v19568_v52  ;;  %v19571_v49 = vsub.s32 32, %v15977_v37  ;;  %v19572_v2 = vsub.s32 4294967266, %v15977_v37  ;;  %v4248_v19 = vsel %vm4246_vm6, %v16795_v29, %v16719_v56 }
 0x50c   :  { %v7868_v21 = vmul.f32 %v7836_v48, %v7804_v3  ;;  %v4244_v27 = vmul.u32 %v16360_v23, %v16777_v32  ;;  %v7929_v22 = vsub.f32 1.0, %v7897_v46  ;;  %v6344_v11 = vand.u32 3, %v3030_v28 }
 0x50d   :  { %v16882_v15 = vshrl.u32 %v15930_v63, %v19571_v49  ;;  %v16886_v55 = vadd.s32 127, %v19572_v2  ;;  %v16901_v63 = vsel %vm2825_vm10, nan, %v2835_v36  ;;  %v4057_v52 = vsub.s32 4294967266, %v16365_v20  ;;  %v16919_v46 = vpop.permute.xlu1 %8117  ;;  %v8370_v24 = vpop.permute.xlu0 %8369  ;;  %v19575_v36 = vld [vmem:[#allocation30_spill] sm:$0xff] }
 0x50e   :  { %19573 = vst [vmem:[#allocation50_spill] sm:$0xff] %v16901_v63  ;;  %8395 = vrot.lane.b32.xlu0 %v7868_v21, %s11667_s24  ;;  %vm3141_vm15 = vcmp.eq.s32.totalorder %v3139_v1, 0  ;;  %v6455_v56 = vsel %vm6448_vm4, %v6451_v26, %v6454_v61  ;;  %v3034_v29 = vadd.s32 3, %v3030_v28  ;;  %v19574_v3 = vsub.s32 0, %v16750_v50  ;;  %8517 = vrot.lane.b32.xlu1 %v7929_v22, %s11668_s25 }
 0x50f   :  { %v16911_v23 = vadd.s32 %v4248_v19, %v4244_v27  ;;  %v16915_v32 = vmul.f32 %v16837_v33, %v16781_v57  ;;  %vm3144_vm6 = vcmp.eq.s32.totalorder %v3139_v1, 2  ;;  %v7709_v40 = vmul.f32 2.0, %v16901_v63 }
 0x510   :  { %v16909_v4 = vmin.u32 %v19574_v3, %v16750_v50  ;;  %vm3137_vm10 = vweird.f32 %v19575_v36  ;;  %vm3140_vm1 = vcmp.lt.s32.totalorder %v3139_v1, 2  ;;  %v7835_v26 = vmul.f32 2.0, %v16798_v44 }
 0x511   :  { %v16925_v61 = vsel %vm3137_vm10, nan, %v6455_v56  ;;  %v3143_v57 = vsel %vm3141_vm15, %v19567_v59, %v3142_v25  ;;  %vm6346_vm9 = vcmp.eq.s32.totalorder %v6344_v11, 0  ;;  %vm6349_vm13 = vcmp.eq.s32.totalorder %v6344_v11, 2  ;;  %v8500_v59 = vpop.permute.xlu0 %8499  ;;  %v16941_v56 = vpop.permute.xlu1 %7993 }
 0x512   :  { %8019 = vrot.lane.b32.xlu0 %v16925_v61, %s11664_s6  ;;  %v3146_v28 = vsel %vm3144_vm6, %v3145_v0, %v15411_v17  ;;  %v16931_v49 = vand.u32 3, %v3034_v29  ;;  %v3038_v2 = vxor.u32 2147483648, %v15473_v53  ;;  %v3041_v19 = vxor.u32 2147483648, %v15440_v41  ;;  %8143 = vrot.lane.b32.xlu1 %v16915_v32, %s11665_s7 }
 0x513   :  { %v4250_v22 = vadd.s32 536870912, %v16911_v23  ;;  %v7900_v25 = vmul.f32 %v7836_v48, %v16761_v9  ;;  %v7867_v17 = vmul.f32 %v7835_v26, %v7803_v34  ;;  %vm6345_vm0 = vcmp.lt.s32.totalorder %v6344_v11, 2  ;;  %v19576_v11 = vld [vmem:[#allocation108_spill] sm:$0xff] }
 0x514   :  { %v6348_v0 = vsel %vm6346_vm9, %v15440_v41, %v3038_v2  ;;  %v6351_v29 = vsel %vm6349_vm13, %v3041_v19, %v15473_v53  ;;  %v16949_v3 = vadd.s32 127, %v4057_v52  ;;  %v4361_v27 = vclz %v16909_v4  ;;  %v19577_v52 = vld [vmem:[#allocation116_spill] sm:$0xff] }
 0x515   :  { %v16953_v21 = vmul.f32 %v7709_v40, %v16841_v47  ;;  %v3147_v9 = vsel %vm3140_vm1, %v3143_v57, %v3146_v28  ;;  %vm3037_vm4 = vcmp.eq.s32.totalorder %v16931_v49, 0  ;;  %vm3040_vm5 = vcmp.eq.s32.totalorder %v16931_v49, 2  ;;  %v16978_v57 = vpop.permute.xlu0 %8245 }
 0x516   :  { %8393 = vrot.lane.b32.xlu0 %v7867_v17, %s11667_s24  ;;  %v16960_v35 = vmul.f32 %v7709_v40, %v16901_v63  ;;  %v7774_v34 = vmul.f32 %v16837_v33, %v16817_v5  ;;  %v16964_v48 = vshrl.u32 %v4250_v22, 30  ;;  %v8593_v47 = vsel %vm63_vm8, %v15903_v38, %v16628_v58  ;;  %v16980_v33 = vpop.permute.xlu1 %8247  ;;  %v19580_v22 = vld [vmem:[#allocation31_spill] sm:$0xff]  ;;  %v19581_v58 = vld [vmem:[#allocation32_spill] sm:$0xff]  ;;  %v19590_v5 = vld [vmem:[#allocation38_spill] sm:$0xff] }
 0x517   :  { %8141 = vrot.lane.b32.xlu1 %v16953_v21, %s11665_s7  ;;  %v6352_v1 = vsel %vm6345_vm0, %v6348_v0, %v6351_v29  ;;  %vm19578_vm15 = vnez %v19577_v52  ;;  %v16976_v40 = vsel %vm3137_vm10, nan, %v3147_v9  ;;  %v7932_v28 = vsub.f32 1.0, %v7900_v25 }
 0x518   :  { %v3342_v4 = vsel %vm19578_vm15, 0, %v19576_v11  ;;  %19579 = vst [vmem:[#allocation7_spill] sm:$0xff] %v16976_v40  ;;  %vm3033_vm6 = vweird.f32 %v19580_v22  ;;  %v8592_v17 = vsel %vm63_vm8, %v19581_v58, %v16679_v18  ;;  %vm3036_vm1 = vcmp.lt.s32.totalorder %v16931_v49, 2 }
 0x519   :  { %v6653_v38 = vand.u32 3, %v3342_v4  ;;  %v3039_v36 = vsel %vm3037_vm4, %v15440_v41, %v3038_v2  ;;  %v3042_v0 = vsel %vm3040_vm5, %v3041_v19, %v15473_v53  ;;  %v8625_v25 = vsel %vm8622_vm3, %v8592_v17, %v16772_v60 }
 0x51a   :  { %8523 = vrot.lane.b32.xlu0 %v7932_v28, %s11668_s25  ;;  %v16998_v29 = vsel %vm3033_vm6, nan, %v6352_v1  ;;  %v19011_v18 = vsub.f32 1.0, %v16960_v35  ;;  %v7806_v9 = vsub.f32 1.0, %v7774_v34  ;;  %v8626_v11 = vsel %vm8622_vm3, %v8593_v47, %v16745_v43  ;;  %v17011_v1 = vpop.permute.xlu0 %8375  ;;  %v8498_v34 = vpop.permute.xlu1 %8497  ;;  %v19582_v47 = vld [vmem:[#allocation123_spill] sm:$0xff]  ;;  %v19583_v28 = vld [vmem:[#allocation122_spill] sm:$0xff] }
 0x51b   :  { %v8658_v41 = vsel %vm8655_vm2, %v8625_v25, %v16831_v10  ;;  %8017 = vrot.lane.b32.xlu1 %v16998_v29, %s11664_s6  ;;  %v7899_v53 = vmul.f32 %v7835_v26, %v16798_v44  ;;  %v3346_v60 = vadd.s32 3, %v3342_v4  ;;  %v8659_v2 = vsel %vm8655_vm2, %v8626_v11, %v16833_v8 }
 0x51c   :  { %v8691_v19 = vsel %vm8688_vm7, %v8658_v41, %v8370_v24  ;;  %vm6655_vm10 = vcmp.eq.s32.totalorder %v6653_v38, 0  ;;  %vm6658_vm9 = vcmp.eq.s32.totalorder %v6653_v38, 2  ;;  %v8692_v43 = vsel %vm8688_vm7, %v8659_v2, %v16856_v14  ;;  %v19587_v2 = vld [vmem:[#allocation36_spill] sm:$0xff] }
 0x51d   :  { %v8724_v10 = vsel %vm8721_vm11, %v8691_v19, %v8498_v34  ;;  %v3350_v52 = vxor.u32 2147483648, %v19582_v47  ;;  %v3353_v44 = vxor.u32 2147483648, %v19583_v28  ;;  %v10394_v26 = vadd.s32 4294967294, %v4361_v27 }
 0x51e   :  { %v4252_v4 = vshll.u32 %v16964_v48, 30  ;;  %v8725_v8 = vsel %vm8721_vm11, %v8692_v43, %v8500_v59  ;;  %11141 = vmatprep.mubr.msk.f32.mxu1 %vm8773_vm12, %v8724_v10  ;;  %8269 = vrot.lane.b32.xlu0 %v19011_v18, %s11666_s23  ;;  %v7838_v24 = vmul.f32 2.0, %v16915_v32  ;;  %v3043_v14 = vsel %vm3036_vm1, %v3039_v36, %v3042_v0  ;;  %v17034_v17 = vpop.permute.xlu1 %8123  ;;  %v17036_v25 = vpop.permute.xlu0 %7999  ;;  %v19584_v36 = vld [vmem:[#allocation119_spill] sm:$0xff]  ;;  %v19585_v0 = vld [vmem:[#allocation110_spill] sm:$0xff] }
 0x51f   :  { %8271 = vrot.lane.b32.xlu1 %v7806_v9, %s11666_s23  ;;  %11142 = vmatmul.mubr.msk.f32.gmra.mrb[42].mxu1 %vm8773_vm12, %v8725_v8  ;;  %vm6654_vm13 = vcmp.lt.s32.totalorder %v6653_v38, 2  ;;  %v6657_v27 = vsel %vm6655_vm10, %v19583_v28, %v3350_v52  ;;  %v6660_v59 = vsel %vm6658_vm9, %v3353_v44, %v19582_v47  ;;  %v7712_v58 = vmul.f32 2.0, %v16976_v40 }
 0x520   :  { %v7870_v11 = vmul.f32 %v7838_v24, %v7806_v9  ;;  %v3347_v49 = vand.u32 3, %v3346_v60  ;;  %vm19586_vm0 = vnez %v19585_v0  ;;  %v19588_v19 = vshll.u32 %v19587_v2, %v15977_v37 }
 0x521   :  { %v3238_v41 = vsel %vm19586_vm0, 0, %v19584_v36  ;;  %v19589_v43 = vshll.u32 %v16886_v55, 23  ;;  %v7931_v8 = vsub.f32 1.0, %v7899_v53  ;;  %v4054_v9 = vshll.u32 %v19590_v5, %v16365_v20  ;;  %v19593_v53 = vld [vmem:[#allocation35_spill] sm:$0xff] }
 0x522   :  { %v17045_v34 = vor.u32 %v16882_v15, %v19588_v19  ;;  %v6550_v18 = vand.u32 3, %v3238_v41  ;;  %v19591_v60 = vsub.s32 32, %v16365_v20  ;;  %v17058_v36 = vsel %vm3033_vm6, nan, %v3043_v14  ;;  %8399 = vrot.lane.b32.xlu0 %v7870_v11, %s11667_s24  ;;  %v8374_v22 = vpop.permute.xlu0 %8373 }
 0x523   :  { %v17049_v10 = vor.u32 4788187, %v19589_v43  ;;  %19592 = vst [vmem:[#allocation59_spill] sm:$0xff] %v17058_v36  ;;  %v6661_v37 = vsel %vm6654_vm13, %v6657_v27, %v6660_v59  ;;  %v4059_v15 = vshll.u32 %v16949_v3, 23  ;;  %vm10395_vm4 = vcmp.lt.s32.totalorder %v10394_v26, 0  ;;  %8521 = vrot.lane.b32.xlu1 %v7931_v8, %s11668_s25  ;;  %v19595_v27 = vld [vmem:[#allocation124_spill] sm:$0xff] }
 0x524   :  { %v4055_v0 = vshrl.u32 %v16354_v16, %v19591_v60  ;;  %v17064_v55 = vsub.s32 %v16911_v23, %v4252_v4  ;;  %v3242_v5 = vadd.s32 3, %v3238_v41  ;;  %v17068_v20 = vmul.f32 %v7712_v58, %v16925_v61  ;;  %v17070_v16 = vpop.permute.xlu1 %8121  ;;  %v19594_v4 = vld [vmem:[#allocation125_spill] sm:$0xff] }
 0x525   :  { %vm3345_vm5 = vweird.f32 %v19593_v53  ;;  %vm3349_vm15 = vcmp.eq.s32.totalorder %v3347_v49, 0  ;;  %vm3352_vm6 = vcmp.eq.s32.totalorder %v3347_v49, 2  ;;  %v7711_v38 = vmul.f32 2.0, %v17058_v36 }
 0x526   :  { %v17076_v3 = vsel %vm3345_vm5, nan, %v6661_v37  ;;  %vm6552_vm1 = vcmp.eq.s32.totalorder %v6550_v18, 0  ;;  %vm6555_vm10 = vcmp.eq.s32.totalorder %v6550_v18, 2  ;;  %v7837_v23 = vmul.f32 2.0, %v16953_v21  ;;  %v8504_v19 = vpop.permute.xlu0 %8503 }
 0x527   :  { %8023 = vrot.lane.b32.xlu0 %v17076_v3, %s11664_s6  ;;  %v7902_v61 = vmul.f32 %v7838_v24, %v16915_v32  ;;  %v3246_v14 = vxor.u32 2147483648, %v19594_v4  ;;  %v3249_v59 = vxor.u32 2147483648, %v19595_v27  ;;  %8147 = vrot.lane.b32.xlu1 %v17068_v20, %s11665_s7  ;;  %vm3348_vm9 = vcmp.lt.s32.totalorder %v3347_v49, 2 }
 0x528   :  { %v3351_v11 = vsel %vm3349_vm15, %v19583_v28, %v3350_v52  ;;  %v3354_v41 = vsel %vm3352_vm6, %v3353_v44, %v19582_v47  ;;  %v3243_v2 = vand.u32 3, %v3242_v5  ;;  %v17088_v43 = vpop.permute.xlu1 %7997  ;;  %v19596_v8 = vsub.f32 1.0, %v16960_v35 }
 0x529   :  { %vm6551_vm13 = vcmp.lt.s32.totalorder %v6550_v18, 2  ;;  %v6554_v32 = vsel %vm6552_vm1, %v19595_v27, %v3246_v14  ;;  %v6557_v24 = vsel %vm6555_vm10, %v3249_v59, %v19594_v4  ;;  %v4165_v37 = vand.u32 2147483647, %v17049_v10 }
 0x52a   :  { %v7869_v60 = vmul.f32 %v7837_v23, %v19596_v8  ;;  %v17097_v63 = vor.u32 %v4055_v0, %v4054_v9  ;;  %v17099_v52 = vor.u32 4788187, %v4059_v15  ;;  %v17102_v47 = vmul.f32 %v7711_v38, %v16998_v29  ;;  %v17119_v15 = vpop.permute.xlu0 %8249  ;;  %v19600_v8 = vld [vmem:[#allocation40_spill] sm:$0xff] }
 0x52b   :  { %v17105_v28 = vsel %vm10395_vm4, 0, %v10394_v26  ;;  %v4255_v35 = vsub.s32 0, %v17064_v55  ;;  %v3355_v44 = vsel %vm3348_vm9, %v3351_v11, %v3354_v41  ;;  %v17111_v18 = vmul.f32 %v7711_v38, %v17058_v36  ;;  %v19597_v26 = vld [vmem:[#allocation41_spill] sm:$0xff] }
 0x52c   :  { %8397 = vrot.lane.b32.xlu0 %v7869_v60, %s11667_s24  ;;  %8145 = vrot.lane.b32.xlu1 %v17102_v47, %s11665_s7  ;;  %vm3245_vm0 = vcmp.eq.s32.totalorder %v3243_v2, 0  ;;  %vm3248_vm15 = vcmp.eq.s32.totalorder %v3243_v2, 2  ;;  %v6558_v9 = vsel %vm6551_vm13, %v6554_v32, %v6557_v24  ;;  %v7776_v29 = vmul.f32 %v7712_v58, %v16976_v40  ;;  %v17121_v49 = vpop.permute.xlu1 %8251  ;;  %v19598_v11 = vld [vmem:[#allocation37_spill] sm:$0xff] }
 0x52d   :  { %v8595_v0 = vsel %vm63_vm8, %v19597_v26, %v16747_v7  ;;  %v7934_v5 = vsub.f32 1.0, %v7902_v61  ;;  %vm3241_vm4 = vweird.f32 %v19598_v11  ;;  %v19599_v38 = vld [vmem:[#allocation109_spill] sm:$0xff]  ;;  %v8594_v60 = vsel %vm63_vm8, %v19600_v8, %v16800_v54  ;;  %v19603_v26 = vld [vmem:[#allocation126_spill] sm:$0xff] }
 0x52e   :  { %v6859_v41 = vand.u32 3, %v19599_v38  ;;  %v17130_v58 = vsel %vm3345_vm5, nan, %v3355_v44  ;;  %vm3244_vm6 = vcmp.lt.s32.totalorder %v3243_v2, 2  ;;  %v7901_v7 = vmul.f32 %v7837_v23, %v16953_v21  ;;  %v19613_v40 = vld [vmem:[#allocation5_spill] sm:$0xff] }
 0x52f   :  { %19601 = vst [vmem:[#allocation58_spill] sm:$0xff] %v17130_v58  ;;  %v8627_v32 = vsel %vm8622_vm3, %v8594_v60, %v16919_v46  ;;  %v17138_v61 = vsel %vm3241_vm4, nan, %v6558_v9  ;;  %v3247_v24 = vsel %vm3245_vm0, %v19595_v27, %v3246_v14  ;;  %v3250_v54 = vsel %vm3248_vm15, %v3249_v59, %v19594_v4  ;;  %v17154_v27 = vpop.permute.xlu0 %8379  ;;  %v19602_v59 = vld [vmem:[#allocation129_spill] sm:$0xff] }
 0x530   :  { %8527 = vrot.lane.b32.xlu0 %v7934_v5, %s11668_s25  ;;  %v8628_v53 = vsel %vm8622_vm3, %v8595_v0, %v16893_v13  ;;  %v8660_v21 = vsel %vm8655_vm2, %v8627_v32, %v16978_v57  ;;  %8021 = vrot.lane.b32.xlu1 %v17138_v61, %s11664_s6  ;;  %v7807_v46 = vsub.f32 1.0, %v17111_v18  ;;  %v7808_v23 = vsub.f32 1.0, %v7776_v29  ;;  %v8502_v4 = vpop.permute.xlu1 %8501  ;;  %v19604_v32 = vld [vmem:[#allocation33_spill] sm:$0xff] }
 0x531   :  { %v8661_v44 = vsel %vm8655_vm2, %v8628_v53, %v16980_v33  ;;  %v8693_v14 = vsel %vm8688_vm7, %v8660_v21, %v8374_v22  ;;  %vm6861_vm5 = vcmp.eq.s32.totalorder %v6859_v41, 0  ;;  %vm6864_vm1 = vcmp.eq.s32.totalorder %v6859_v41, 2  ;;  %v19605_v53 = vld [vmem:[#allocation107_spill] sm:$0xff] }
 0x532   :  { %v8694_v13 = vsel %vm8688_vm7, %v8661_v44, %v17011_v1  ;;  %v8726_v57 = vsel %vm8721_vm11, %v8693_v14, %v8502_v4  ;;  %v3558_v9 = vxor.u32 2147483648, %v19602_v59  ;;  %v3561_v18 = vxor.u32 2147483648, %v19603_v26 }
 0x533   :  { %v4061_v29 = vand.u32 2147483647, %v17099_v52  ;;  %v10389_v33 = vmin.u32 %v4255_v35, %v17064_v55  ;;  %v7840_v22 = vmul.f32 2.0, %v17068_v20  ;;  %v8727_v0 = vsel %vm8721_vm11, %v8694_v13, %v8504_v19  ;;  %11144 = vmatprep.mubr.msk.f32.mxu1 %vm8773_vm12, %v8726_v57  ;;  %v17183_v60 = vpop.permute.xlu0 %8003  ;;  %v19607_v57 = vld [vmem:[#allocation42_spill] sm:$0xff] }
 0x534   :  { %8273 = vrot.lane.b32.xlu0 %v7807_v46, %s11666_s23  ;;  %v3251_v1 = vsel %vm3244_vm6, %v3247_v24, %v3250_v54  ;;  %8275 = vrot.lane.b32.xlu1 %v7808_v23, %s11666_s23  ;;  %vm6860_vm10 = vcmp.lt.s32.totalorder %v6859_v41, 2  ;;  %v6863_v52 = vsel %vm6861_vm5, %v19603_v26, %v3558_v9  ;;  %v6866_v19 = vsel %vm6864_vm1, %v3561_v18, %v19602_v59  ;;  %v17181_v8 = vpop.permute.xlu1 %8127 }
 0x535   :  { %11145 = vmatmul.mubr.msk.f32.gmra.mrb[44].mxu1 %vm8773_vm12, %v8727_v0  ;;  %v4167_v35 = vcvt.s32.f32 %v17045_v34  ;;  %v4369_v2 = vsub.s32 4294967266, %v17105_v28  ;;  %v7714_v5 = vmul.f32 2.0, %v17130_v58  ;;  %v7872_v38 = vmul.f32 %v7840_v22, %v7808_v23  ;;  %v19610_v0 = vld [vmem:[#allocation15_spill] sm:$0xff] }
 0x536   :  { %11638 = vcosq.f32 %v19604_v32  ;;  %v4063_v24 = vcvt.s32.f32 %v17097_v63  ;;  %v7933_v54 = vsub.f32 1.0, %v7901_v7  ;;  %v6756_v21 = vand.u32 3, %v19605_v53 }
 0x537   :  { %11640 = vsinq.f32 %v19604_v32  ;;  %v17191_v34 = vmul.f32 %v4167_v35, %v4165_v37  ;;  %v17195_v23 = vsel %vm3241_vm4, nan, %v3251_v1  ;;  %v6867_v44 = vsel %vm6860_vm10, %v6863_v52, %v6866_v19  ;;  %v8378_v13 = vpop.permute.xlu0 %8377 }
 0x538   :  { %19606 = vst [vmem:[#allocation53_spill] sm:$0xff] %v17195_v23  ;;  %8403 = vrot.lane.b32.xlu0 %v7872_v38, %s11667_s24  ;;  %v17199_v14 = vmul.f32 %v4063_v24, %v4061_v29  ;;  %v4349_v63 = vadd.s32 %v16285_v30, %v16322_v62  ;;  %v4365_v7 = vsub.s32 32, %v17105_v28  ;;  %v4257_v4 = vclz %v10389_v33  ;;  %8525 = vrot.lane.b32.xlu1 %v7933_v54, %s11668_s25  ;;  %v17213_v41 = vpop.permute.xlu1 %8125  ;;  %v19608_v29 = vld [vmem:[#allocation120_spill] sm:$0xff] }
 0x539   :  { %v17205_v10 = vadd.s32 127, %v4369_v2  ;;  %v17208_v37 = vmul.f32 2.0, %v17102_v47  ;;  %v17211_v11 = vmul.f32 %v7714_v5, %v17076_v3  ;;  %vm3553_vm9 = vweird.f32 %v19607_v57  ;;  %v19609_v3 = vld [vmem:[#allocation115_spill] sm:$0xff] }
 0x53a   :  { %v7713_v30 = vmul.f32 2.0, %v17195_v23  ;;  %v17219_v62 = vsel %vm3553_vm9, nan, %v6867_v44  ;;  %vm6758_vm13 = vcmp.eq.s32.totalorder %v6756_v21, 0  ;;  %vm6761_vm0 = vcmp.eq.s32.totalorder %v6756_v21, 2 }
 0x53b   :  { %vm3557_vm15 = vcmp.eq.s32.totalorder %v19608_v29, 0  ;;  %vm3560_vm4 = vcmp.eq.s32.totalorder %v19608_v29, 2  ;;  %v3454_v33 = vxor.u32 2147483648, %v19609_v3  ;;  %v3457_v1 = vxor.u32 2147483648, %v19610_v0  ;;  %v8508_v32 = vpop.permute.xlu0 %8507 }
 0x53c   :  { %8027 = vrot.lane.b32.xlu0 %v17219_v62, %s11664_s6  ;;  %v17227_v52 = vadd.s32 4294967294, %v4257_v4  ;;  %v7904_v19 = vmul.f32 %v7840_v22, %v17068_v20  ;;  %v17231_v35 = vmul.f32 %v7714_v5, %v17130_v58  ;;  %v7871_v2 = vmul.f32 %v17208_v37, %v7807_v46  ;;  %8151 = vrot.lane.b32.xlu1 %v17211_v11, %s11665_s7  ;;  %v17239_v24 = vpop.permute.xlu1 %8001 }
 0x53d   :  { %v17237_v38 = vmul.f32 %v7713_v30, %v17195_v23  ;;  %vm6757_vm6 = vcmp.lt.s32.totalorder %v6756_v21, 2  ;;  %v6760_v54 = vsel %vm6758_vm13, %v19610_v0, %v3454_v33  ;;  %v6763_v20 = vsel %vm6761_vm0, %v3457_v1, %v19609_v3  ;;  %v19612_v23 = vld [vmem:[#allocation85_spill] sm:$0xff] }
 0x53e   :  { %v17246_v22 = vmul.f32 %v7713_v30, %v17138_v61  ;;  %vm3556_vm5 = vcmp.lt.s32.totalorder %v19608_v29, 2  ;;  %v3559_v46 = vsel %vm3557_vm15, %v19603_v26, %v3558_v9  ;;  %v3562_v5 = vsel %vm3560_vm4, %v3561_v18, %v19602_v59  ;;  %v19611_v61 = vld [vmem:[#allocation34_spill] sm:$0xff] }
 0x53f   :  { %v4169_v53 = vxor.u32 2147483648, %v17191_v34  ;;  %v4067_v4 = vsub.s32 4, %v19611_v61  ;;  %v17262_v30 = vshrl.u32 %v4349_v63, %v4365_v7  ;;  %vm3983_vm1 = vcmp.lt.s32.totalorder %v19612_v23, 0 }
 0x540   :  { %8401 = vrot.lane.b32.xlu0 %v7871_v2, %s11667_s24  ;;  %v17265_v58 = vpop.eup %11638  ;;  %v4371_v9 = vshll.u32 %v17205_v10, 23  ;;  %vm10391_vm10 = vcmp.lt.s32.totalorder %v17227_v52, 0  ;;  %v7810_v59 = vsub.f32 1.0, %v17231_v35  ;;  %8149 = vrot.lane.b32.xlu1 %v17246_v22, %s11665_s7  ;;  %v6764_v26 = vsel %vm6757_vm6, %v6760_v54, %v6763_v20  ;;  %v17282_v2 = vpop.permute.xlu0 %8253  ;;  %v19614_v54 = vld [vmem:[#allocation43_spill] sm:$0xff]  ;;  %v19615_v20 = vld [vmem:[#allocation121_spill] sm:$0xff] }
 0x541   :  { %v17274_v18 = vpop.eup %11640  ;;  %v8597_v63 = vsel %vm63_vm8, %v16170_v42, %v16895_v45  ;;  %v3563_v10 = vsel %vm3556_vm5, %v3559_v46, %v3562_v5  ;;  %v17284_v44 = vpop.permute.xlu1 %8255  ;;  %v7936_v35 = vsub.f32 1.0, %v7904_v19  ;;  %v8596_v21 = vsel %vm63_vm8, %v19613_v40, %v16941_v56  ;;  %v19619_v40 = vld [vmem:[#allocation127_spill] sm:$0xff] }
 0x542   :  { %vm3449_vm13 = vweird.f32 %v19614_v54  ;;  %vm3453_vm0 = vcmp.eq.s32.totalorder %v19615_v20, 0  ;;  %vm3456_vm15 = vcmp.eq.s32.totalorder %v19615_v20, 2  ;;  %v19616_v42 = vand.u32 2147483647, %v19612_v23 }
 0x543   :  { %v8629_v29 = vsel %vm8622_vm3, %v8596_v21, %v17070_v16  ;;  %vm3452_vm6 = vcmp.lt.s32.totalorder %v19615_v20, 2  ;;  %v17304_v56 = vsel %vm3449_vm13, nan, %v6764_v26  ;;  %v7065_v19 = vand.u32 3, %v19619_v40  ;;  %v19620_v16 = vld [vmem:[#allocation19_spill] sm:$0xff] }
 0x544   :  { %vm17294_vm4 = vcmp.le.f32.partialorder %v19616_v42, 0.7853982  ;;  %8531 = vrot.lane.b32.xlu0 %v7936_v35, %s11668_s25  ;;  %v8630_v46 = vsel %vm8622_vm3, %v8597_v63, %v17034_v17  ;;  %v8662_v5 = vsel %vm8655_vm2, %v8629_v29, %v17119_v15  ;;  %8025 = vrot.lane.b32.xlu1 %v17304_v56, %s11664_s6  ;;  %v19621_v35 = vld [vmem:[#allocation3_spill] sm:$0xff]  ;;  %v3455_v40 = vsel %vm3453_vm0, %v19610_v0, %v3454_v33  ;;  %v17320_v17 = vpop.permute.xlu0 %8383 }
 0x545   :  { %v8663_v7 = vsel %vm8655_vm2, %v8630_v46, %v17121_v49  ;;  %v8695_v26 = vsel %vm8688_vm7, %v8662_v5, %v8378_v13  ;;  %v3458_v36 = vsel %vm3456_vm15, %v3457_v1, %v19609_v3  ;;  %v8506_v63 = vpop.permute.xlu1 %8505  ;;  %v7903_v15 = vmul.f32 %v17208_v37, %v17102_v47  ;;  %v19625_v1 = vld [vmem:[#allocation81_spill] sm:$0xff] }
 0x546   :  { %v7842_v29 = vmul.f32 2.0, %v17211_v11  ;;  %v8696_v42 = vsel %vm8688_vm7, %v8663_v7, %v17154_v27  ;;  %v8728_v21 = vsel %vm8721_vm11, %v8695_v26, %v8506_v63  ;;  %v17330_v49 = vsel %vm3553_vm9, nan, %v3563_v10  ;;  %v19630_v63 = vld [vmem:[#allocation46_spill] sm:$0xff] }
 0x547   :  { %v8729_v13 = vsel %vm8721_vm11, %v8696_v42, %v8508_v32  ;;  %11147 = vmatprep.mubr.msk.f32.mxu1 %vm8773_vm12, %v8728_v21  ;;  %v19622_v3 = vsub.f32 1.0, %v17237_v38  ;;  %vm7067_vm5 = vcmp.eq.s32.totalorder %v7065_v19, 0  ;;  %vm7070_vm0 = vcmp.eq.s32.totalorder %v7065_v19, 2 }
 0x548   :  { %v17340_v47 = vsel %vm10391_vm10, 0, %v17227_v52  ;;  %v3459_v27 = vsel %vm3452_vm6, %v3455_v40, %v3458_v36  ;;  %8279 = vrot.lane.b32.xlu1 %v7810_v59, %s11666_s23  ;;  %11148 = vmatmul.mubr.msk.f32.gmra.mrb[46].mxu1 %vm8773_vm12, %v8729_v13  ;;  %v19623_v37 = vxor.u32 2147483648, %v19620_v16  ;;  %v19624_v33 = vxor.u32 2147483648, %v19621_v35  ;;  %v17362_v10 = vpop.permute.xlu0 %8007 }
 0x549   :  { %8277 = vrot.lane.b32.xlu0 %v19622_v3, %s11666_s23  ;;  %vm19626_vm9 = vcmp.lt.s32.totalorder %v19625_v1, 0  ;;  %v4068_v36 = vsel %vm3983_vm1, %v4067_v4, %v19611_v61  ;;  %v4366_v32 = vshll.u32 %v16750_v50, %v17105_v28  ;;  %v17360_v7 = vpop.permute.xlu1 %8131  ;;  %v7874_v20 = vmul.f32 %v7842_v29, %v7810_v59  ;;  %v19629_v59 = vld [vmem:[#allocation128_spill] sm:$0xff] }
 0x54a   :  { %v7069_v57 = vsel %vm7067_vm5, %v19621_v35, %v19623_v37  ;;  %v7072_v0 = vsel %vm7070_vm0, %v19624_v33, %v19620_v16  ;;  %v4170_v52 = vsel %vm19626_vm9, %v4169_v53, %v17191_v34  ;;  %v4372_v46 = vor.u32 4788187, %v4371_v9 }
 0x54b   :  { %v7716_v5 = vmul.f32 2.0, %v17330_v49  ;;  %v7935_v21 = vsub.f32 1.0, %v7903_v15  ;;  %vm7066_vm10 = vcmp.lt.s32.totalorder %v7065_v19, 2  ;;  %v4368_v42 = vor.u32 %v17262_v30, %v4366_v32  ;;  %v19631_v15 = vld [vmem:[#allocation23_spill] sm:$0xff] }
 0x54c   :  { %v4265_v34 = vsub.s32 4294967266, %v17340_v47  ;;  %v17369_v53 = vsel %vm3449_vm13, nan, %v3459_v27  ;;  %v7073_v50 = vsel %vm7066_vm10, %v7069_v57, %v7072_v0  ;;  %v17375_v61 = vsel %vm15881_vm14, %v19625_v1, %v4170_v52  ;;  %v8382_v40 = vpop.permute.xlu0 %8381 }
 0x54d   :  { %8407 = vrot.lane.b32.xlu0 %v7874_v20, %s11667_s24  ;;  %v19628_v4 = vxor.u32 2147483648, %v17199_v14  ;;  %v17386_v9 = vsel %vm17294_vm4, 0, %v4068_v36  ;;  %8529 = vrot.lane.b32.xlu1 %v7935_v21, %s11668_s25  ;;  %v6962_v54 = vand.u32 3, %v19629_v59  ;;  %v4245_v19 = vadd.s32 %v16718_v39, %v16754_v12  ;;  %v17392_v26 = vpop.permute.xlu1 %8129 }
 0x54e   :  { %vm3761_vm14 = vweird.f32 %v19630_v63  ;;  %v3662_v13 = vxor.u32 2147483648, %v19631_v15  ;;  %v4373_v27 = vand.u32 2147483647, %v4372_v46  ;;  %v17398_v37 = vmul.f32 %v7716_v5, %v17219_v62  ;;  %v19633_v62 = vld [vmem:[#allocation132_spill] sm:$0xff] }
 0x54f   :  { %v17382_v30 = vsel %vm3983_vm1, %v19628_v4, %v17199_v14  ;;  %v19632_v14 = vld [vmem:[#allocation24_spill] sm:$0xff]  ;;  %v7715_v57 = vmul.f32 2.0, %v17369_v53  ;;  %v17403_v33 = vsel %vm3761_vm14, nan, %v7073_v50  ;;  %v4375_v12 = vcvt.s32.f32 %v4368_v42 }
 0x550   :  { %v3665_v3 = vxor.u32 2147483648, %v19632_v14  ;;  %v4261_v39 = vsub.s32 32, %v17340_v47  ;;  %v17406_v0 = vadd.s32 127, %v4265_v34  ;;  %v7841_v52 = vmul.f32 2.0, %v17246_v22  ;;  %v8512_v32 = vpop.permute.xlu0 %8511 }
 0x551   :  { %8031 = vrot.lane.b32.xlu0 %v17403_v33, %s11664_s6  ;;  %v7906_v36 = vmul.f32 %v7842_v29, %v17211_v11  ;;  %8155 = vrot.lane.b32.xlu1 %v17398_v37, %s11665_s7  ;;  %vm3765_vm1 = vcmp.eq.s32.totalorder %v19633_v62, 0  ;;  %vm6964_vm13 = vcmp.eq.s32.totalorder %v6962_v54, 0  ;;  %vm6967_vm15 = vcmp.eq.s32.totalorder %v6962_v54, 2  ;;  %v17416_v20 = vpop.permute.xlu1 %8005 }
 0x552   :  { %vm3768_vm6 = vcmp.eq.s32.totalorder %v19633_v62, 2  ;;  %v19634_v46 = vsub.f32 1.0, %v17237_v38  ;;  %v6966_v42 = vsel %vm6964_vm13, %v19632_v14, %v3662_v13  ;;  %v6969_v34 = vsel %vm6967_vm15, %v3665_v3, %v19631_v15 }
 0x553   :  { %v17422_v11 = vmul.f32 %v4375_v12, %v4373_v27  ;;  %v17425_v29 = vmul.f32 %v7715_v57, %v17304_v56  ;;  %v19635_v50 = vxor.u32 2147483648, %v19620_v16  ;;  %v19636_v4 = vxor.u32 2147483648, %v19621_v35 }
 0x554   :  { %v7873_v21 = vmul.f32 %v7841_v52, %v19634_v46  ;;  %v4263_v31 = vshrl.u32 %v4245_v19, %v4261_v39  ;;  %v4267_v38 = vshll.u32 %v17406_v0, 23  ;;  %v17435_v46 = vmul.f32 %v7841_v52, %v17246_v22  ;;  %v17445_v19 = vpop.permute.xlu0 %8257  ;;  %v19637_v39 = vld [vmem:[#allocation67_spill] sm:$0xff] }
 0x555   :  { %v3767_v28 = vsel %vm3765_vm1, %v19621_v35, %v19635_v50  ;;  %v3770_v59 = vsel %vm3768_vm6, %v19636_v4, %v19620_v16  ;;  %vm6963_vm5 = vcmp.lt.s32.totalorder %v6962_v54, 2  ;;  %v7780_v56 = vmul.f32 %v7716_v5, %v17330_v49  ;;  %8153 = vrot.lane.b32.xlu1 %v17425_v29, %s11665_s7  ;;  %v17447_v12 = vpop.permute.xlu1 %8259  ;;  %v19638_v54 = vld [vmem:[#allocation133_spill] sm:$0xff]  ;;  %v19640_v0 = vld [vmem:[#allocation27_spill] sm:$0xff] }
 0x556   :  { %8405 = vrot.lane.b32.xlu0 %v7873_v21, %s11667_s24  ;;  %v17440_v27 = vmul.f32 %v7715_v57, %v17369_v53  ;;  %vm3764_vm0 = vcmp.lt.s32.totalorder %v19633_v62, 2  ;;  %v6970_v16 = vsel %vm6963_vm5, %v6966_v42, %v6969_v34  ;;  %v7938_v22 = vsub.f32 1.0, %v7906_v36  ;;  %v19639_v5 = vld [vmem:[#allocation45_spill] sm:$0xff] }
 0x557   :  { %v3771_v35 = vsel %vm3764_vm0, %v3767_v28, %v3770_v59  ;;  %vm3657_vm9 = vweird.f32 %v19637_v39  ;;  %vm3661_vm10 = vcmp.eq.s32.totalorder %v19638_v54, 0  ;;  %v8599_v57 = vsel %vm63_vm8, %v19639_v5, %v17036_v25  ;;  %v19641_v25 = vld [vmem:[#allocation130_spill] sm:$0xff] }
 0x558   :  { %v8598_v52 = vsel %vm63_vm8, %v19640_v0, %v17088_v43  ;;  %vm3664_vm1 = vcmp.eq.s32.totalorder %v19638_v54, 2  ;;  %v3663_v62 = vsel %vm3661_vm10, %v19632_v14, %v3662_v13  ;;  %v17464_v36 = vsel %vm3657_vm9, nan, %v6970_v16  ;;  %v19643_v14 = vld [vmem:[#allocation22_spill] sm:$0xff] }
 0x559   :  { %v8631_v21 = vsel %vm8622_vm3, %v8598_v52, %v17213_v41  ;;  %v3666_v42 = vsel %vm3664_vm1, %v3665_v3, %v19631_v15  ;;  %v7271_v34 = vand.u32 3, %v19641_v25  ;;  %v8632_v43 = vsel %vm8622_vm3, %v8599_v57, %v17181_v8  ;;  %8029 = vrot.lane.b32.xlu1 %v17464_v36, %s11664_s6  ;;  %v19642_v41 = vld [vmem:[#allocation21_spill] sm:$0xff]  ;;  %v17479_v3 = vpop.permute.xlu0 %8387  ;;  %v8510_v59 = vpop.permute.xlu1 %8509 }
 0x55a   :  { %8535 = vrot.lane.b32.xlu0 %v7938_v22, %s11668_s25  ;;  %v8664_v50 = vsel %vm8655_vm2, %v8631_v21, %v17282_v2  ;;  %v3974_v13 = vxor.u32 2147483648, %v19642_v41  ;;  %v3977_v28 = vxor.u32 2147483648, %v19643_v14  ;;  %v8665_v4 = vsel %vm8655_vm2, %v8632_v43, %v17284_v44 }
 0x55b   :  { %v8697_v15 = vsel %vm8688_vm7, %v8664_v50, %v8382_v40  ;;  %v7811_v8 = vsub.f32 1.0, %v17440_v27  ;;  %v7812_v16 = vsub.f32 1.0, %v7780_v56  ;;  %v7844_v2 = vmul.f32 2.0, %v17398_v37  ;;  %v19650_v50 = vld [vmem:[#allocation70_spill] sm:$0xff] }
 0x55c   :  { %v8698_v22 = vsel %vm8688_vm7, %v8665_v4, %v17320_v17  ;;  %vm3660_vm13 = vcmp.lt.s32.totalorder %v19638_v54, 2  ;;  %v8730_v5 = vsel %vm8721_vm11, %v8697_v15, %v8510_v59  ;;  %v17489_v44 = vsel %vm3761_vm14, nan, %v3771_v35 }
 0x55d   :  { %v8731_v40 = vsel %vm8721_vm11, %v8698_v22, %v8512_v32  ;;  %11150 = vmatprep.mubr.msk.f32.mxu1 %vm8773_vm12, %v8730_v5  ;;  %vm7273_vm15 = vcmp.eq.s32.totalorder %v7271_v34, 0  ;;  %vm7276_vm6 = vcmp.eq.s32.totalorder %v7271_v34, 2  ;;  %11642 = vcosq.f32 %v17375_v61  ;;  %8283 = vrot.lane.b32.xlu1 %v7812_v16, %s11666_s23  ;;  %v17510_v35 = vpop.permute.xlu1 %8135  ;;  %v17512_v54 = vpop.permute.xlu0 %8011 }
 0x55e   :  { %8281 = vrot.lane.b32.xlu0 %v7811_v8, %s11666_s23  ;;  %v3667_v56 = vsel %vm3660_vm13, %v3663_v62, %v3666_v42  ;;  %11151 = vmatmul.mubr.msk.f32.gmra.mrb[48].mxu1 %vm8773_vm12, %v8731_v40  ;;  %v7275_v17 = vsel %vm7273_vm15, %v19643_v14, %v3974_v13  ;;  %v7278_v63 = vsel %vm7276_vm6, %v3977_v28, %v19642_v41  ;;  %11644 = vsinq.f32 %v17375_v61  ;;  %v19645_v42 = vld [vmem:[#allocation98_spill] sm:$0xff] }
 0x55f   :  { %v4069_v32 = vsel %vm17294_vm4, %v19612_v23, %v17382_v30  ;;  %v4262_v27 = vshll.u32 %v17064_v55, %v17340_v47  ;;  %v7876_v57 = vmul.f32 %v7844_v2, %v7812_v16  ;;  %v4377_v0 = vxor.u32 2147483648, %v17422_v11  ;;  %v19644_v47 = vld [vmem:[#allocation4_spill] sm:$0xff] }
 0x560   :  { %v7718_v52 = vmul.f32 2.0, %v17489_v44  ;;  %v7937_v62 = vsub.f32 1.0, %v17435_v46  ;;  %vm7272_vm14 = vcmp.lt.s32.totalorder %v7271_v34, 2  ;;  %v4268_v21 = vor.u32 4788187, %v4267_v38 }
 0x561   :  { %v4264_v61 = vor.u32 %v4263_v31, %v4262_v27  ;;  %v17519_v45 = vsel %vm3657_vm9, nan, %v3667_v56  ;;  %v7279_v55 = vsel %vm7272_vm14, %v7275_v17, %v7278_v63  ;;  %v17523_v30 = vadd.s32 3, %v19644_v47  ;;  %v19649_v31 = vld [vmem:[#allocation131_spill] sm:$0xff]  ;;  %v17537_v39 = vpop.permute.xlu1 %8133  ;;  %v17539_v34 = vpop.permute.xlu0 %8385 }
 0x562   :  { %8411 = vrot.lane.b32.xlu0 %v7876_v57, %s11667_s24  ;;  %v19646_v25 = vand.u32 2147483647, %v19645_v42  ;;  %vm4295_vm5 = vcmp.lt.s32.totalorder %v19645_v42, 0  ;;  %8533 = vrot.lane.b32.xlu1 %v7937_v62, %s11668_s25  ;;  %v7168_v38 = vand.u32 3, %v19649_v31  ;;  %v17535_v46 = vadd.s32 3, %v17386_v9 }
 0x563   :  { %vm3969_vm0 = vweird.f32 %v19650_v50  ;;  %v3870_v4 = vxor.u32 2147483648, %v17274_v18  ;;  %v3873_v15 = vxor.u32 2147483648, %v17265_v58  ;;  %11646 = vcosq.f32 %v4069_v32 }
 0x564   :  { %vm17527_vm4 = vcmp.le.f32.partialorder %v19646_v25, 0.7853982  ;;  %v17545_v59 = vmul.f32 %v7718_v52, %v17403_v33  ;;  %v7717_v16 = vmul.f32 2.0, %v17519_v45  ;;  %v17550_v22 = vsel %vm3969_vm0, nan, %v7279_v55  ;;  %v19651_v33 = vld [vmem:[#allocation134_spill] sm:$0xff] }
 0x565   :  { %v4378_v5 = vsel %vm4295_vm5, %v4377_v0, %v17422_v11  ;;  %v4269_v40 = vand.u32 2147483647, %v4268_v21  ;;  %v4271_v56 = vcvt.s32.f32 %v4264_v61  ;;  %v7843_v17 = vmul.f32 2.0, %v17425_v29  ;;  %v8516_v63 = vpop.permute.xlu0 %8515  ;;  %v17562_v27 = vpop.permute.xlu1 %8009 }
 0x566   :  { %8035 = vrot.lane.b32.xlu0 %v17550_v22, %s11664_s6  ;;  %8159 = vrot.lane.b32.xlu1 %v17545_v59, %s11665_s7  ;;  %vm3973_vm9 = vcmp.eq.s32.totalorder %v19651_v33, 0  ;;  %vm3976_vm10 = vcmp.eq.s32.totalorder %v19651_v33, 2  ;;  %vm7170_vm1 = vcmp.eq.s32.totalorder %v7168_v38, 0  ;;  %vm7173_vm13 = vcmp.eq.s32.totalorder %v7168_v38, 2 }
 0x567   :  { %v7875_v11 = vmul.f32 %v7843_v17, %v7811_v8  ;;  %v7908_v57 = vmul.f32 %v7844_v2, %v17398_v37  ;;  %v7172_v0 = vsel %vm7170_vm1, %v17265_v58, %v3870_v4  ;;  %v7175_v62 = vsel %vm7173_vm13, %v3873_v15, %v17274_v18  ;;  %v17567_v61 = vpop.eup %11642 }
 0x568   :  { %v17570_v21 = vmul.f32 %v7717_v16, %v17464_v36  ;;  %v17573_v55 = vmul.f32 %v7717_v16, %v17519_v45  ;;  %v3975_v25 = vsel %vm3973_vm9, %v19643_v14, %v3974_v13  ;;  %v3978_v37 = vsel %vm3976_vm10, %v3977_v28, %v19642_v41  ;;  %v17581_v8 = vpop.eup %11644 }
 0x569   :  { %11648 = vsinq.f32 %v4069_v32  ;;  %v17586_v2 = vsel %vm17527_vm4, %v19645_v42, %v4378_v5  ;;  %v17588_v36 = vmul.f32 %v4271_v56, %v4269_v40  ;;  %vm7169_vm15 = vcmp.lt.s32.totalorder %v7168_v38, 2  ;;  %v17598_v28 = vpop.permute.xlu0 %8261  ;;  %v17600_v32 = vpop.permute.xlu1 %8263  ;;  %v19652_v5 = vld [vmem:[#allocation73_spill] sm:$0xff] }
 0x56a   :  { %8409 = vrot.lane.b32.xlu0 %v7875_v11, %s11667_s24  ;;  %v7782_v31 = vmul.f32 %v7718_v52, %v17489_v44  ;;  %v17593_v13 = vmul.f32 2.0, %v17545_v59  ;;  %vm3972_vm6 = vcmp.lt.s32.totalorder %v19651_v33, 2  ;;  %8157 = vrot.lane.b32.xlu1 %v17570_v21, %s11665_s7  ;;  %v7176_v41 = vsel %vm7169_vm15, %v7172_v0, %v7175_v62  ;;  %v19653_v38 = vld [vmem:[#allocation117_spill] sm:$0xff]  ;;  %v19654_v52 = vld [vmem:[#allocation39_spill] sm:$0xff]  ;;  %v19655_v11 = vld [vmem:[#allocation6_spill] sm:$0xff] }
 0x56b   :  { %v3979_v14 = vsel %vm3972_vm6, %v3975_v25, %v3978_v37  ;;  %v7940_v16 = vsub.f32 1.0, %v7908_v57  ;;  %vm3865_vm14 = vweird.f32 %v19652_v5  ;;  %vm3869_vm9 = vcmp.eq.s32.totalorder %v19653_v38, 0 }
 0x56c   :  { %v8600_v40 = vsel %vm63_vm8, %v19654_v52, %v17239_v24  ;;  %vm3872_vm10 = vcmp.eq.s32.totalorder %v19653_v38, 2  ;;  %v3871_v56 = vsel %vm3869_vm9, %v17265_v58, %v3870_v4  ;;  %v7813_v33 = vsub.f32 1.0, %v17573_v55 }
 0x56d   :  { %v8601_v0 = vsel %vm63_vm8, %v19655_v11, %v17183_v60  ;;  %v8633_v57 = vsel %vm8622_vm3, %v8600_v40, %v17392_v26  ;;  %v17618_v62 = vsel %vm3865_vm14, nan, %v7176_v41  ;;  %v7477_v24 = vand.u32 3, %v19644_v47  ;;  %v17621_v25 = vpop.eup %11646  ;;  %v17638_v41 = vpop.permute.xlu0 %8391 }
 0x56e   :  { %8539 = vrot.lane.b32.xlu0 %v7940_v16, %s11668_s25  ;;  %v8634_v58 = vsel %vm8622_vm3, %v8601_v0, %v17360_v7  ;;  %v8666_v4 = vsel %vm8655_vm2, %v8633_v57, %v17445_v19  ;;  %8033 = vrot.lane.b32.xlu1 %v17618_v62, %s11664_s6  ;;  %v4182_v60 = vxor.u32 2147483648, %v17581_v8  ;;  %v4185_v26 = vxor.u32 2147483648, %v17567_v61  ;;  %v8514_v19 = vpop.permute.xlu1 %8513 }
 0x56f   :  { %v8667_v37 = vsel %vm8655_vm2, %v8634_v58, %v17447_v12  ;;  %v8699_v47 = vsel %vm8688_vm7, %v8666_v4, %v17539_v34  ;;  %v3874_v7 = vsel %vm3872_vm10, %v3873_v15, %v17274_v18  ;;  %v7814_v16 = vsub.f32 1.0, %v7782_v31 }
 0x570   :  { %v8700_v52 = vsel %vm8688_vm7, %v8667_v37, %v17479_v3  ;;  %v17644_v40 = vsel %vm3969_vm0, nan, %v3979_v14  ;;  %v8732_v12 = vsel %vm8721_vm11, %v8699_v47, %v8514_v19  ;;  %v7907_v11 = vmul.f32 %v7843_v17, %v17425_v29 }
 0x571   :  { %v8733_v34 = vsel %vm8721_vm11, %v8700_v52, %v8516_v63  ;;  %vm3868_vm1 = vcmp.lt.s32.totalorder %v19653_v38, 2  ;;  %11153 = vmatprep.mubr.msk.f32.mxu1 %vm8773_vm12, %v8732_v12  ;;  %vm7479_vm13 = vcmp.eq.s32.totalorder %v7477_v24, 0  ;;  %vm7482_vm15 = vcmp.eq.s32.totalorder %v7477_v24, 2  ;;  %v19656_v63 = vld [vmem:[#allocation105_spill] sm:$0xff]  ;;  %v17666_v38 = vpop.permute.xlu0 %8015 }
 0x572   :  { %8285 = vrot.lane.b32.xlu0 %v7813_v33, %s11666_s23  ;;  %v4273_v18 = vxor.u32 2147483648, %v17588_v36  ;;  %v3875_v3 = vsel %vm3868_vm1, %v3871_v56, %v3874_v7  ;;  %8287 = vrot.lane.b32.xlu1 %v7814_v16, %s11666_s23  ;;  %v7481_v29 = vsel %vm7479_vm13, %v17567_v61, %v4182_v60  ;;  %v7484_v50 = vsel %vm7482_vm15, %v4185_v26, %v17581_v8  ;;  %v17664_v14 = vpop.permute.xlu1 %8139 }
 0x573   :  { %11154 = vmatmul.mubr.msk.f32.gmra.mrb[50].mxu1 %vm8773_vm12, %v8733_v34  ;;  %v17659_v15 = vpop.eup %11648  ;;  %v4179_v17 = vand.u32 3, %v17523_v30  ;;  %vm4191_vm0 = vcmp.lt.s32.totalorder %v19656_v63, 0  ;;  %v7720_v31 = vmul.f32 2.0, %v17644_v40  ;;  %v7878_v56 = vmul.f32 %v17593_v13, %v7814_v16 }
 0x574   :  { %11650 = vcosq.f32 %v17586_v2  ;;  %v19657_v0 = vand.u32 2147483647, %v19656_v63  ;;  %v7939_v58 = vsub.f32 1.0, %v7907_v11  ;;  %vm7478_vm9 = vcmp.lt.s32.totalorder %v7477_v24, 2 }
 0x575   :  { %v4379_v30 = vsub.s32 4, %v16605_v6  ;;  %11652 = vsinq.f32 %v17586_v2  ;;  %v17680_v4 = vsel %vm3865_vm14, nan, %v3875_v3  ;;  %v7485_v37 = vsel %vm7478_vm9, %v7481_v29, %v7484_v50  ;;  %v17699_v16 = vpop.permute.xlu0 %8389 }
 0x576   :  { %vm17672_vm6 = vcmp.le.f32.partialorder %v19657_v0, 0.7853982  ;;  %8415 = vrot.lane.b32.xlu0 %v7878_v56, %s11667_s24  ;;  %v17684_v47 = vand.u32 3, %v17535_v46  ;;  %v4274_v7 = vsel %vm4191_vm0, %v4273_v18, %v17588_v36  ;;  %v17690_v24 = vmul.f32 2.0, %v17570_v21  ;;  %8537 = vrot.lane.b32.xlu1 %v7939_v58, %s11668_s25  ;;  %v17697_v19 = vpop.permute.xlu1 %8137 }
 0x577   :  { %v7374_v2 = vand.u32 3, %v17386_v9  ;;  %v17695_v5 = vmul.f32 %v7720_v31, %v17550_v22  ;;  %vm4177_vm14 = vweird.f32 %v19625_v1  ;;  %v4078_v46 = vxor.u32 2147483648, %v17659_v15 }
 0x578   :  { %v4081_v36 = vxor.u32 2147483648, %v17621_v25  ;;  %v7719_v52 = vmul.f32 2.0, %v17680_v4  ;;  %vm4181_vm10 = vcmp.eq.s32.totalorder %v4179_v17, 0  ;;  %vm4184_vm1 = vcmp.eq.s32.totalorder %v4179_v17, 2 }
 0x579   :  { %v17707_v9 = vsel %vm4177_vm14, nan, %v7485_v37  ;;  %v4380_v22 = vsel %vm4295_vm5, %v4379_v30, %v16605_v6  ;;  %v4275_v12 = vsub.s32 4, %v16964_v48  ;;  %v4183_v11 = vsel %vm4181_vm10, %v17567_v61, %v4182_v60  ;;  %v8520_v6 = vpop.permute.xlu0 %8519  ;;  %v19660_v37 = vld [vmem:[#allocation54_spill] sm:$0xff] }
 0x57a   :  { %8039 = vrot.lane.b32.xlu0 %v17707_v9, %s11664_s6  ;;  %v4186_v34 = vsel %vm4184_vm1, %v4185_v26, %v17581_v8  ;;  %v4277_v18 = vsel %vm17672_vm6, %v19656_v63, %v4274_v7  ;;  %8163 = vrot.lane.b32.xlu1 %v17695_v5, %s11665_s7  ;;  %vm4180_vm13 = vcmp.lt.s32.totalorder %v4179_v17, 2  ;;  %vm7376_vm15 = vcmp.eq.s32.totalorder %v7374_v2, 0  ;;  %v17722_v3 = vpop.permute.xlu1 %8013 }
 0x57b   :  { %vm7379_vm9 = vcmp.eq.s32.totalorder %v7374_v2, 2  ;;  %v7877_v29 = vmul.f32 %v17690_v24, %v7813_v33  ;;  %v7910_v61 = vmul.f32 %v17593_v13, %v17545_v59  ;;  %v7378_v8 = vsel %vm7376_vm15, %v17621_v25, %v4078_v46 }
 0x57c   :  { %v7381_v60 = vsel %vm7379_vm9, %v4081_v36, %v17659_v15  ;;  %v17732_v26 = vmul.f32 %v7719_v52, %v17618_v62  ;;  %v4187_v50 = vsel %vm4180_vm13, %v4183_v11, %v4186_v34  ;;  %v4382_v17 = vsel %vm17527_vm4, 0, %v4380_v22  ;;  %v19661_v22 = vld [vmem:[#allocation44_spill] sm:$0xff] }
 0x57d   :  { %v4276_v55 = vsel %vm4191_vm0, %v4275_v12, %v16964_v48  ;;  %11654 = vcosq.f32 %v4277_v18  ;;  %vm7375_vm5 = vcmp.lt.s32.totalorder %v7374_v2, 2  ;;  %v7784_v13 = vmul.f32 %v7720_v31, %v17644_v40  ;;  %v17757_v0 = vpop.permute.xlu0 %8265 }
 0x57e   :  { %8413 = vrot.lane.b32.xlu0 %v7877_v29, %s11667_s24  ;;  %v17740_v59 = vpop.eup %11650  ;;  %11656 = vsinq.f32 %v4277_v18  ;;  %v17744_v33 = vmul.f32 2.0, %v17695_v5  ;;  %8161 = vrot.lane.b32.xlu1 %v17732_v26, %s11665_s7  ;;  %v7382_v43 = vsel %vm7375_vm5, %v7378_v8, %v7381_v60  ;;  %v17751_v48 = vmul.f32 %v7719_v52, %v17680_v4  ;;  %v17760_v31 = vpop.permute.xlu1 %8267 }
 0x57f   :  { %v17748_v62 = vpop.eup %11652  ;;  %v17755_v56 = vsel %vm4177_vm14, nan, %v4187_v50  ;;  %v7942_v58 = vsub.f32 1.0, %v7910_v61  ;;  %vm4077_vm4 = vcmp.eq.s32.totalorder %v17684_v47, 0  ;;  %vm4073_vm0 = vweird.f32 %v19612_v23 }
 0x580   :  { %vm4076_vm10 = vcmp.lt.s32.totalorder %v17684_v47, 2  ;;  %vm4080_vm1 = vcmp.eq.s32.totalorder %v17684_v47, 2  ;;  %v4079_v30 = vsel %vm4077_vm4, %v17621_v25, %v4078_v46  ;;  %v8602_v1 = vsel %vm63_vm8, %v19660_v37, %v17416_v20 }
 0x581   :  { %v17772_v7 = vsel %vm4073_vm0, nan, %v7382_v43  ;;  %v4082_v2 = vsel %vm4080_vm1, %v4081_v36, %v17659_v15  ;;  %v7683_v52 = vand.u32 3, %v4382_v17  ;;  %v8603_v12 = vsel %vm63_vm8, %v19661_v22, %v17362_v10  ;;  %v17788_v36 = vpop.permute.xlu0 %8395 }
 0x582   :  { %8543 = vrot.lane.b32.xlu0 %v7942_v58, %s11668_s25  ;;  %v8635_v25 = vsel %vm8622_vm3, %v8602_v1, %v17537_v39  ;;  %8037 = vrot.lane.b32.xlu1 %v17772_v7, %s11664_s6  ;;  %v4390_v20 = vxor.u32 2147483648, %v17748_v62  ;;  %v4393_v46 = vxor.u32 2147483648, %v17740_v59  ;;  %v8636_v11 = vsel %vm8622_vm3, %v8603_v12, %v17510_v35  ;;  %v8518_v61 = vpop.permute.xlu1 %8517 }
 0x583   :  { %v8668_v15 = vsel %vm8655_vm2, %v8635_v25, %v17598_v28  ;;  %v7815_v10 = vsub.f32 1.0, %v17751_v48  ;;  %v7816_v34 = vsub.f32 1.0, %v7784_v13  ;;  %v8669_v39 = vsel %vm8655_vm2, %v8636_v11, %v17600_v32 }
 0x584   :  { %v8701_v18 = vsel %vm8688_vm7, %v8668_v15, %v17699_v16  ;;  %v4083_v29 = vsel %vm4076_vm10, %v4079_v30, %v4082_v2  ;;  %v7909_v35 = vmul.f32 %v17690_v24, %v17570_v21  ;;  %v8702_v28 = vsel %vm8688_vm7, %v8669_v39, %v17638_v41 }
 0x585   :  { %v8734_v8 = vsel %vm8721_vm11, %v8701_v18, %v8518_v61  ;;  %vm7685_vm14 = vcmp.eq.s32.totalorder %v7683_v52, 0  ;;  %vm7688_vm13 = vcmp.eq.s32.totalorder %v7683_v52, 2  ;;  %v8735_v32 = vsel %vm8721_vm11, %v8702_v28, %v8520_v6  ;;  %v17817_v16 = vpop.permute.xlu0 %8019 }
 0x586   :  { %8289 = vrot.lane.b32.xlu0 %v7815_v10, %s11666_s23  ;;  %11156 = vmatprep.mubr.msk.f32.mxu1 %vm8773_vm12, %v8734_v8  ;;  %v7687_v47 = vsel %vm7685_vm14, %v17740_v59, %v4390_v20  ;;  %v7690_v21 = vsel %vm7688_vm13, %v4393_v46, %v17748_v62  ;;  %v4278_v24 = vsel %vm17672_vm6, 0, %v4276_v55  ;;  %v7880_v6 = vmul.f32 %v17744_v33, %v7816_v34  ;;  %v17821_v43 = vpop.permute.xlu1 %8143 }
 0x587   :  { %8291 = vrot.lane.b32.xlu1 %v7816_v34, %s11666_s23  ;;  %v17812_v41 = vpop.eup %11654  ;;  %11157 = vmatmul.mubr.msk.f32.gmra.mrb[52].mxu1 %vm8773_vm12, %v8735_v32  ;;  %v4386_v50 = vadd.s32 3, %v4382_v17  ;;  %v7722_v13 = vmul.f32 2.0, %v17755_v56  ;;  %v7941_v48 = vsub.f32 1.0, %v7909_v35  ;;  %vm7684_vm15 = vcmp.lt.s32.totalorder %v7683_v52, 2 }
 0x588   :  { %v11657_v60 = vpop.eup %11656  ;;  %v17825_v58 = vsel %vm4073_vm0, nan, %v4083_v29  ;;  %v7691_v57 = vsel %vm7684_vm15, %v7687_v47, %v7690_v21  ;;  %v7580_v55 = vand.u32 3, %v4278_v24  ;;  %v7847_v30 = vmul.f32 2.0, %v17732_v26  ;;  %v19662_v47 = vld [vmem:[#allocation49_spill] sm:$0xff] }
 0x589   :  { %v8394_v37 = vpop.permute.xlu0 %8393  ;;  %vm4385_vm6 = vweird.f32 %v19645_v42  ;;  %v4286_v17 = vxor.u32 2147483648, %v11657_v60  ;;  %v4289_v1 = vxor.u32 2147483648, %v17812_v41  ;;  %v4387_v2 = vand.u32 3, %v4386_v50 }
 0x58a   :  { %8419 = vrot.lane.b32.xlu0 %v7880_v6, %s11667_s24  ;;  %v17833_v52 = vmul.f32 %v7722_v13, %v17707_v9  ;;  %v7721_v23 = vmul.f32 2.0, %v17825_v58  ;;  %v17836_v22 = vpop.permute.xlu1 %8141  ;;  %v17840_v12 = vsel %vm4385_vm6, nan, %v7691_v57  ;;  %v4282_v25 = vadd.s32 3, %v4278_v24 }
 0x58b   :  { %8541 = vrot.lane.b32.xlu1 %v7941_v48, %s11668_s25  ;;  %vm7582_vm9 = vcmp.eq.s32.totalorder %v7580_v55, 0  ;;  %vm7585_vm5 = vcmp.eq.s32.totalorder %v7580_v55, 2  ;;  %v7879_v9 = vmul.f32 %v7847_v30, %v7815_v10  ;;  %v7912_v15 = vmul.f32 %v17744_v33, %v17695_v5 }
 0x58c   :  { %v7584_v34 = vsel %vm7582_vm9, %v17812_v41, %v4286_v17  ;;  %v7587_v39 = vsel %vm7585_vm5, %v4289_v1, %v11657_v60  ;;  %v17850_v18 = vmul.f32 %v7721_v23, %v17772_v7  ;;  %vm4389_vm4 = vcmp.eq.s32.totalorder %v4387_v2, 0 }
 0x58d   :  { %v8524_v11 = vpop.permute.xlu0 %8523  ;;  %vm4392_vm0 = vcmp.eq.s32.totalorder %v4387_v2, 2  ;;  %v4283_v61 = vand.u32 3, %v4282_v25  ;;  %v4391_v35 = vsel %vm4389_vm4, %v17740_v59, %v4390_v20  ;;  %vm7581_vm10 = vcmp.lt.s32.totalorder %v7580_v55, 2 }
 0x58e   :  { %8043 = vrot.lane.b32.xlu0 %v17840_v12, %s11664_s6  ;;  %v17852_v29 = vpop.permute.xlu1 %8017  ;;  %v4394_v10 = vsel %vm4392_vm0, %v4393_v46, %v17748_v62  ;;  %v7588_v5 = vsel %vm7581_vm10, %v7584_v34, %v7587_v39  ;;  %v7786_v33 = vmul.f32 %v7722_v13, %v17755_v56  ;;  %v7785_v7 = vmul.f32 %v7721_v23, %v17825_v58 }
 0x58f   :  { %8167 = vrot.lane.b32.xlu1 %v17833_v52, %s11665_s7  ;;  %vm4388_vm1 = vcmp.lt.s32.totalorder %v4387_v2, 2  ;;  %v7944_v8 = vsub.f32 1.0, %v7912_v15  ;;  %v7850_v20 = vmul.f32 2.0, %v17833_v52  ;;  %vm4281_vm14 = vweird.f32 %v19656_v63 }
 0x590   :  { %v4395_v32 = vsel %vm4388_vm1, %v4391_v35, %v4394_v10  ;;  %v8604_v62 = vsel %vm63_vm8, %v16734_v51, %v17562_v27  ;;  %vm4285_vm13 = vcmp.eq.s32.totalorder %v4283_v61, 0  ;;  %vm4288_vm15 = vcmp.eq.s32.totalorder %v4283_v61, 2 }
 0x591   :  { %v17865_v28 = vpop.permute.xlu0 %8269  ;;  %v7589_v46 = vsel %vm4281_vm14, nan, %v7588_v5  ;;  %v8605_v21 = vsel %vm63_vm8, %v19662_v47, %v17512_v54  ;;  %v8637_v24 = vsel %vm8622_vm3, %v8604_v62, %v17697_v19  ;;  %v4287_v6 = vsel %vm4285_vm13, %v17812_v41, %v4286_v17 }
 0x592   :  { %8417 = vrot.lane.b32.xlu0 %v7879_v9, %s11667_s24  ;;  %v17868_v59 = vpop.permute.xlu1 %8271  ;;  %v4290_v50 = vsel %vm4288_vm15, %v4289_v1, %v11657_v60  ;;  %v8638_v51 = vsel %vm8622_vm3, %v8605_v21, %v17664_v14  ;;  %v8670_v27 = vsel %vm8655_vm2, %v8637_v24, %v17757_v0  ;;  %v7817_v48 = vsub.f32 1.0, %v7785_v7 }
 0x593   :  { %8165 = vrot.lane.b32.xlu1 %v17850_v18, %s11665_s7  ;;  %v7818_v57 = vsub.f32 1.0, %v7786_v33  ;;  %v8671_v54 = vsel %vm8655_vm2, %v8638_v51, %v17760_v31  ;;  %v8703_v19 = vsel %vm8688_vm7, %v8670_v27, %v8394_v37  ;;  %vm4284_vm9 = vcmp.lt.s32.totalorder %v4283_v61, 2 }
 0x594   :  { %v7911_v41 = vmul.f32 %v7847_v30, %v17732_v26  ;;  %v8704_v60 = vsel %vm8688_vm7, %v8671_v54, %v17788_v36  ;;  %v17898_v14 = vsel %vm4385_vm6, nan, %v4395_v32  ;;  %v4291_v0 = vsel %vm4284_vm9, %v4287_v6, %v4290_v50  ;;  %v19663_v32 = vld [vmem:[#allocation50_spill] sm:$0xff] }
 0x595   :  { %v17888_v13 = vpop.permute.xlu0 %8399  ;;  %v8737_v31 = vsel %vm8721_vm11, %v8704_v60, %v8524_v11  ;;  %v7849_v26 = vmul.f32 2.0, %v17850_v18  ;;  %v7882_v42 = vmul.f32 %v7850_v20, %v7818_v57  ;;  %v7724_v30 = vmul.f32 2.0, %v17898_v14 }
 0x596   :  { %8547 = vrot.lane.b32.xlu0 %v7944_v8, %s11668_s25  ;;  %v8522_v55 = vpop.permute.xlu1 %8521  ;;  %v17912_v37 = vsel %vm4281_vm14, nan, %v4291_v0  ;;  %v7943_v2 = vsub.f32 1.0, %v7911_v41  ;;  %v7914_v9 = vmul.f32 %v7850_v20, %v17833_v52  ;;  %v8606_v62 = vsel %vm63_vm8, %v19663_v32, %v17722_v3  ;;  %v19667_v32 = vld [vmem:[#allocation53_spill] sm:$0xff] }
 0x597   :  { %8041 = vrot.lane.b32.xlu1 %v7589_v46, %s11664_s6  ;;  %v8736_v17 = vsel %vm8721_vm11, %v8703_v19, %v8522_v55  ;;  %v7723_v23 = vmul.f32 2.0, %v17912_v37  ;;  %v7881_v11 = vmul.f32 %v7849_v26, %v7817_v48  ;;  %v7756_v15 = vmul.f32 %v7724_v30, %v17840_v12 }
 0x598   :  { %11159 = vmatprep.mubr.msk.f32.mxu1 %vm8773_vm12, %v8736_v17  ;;  %v7946_v35 = vsub.f32 1.0, %v7914_v9  ;;  %v7788_v10 = vmul.f32 %v7724_v30, %v17898_v14  ;;  %v7913_v20 = vmul.f32 %v7849_v26, %v17850_v18  ;;  %v8639_v21 = vsel %vm8622_vm3, %v8606_v62, %v17836_v22  ;;  %v19665_v30 = vld [vmem:[#allocation59_spill] sm:$0xff] }
 0x599   :  { %11160 = vmatmul.mubr.msk.f32.gmra.mrb[54].mxu1 %vm8773_vm12, %v8737_v31  ;;  %v17907_v36 = vpop.permute.xlu0 %8023  ;;  %v7755_v63 = vmul.f32 %v7723_v23, %v7589_v46  ;;  %v7787_v39 = vmul.f32 %v7723_v23, %v17912_v37  ;;  %v19664_v46 = vld [vmem:[#allocation47_spill] sm:$0xff]  ;;  %v8672_v18 = vsel %vm8655_vm2, %v8639_v21, %v17865_v28  ;;  %v7852_v51 = vmul.f32 2.0, %v7756_v15 }
 0x59a   :  { %8293 = vrot.lane.b32.xlu0 %v7817_v48, %s11666_s23  ;;  %v17914_v1 = vpop.permute.xlu1 %8147  ;;  %v7820_v8 = vsub.f32 1.0, %v7788_v10  ;;  %v8607_v47 = vsel %vm63_vm8, %v19664_v46, %v17666_v38  ;;  %v19666_v23 = vld [vmem:[#allocation7_spill] sm:$0xff]  ;;  %v19668_v46 = vld [vmem:[#allocation58_spill] sm:$0xff] }
 0x59b   :  { %8295 = vrot.lane.b32.xlu1 %v7818_v57, %s11666_s23  ;;  %v7851_v52 = vmul.f32 2.0, %v7755_v63  ;;  %v7819_v33 = vsub.f32 1.0, %v7787_v39  ;;  %v8640_v24 = vsel %vm8622_vm3, %v8607_v47, %v17821_v43  ;;  %v7945_v57 = vsub.f32 1.0, %v7913_v20 }
 0x59c   :  { %v8673_v27 = vsel %vm8655_vm2, %v8640_v24, %v17868_v59  ;;  %v7884_v55 = vmul.f32 %v7852_v51, %v7820_v8  ;;  %v7916_v41 = vmul.f32 %v7852_v51, %v7756_v15  ;;  %v8611_v47 = vsel %vm63_vm8, %v19668_v46, %v17907_v36 }
 0x59d   :  { %v7883_v50 = vmul.f32 %v7851_v52, %v7819_v33  ;;  %v7915_v3 = vmul.f32 %v7851_v52, %v7755_v63  ;;  %v8706_v22 = vsel %vm8688_vm7, %v8673_v27, %v17888_v13 }
 0x59e   :  { %8423 = vrot.lane.b32.xlu0 %v7882_v42, %s11667_s24  ;;  %v8398_v25 = vpop.permute.xlu0 %8397  ;;  %v8146_v34 = vpop.permute.xlu1 %8145  ;;  %v7948_v0 = vsub.f32 1.0, %v7916_v41 }
 0x59f   :  { %8545 = vrot.lane.b32.xlu1 %v7943_v2, %s11668_s25  ;;  %v8705_v38 = vsel %vm8688_vm7, %v8672_v18, %v8398_v25  ;;  %v7947_v59 = vsub.f32 1.0, %v7915_v3  ;;  %v8608_v2 = vsel %vm63_vm8, %v19665_v30, %v17852_v29  ;;  %v8609_v25 = vsel %vm63_vm8, %v19666_v23, %v17817_v16 }
 0x5a0   :  { %v8642_v9 = vsel %vm8622_vm3, %v8609_v25, %v17914_v1 }
 0x5a2   :  { %8421 = vrot.lane.b32.xlu0 %v7881_v11, %s11667_s24  ;;  %v8528_v61 = vpop.permute.xlu0 %8527  ;;  %v17925_v5 = vpop.permute.xlu1 %8021  ;;  %v8641_v11 = vsel %vm8622_vm3, %v8608_v2, %v8146_v34 }
 0x5a3   :  { %8171 = vrot.lane.b32.xlu1 %v7756_v15, %s11665_s7  ;;  %v8739_v43 = vsel %vm8721_vm11, %v8706_v22, %v8528_v61  ;;  %v8610_v62 = vsel %vm63_vm8, %v19667_v32, %v17925_v5 }
 0x5a6   :  { %8551 = vrot.lane.b32.xlu0 %v7946_v35, %s11668_s25  ;;  %v8274_v12 = vpop.permute.xlu0 %8273  ;;  %v8276_v7 = vpop.permute.xlu1 %8275 }
 0x5a7   :  { %8169 = vrot.lane.b32.xlu1 %v7755_v63, %s11665_s7  ;;  %v8674_v15 = vsel %vm8655_vm2, %v8641_v11, %v8274_v12  ;;  %v8675_v39 = vsel %vm8655_vm2, %v8642_v9, %v8276_v7 }
 0x5aa   :  { %8297 = vrot.lane.b32.xlu0 %v7819_v33, %s11666_s23  ;;  %v8404_v6 = vpop.permute.xlu0 %8403  ;;  %v8526_v48 = vpop.permute.xlu1 %8525 }
 0x5ab   :  { %8299 = vrot.lane.b32.xlu1 %v7820_v8, %s11666_s23  ;;  %v8738_v54 = vsel %vm8721_vm11, %v8705_v38, %v8526_v48  ;;  %v8708_v10 = vsel %vm8688_vm7, %v8675_v39, %v8404_v6 }
 0x5ac   :  { %11162 = vmatprep.mubr.msk.f32.mxu1 %vm8773_vm12, %v8738_v54 }
 0x5ad   :  { %11163 = vmatmul.mubr.msk.f32.gmra.mrb[56].mxu1 %vm8773_vm12, %v8739_v43  ;;  %v18000_v43 = vld [vmem:[%s18708_s10] ss:$0 sm:$0xff] }
 0x5ae   :  { %8425 = vrot.lane.b32.xlu0 %v7883_v50, %s11667_s24  ;;  %v17955_v28 = vpop.permute.xlu0 %8027  ;;  %v8152_v19 = vpop.permute.xlu1 %8151 }
 0x5af   :  { %8549 = vrot.lane.b32.xlu1 %v7945_v57, %s11668_s25  ;;  %v8644_v24 = vsel %vm8622_vm3, %v8611_v47, %v8152_v19 }
 0x5b2   :  { %8553 = vrot.lane.b32.xlu0 %v7947_v59, %s11668_s25  ;;  %v8402_v13 = vpop.permute.xlu0 %8401  ;;  %v8150_v60 = vpop.permute.xlu1 %8149 }
 0x5b3   :  { %8427 = vrot.lane.b32.xlu1 %v7884_v55, %s11667_s24  ;;  %v8707_v61 = vsel %vm8688_vm7, %v8674_v15, %v8402_v13  ;;  %v8643_v21 = vsel %vm8622_vm3, %v8610_v62, %v8150_v60 }
 0x5b6   :  { %v8532_v17 = vpop.permute.xlu0 %8531  ;;  %v8026_v31 = vpop.permute.xlu1 %8025 }
 0x5b7   :  { %8555 = vrot.lane.b32.xlu1 %v7948_v0, %s11668_s25  ;;  %v8741_v52 = vsel %vm8721_vm11, %v8708_v10, %v8532_v17  ;;  %v8612_v17 = vsel %vm63_vm8, %v17369_v53, %v8026_v31 }
 0x5ba   :  { %v8280_v42 = vpop.permute.xlu1 %8279 }
 0x5bb   :  { %v8278_v26 = vpop.permute.xlu0 %8277  ;;  %v8677_v50 = vsel %vm8655_vm2, %v8644_v24, %v8280_v42  ;;  %v8613_v42 = vsel %vm63_vm8, %v17330_v49, %v17955_v28 }
 0x5bc   :  { %v8676_v18 = vsel %vm8655_vm2, %v8643_v21, %v8278_v26 }
 0x5bf   :  { %v8408_v63 = vpop.permute.xlu0 %8407  ;;  %v8530_v35 = vpop.permute.xlu1 %8529 }
 0x5c0   :  { %v8740_v29 = vsel %vm8721_vm11, %v8707_v61, %v8530_v35  ;;  %v8710_v27 = vsel %vm8688_vm7, %v8677_v50, %v8408_v63 }
 0x5c1   :  { %11165 = vmatprep.mubr.msk.f32.mxu1 %vm8773_vm12, %v8740_v29 }
 0x5c2   :  { %11166 = vmatmul.mubr.msk.f32.gmra.mrb[58].mxu1 %vm8773_vm12, %v8741_v52 }
 0x5c3   :  { %v17977_v16 = vpop.permute.xlu0 %8031  ;;  %v8156_v1 = vpop.permute.xlu1 %8155 }
 0x5c4   :  { %v8646_v2 = vsel %vm8622_vm3, %v8613_v42, %v8156_v1  ;;  %v8615_v32 = vsel %vm63_vm8, %v17489_v44, %v17977_v16 }
 0x5c7   :  { %v8154_v12 = vpop.permute.xlu1 %8153 }
 0x5c8   :  { %v8406_v34 = vpop.permute.xlu0 %8405  ;;  %v8645_v30 = vsel %vm8622_vm3, %v8612_v17, %v8154_v12 }
 0x5c9   :  { %v8709_v3 = vsel %vm8688_vm7, %v8676_v18, %v8406_v34 }
 0x5cb   :  { %v8030_v7 = vpop.permute.xlu1 %8029 }
 0x5cc   :  { %v8536_v33 = vpop.permute.xlu0 %8535 }
 0x5cd   :  { %v8743_v38 = vsel %vm8721_vm11, %v8710_v27, %v8536_v33 }
 0x5cf   :  { %v8284_v20 = vpop.permute.xlu1 %8283 }
 0x5d0   :  { %v8282_v8 = vpop.permute.xlu0 %8281  ;;  %v8679_v11 = vsel %vm8655_vm2, %v8646_v2, %v8284_v20 }
 0x5d1   :  { %v8678_v23 = vsel %vm8655_vm2, %v8645_v30, %v8282_v8  ;;  %v8614_v8 = vsel %vm63_vm8, %v17519_v45, %v8030_v7 }
 0x5d4   :  { %v8412_v6 = vpop.permute.xlu0 %8411  ;;  %v8534_v51 = vpop.permute.xlu1 %8533 }
 0x5d5   :  { %v8742_v5 = vsel %vm8721_vm11, %v8709_v3, %v8534_v51  ;;  %v8712_v53 = vsel %vm8688_vm7, %v8679_v11, %v8412_v6 }
 0x5d6   :  { %11168 = vmatprep.mubr.msk.f32.mxu1 %vm8773_vm12, %v8742_v5 }
 0x5d7   :  { %11169 = vmatmul.mubr.msk.f32.gmra.mrb[60].mxu1 %vm8773_vm12, %v8743_v38 }
 0x5d8   :  { %v17995_v36 = vpop.permute.xlu0 %8035  ;;  %v8160_v48 = vpop.permute.xlu1 %8159 }
 0x5d9   :  { %v8648_v46 = vsel %vm8622_vm3, %v8615_v32, %v8160_v48 }
 0x5dc   :  { %v8410_v57 = vpop.permute.xlu0 %8409  ;;  %v8158_v22 = vpop.permute.xlu1 %8157 }
 0x5dd   :  { %v11140_v19 = vpop.f32.mrb[40].mxu1  ;;  %v8711_v9 = vsel %vm8688_vm7, %v8678_v23, %v8410_v57  ;;  %v8647_v62 = vsel %vm8622_vm3, %v8614_v8, %v8158_v22 }
 0x5de   :  { %v18003_v55 = vadd.f32 %v11140_v19, %v18000_v43  ;;  %v8936_v41 = vpop.f32.mrb[41].mxu1 }
 0x5df   :  { %v18006_v13 = vadd.f32 %v18000_v43, %v8936_v41 }
 0x5e0   :  { %v8540_v54 = vpop.permute.xlu0 %8539  ;;  %v8034_v59 = vpop.permute.xlu1 %8033 }
 0x5e1   :  { %v11330_v26 = vpack.c.bf16 %v18003_v55, %v18006_v13  ;;  %v8745_v63 = vsel %vm8721_vm11, %v8712_v53, %v8540_v54  ;;  %v8616_v41 = vsel %vm63_vm8, %v17680_v4, %v8034_v59 }
 0x5e4   :  { %v8286_v60 = vpop.permute.xlu0 %8285  ;;  %v8288_v0 = vpop.permute.xlu1 %8287 }
 0x5e5   :  { %v8680_v47 = vsel %vm8655_vm2, %v8647_v62, %v8286_v60  ;;  %v8681_v24 = vsel %vm8655_vm2, %v8648_v46, %v8288_v0  ;;  %v8617_v0 = vsel %vm63_vm8, %v17644_v40, %v17995_v36 }
 0x5e8   :  { %v8416_v25 = vpop.permute.xlu0 %8415  ;;  %v8538_v15 = vpop.permute.xlu1 %8537 }
 0x5e9   :  { %v8744_v31 = vsel %vm8721_vm11, %v8711_v9, %v8538_v15  ;;  %v8714_v45 = vsel %vm8688_vm7, %v8681_v24, %v8416_v25 }
 0x5ea   :  { %11171 = vmatprep.mubr.msk.f32.mxu1 %vm8773_vm12, %v8744_v31 }
 0x5eb   :  { %11172 = vmatmul.mubr.msk.f32.gmra.mrb[62].mxu1 %vm8773_vm12, %v8745_v63 }
 0x5ec   :  { %v18025_v49 = vpop.permute.xlu0 %8039  ;;  %v8164_v28 = vpop.permute.xlu1 %8163 }
 0x5ed   :  { %v8650_v42 = vsel %vm8622_vm3, %v8617_v0, %v8164_v28 }
 0x5f0   :  { %v8414_v39 = vpop.permute.xlu0 %8413  ;;  %v8162_v61 = vpop.permute.xlu1 %8161 }
 0x5f1   :  { %v8713_v18 = vsel %vm8688_vm7, %v8680_v47, %v8414_v39  ;;  %v8649_v17 = vsel %vm8622_vm3, %v8616_v41, %v8162_v61  ;;  %v8619_v61 = vsel %vm63_vm8, %v17755_v56, %v18025_v49 }
 0x5f2   :  { %v11143_v29 = vpop.f32.mrb[42].mxu1 }
 0x5f3   :  { %v18028_v52 = vadd.f32 %v11143_v29, %v18000_v43  ;;  %v8946_v1 = vpop.f32.mrb[43].mxu1 }
 0x5f4   :  { %v8544_v35 = vpop.permute.xlu0 %8543  ;;  %v8038_v10 = vpop.permute.xlu1 %8037  ;;  %v18031_v34 = vadd.f32 %v18000_v43, %v8946_v1 }
 0x5f5   :  { %v8747_v50 = vsel %vm8721_vm11, %v8714_v45, %v8544_v35  ;;  %v8618_v28 = vsel %vm63_vm8, %v17825_v58, %v8038_v10 }
 0x5f6   :  { %v11334_v20 = vpack.c.bf16 %v18028_v52, %v18031_v34 }
 0x5f8   :  { %v8290_v12 = vpop.permute.xlu0 %8289 }
 0x5f9   :  { %v8292_v33 = vpop.permute.xlu1 %8291  ;;  %v8682_v30 = vsel %vm8655_vm2, %v8649_v17, %v8290_v12 }
 0x5fa   :  { %v8683_v23 = vsel %vm8655_vm2, %v8650_v42, %v8292_v33 }
 0x5fc   :  { %v8420_v21 = vpop.permute.xlu0 %8419 }
 0x5fd   :  { %v8542_v6 = vpop.permute.xlu1 %8541  ;;  %v8716_v4 = vsel %vm8688_vm7, %v8683_v23, %v8420_v21 }
 0x5fe   :  { %v8746_v7 = vsel %vm8721_vm11, %v8713_v18, %v8542_v6 }
 0x5ff   :  { %11174 = vmatprep.mubr.msk.f32.mxu1 %vm8773_vm12, %v8746_v7 }
 0x600   :  { %11175 = vmatmul.mubr.msk.f32.gmra.mrb[64].mxu1 %vm8773_vm12, %v8747_v50  ;;  %v8044_v44 = vpop.permute.xlu0 %8043 }
 0x601   :  { %v8168_v16 = vpop.permute.xlu1 %8167  ;;  %v8621_v50 = vsel %vm63_vm8, %v17898_v14, %v8044_v44 }
 0x602   :  { %v8652_v12 = vsel %vm8622_vm3, %v8619_v61, %v8168_v16 }
 0x604   :  { %v8418_v3 = vpop.permute.xlu0 %8417 }
 0x605   :  { %v8166_v51 = vpop.permute.xlu1 %8165  ;;  %v8715_v25 = vsel %vm8688_vm7, %v8682_v30, %v8418_v3 }
 0x606   :  { %v8651_v35 = vsel %vm8622_vm3, %v8618_v28, %v8166_v51  ;;  %v9095_v28 = vlaneseq }
 0x608   :  { %v8548_v27 = vpop.permute.xlu0 %8547  ;;  %v11146_v38 = vpop.f32.mrb[44].mxu1 }
 0x609   :  { %v8042_v5 = vpop.permute.xlu1 %8041  ;;  %v18051_v48 = vadd.f32 %v11146_v38, %v18000_v43  ;;  %v8956_v57 = vpop.f32.mrb[45].mxu1  ;;  %v8749_v9 = vsel %vm8721_vm11, %v8716_v4, %v8548_v27 }
 0x60a   :  { %v18054_v22 = vadd.f32 %v18000_v43, %v8956_v57  ;;  %v8620_v58 = vsel %vm63_vm8, %v17912_v37, %v8042_v5 }
 0x60c   :  { %v8294_v54 = vpop.permute.xlu0 %8293  ;;  %v11338_v60 = vpack.c.bf16 %v18051_v48, %v18054_v22 }
 0x60d   :  { %v8296_v19 = vpop.permute.xlu1 %8295  ;;  %v8684_v33 = vsel %vm8655_vm2, %v8651_v35, %v8294_v54  ;;  %v18176_v35 = vshrl.u32 %v9095_v28, 7 }
 0x60e   :  { %v8685_v10 = vsel %vm8655_vm2, %v8652_v12, %v8296_v19  ;;  %v9217_v12 = vld [vmem:[%s18710_s3] sm:$0x3] }
 0x610   :  { %v8424_v2 = vpop.permute.xlu0 %8423 }
 0x611   :  { %v8546_v11 = vpop.permute.xlu1 %8545  ;;  %v8718_v62 = vsel %vm8688_vm7, %v8685_v10, %v8424_v2 }
 0x612   :  { %v8748_v59 = vsel %vm8721_vm11, %v8715_v25, %v8546_v11 }
 0x613   :  { %11177 = vmatprep.mubr.msk.f32.mxu1 %vm8773_vm12, %v8748_v59 }
 0x614   :  { %11178 = vmatmul.mubr.msk.f32.gmra.mrb[66].mxu1 %vm8773_vm12, %v8749_v9  ;;  %v8422_v40 = vpop.permute.xlu0 %8421 }
 0x615   :  { %v8172_v36 = vpop.permute.xlu1 %8171  ;;  %v8717_v56 = vsel %vm8688_vm7, %v8684_v33, %v8422_v40  ;;  %v9115_v33 = vsub.s32 0, %v18176_v35 }
 0x616   :  { %v8654_v16 = vsel %vm8622_vm3, %v8621_v50, %v8172_v36 }
 0x618   :  { %v8552_v15 = vpop.permute.xlu0 %8551 }
 0x619   :  { %v8170_v53 = vpop.permute.xlu1 %8169  ;;  %v8751_v24 = vsel %vm8721_vm11, %v8718_v62, %v8552_v15 }
 0x61a   :  { %v8653_v46 = vsel %vm8622_vm3, %v8620_v58, %v8170_v53  ;;  %v9097_v58 = vadd.s32 8, %v18176_v35 }
 0x61b   :  { %v11149_v39 = vpop.f32.mrb[46].mxu1 }
 0x61c   :  { %v8298_v31 = vpop.permute.xlu0 %8297  ;;  %v18080_v29 = vadd.f32 %v11149_v39, %v18000_v43  ;;  %v8966_v1 = vpop.f32.mrb[47].mxu1  ;;  %v11669_v39 = vmov 0.0  }
 0x61d   :  { %v8300_v63 = vpop.permute.xlu1 %8299  ;;  %v18085_v8 = vadd.f32 %v18000_v43, %v8966_v1  ;;  %v8686_v18 = vsel %vm8655_vm2, %v8653_v46, %v8298_v31  ;;  %64 = vst.msk [vmem:[#allocation2] sm:$0xff] %vm63_vm8, %v11669_v39  ;;  %65 = vst.msk [vmem:[#allocation2 + $0x8] sm:$0xff] %vm63_vm8, %v11669_v39  ;;  %v9112_v1 = vld [vmem:[%s18709_s2] sm:$0x3]  ;;  %v9098_v46 = vadd.s32 16, %v18176_v35 }
 0x61e   :  { %v8687_v3 = vsel %vm8655_vm2, %v8654_v16, %v8300_v63  ;;  %66 = vst.msk [vmem:[#allocation2 + $0x10] sm:$0xff] %vm63_vm8, %v11669_v39  ;;  %67 = vst.msk [vmem:[#allocation2 + $0x18] sm:$0xff] %vm63_vm8, %v11669_v39  ;;  %v18190_v10 = vrot.slane %v9112_v1, %v9115_v33 }
 0x61f   :  { %v11342_v47 = vpack.c.bf16 %v18080_v29, %v18085_v8  ;;  %68 = vst.msk [vmem:[#allocation2 + $0x20] sm:$0xff] %vm63_vm8, %v11669_v39  ;;  %69 = vst.msk [vmem:[#allocation2 + $0x28] sm:$0xff] %vm63_vm8, %v11669_v39 }
 0x620   :  { %v8426_v32 = vpop.permute.xlu0 %8425  ;;  %70 = vst.msk [vmem:[#allocation2 + $0x30] sm:$0xff] %vm63_vm8, %v11669_v39  ;;  %71 = vst.msk [vmem:[#allocation2 + $0x38] sm:$0xff] %vm63_vm8, %v11669_v39  ;;  %vm9125_vm5 = vcmp.eq.s32.totalorder %v9098_v46, %v18190_v10 }
 0x621   :  { %v8550_v49 = vpop.permute.xlu1 %8549  ;;  %v8719_v37 = vsel %vm8688_vm7, %v8686_v18, %v8426_v32  ;;  %72 = vst.msk [vmem:[#allocation2 + $0x40] sm:$0xff] %vm63_vm8, %v11669_v39  ;;  %73 = vst.msk [vmem:[#allocation2 + $0x48] sm:$0xff] %vm63_vm8, %v11669_v39  ;;  %v9119_v32 = vsub.s32 1, %v18176_v35  ;;  %v10561_v50 = vsel %vm9125_vm5, 1.0, %v11669_v39 }
 0x622   :  { %v8750_v21 = vsel %vm8721_vm11, %v8717_v56, %v8550_v49  ;;  %74 = vst.msk [vmem:[#allocation2 + $0x50] sm:$0xff] %vm63_vm8, %v11669_v39  ;;  %75 = vst.msk [vmem:[#allocation2 + $0x58] sm:$0xff] %vm63_vm8, %v11669_v39  ;;  %v18194_v49 = vrot.slane %v9217_v12, %v9115_v33  ;;  %v9102_v33 = vadd.s32 48, %v18176_v35 }
 0x623   :  { %11180 = vmatprep.mubr.msk.f32.mxu1 %vm8773_vm12, %v8750_v21  ;;  %76 = vst.msk [vmem:[#allocation2 + $0x60] sm:$0xff] %vm63_vm8, %v11669_v39  ;;  %77 = vst.msk [vmem:[#allocation2 + $0x68] sm:$0xff] %vm63_vm8, %v11669_v39  ;;  %v18192_v56 = vrot.slane %v9112_v1, %v9119_v32  ;;  %v18196_v62 = vrot.slane %v9217_v12, %v9119_v32 }
 0x624   :  { %11181 = vmatmul.mubr.msk.f32.gmra.mrb[68].mxu1 %vm8773_vm12, %v8751_v24  ;;  %v8554_v6 = vpop.permute.xlu0 %8553  ;;  %78 = vst.msk [vmem:[#allocation2 + $0x70] sm:$0xff] %vm63_vm8, %v11669_v39  ;;  %79 = vst.msk [vmem:[#allocation2 + $0x78] sm:$0xff] %vm63_vm8, %v11669_v39  ;;  %vm9133_vm9 = vcmp.eq.s32.totalorder %v9102_v33, %v18190_v10 }
 0x625   :  { %v8428_v45 = vpop.permute.xlu1 %8427  ;;  %v8752_v7 = vsel %vm8721_vm11, %v8719_v37, %v8554_v6  ;;  %vm9122_vm2 = vcmp.eq.s32.totalorder %v18176_v35, %v18192_v56  ;;  %vm9126_vm6 = vcmp.eq.s32.totalorder %v9098_v46, %v18192_v56  ;;  %vm9134_vm15 = vcmp.eq.s32.totalorder %v9102_v33, %v18192_v56 }
 0x626   :  { %11183 = vmatprep.mubr.msk.f32.mxu1 %vm8773_vm12, %v8752_v7  ;;  %v8720_v51 = vsel %vm8688_vm7, %v8687_v3, %v8428_v45  ;;  %vm9121_vm7 = vcmp.eq.s32.totalorder %v18176_v35, %v18190_v10  ;;  %v10558_v55 = vsel %vm9122_vm2, 1.0, %v11669_v39  ;;  %v9099_v45 = vadd.s32 24, %v18176_v35 }
 0x627   :  { %v10557_v13 = vsel %vm9121_vm7, 1.0, %v11669_v39  ;;  %v9230_v24 = vmul.f32 %v10558_v55, %v18196_v62  ;;  %v10562_v7 = vsel %vm9126_vm6, 1.0, %v11669_v39  ;;  %v18228_v3 = vmul.f32 %v10561_v50, %v18194_v49 }
 0x628   :  { %v18211_v18 = vmul.f32 %v10557_v13, %v18194_v49  ;;  %v18225_v16 = vmul.f32 %v10562_v7, %v18196_v62  ;;  %vm9128_vm4 = vcmp.eq.s32.totalorder %v9099_v45, %v18192_v56  ;;  %vm9127_vm0 = vcmp.eq.s32.totalorder %v9099_v45, %v18190_v10 }
 0x629   :  { %v8556_v27 = vpop.permute.xlu1 %8555  ;;  %9341 = vmatprep.mubr.f32.mxu0 %v9230_v24  ;;  %v10570_v32 = vsel %vm9134_vm15, 1.0, %v11669_v39  ;;  %v9103_v13 = vadd.s32 56, %v18176_v35 }
 0x62a   :  { %v8753_v5 = vsel %vm8721_vm11, %v8720_v51, %v8556_v27  ;;  %vm9124_vm11 = vcmp.eq.s32.totalorder %v9097_v58, %v18192_v56  ;;  %v10564_v51 = vsel %vm9128_vm4, 1.0, %v11669_v39  ;;  %v10563_v27 = vsel %vm9127_vm0, 1.0, %v11669_v39 }
 0x62b   :  { %11184 = vmatmul.mubr.msk.f32.gmra.mrb[70].mxu1 %vm8773_vm12, %v8753_v5  ;;  %vm9123_vm12 = vcmp.eq.s32.totalorder %v9097_v58, %v18190_v10  ;;  %v18235_v5 = vmul.f32 %v10564_v51, %v18196_v62  ;;  %v10569_v58 = vsel %vm9133_vm9, 1.0, %v11669_v39  ;;  %v18273_v46 = vmul.f32 %v10570_v32, %v18196_v62 }
 0x62c   :  { %v10559_v21 = vsel %vm9123_vm12, 1.0, %v11669_v39  ;;  %v18276_v55 = vmul.f32 %v10569_v58, %v18194_v49  ;;  %vm9136_vm2 = vcmp.eq.s32.totalorder %v9103_v13, %v18192_v56  ;;  %vm9135_vm7 = vcmp.eq.s32.totalorder %v9103_v13, %v18190_v10 }
 0x62d   :  { %v18217_v6 = vmul.f32 %v10559_v21, %v18194_v49  ;;  %v10572_v52 = vsel %vm9136_vm2, 1.0, %v11669_v39  ;;  %v10571_v34 = vsel %vm9135_vm7, 1.0, %v11669_v39  ;;  %v9104_v21 = vadd.s32 64, %v18176_v35 }
 0x62e   :  { %v9105_v51 = vadd.s32 72, %v18176_v35  ;;  %v9107_v58 = vadd.s32 88, %v18176_v35 }
 0x62f   :  { %vm9137_vm12 = vcmp.eq.s32.totalorder %v9104_v21, %v18190_v10 }
 0x630   :  { %v10573_v45 = vsel %vm9137_vm12, 1.0, %v11669_v39  ;;  %vm9140_vm6 = vcmp.eq.s32.totalorder %v9105_v51, %v18192_v56  ;;  %vm9139_vm5 = vcmp.eq.s32.totalorder %v9105_v51, %v18190_v10  ;;  %v9109_v51 = vadd.s32 104, %v18176_v35 }
 0x631   :  { %v11152_v38 = vpop.f32.mrb[48].mxu1  ;;  %v18298_v50 = vmul.f32 %v10573_v45, %v18194_v49 }
 0x632   :  { %v18111_v57 = vadd.f32 %v11152_v38, %v18000_v43  ;;  %v8976_v54 = vpop.f32.mrb[49].mxu1  ;;  %v18238_v38 = vmul.f32 %v10563_v27, %v18194_v49  ;;  %vm9148_vm15 = vcmp.eq.s32.totalorder %v9109_v51, %v18192_v56  ;;  %vm9147_vm9 = vcmp.eq.s32.totalorder %v9109_v51, %v18190_v10 }
 0x633   :  { %v18114_v14 = vadd.f32 %v18000_v43, %v8976_v54  ;;  %v9100_v54 = vadd.s32 32, %v18176_v35 }
 0x635   :  { %v11346_v44 = vpack.c.bf16 %v18111_v57, %v18114_v14  ;;  %vm9130_vm10 = vcmp.eq.s32.totalorder %v9100_v54, %v18192_v56  ;;  %vm9129_vm1 = vcmp.eq.s32.totalorder %v9100_v54, %v18190_v10  ;;  %v10576_v54 = vsel %vm9140_vm6, 1.0, %v11669_v39 }
 0x636   :  { %vm19669_vm6 = vcmask 64512  }
 0x646   :  { %v11155_v19 = vpop.f32.mrb[50].mxu1 }
 0x647   :  { %v18119_v41 = vadd.f32 %v11155_v19, %v18000_v43  ;;  %v8986_v0 = vpop.f32.mrb[51].mxu1 }
 0x648   :  { %v18122_v17 = vadd.f32 %v18000_v43, %v8986_v0  ;;  %v10566_v0 = vsel %vm9130_vm10, 1.0, %v11669_v39  ;;  %vm9144_vm10 = vcmp.eq.s32.totalorder %v9107_v58, %v18192_v56 }
 0x649   :  { %v10580_v13 = vsel %vm9144_vm10, 1.0, %v11669_v39 }
 0x64a   :  { %v11350_v42 = vpack.c.bf16 %v18119_v41, %v18122_v17  ;;  %v9917_v17 = vld [vmem:[%s18713_s14] sm:$0xff] }
 0x65a   :  { %v11158_v30 = vpop.f32.mrb[52].mxu1 }
 0x65b   :  { %v18127_v2 = vadd.f32 %v11158_v30, %v18000_v43  ;;  %v8996_v23 = vpop.f32.mrb[53].mxu1  ;;  %v10565_v30 = vsel %vm9129_vm1, 1.0, %v11669_v39  ;;  %vm9143_vm1 = vcmp.eq.s32.totalorder %v9107_v58, %v18190_v10 }
 0x65c   :  { %v18130_v25 = vadd.f32 %v18000_v43, %v8996_v23 }
 0x65e   :  { %v11354_v11 = vpack.c.bf16 %v18127_v2, %v18130_v25  ;;  %v9919_v2 = vld [vmem:[%s18713_s14 + $0x10] sm:$0xff] }
 0x66c   :  { %v11161_v4 = vpop.f32.mrb[54].mxu1 }
 0x66d   :  { %v18135_v59 = vadd.f32 %v11161_v4, %v18000_v43  ;;  %v9006_v9 = vpop.f32.mrb[55].mxu1 }
 0x66e   :  { %v18138_v40 = vadd.f32 %v18000_v43, %v9006_v9  ;;  %v18247_v9 = vmul.f32 %v10566_v0, %v18196_v62 }
 0x670   :  { %v11358_v36 = vpack.c.bf16 %v18135_v59, %v18138_v40 }
 0x680   :  { %v11164_v15 = vpop.f32.mrb[56].mxu1 }
 0x681   :  { %v9022_v53 = vadd.f32 %v11164_v15, %v18000_v43  ;;  %v9016_v31 = vpop.f32.mrb[57].mxu1  ;;  %v18250_v15 = vmul.f32 %v10565_v30, %v18194_v49 }
 0x682   :  { %v9017_v63 = vadd.f32 %v18000_v43, %v9016_v31 }
 0x684   :  { %v11328_v61 = vpack.c.bf16 %v9022_v53, %v9017_v63  ;;  %v9101_v53 = vadd.s32 40, %v18176_v35 }
 0x686   :  { %11329 = vmatprep.subr.bf16.mxu0 %v11328_v61  ;;  %vm9132_vm14 = vcmp.eq.s32.totalorder %v9101_v53, %v18192_v56  ;;  %vm9131_vm13 = vcmp.eq.s32.totalorder %v9101_v53, %v18190_v10  ;;  %v9106_v53 = vadd.s32 80, %v18176_v35 }
 0x687   :  { %11331 = vmatpush3.bf16.msra.mxu0 %v11330_v26  ;;  %v10560_v26 = vsel %vm9124_vm11, 1.0, %v11669_v39  ;;  %v10568_v28 = vsel %vm9132_vm14, 1.0, %v11669_v39  ;;  %v10567_v61 = vsel %vm9131_vm13, 1.0, %v11669_v39  ;;  %vm9138_vm11 = vcmp.eq.s32.totalorder %v9104_v21, %v18192_v56 }
 0x688   :  { %v18214_v37 = vmul.f32 %v10560_v26, %v18196_v62  ;;  %v18259_v1 = vmul.f32 %v10568_v28, %v18196_v62  ;;  %v18262_v12 = vmul.f32 %v10567_v61, %v18194_v49  ;;  %v18287_v26 = vmul.f32 %v10571_v34, %v18194_v49 }
 0x689   :  { %v10574_v24 = vsel %vm9138_vm11, 1.0, %v11669_v39  ;;  %vm9142_vm4 = vcmp.eq.s32.totalorder %v9106_v53, %v18192_v56  ;;  %vm9141_vm0 = vcmp.eq.s32.totalorder %v9106_v53, %v18190_v10  ;;  %v18333_v34 = vmul.f32 %v10580_v13, %v18196_v62 }
 0x68a   :  { %v18295_v7 = vmul.f32 %v10574_v24, %v18196_v62  ;;  %v10578_v28 = vsel %vm9142_vm4, 1.0, %v11669_v39  ;;  %v10577_v61 = vsel %vm9141_vm0, 1.0, %v11669_v39  ;;  %v9108_v24 = vadd.s32 96, %v18176_v35 }
 0x68b   :  { %v18319_v33 = vmul.f32 %v10578_v28, %v18196_v62  ;;  %v18322_v32 = vmul.f32 %v10577_v61, %v18194_v49 }
 0x68c   :  { %vm9146_vm14 = vcmp.eq.s32.totalorder %v9108_v24, %v18192_v56  ;;  %vm9145_vm13 = vcmp.eq.s32.totalorder %v9108_v24, %v18190_v10 }
 0x68d   :  { %v10582_v48 = vsel %vm9146_vm14, 1.0, %v11669_v39  ;;  %v10581_v22 = vsel %vm9145_vm13, 1.0, %v11669_v39 }
 0x68e   :  { %v18347_v45 = vmul.f32 %v10581_v22, %v18194_v49 }
 0x695   :  { %v11167_v19 = vpop.f32.mrb[58].mxu1 }
 0x696   :  { %v9032_v23 = vadd.f32 %v11167_v19, %v18000_v43  ;;  %v9026_v4 = vpop.f32.mrb[59].mxu1  ;;  %v10575_v19 = vsel %vm9139_vm5, 1.0, %v11669_v39  ;;  %vm19670_vm5 = vmmov %vm19669_vm6 }
 0x697   :  { %v9027_v31 = vadd.f32 %v18000_v43, %v9026_v4  ;;  %v18310_v4 = vmul.f32 %v10575_v19, %v18194_v49  ;;  %vm19671_vm4 = vmmov %vm19670_vm5 }
 0x698   :  { %vm19672_vm0 = vmmov %vm19671_vm4 }
 0x699   :  { %v11332_v63 = vpack.c.bf16 %v9032_v23, %v9027_v31  ;;  %v18307_v23 = vmul.f32 %v10576_v54, %v18196_v62  ;;  %v10583_v54 = vsel %vm9147_vm9, 1.0, %v11669_v39  ;;  %vm19673_vm10 = vmmov %vm19672_vm0 }
 0x69a   :  { %vm19675_vm14 = vmmov %vm19672_vm0 }
 0x69b   :  { %11333 = vmatprep.subr.bf16.mxu0 %v11332_v63  ;;  %vm19676_vm13 = vmmov %vm19672_vm0 }
 0x69c   :  { %11335 = vmatpush3.bf16.msra.mxu0 %v11334_v20  ;;  %v18284_v20 = vmul.f32 %v10572_v52, %v18196_v62  ;;  %v10579_v52 = vsel %vm9143_vm1, 1.0, %v11669_v39  ;;  %vm19674_vm1 = vmmov %vm19672_vm0 }
 0x69d   :  { %v18336_v21 = vmul.f32 %v10579_v52, %v18194_v49  ;;  %v9111_v52 = vadd.s32 120, %v18176_v35  ;;  %vm19678_vm9 = vmmov %vm19672_vm0 }
 0x69f   :  { %vm9152_vm11 = vcmp.eq.s32.totalorder %v9111_v52, %v18192_v56  ;;  %vm9151_vm12 = vcmp.eq.s32.totalorder %v9111_v52, %v18190_v10 }
 0x6a0   :  { %v10588_v22 = vsel %vm9152_vm11, 1.0, %v11669_v39  ;;  %v10587_v51 = vsel %vm9151_vm12, 1.0, %v11669_v39  ;;  %vm19681_vm11 = vmmov %vm19672_vm0 }
 0x6a1   :  { %vm19682_vm12 = vmmov %vm19672_vm0 }
 0x6aa   :  { %v11170_v27 = vpop.f32.mrb[60].mxu1 }
 0x6ab   :  { %v9042_v0 = vadd.f32 %v11170_v27, %v18000_v43  ;;  %v9036_v30 = vpop.f32.mrb[61].mxu1  ;;  %v10584_v27 = vsel %vm9148_vm15, 1.0, %v11669_v39  ;;  %vm19677_vm15 = vmmov %vm19672_vm0 }
 0x6ac   :  { %v9037_v31 = vadd.f32 %v18000_v43, %v9036_v30  ;;  %v18355_v19 = vmul.f32 %v10584_v27, %v18196_v62  ;;  %v9110_v30 = vadd.s32 112, %v18176_v35  ;;  %v18379_v27 = vmul.f32 %v10588_v22, %v18196_v62  ;;  %v9490_v35 = vld [vmem:[%s18711_s12] sm:$0xff] }
 0x6ae   :  { %v11336_v63 = vpack.c.bf16 %v9042_v0, %v9037_v31  ;;  %v18358_v0 = vmul.f32 %v10583_v54, %v18194_v49  ;;  %vm9150_vm2 = vcmp.eq.s32.totalorder %v9110_v30, %v18192_v56  ;;  %vm9149_vm7 = vcmp.eq.s32.totalorder %v9110_v30, %v18190_v10  ;;  %v9491_v10 = vld [vmem:[%s18711_s12 + $0x8] sm:$0xff] }
 0x6af   :  { %v10586_v31 = vsel %vm9150_vm2, 1.0, %v11669_v39  ;;  %v18382_v54 = vmul.f32 %v10587_v51, %v18194_v49  ;;  %vm19679_vm2 = vmmov %vm19672_vm0 }
 0x6b0   :  { %11337 = vmatprep.subr.bf16.mxu0 %v11336_v63  ;;  %v10585_v63 = vsel %vm9149_vm7, 1.0, %v11669_v39  ;;  %v18367_v58 = vmul.f32 %v10586_v31, %v18196_v62  ;;  %v11360_v39 = vpack.c.bf16 %v9491_v10, %v9490_v35  ;;  %v9267_v35 = vld [vmem:[#allocation2 + $0x30] sm:$0xff]  ;;  %vm19680_vm7 = vmmov %vm19672_vm0 }
 0x6b1   :  { %11339 = vmatpush3.bf16.msra.mxu0 %v11338_v60  ;;  %v18344_v60 = vmul.f32 %v10582_v48, %v18196_v62  ;;  %v18370_v13 = vmul.f32 %v10585_v63, %v18194_v49 }
 0x6b2   :  { %11361 = vmatprep.subr.bf16.mxu1 %v11360_v39 }
 0x6b3   :  { %11363 = vmatpush3.bf16.msra.mxu1 %v11360_v39 }
 0x6be   :  { %v11173_v53 = vpop.f32.mrb[62].mxu1 }
 0x6bf   :  { %v9052_v28 = vadd.f32 %v11173_v53, %v18000_v43  ;;  %v9046_v61 = vpop.f32.mrb[63].mxu1 }
 0x6c0   :  { %v9047_v24 = vadd.f32 %v18000_v43, %v9046_v61 }
 0x6c2   :  { %v11340_v48 = vpack.c.bf16 %v9052_v28, %v9047_v24 }
 0x6c4   :  { %11341 = vmatprep.subr.bf16.mxu0 %v11340_v48 }
 0x6c5   :  { %11343 = vmatpush3.bf16.msra.mxu0 %v11342_v47 }
 0x6d3   :  { %v11176_v56 = vpop.f32.mrb[64].mxu1 }
 0x6d4   :  { %v9062_v49 = vadd.f32 %v11176_v56, %v18000_v43  ;;  %v9056_v62 = vpop.f32.mrb[65].mxu1 }
 0x6d5   :  { %v9057_v30 = vadd.f32 %v18000_v43, %v9056_v62 }
 0x6d7   :  { %v11344_v53 = vpack.c.bf16 %v9062_v49, %v9057_v30  ;;  %v9268_v30 = vld [vmem:[#allocation2 + $0x38] sm:$0xff] }
 0x6d9   :  { %11345 = vmatprep.subr.bf16.mxu0 %v11344_v53 }
 0x6da   :  { %11347 = vmatpush3.bf16.msra.mxu0 %v11346_v44 }
 0x6e7   :  { %v11179_v31 = vpop.f32.mrb[66].mxu1 }
 0x6e8   :  { %v9072_v63 = vadd.f32 %v11179_v31, %v18000_v43  ;;  %v9066_v29 = vpop.f32.mrb[67].mxu1 }
 0x6e9   :  { %v9067_v8 = vadd.f32 %v18000_v43, %v9066_v29 }
 0x6eb   :  { %v11348_v47 = vpack.c.bf16 %v9072_v63, %v9067_v8 }
 0x6ed   :  { %11349 = vmatprep.subr.bf16.mxu0 %v11348_v47  ;;  %v9269_v47 = vld [vmem:[#allocation2 + $0x40] sm:$0xff] }
 0x6ee   :  { %11351 = vmatpush3.bf16.msra.mxu0 %v11350_v42  ;;  %v9918_v42 = vld [vmem:[%s18713_s14 + $0x8] sm:$0xff] }
 0x6ef   :  { %v11364_v25 = vpack.c.bf16 %v9918_v42, %v9917_v17  ;;  %v9271_v17 = vld [vmem:[#allocation2 + $0x50] sm:$0xff] }
 0x6f7   :  { %v11182_v28 = vpop.f32.mrb[68].mxu1 }
 0x6f8   :  { %v9082_v61 = vadd.f32 %v11182_v28, %v18000_v43  ;;  %v9076_v52 = vpop.f32.mrb[69].mxu1 }
 0x6f9   :  { %v9077_v24 = vadd.f32 %v18000_v43, %v9076_v52 }
 0x6fb   :  { %v11352_v57 = vpack.c.bf16 %v9082_v61, %v9077_v24 }
 0x6fd   :  { %11353 = vmatprep.subr.bf16.mxu0 %v11352_v57 }
 0x6fe   :  { %v11185_v14 = vpop.f32.mrb[70].mxu1  ;;  %11355 = vmatpush3.bf16.msra.mxu0 %v11354_v11  ;;  %v9920_v11 = vld [vmem:[%s18713_s14 + $0x18] sm:$0xff] }
 0x6ff   :  { %v9092_v44 = vadd.f32 %v11185_v14, %v18000_v43  ;;  %v9086_v48 = vpop.f32.mrb[71].mxu1  ;;  %v11368_v59 = vpack.c.bf16 %v9920_v11, %v9919_v2  ;;  %v9270_v14 = vld [vmem:[#allocation2 + $0x48] sm:$0xff] }
 0x700   :  { %v9087_v22 = vadd.f32 %v18000_v43, %v9086_v48  ;;  %v9473_v43 = vld [vmem:[%s18712_s11] sm:$0xff] }
 0x701   :  { %11214 = vmatprep.subr.mxu1 %v9473_v43 }
 0x702   :  { %v11356_v41 = vpack.c.bf16 %v9092_v44, %v9087_v22 }
 0x704   :  { %11357 = vmatprep.subr.bf16.mxu0 %v11356_v41 }
 0x705   :  { %11359 = vmatpush3.bf16.msra.mxu0 %v11358_v36  ;;  %v9261_v36 = vld [vmem:[#allocation2] sm:$0xff] }
 0x706   :  { %11365 = vmatprep.subr.bf16.mxu0 %v11364_v25 }
 0x708   :  { %9342 = vmatmul.mubr.f32.vlgmr.msra.gmra.mrb[56].mxu0 %v18211_v18 }
 0x709   :  { %9346 = vmatprep.mubr.f32.mxu0 %v18214_v37  ;;  %11367 = vmatpush3.bf16.msra.mxu0 %v11364_v25 }
 0x70a   :  { %11369 = vmatprep.subr.bf16.mxu0 %v11368_v59 }
 0x70c   :  { %9347 = vmatmul.mubr.f32.gmra.mrb[58].mxu0 %v18217_v6 }
 0x70d   :  { %9351 = vmatprep.mubr.f32.mxu0 %v18225_v16  ;;  %11371 = vmatpush3.bf16.msra.mxu0 %v11368_v59 }
 0x710   :  { %9352 = vmatmul.mubr.f32.gmra.mrb[60].mxu0 %v18228_v3  ;;  %v9262_v3 = vld [vmem:[#allocation2 + $0x8] sm:$0xff] }
 0x711   :  { %9356 = vmatprep.mubr.f32.mxu0 %v18235_v5 }
 0x714   :  { %9357 = vmatmul.mubr.f32.gmra.mrb[62].mxu0 %v18238_v38 }
 0x715   :  { %9361 = vmatprep.mubr.f32.mxu0 %v18247_v9 }
 0x718   :  { %9362 = vmatmul.mubr.f32.gmra.mrb[64].mxu0 %v18250_v15 }
 0x719   :  { %9366 = vmatprep.mubr.f32.mxu0 %v18259_v1  ;;  %v9263_v1 = vld [vmem:[#allocation2 + $0x10] sm:$0xff] }
 0x71c   :  { %9367 = vmatmul.mubr.f32.gmra.mrb[66].mxu0 %v18262_v12 }
 0x71d   :  { %9371 = vmatprep.mubr.f32.mxu0 %v18273_v46 }
 0x720   :  { %9372 = vmatmul.mubr.f32.gmra.mrb[68].mxu0 %v18276_v55 }
 0x721   :  { %9376 = vmatprep.mubr.f32.mxu0 %v18284_v20 }
 0x724   :  { %9377 = vmatmul.mubr.f32.gmra.mrb[70].mxu0 %v18287_v26  ;;  %v9264_v26 = vld [vmem:[#allocation2 + $0x18] sm:$0xff] }
 0x725   :  { %9381 = vmatprep.mubr.f32.mxu0 %v18295_v7 }
 0x728   :  { %9382 = vmatmul.mubr.f32.gmra.mrb[72].mxu0 %v18298_v50 }
 0x729   :  { %9386 = vmatprep.mubr.f32.mxu0 %v18307_v23 }
 0x72c   :  { %9387 = vmatmul.mubr.f32.gmra.mrb[74].mxu0 %v18310_v4 }
 0x72d   :  { %9391 = vmatprep.mubr.f32.mxu0 %v18319_v33 }
 0x730   :  { %9392 = vmatmul.mubr.f32.gmra.mrb[76].mxu0 %v18322_v32  ;;  %v9265_v32 = vld [vmem:[#allocation2 + $0x20] sm:$0xff] }
 0x731   :  { %9396 = vmatprep.mubr.f32.mxu0 %v18333_v34 }
 0x734   :  { %9397 = vmatmul.mubr.f32.gmra.mrb[78].mxu0 %v18336_v21 }
 0x735   :  { %9401 = vmatprep.mubr.f32.mxu0 %v18344_v60 }
 0x738   :  { %9402 = vmatmul.mubr.f32.gmra.mrb[80].mxu0 %v18347_v45 }
 0x739   :  { %9406 = vmatprep.mubr.f32.mxu0 %v18355_v19 }
 0x73c   :  { %9407 = vmatmul.mubr.f32.gmra.mrb[82].mxu0 %v18358_v0  ;;  %v9266_v0 = vld [vmem:[#allocation2 + $0x28] sm:$0xff] }
 0x73d   :  { %9411 = vmatprep.mubr.f32.mxu0 %v18367_v58 }
 0x740   :  { %9412 = vmatmul.mubr.f32.gmra.mrb[84].mxu0 %v18370_v13 }
 0x741   :  { %9416 = vmatprep.mubr.f32.mxu0 %v18379_v27 }
 0x744   :  { %9417 = vmatmul.mubr.f32.gmra.mrb[86].mxu0 %v18382_v54 }
 0x7db   :  { %v10831_v40 = vpop.f32.mrb[56].mxu0 }
 0x7dc   :  { %v10832_v18 = vpop.f32.mrb[57].mxu0 }
 0x7dd   :  { %v10833_v37 = vadd.f32 %v10832_v18, %v10831_v40  ;;  %v9272_v40 = vld [vmem:[#allocation2 + $0x58] sm:$0xff] }
 0x7df   :  { %v9422_v6 = vadd.f32 %v10833_v37, %v9261_v36  ;;  %v10834_v16 = vpop.f32.mrb[58].mxu0 }
 0x7e0   :  { %v10835_v5 = vpop.f32.mrb[59].mxu0 }
 0x7e1   :  { %9438 = vst.msk [vmem:[#allocation2] sm:$0xff] %vm63_vm8, %v9422_v6  ;;  %v10836_v38 = vadd.f32 %v10835_v5, %v10834_v16 }
 0x7e3   :  { %v9423_v9 = vadd.f32 %v10836_v38, %v9262_v3  ;;  %v10837_v15 = vpop.f32.mrb[60].mxu0  ;;  %v9273_v3 = vld [vmem:[#allocation2 + $0x60] sm:$0xff] }
 0x7e4   :  { %v10838_v12 = vpop.f32.mrb[61].mxu0 }
 0x7e5   :  { %9439 = vst.msk [vmem:[#allocation2 + $0x8] sm:$0xff] %vm63_vm8, %v9423_v9  ;;  %v10839_v46 = vadd.f32 %v10838_v12, %v10837_v15  ;;  %v9274_v12 = vld [vmem:[#allocation2 + $0x68] sm:$0xff] }
 0x7e7   :  { %v9424_v55 = vadd.f32 %v10839_v46, %v9263_v1  ;;  %v10840_v20 = vpop.f32.mrb[62].mxu0 }
 0x7e8   :  { %v10841_v7 = vpop.f32.mrb[63].mxu0  ;;  %v9474_v50 = vld [vmem:[#allocation2] sm:$0xff] }
 0x7e9   :  { %9440 = vst.msk [vmem:[#allocation2 + $0x10] sm:$0xff] %vm63_vm8, %v9424_v55  ;;  %v10842_v23 = vadd.f32 %v10841_v7, %v10840_v20  ;;  %11190 = vmatprep.mubr.msk.f32.mxu1 %vm63_vm8, %v9474_v50  ;;  %v9275_v50 = vld [vmem:[#allocation2 + $0x70] sm:$0xff] }
 0x7eb   :  { %v9425_v4 = vadd.f32 %v10842_v23, %v9264_v26  ;;  %v10843_v33 = vpop.f32.mrb[64].mxu0 }
 0x7ec   :  { %v10844_v34 = vpop.f32.mrb[65].mxu0  ;;  %v9475_v21 = vld [vmem:[#allocation2 + $0x8] sm:$0xff] }
 0x7ed   :  { %9441 = vst.msk [vmem:[#allocation2 + $0x18] sm:$0xff] %vm63_vm8, %v9425_v4  ;;  %v10845_v60 = vadd.f32 %v10844_v34, %v10843_v33  ;;  %11191 = vmatmul.mubr.msk.f32.vlgmr.msra.gmra.mrb[72].mxu1 %vm63_vm8, %v9475_v21  ;;  %v9276_v21 = vld [vmem:[#allocation2 + $0x78] sm:$0xff] }
 0x7ee   :  { %11215 = vmatpush3.msra.mxu1 %v9473_v43 }
 0x7ef   :  { %v9426_v45 = vadd.f32 %v10845_v60, %v9265_v32  ;;  %v10846_v19 = vpop.f32.mrb[66].mxu0 }
 0x7f0   :  { %v10847_v58 = vpop.f32.mrb[67].mxu0  ;;  %v9476_v13 = vld [vmem:[#allocation2 + $0x10] sm:$0xff] }
 0x7f1   :  { %9442 = vst.msk [vmem:[#allocation2 + $0x20] sm:$0xff] %vm63_vm8, %v9426_v45  ;;  %v10848_v51 = vadd.f32 %v10847_v58, %v10846_v19  ;;  %11193 = vmatprep.mubr.msk.f32.mxu1 %vm63_vm8, %v9476_v13 }
 0x7f3   :  { %v9427_v27 = vadd.f32 %v10848_v51, %v9266_v0  ;;  %v10849_v54 = vpop.f32.mrb[68].mxu0  ;;  %v9457_v51 = vld [vmem:[%s18714_s4] sm:$0xff] }
 0x7f4   :  { %v10850_v10 = vpop.f32.mrb[69].mxu0  ;;  %v9477_v39 = vld [vmem:[#allocation2 + $0x18] sm:$0xff] }
 0x7f5   :  { %9443 = vst.msk [vmem:[#allocation2 + $0x28] sm:$0xff] %vm63_vm8, %v9427_v27  ;;  %v10851_v56 = vadd.f32 %v10850_v10, %v10849_v54  ;;  %11194 = vmatmul.mubr.msk.f32.gmra.mrb[74].mxu1 %vm63_vm8, %v9477_v39  ;;  %v9458_v54 = vld [vmem:[%s18714_s4 + $0x8] sm:$0xff]  ;;  %v9460_v10 = vld [vmem:[%s18714_s4 + $0x18] sm:$0xff]  ;;  %v9461_v39 = vld [vmem:[%s18714_s4 + $0x20] sm:$0xff] }
 0x7f7   :  { %v9428_v49 = vadd.f32 %v10851_v56, %v9267_v35  ;;  %v10852_v62 = vpop.f32.mrb[70].mxu0  ;;  %v9459_v35 = vld [vmem:[%s18714_s4 + $0x10] sm:$0xff]  ;;  %v9462_v56 = vld [vmem:[%s18714_s4 + $0x28] sm:$0xff] }
 0x7f8   :  { %v10853_v53 = vpop.f32.mrb[71].mxu0  ;;  %v9478_v31 = vld [vmem:[#allocation2 + $0x20] sm:$0xff] }
 0x7f9   :  { %9444 = vst.msk [vmem:[#allocation2 + $0x30] sm:$0xff] %vm63_vm8, %v9428_v49  ;;  %v10854_v63 = vadd.f32 %v10853_v53, %v10852_v62  ;;  %11196 = vmatprep.mubr.msk.f32.mxu1 %vm63_vm8, %v9478_v31  ;;  %v9463_v49 = vld [vmem:[%s18714_s4 + $0x30] sm:$0xff]  ;;  %v9464_v62 = vld [vmem:[%s18714_s4 + $0x38] sm:$0xff]  ;;  %v9466_v53 = vld [vmem:[%s18714_s4 + $0x48] sm:$0xff] }
 0x7fa   :  { %v9467_v31 = vld [vmem:[%s18714_s4 + $0x50] sm:$0xff] }
 0x7fb   :  { %v9429_v29 = vadd.f32 %v10854_v63, %v9268_v30  ;;  %v10855_v8 = vpop.f32.mrb[72].mxu0  ;;  %v9465_v30 = vld [vmem:[%s18714_s4 + $0x40] sm:$0xff]  ;;  %v9468_v63 = vld [vmem:[%s18714_s4 + $0x58] sm:$0xff] }
 0x7fc   :  { %v10856_v28 = vpop.f32.mrb[73].mxu0  ;;  %v9479_v61 = vld [vmem:[#allocation2 + $0x28] sm:$0xff] }
 0x7fd   :  { %9445 = vst.msk [vmem:[#allocation2 + $0x38] sm:$0xff] %vm63_vm8, %v9429_v29  ;;  %v10857_v52 = vadd.f32 %v10856_v28, %v10855_v8  ;;  %11197 = vmatmul.mubr.msk.f32.gmra.mrb[76].mxu1 %vm63_vm8, %v9479_v61  ;;  %v9469_v29 = vld [vmem:[%s18714_s4 + $0x60] sm:$0xff]  ;;  %v9470_v8 = vld [vmem:[%s18714_s4 + $0x68] sm:$0xff]  ;;  %v9472_v28 = vld [vmem:[%s18714_s4 + $0x78] sm:$0xff] }
 0x7fe   :  { %v10621_v61 = vld [vmem:[%s18715_s13] ss:$0 sm:$0xff] }
 0x7ff   :  { %v9430_v24 = vadd.f32 %v10857_v52, %v9269_v47  ;;  %v10858_v57 = vpop.f32.mrb[74].mxu0  ;;  %v9471_v47 = vld [vmem:[%s18714_s4 + $0x70] sm:$0xff] }
 0x800   :  { %v10859_v44 = vpop.f32.mrb[75].mxu0  ;;  %v9480_v48 = vld [vmem:[#allocation2 + $0x30] sm:$0xff] }
 0x801   :  { %9446 = vst.msk [vmem:[#allocation2 + $0x40] sm:$0xff] %vm63_vm8, %v9430_v24  ;;  %v10860_v22 = vadd.f32 %v10859_v44, %v10858_v57  ;;  %11199 = vmatprep.mubr.msk.f32.mxu1 %vm63_vm8, %v9480_v48 }
 0x803   :  { %v9431_v41 = vadd.f32 %v10860_v22, %v9270_v14  ;;  %v10861_v43 = vpop.f32.mrb[76].mxu0 }
 0x804   :  { %v10862_v42 = vpop.f32.mrb[77].mxu0  ;;  %v9481_v2 = vld [vmem:[#allocation2 + $0x38] sm:$0xff] }
 0x805   :  { %9447 = vst.msk [vmem:[#allocation2 + $0x48] sm:$0xff] %vm63_vm8, %v9431_v41  ;;  %v10863_v25 = vadd.f32 %v10862_v42, %v10861_v43  ;;  %11200 = vmatmul.mubr.msk.f32.gmra.mrb[78].mxu1 %vm63_vm8, %v9481_v2 }
 0x807   :  { %v9432_v11 = vadd.f32 %v10863_v25, %v9271_v17  ;;  %v10864_v59 = vpop.f32.mrb[78].mxu0 }
 0x808   :  { %v10865_v36 = vpop.f32.mrb[79].mxu0  ;;  %v9482_v18 = vld [vmem:[#allocation2 + $0x40] sm:$0xff] }
 0x809   :  { %9448 = vst.msk [vmem:[#allocation2 + $0x50] sm:$0xff] %vm63_vm8, %v9432_v11  ;;  %v10866_v37 = vadd.f32 %v10865_v36, %v10864_v59  ;;  %11202 = vmatprep.mubr.msk.f32.mxu1 %vm63_vm8, %v9482_v18 }
 0x80b   :  { %v9433_v6 = vadd.f32 %v10866_v37, %v9272_v40  ;;  %v10867_v16 = vpop.f32.mrb[80].mxu0 }
 0x80c   :  { %v10868_v5 = vpop.f32.mrb[81].mxu0  ;;  %v9483_v38 = vld [vmem:[#allocation2 + $0x48] sm:$0xff] }
 0x80d   :  { %9449 = vst.msk [vmem:[#allocation2 + $0x58] sm:$0xff] %vm63_vm8, %v9433_v6  ;;  %v10869_v9 = vadd.f32 %v10868_v5, %v10867_v16  ;;  %11203 = vmatmul.mubr.msk.f32.gmra.mrb[80].mxu1 %vm63_vm8, %v9483_v38 }
 0x80f   :  { %v9434_v15 = vadd.f32 %v10869_v9, %v9273_v3  ;;  %v10870_v1 = vpop.f32.mrb[82].mxu0 }
 0x810   :  { %v10871_v46 = vpop.f32.mrb[83].mxu0  ;;  %v9484_v55 = vld [vmem:[#allocation2 + $0x50] sm:$0xff] }
 0x811   :  { %9450 = vst.msk [vmem:[#allocation2 + $0x60] sm:$0xff] %vm63_vm8, %v9434_v15  ;;  %v10872_v20 = vadd.f32 %v10871_v46, %v10870_v1  ;;  %11205 = vmatprep.mubr.msk.f32.mxu1 %vm63_vm8, %v9484_v55 }
 0x813   :  { %v9435_v26 = vadd.f32 %v10872_v20, %v9274_v12  ;;  %v10873_v7 = vpop.f32.mrb[84].mxu0 }
 0x814   :  { %v10874_v23 = vpop.f32.mrb[85].mxu0  ;;  %v9485_v4 = vld [vmem:[#allocation2 + $0x58] sm:$0xff] }
 0x815   :  { %9451 = vst.msk [vmem:[#allocation2 + $0x68] sm:$0xff] %vm63_vm8, %v9435_v26  ;;  %v10875_v33 = vadd.f32 %v10874_v23, %v10873_v7  ;;  %11206 = vmatmul.mubr.msk.f32.gmra.mrb[82].mxu1 %vm63_vm8, %v9485_v4 }
 0x817   :  { %v9436_v32 = vadd.f32 %v10875_v33, %v9275_v50  ;;  %v10876_v34 = vpop.f32.mrb[86].mxu0 }
 0x818   :  { %v10877_v60 = vpop.f32.mrb[87].mxu0  ;;  %v9486_v45 = vld [vmem:[#allocation2 + $0x60] sm:$0xff] }
 0x819   :  { %9452 = vst.msk [vmem:[#allocation2 + $0x70] sm:$0xff] %vm63_vm8, %v9436_v32  ;;  %v10878_v19 = vadd.f32 %v10877_v60, %v10876_v34  ;;  %11208 = vmatprep.mubr.msk.f32.mxu1 %vm63_vm8, %v9486_v45 }
 0x81b   :  { %v9437_v0 = vadd.f32 %v10878_v19, %v9276_v21 }
 0x81c   :  { %v9487_v58 = vld [vmem:[#allocation2 + $0x68] sm:$0xff] }
 0x81d   :  { %9453 = vst.msk [vmem:[#allocation2 + $0x78] sm:$0xff] %vm63_vm8, %v9437_v0  ;;  %11209 = vmatmul.mubr.msk.f32.gmra.mrb[84].mxu1 %vm63_vm8, %v9487_v58 }
 0x820   :  { %v9488_v13 = vld [vmem:[#allocation2 + $0x70] sm:$0xff] }
 0x821   :  { %11211 = vmatprep.mubr.msk.f32.mxu1 %vm63_vm8, %v9488_v13 }
 0x824   :  { %v9489_v27 = vld [vmem:[#allocation2 + $0x78] sm:$0xff] }
 0x825   :  { %11212 = vmatmul.mubr.msk.f32.gmra.mrb[86].mxu1 %vm63_vm8, %v9489_v27 }
 0x826   :  { %11216 = vmatprep.mubr.msk.f32.mxu1 %vm19669_vm6, %v9457_v51  ;;  %vm19683_vm6 = vmmov %vm19672_vm0 }
 0x829   :  { %11217 = vmatmul.mubr.msk.f32.vlgmr.msra.gmra.mrb[72].mxu1 %vm19670_vm5, %v9458_v54  ;;  %vm19684_vm5 = vmmov %vm19672_vm0  ;;  %v18577_v54 = vld [vmem:[%s18716_s15] ss:$0 sm:$0xff] }
 0x82a   :  { %11219 = vmatprep.mubr.msk.f32.mxu1 %vm19671_vm4, %v9459_v35 }
 0x82d   :  { %11220 = vmatmul.mubr.msk.f32.gmra.mrb[74].mxu1 %vm19672_vm0, %v9460_v10  ;;  %v18582_v10 = vld [vmem:[%s18717_s16] ss:$0 sm:$0xff] }
 0x82e   :  { %11222 = vmatprep.mubr.msk.f32.mxu1 %vm19673_vm10, %v9461_v39 }
 0x831   :  { %11223 = vmatmul.mubr.msk.f32.gmra.mrb[76].mxu1 %vm19674_vm1, %v9462_v56 }
 0x832   :  { %11225 = vmatprep.mubr.msk.f32.mxu1 %vm19675_vm14, %v9463_v49  ;;  %v18588_v49 = vld [vmem:[%s18718_s17] ss:$0 sm:$0xff] }
 0x835   :  { %11226 = vmatmul.mubr.msk.f32.gmra.mrb[78].mxu1 %vm19676_vm13, %v9464_v62 }
 0x836   :  { %11228 = vmatprep.mubr.msk.f32.mxu1 %vm19677_vm15, %v9465_v30 }
 0x839   :  { %11229 = vmatmul.mubr.msk.f32.gmra.mrb[80].mxu1 %vm19678_vm9, %v9466_v53 }
 0x83a   :  { %11231 = vmatprep.mubr.msk.f32.mxu1 %vm19679_vm2, %v9467_v31 }
 0x83d   :  { %11232 = vmatmul.mubr.msk.f32.gmra.mrb[82].mxu1 %vm19680_vm7, %v9468_v63 }
 0x83e   :  { %11234 = vmatprep.mubr.msk.f32.mxu1 %vm19681_vm11, %v9469_v29 }
 0x841   :  { %11235 = vmatmul.mubr.msk.f32.gmra.mrb[84].mxu1 %vm19682_vm12, %v9470_v8 }
 0x842   :  { %11237 = vmatprep.mubr.msk.f32.mxu1 %vm19683_vm6, %v9471_v47 }
 0x845   :  { %11238 = vmatmul.mubr.msk.f32.gmra.mrb[86].mxu1 %vm19684_vm5, %v9472_v28 }
 0x8fc   :  { %v11218_v52 = vpop.f32.mrb[72].mxu1 }
 0x8fd   :  { %v9886_v24 = vadd.f32 %v11218_v52, %v10621_v61  ;;  %v9799_v57 = vpop.f32.mrb[73].mxu1 }
 0x8fe   :  { %v9885_v14 = vadd.f32 %v10621_v61, %v9799_v57 }
 0x8ff   :  { %v9902_v22 = vmax.f32 %v9886_v24, 0.0 }
 0x900   :  { %v9901_v44 = vmax.f32 %v9885_v14, 0.0  ;;  %v11221_v48 = vpop.f32.mrb[74].mxu1 }
 0x901   :  { %v9888_v41 = vadd.f32 %v11221_v48, %v10621_v61  ;;  %v9809_v43 = vpop.f32.mrb[75].mxu1 }
 0x902   :  { %v9887_v17 = vadd.f32 %v10621_v61, %v9809_v43  ;;  %11248 = vmatprep.mubr.msk.f32.mxu0 %vm8622_vm3, %v9901_v44 }
 0x903   :  { %11249 = vmatmul.mubr.msk.f32.vlgmr.msra.gmra.mrb[88].mxu0 %vm8622_vm3, %v9902_v22  ;;  %v9904_v25 = vmax.f32 %v9888_v41, 0.0 }
 0x904   :  { %v9903_v42 = vmax.f32 %v9887_v17, 0.0  ;;  %v11224_v2 = vpop.f32.mrb[76].mxu1 }
 0x905   :  { %v9890_v11 = vadd.f32 %v11224_v2, %v10621_v61  ;;  %v9819_v59 = vpop.f32.mrb[77].mxu1 }
 0x906   :  { %v9889_v40 = vadd.f32 %v10621_v61, %v9819_v59  ;;  %11251 = vmatprep.mubr.msk.f32.mxu0 %vm8622_vm3, %v9903_v42 }
 0x907   :  { %11252 = vmatmul.mubr.msk.f32.gmra.mrb[90].mxu0 %vm8622_vm3, %v9904_v25  ;;  %v9906_v37 = vmax.f32 %v9890_v11, 0.0 }
 0x908   :  { %v9905_v36 = vmax.f32 %v9889_v40, 0.0  ;;  %v11227_v18 = vpop.f32.mrb[78].mxu1 }
 0x909   :  { %v9892_v6 = vadd.f32 %v11227_v18, %v10621_v61  ;;  %v9829_v16 = vpop.f32.mrb[79].mxu1 }
 0x90a   :  { %v9891_v3 = vadd.f32 %v10621_v61, %v9829_v16  ;;  %11254 = vmatprep.mubr.msk.f32.mxu0 %vm8622_vm3, %v9905_v36 }
 0x90b   :  { %11255 = vmatmul.mubr.msk.f32.gmra.mrb[92].mxu0 %vm8622_vm3, %v9906_v37  ;;  %v9908_v9 = vmax.f32 %v9892_v6, 0.0 }
 0x90c   :  { %v9907_v5 = vmax.f32 %v9891_v3, 0.0  ;;  %v11230_v38 = vpop.f32.mrb[80].mxu1 }
 0x90d   :  { %v9894_v15 = vadd.f32 %v11230_v38, %v10621_v61  ;;  %v9839_v1 = vpop.f32.mrb[81].mxu1 }
 0x90e   :  { %v9893_v12 = vadd.f32 %v10621_v61, %v9839_v1  ;;  %11257 = vmatprep.mubr.msk.f32.mxu0 %vm8622_vm3, %v9907_v5 }
 0x90f   :  { %11258 = vmatmul.mubr.msk.f32.gmra.mrb[94].mxu0 %vm8622_vm3, %v9908_v9  ;;  %v9910_v20 = vmax.f32 %v9894_v15, 0.0 }
 0x910   :  { %v9909_v46 = vmax.f32 %v9893_v12, 0.0  ;;  %v11233_v55 = vpop.f32.mrb[82].mxu1 }
 0x911   :  { %v9896_v26 = vadd.f32 %v11233_v55, %v10621_v61  ;;  %v9849_v7 = vpop.f32.mrb[83].mxu1 }
 0x912   :  { %v9895_v50 = vadd.f32 %v10621_v61, %v9849_v7  ;;  %11260 = vmatprep.mubr.msk.f32.mxu0 %vm8622_vm3, %v9909_v46 }
 0x913   :  { %11261 = vmatmul.mubr.msk.f32.gmra.mrb[96].mxu0 %vm8622_vm3, %v9910_v20  ;;  %v9912_v33 = vmax.f32 %v9896_v26, 0.0 }
 0x914   :  { %v9911_v23 = vmax.f32 %v9895_v50, 0.0  ;;  %v11236_v4 = vpop.f32.mrb[84].mxu1 }
 0x915   :  { %v9898_v32 = vadd.f32 %v11236_v4, %v10621_v61  ;;  %v9859_v34 = vpop.f32.mrb[85].mxu1 }
 0x916   :  { %v9897_v21 = vadd.f32 %v10621_v61, %v9859_v34  ;;  %11263 = vmatprep.mubr.msk.f32.mxu0 %vm8622_vm3, %v9911_v23 }
 0x917   :  { %11264 = vmatmul.mubr.msk.f32.gmra.mrb[98].mxu0 %vm8622_vm3, %v9912_v33  ;;  %v9914_v19 = vmax.f32 %v9898_v32, 0.0 }
 0x918   :  { %v9913_v60 = vmax.f32 %v9897_v21, 0.0  ;;  %v11239_v45 = vpop.f32.mrb[86].mxu1 }
 0x919   :  { %v9900_v0 = vadd.f32 %v11239_v45, %v10621_v61  ;;  %v9869_v58 = vpop.f32.mrb[87].mxu1 }
 0x91a   :  { %v9899_v13 = vadd.f32 %v10621_v61, %v9869_v58  ;;  %11266 = vmatprep.mubr.msk.f32.mxu0 %vm8622_vm3, %v9913_v60 }
 0x91b   :  { %11267 = vmatmul.mubr.msk.f32.gmra.mrb[100].mxu0 %vm8622_vm3, %v9914_v19  ;;  %v9916_v27 = vmax.f32 %v9900_v0, 0.0 }
 0x91c   :  { %v9915_v51 = vmax.f32 %v9899_v13, 0.0 }
 0x91e   :  { %11269 = vmatprep.mubr.msk.f32.mxu0 %vm8622_vm3, %v9915_v51 }
 0x91f   :  { %11270 = vmatmul.mubr.msk.f32.gmra.mrb[102].mxu0 %vm8622_vm3, %v9916_v27 }
 0x9d6   :  { %v11250_v35 = vpop.f32.mrb[88].mxu0 }
 0x9d7   :  { %v10048_v39 = vadd.f32 %v11250_v35, %v18577_v54  ;;  %v10042_v56 = vpop.f32.mrb[89].mxu0 }
 0x9d8   :  { %v10043_v62 = vadd.f32 %v18577_v54, %v10042_v56 }
 0x9d9   :  { %v10129_v30 = vmul.f32 %v18582_v10, %v10048_v39 }
 0x9da   :  { %v10128_v53 = vmul.f32 %v18582_v10, %v10043_v62  ;;  %v11253_v31 = vpop.f32.mrb[90].mxu0 }
 0x9db   :  { %v10152_v63 = vadd.f32 %v18588_v49, %v10129_v30  ;;  %v10058_v29 = vadd.f32 %v11253_v31, %v18577_v54  ;;  %v10052_v8 = vpop.f32.mrb[91].mxu0 }
 0x9dc   :  { %v10151_v47 = vadd.f32 %v18588_v49, %v10128_v53  ;;  %v10053_v28 = vadd.f32 %v18577_v54, %v10052_v8 }
 0x9dd   :  { %v10168_v61 = vmax.f32 %v10152_v63, 0.0  ;;  %v10131_v52 = vmul.f32 %v18582_v10, %v10058_v29 }
 0x9de   :  { %v10167_v24 = vmax.f32 %v10151_v47, 0.0  ;;  %v10130_v57 = vmul.f32 %v18582_v10, %v10053_v28  ;;  %v11256_v14 = vpop.f32.mrb[92].mxu0 }
 0x9df   :  { %10184 = vst.msk [vmem:[%s18719_s18 + $0x8] sm:$0xff] %vm63_vm8, %v10168_v61  ;;  %v10154_v44 = vadd.f32 %v18588_v49, %v10131_v52  ;;  %v10068_v48 = vadd.f32 %v11256_v14, %v18577_v54  ;;  %v10062_v22 = vpop.f32.mrb[93].mxu0 }
 0x9e0   :  { %10183 = vst.msk [vmem:[%s18719_s18] sm:$0xff] %vm63_vm8, %v10167_v24  ;;  %v10153_v41 = vadd.f32 %v18588_v49, %v10130_v57  ;;  %v10063_v43 = vadd.f32 %v18577_v54, %v10062_v22 }
 0x9e1   :  { %v10170_v17 = vmax.f32 %v10154_v44, 0.0  ;;  %v10133_v42 = vmul.f32 %v18582_v10, %v10068_v48 }
 0x9e2   :  { %v10169_v2 = vmax.f32 %v10153_v41, 0.0  ;;  %v10132_v25 = vmul.f32 %v18582_v10, %v10063_v43  ;;  %v11259_v11 = vpop.f32.mrb[94].mxu0 }
 0x9e3   :  { %10186 = vst.msk [vmem:[%s18719_s18 + $0x18] sm:$0xff] %vm63_vm8, %v10170_v17  ;;  %v10156_v59 = vadd.f32 %v18588_v49, %v10133_v42  ;;  %v10078_v40 = vadd.f32 %v11259_v11, %v18577_v54  ;;  %v10072_v36 = vpop.f32.mrb[95].mxu0 }
 0x9e4   :  { %10185 = vst.msk [vmem:[%s18719_s18 + $0x10] sm:$0xff] %vm63_vm8, %v10169_v2  ;;  %v10155_v18 = vadd.f32 %v18588_v49, %v10132_v25  ;;  %v10073_v37 = vadd.f32 %v18577_v54, %v10072_v36 }
 0x9e5   :  { %v10172_v6 = vmax.f32 %v10156_v59, 0.0  ;;  %v10135_v16 = vmul.f32 %v18582_v10, %v10078_v40 }
 0x9e6   :  { %v10171_v3 = vmax.f32 %v10155_v18, 0.0  ;;  %v10134_v5 = vmul.f32 %v18582_v10, %v10073_v37  ;;  %v11262_v38 = vpop.f32.mrb[96].mxu0 }
 0x9e7   :  { %10188 = vst.msk [vmem:[%s18719_s18 + $0x28] sm:$0xff] %vm63_vm8, %v10172_v6  ;;  %v10158_v9 = vadd.f32 %v18588_v49, %v10135_v16  ;;  %v10088_v15 = vadd.f32 %v11262_v38, %v18577_v54  ;;  %v10082_v1 = vpop.f32.mrb[97].mxu0 }
 0x9e8   :  { %10187 = vst.msk [vmem:[%s18719_s18 + $0x20] sm:$0xff] %vm63_vm8, %v10171_v3  ;;  %v10157_v12 = vadd.f32 %v18588_v49, %v10134_v5  ;;  %v10083_v46 = vadd.f32 %v18577_v54, %v10082_v1 }
 0x9e9   :  { %v10174_v55 = vmax.f32 %v10158_v9, 0.0  ;;  %v10137_v20 = vmul.f32 %v18582_v10, %v10088_v15 }
 0x9ea   :  { %v10173_v26 = vmax.f32 %v10157_v12, 0.0  ;;  %v10136_v7 = vmul.f32 %v18582_v10, %v10083_v46  ;;  %v11265_v50 = vpop.f32.mrb[98].mxu0 }
 0x9eb   :  { %10190 = vst.msk [vmem:[%s18719_s18 + $0x38] sm:$0xff] %vm63_vm8, %v10174_v55  ;;  %v10160_v23 = vadd.f32 %v18588_v49, %v10137_v20  ;;  %v10098_v4 = vadd.f32 %v11265_v50, %v18577_v54  ;;  %v10092_v33 = vpop.f32.mrb[99].mxu0 }
 0x9ec   :  { %10189 = vst.msk [vmem:[%s18719_s18 + $0x30] sm:$0xff] %vm63_vm8, %v10173_v26  ;;  %v10159_v32 = vadd.f32 %v18588_v49, %v10136_v7  ;;  %v10093_v34 = vadd.f32 %v18577_v54, %v10092_v33 }
 0x9ed   :  { %v10176_v21 = vmax.f32 %v10160_v23, 0.0  ;;  %v10139_v60 = vmul.f32 %v18582_v10, %v10098_v4 }
 0x9ee   :  { %v10175_v45 = vmax.f32 %v10159_v32, 0.0  ;;  %v10138_v19 = vmul.f32 %v18582_v10, %v10093_v34  ;;  %v11268_v0 = vpop.f32.mrb[100].mxu0 }
 0x9ef   :  { %10192 = vst.msk [vmem:[%s18719_s18 + $0x48] sm:$0xff] %vm63_vm8, %v10176_v21  ;;  %v10162_v58 = vadd.f32 %v18588_v49, %v10139_v60  ;;  %v10108_v13 = vadd.f32 %v11268_v0, %v18577_v54  ;;  %v10102_v51 = vpop.f32.mrb[101].mxu0 }
 0x9f0   :  { %10191 = vst.msk [vmem:[%s18719_s18 + $0x40] sm:$0xff] %vm63_vm8, %v10175_v45  ;;  %v10161_v27 = vadd.f32 %v18588_v49, %v10138_v19  ;;  %v10103_v35 = vadd.f32 %v18577_v54, %v10102_v51 }
 0x9f1   :  { %v10178_v39 = vmax.f32 %v10162_v58, 0.0  ;;  %v10141_v56 = vmul.f32 %v18582_v10, %v10108_v13 }
 0x9f2   :  { %v10177_v62 = vmax.f32 %v10161_v27, 0.0  ;;  %v10140_v30 = vmul.f32 %v18582_v10, %v10103_v35  ;;  %v11271_v53 = vpop.f32.mrb[102].mxu0 }
 0x9f3   :  { %10194 = vst.msk [vmem:[%s18719_s18 + $0x58] sm:$0xff] %vm63_vm8, %v10178_v39  ;;  %v10164_v31 = vadd.f32 %v18588_v49, %v10141_v56  ;;  %v10118_v63 = vadd.f32 %v11271_v53, %v18577_v54  ;;  %v10112_v29 = vpop.f32.mrb[103].mxu0 }
 0x9f4   :  { %10193 = vst.msk [vmem:[%s18719_s18 + $0x50] sm:$0xff] %vm63_vm8, %v10177_v62  ;;  %v10163_v8 = vadd.f32 %v18588_v49, %v10140_v30  ;;  %v10113_v47 = vadd.f32 %v18577_v54, %v10112_v29 }
 0x9f5   :  { %v10180_v28 = vmax.f32 %v10164_v31, 0.0  ;;  %v10143_v61 = vmul.f32 %v18582_v10, %v10118_v63 }
 0x9f6   :  { %v10179_v52 = vmax.f32 %v10163_v8, 0.0  ;;  %v10142_v24 = vmul.f32 %v18582_v10, %v10113_v47 }
 0x9f7   :  { %10196 = vst.msk [vmem:[%s18719_s18 + $0x68] sm:$0xff] %vm63_vm8, %v10180_v28  ;;  %v10166_v57 = vadd.f32 %v18588_v49, %v10143_v61 }
 0x9f8   :  { %10195 = vst.msk [vmem:[%s18719_s18 + $0x60] sm:$0xff] %vm63_vm8, %v10179_v52  ;;  %v10165_v54 = vadd.f32 %v18588_v49, %v10142_v24 }
 0x9f9   :  { %v10182_v14 = vmax.f32 %v10166_v57, 0.0 }
 0x9fa   :  { %v10181_v44 = vmax.f32 %v10165_v54, 0.0 }
 0x9fb   :  { %10198 = vst.msk [vmem:[%s18719_s18 + $0x78] sm:$0xff] %vm63_vm8, %v10182_v14 }
 0x9fc   :  { %10197 = vst.msk [vmem:[%s18719_s18 + $0x70] sm:$0xff] %vm63_vm8, %v10181_v44 }

</bundles_post_ra>
